<compile_context>
chip_gen: v7x
topology: tpu7x:2x2x1
jax: 0.10.0
libtpu: 0.0.40
codegen_flags: <defaults>
</compile_context>

<pallas_src>
import functools

import jax
import jax.numpy as jnp
from jax.experimental import pallas as pl
from jax.experimental.pallas import tpu as pltpu


_LANE = 128
_NEG = -1.0e30                           # effective "-inf" for max-pool masking
_VMEM_BLOCK_BUDGET = 12 * 1024 * 1024    # budget for double-buffered act blocks
_VMEM_LIMIT = 48 * 1024 * 1024           # scoped VMEM limit (safe on v5e/v6e/v7x)


def _round_up(x, n):
    return (x + n - 1) // n * n


def _choose_tm(m, row_bytes):
    """Power-of-two M tile: target 512, capped by a VMEM budget and by m."""
    tm = 512
    while tm > 8 and 2 * tm * row_bytes > _VMEM_BLOCK_BUDGET:
        tm //= 2
    while tm > 8 and tm // 2 >= _round_up(m, 8):
        tm //= 2
    return tm


# ---------------------------------------------------------------------------
# Pallas kernels
# ---------------------------------------------------------------------------
def _make_conv_kernel(ktaps):
    """One M tile of relu((sum_k tap_k @ w[k]) * scale + bias)."""
    def kernel(*refs):
        taps = refs[:ktaps]
        w_ref, s_ref, b_ref, o_ref = refs[ktaps:ktaps + 4]
        acc = jnp.dot(taps[0][...], w_ref[0], preferred_element_type=jnp.float32)
        for k in range(1, ktaps):
            acc += jnp.dot(taps[k][...], w_ref[k],
                           preferred_element_type=jnp.float32)
        o_ref[...] = jnp.maximum(acc * s_ref[...] + b_ref[...],
                                 0.0).astype(o_ref.dtype)
    return kernel


def _make_fused_tail_kernel(kt_a, kt_d, kt_p, c_a, c_d, share_pool):
    """branch3x3 conv+BN+ReLU, dbl3 conv+BN+ReLU and 3x3 max-pool, written
    into one lane-dense (tm, c_a + c_d + c_pool) output block (fused concat).

    When `share_pool` is True the max-pool reuses the conv's zero-padded
    window taps; a (tm, kt_p) additive mask (`padneg`, 0 or -1e30) turns the
    zero-padded border contributions into effective -inf."""
    def kernel(*refs):
        i = 0
        taps_a = refs[i:i + kt_a]; i += kt_a
        w_a, s_a, b_a = refs[i:i + 3]; i += 3
        taps_d = refs[i:i + kt_d]; i += kt_d
        w_d, s_d, b_d = refs[i:i + 3]; i += 3
        if share_pool:
            taps_p = taps_a
        else:
            taps_p = refs[i:i + kt_p]; i += kt_p
        padneg_ref = refs[i]; i += 1
        o_ref = refs[i]

        # branch3x3 (strided 3x3 conv + BN + ReLU)
        acc_a = jnp.dot(taps_a[0][...], w_a[0], preferred_element_type=jnp.float32)
        for k in range(1, kt_a):
            acc_a += jnp.dot(taps_a[k][...], w_a[k],
                             preferred_element_type=jnp.float32)
        o_ref[:, :c_a] = jnp.maximum(acc_a * s_a[...] + b_a[...],
                                     0.0).astype(o_ref.dtype)

        # branch3x3dbl_3 (strided 3x3 conv + BN + ReLU)
        acc_d = jnp.dot(taps_d[0][...], w_d[0], preferred_element_type=jnp.float32)
        for k in range(1, kt_d):
            acc_d += jnp.dot(taps_d[k][...], w_d[k],
                             preferred_element_type=jnp.float32)
        o_ref[:, c_a:c_a + c_d] = jnp.maximum(acc_d * s_d[...] + b_d[...],
                                              0.0).astype(o_ref.dtype)

        # 3x3 / stride max-pool (padding ignored via additive -1e30 mask)
        mx = taps_p[0][...] + padneg_ref[:, 0:1]
        for k in range(1, kt_p):
            mx = jnp.maximum(mx, taps_p[k][...] + padneg_ref[:, k:k + 1])
        o_ref[:, c_a + c_d:] = mx.astype(o_ref.dtype)
    return kernel


# ---------------------------------------------------------------------------
# Glue (plain JAX): window taps, padding, weight prep
# ---------------------------------------------------------------------------
def _extract_taps(x_nhwc, kh, kw, stride, pad):
    """kh*kw zero-padded window taps, each flattened to (N*OH*OW, C)."""
    n, h, w, c = x_nhwc.shape
    xp = x_nhwc
    if pad > 0:
        xp = jnp.pad(x_nhwc, ((0, 0), (pad, pad), (pad, pad), (0, 0)))
    oh = (h + 2 * pad - kh) // stride + 1
    ow = (w + 2 * pad - kw) // stride + 1
    taps = []
    for i in range(kh):
        for j in range(kw):
            taps.append(
                xp[:, i:i + stride * oh:stride, j:j + stride * ow:stride, :]
                .reshape(n * oh * ow, c))
    return taps, oh, ow


def _pool_pad_neg(n, h, w, oh, ow, stride, kh=3, kw=3, pad=1):
    """(N*OH*OW, kh*kw) bf16 array: 0 where the window tap is in-bounds,
    -1e30 where it falls on spatial padding (so zero-padded taps act as -inf
    under max)."""
    hi = jnp.arange(oh) * stride
    wi = jnp.arange(ow) * stride
    cols = []
    for i in range(kh):
        rv = (hi + i >= pad) & (hi + i < h + pad)            # (oh,)
        for j in range(kw):
            cv = (wi + j >= pad) & (wi + j < w + pad)        # (ow,)
            cols.append(rv[:, None] & cv[None, :])           # (oh, ow)
    valid = jnp.stack(cols, axis=-1)                         # (oh, ow, kh*kw)
    neg = jnp.where(valid, 0.0, _NEG).astype(jnp.bfloat16)
    neg = jnp.broadcast_to(neg[None], (n, oh, ow, kh * kw))
    return neg.reshape(n * oh * ow, kh * kw)


def _pad_rows(arrs, m, m_pad):
    if m_pad == m:
        return arrs
    return [jnp.pad(a, ((0, m_pad - m), (0, 0))) for a in arrs]


def _prep_weight(w_pt, cin_x, cout_pad):
    """(Cout, Cin, KH, KW) -> bf16 (KH*KW, cin_x, cout_pad), zero-padded."""
    cout, cin, kh, kw = w_pt.shape
    w3 = jnp.transpose(w_pt, (2, 3, 1, 0)).reshape(kh * kw, cin, cout)
    if cin_x > cin:
        w3 = jnp.pad(w3, ((0, 0), (0, cin_x - cin), (0, 0)))
    if cout_pad > cout:
        w3 = jnp.pad(w3, ((0, 0), (0, 0), (0, cout_pad - cout)))
    return w3.astype(jnp.bfloat16)


# ---------------------------------------------------------------------------
# BasicConv2d equivalent (bf16 NHWC in, folded BN, ReLU)
# ---------------------------------------------------------------------------
def conv_bn_relu(x_nhwc, w_pt, scale, bias, *, stride, pad,
                 cout_pad=None, out_dtype=jnp.float32):
    cout, _, kh, kw = w_pt.shape
    n, h, w_sp, cin_x = x_nhwc.shape
    cp = max(cout, cout_pad or cout)

    if kh == 1 and kw == 1 and stride == 1 and pad == 0:
        taps, oh, ow = [x_nhwc.reshape(n * h * w_sp, cin_x)], h, w_sp  # no im2col
    else:
        taps, oh, ow = _extract_taps(x_nhwc, kh, kw, stride, pad)
    ktaps = len(taps)
    m = n * oh * ow

    w3 = _prep_weight(w_pt, cin_x, cp)
    s2 = jnp.pad(scale, (0, cp - cout)).reshape(1, cp).astype(jnp.float32)
    b2 = jnp.pad(bias, (0, cp - cout)).reshape(1, cp).astype(jnp.float32)

    out_bytes = jnp.dtype(out_dtype).itemsize
    row_bytes = ktaps * cin_x * 2 + cp * out_bytes
    tm = _choose_tm(m, row_bytes)
    m_pad = _round_up(m, tm)
    taps = _pad_rows(taps, m, m_pad)
    grid = (m_pad // tm,)

    in_specs = [pl.BlockSpec((tm, cin_x), lambda i: (i, 0)) for _ in range(ktaps)]
    in_specs += [
        pl.BlockSpec((ktaps, cin_x, cp), lambda i: (0, 0, 0)),
        pl.BlockSpec((1, cp), lambda i: (0, 0)),
        pl.BlockSpec((1, cp), lambda i: (0, 0)),
    ]
    cost = pl.CostEstimate(
        flops=int(2 * m_pad * ktaps * cin_x * cp),
        transcendentals=0,
        bytes_accessed=int(m_pad * ktaps * cin_x * 2 + ktaps * cin_x * cp * 2
                           + m_pad * cp * out_bytes))

    out = pl.pallas_call(
        _make_conv_kernel(ktaps),
        out_shape=jax.ShapeDtypeStruct((m_pad, cp), out_dtype),
        grid_spec=pltpu.PrefetchScalarGridSpec(
            num_scalar_prefetch=0, grid=grid,
            in_specs=in_specs,
            out_specs=pl.BlockSpec((tm, cp), lambda i: (i, 0))),
        compiler_params=pltpu.CompilerParams(
            dimension_semantics=("parallel",),
            vmem_limit_bytes=_VMEM_LIMIT),
        cost_estimate=cost,
    )(*taps, w3, s2, b2)
    return out[:m].reshape(n, oh, ow, cp)


# ---------------------------------------------------------------------------
# Fused strided stage: branch3x3(x) | dbl3(d) | max_pool3x3(x), concat fused
# ---------------------------------------------------------------------------
def fused_stride_branches(x_nhwc, d_nhwc, p_b3x3, p_dbl3, *, stride, padding):
    n, h, w_sp, cin = x_nhwc.shape
    cd = d_nhwc.shape[-1]
    w_a_pt, s_a, b_a = p_b3x3
    w_d_pt, s_d, b_d = p_dbl3
    c_a, c_d = w_a_pt.shape[0], w_d_pt.shape[0]
    c_tot = c_a + c_d + cin
    kh_a, kw_a = w_a_pt.shape[2], w_a_pt.shape[3]

    # branch3x3 conv window == pool window when conv is 3x3 / padding 1:
    # reuse the same zero-padded taps for both (the pool applies an additive
    # -1e30 mask for padded positions).
    share = (kh_a == 3 and kw_a == 3 and padding == 1)

    taps_a, oh, ow = _extract_taps(x_nhwc, kh_a, kw_a, stride, padding)
    taps_d, oh2, ow2 = _extract_taps(d_nhwc, w_d_pt.shape[2], w_d_pt.shape[3],
                                     stride, padding)
    if share:
        taps_p, oh3, ow3 = [], oh, ow
        kt_p = len(taps_a)
    else:
        taps_p, oh3, ow3 = _extract_taps(x_nhwc, 3, 3, stride, 1)
        kt_p = len(taps_p)
    assert (oh, ow) == (oh2, ow2) == (oh3, ow3), "branch spatial shapes differ"
    kt_a, kt_d = len(taps_a), len(taps_d)
    m = n * oh * ow

    padneg = _pool_pad_neg(n, h, w_sp, oh, ow, stride)   # (m, 9) bf16

    w_a = _prep_weight(w_a_pt, cin, c_a)
    w_d = _prep_weight(w_d_pt, cd, c_d)
    s_a2 = s_a.reshape(1, c_a).astype(jnp.float32)
    b_a2 = b_a.reshape(1, c_a).astype(jnp.float32)
    s_d2 = s_d.reshape(1, c_d).astype(jnp.float32)
    b_d2 = b_d.reshape(1, c_d).astype(jnp.float32)

    x_tap_count = kt_a if share else (kt_a + kt_p)
    row_bytes = (x_tap_count * cin + kt_d * cd + kt_p) * 2 + c_tot * 4
    tm = _choose_tm(m, row_bytes)
    m_pad = _round_up(m, tm)
    taps_a = _pad_rows(taps_a, m, m_pad)
    taps_d = _pad_rows(taps_d, m, m_pad)
    taps_p = _pad_rows(taps_p, m, m_pad)
    (padneg,) = _pad_rows([padneg], m, m_pad)
    grid = (m_pad // tm,)

    tap_a_spec = pl.BlockSpec((tm, cin), lambda i: (i, 0))
    tap_d_spec = pl.BlockSpec((tm, cd), lambda i: (i, 0))
    vec_a = pl.BlockSpec((1, c_a), lambda i: (0, 0))
    vec_d = pl.BlockSpec((1, c_d), lambda i: (0, 0))

    in_specs = (
        [tap_a_spec] * kt_a
        + [pl.BlockSpec((kt_a, cin, c_a), lambda i: (0, 0, 0)), vec_a, vec_a]
        + [tap_d_spec] * kt_d
        + [pl.BlockSpec((kt_d, cd, c_d), lambda i: (0, 0, 0)), vec_d, vec_d])
    args = list(taps_a) + [w_a, s_a2, b_a2] + list(taps_d) + [w_d, s_d2, b_d2]
    if not share:
        in_specs += [tap_a_spec] * kt_p
        args += list(taps_p)
    in_specs += [pl.BlockSpec((tm, kt_p), lambda i: (i, 0))]
    args += [padneg]

    cost = pl.CostEstimate(
        flops=int(2 * m_pad * (kt_a * cin * c_a + kt_d * cd * c_d)),
        transcendentals=0,
        bytes_accessed=int(m_pad * (x_tap_count * cin + kt_d * cd + kt_p) * 2
                           + (w_a.size + w_d.size) * 2 + m_pad * c_tot * 4))

    out = pl.pallas_call(
        _make_fused_tail_kernel(kt_a, kt_d, kt_p, c_a, c_d, share),
        out_shape=jax.ShapeDtypeStruct((m_pad, c_tot), jnp.float32),
        grid_spec=pltpu.PrefetchScalarGridSpec(
            num_scalar_prefetch=0, grid=grid,
            in_specs=in_specs,
            out_specs=pl.BlockSpec((tm, c_tot), lambda i: (i, 0))),
        compiler_params=pltpu.CompilerParams(
            dimension_semantics=("parallel",),
            vmem_limit_bytes=_VMEM_LIMIT),
        cost_estimate=cost,
    )(*args)
    return out[:m].reshape(n, oh, ow, c_tot)


# ---------------------------------------------------------------------------
# Parameter init (deterministic, synthetic) — BasicConv2d params, BN folded.
# ---------------------------------------------------------------------------
def init_basic_conv(key, cin, cout, kh, kw):
    k1, k2, k3, k4, k5 = jax.random.split(key, 5)
    w = 0.1 * jax.random.normal(k1, (cout, cin, kh, kw), jnp.float32)
    gamma = 1.0 + 0.1 * jax.random.normal(k2, (cout,), jnp.float32)
    beta = 0.1 * jax.random.normal(k3, (cout,), jnp.float32)
    running_mean = 0.1 * jax.random.normal(k4, (cout,), jnp.float32)
    running_var = 0.5 + 0.1 * jnp.abs(jax.random.normal(k5, (cout,), jnp.float32))
    scale = gamma / jnp.sqrt(running_var + 1e-3)   # BN eps=0.001
    bias = beta - running_mean * scale
    return w, scale, bias


def init_inception_b(key, in_channels):
    ks = jax.random.split(key, 4)
    return {
        "branch3x3": init_basic_conv(ks[0], in_channels, 384, 3, 3),
        "dbl1":      init_basic_conv(ks[1], in_channels, 64, 1, 1),
        "dbl2":      init_basic_conv(ks[2], 64, 96, 3, 3),
        "dbl3":      init_basic_conv(ks[3], 96, 96, 3, 3),
    }


# ---------------------------------------------------------------------------
# InceptionB.forward
# ---------------------------------------------------------------------------
@functools.partial(jax.jit, static_argnames=("stride", "padding"))
def inception_b_forward(x_nchw, params, *, stride=2, padding=1):
    x = jnp.transpose(x_nchw, (0, 2, 3, 1)).astype(jnp.bfloat16)  # NCHW -> NHWC

    # dbl branch, stride-1 part: bf16 intermediates, cout padded to 128 lanes
    # (padded channels are exact zeros -> no effect on downstream convs).
    w, s, b = params["dbl1"]
    d = conv_bn_relu(x, w, s, b, stride=1, pad=0,
                     cout_pad=_LANE, out_dtype=jnp.bfloat16)
    w, s, b = params["dbl2"]
    d = conv_bn_relu(d, w, s, b, stride=1, pad=1,
                     cout_pad=_LANE, out_dtype=jnp.bfloat16)

    # Strided stage + channel concat, fused into one lane-dense output slab.
    out = fused_stride_branches(x, d, params["branch3x3"], params["dbl3"],
                                stride=stride, padding=padding)
    # Keep PyTorch's NCHW output convention (drop this transpose if the
    # consumer accepts NHWC).
    return jnp.transpose(out, (0, 3, 1, 2))


# ---------------------------------------------------------------------------
# Pure-JAX reference (same bf16 casting points as the Pallas path)
# ---------------------------------------------------------------------------
def _ref_conv_bn_relu(x, w_pt, scale, bias, *, stride, pad, out_dtype):
    w = jnp.transpose(w_pt, (2, 3, 1, 0)).astype(jnp.bfloat16)  # HWIO
    y = jax.lax.conv_general_dilated(
        x, w, window_strides=(stride, stride),
        padding=[(pad, pad), (pad, pad)],
        dimension_numbers=("NHWC", "HWIO", "NHWC"),
        preferred_element_type=jnp.float32)
    y = jnp.maximum(y * scale.reshape(1, 1, 1, -1) + bias.reshape(1, 1, 1, -1),
                    0.0)
    return y.astype(out_dtype)


def _ref_forward(x_nchw, params, *, stride, padding):
    x = jnp.transpose(x_nchw, (0, 2, 3, 1)).astype(jnp.bfloat16)
    w, s, b = params["branch3x3"]
    a = _ref_conv_bn_relu(x, w, s, b, stride=stride, pad=padding,
                          out_dtype=jnp.float32)
    w, s, b = params["dbl1"]
    d = _ref_conv_bn_relu(x, w, s, b, stride=1, pad=0, out_dtype=jnp.bfloat16)
    w, s, b = params["dbl2"]
    d = _ref_conv_bn_relu(d, w, s, b, stride=1, pad=1, out_dtype=jnp.bfloat16)
    w, s, b = params["dbl3"]
    d = _ref_conv_bn_relu(d, w, s, b, stride=stride, pad=padding,
                          out_dtype=jnp.float32)
    p = jax.lax.reduce_window(
        x, jnp.array(-jnp.inf, x.dtype), jax.lax.max,
        (1, 3, 3, 1), (1, stride, stride, 1),
        [(0, 0), (1, 1), (1, 1), (0, 0)]).astype(jnp.float32)
    out = jnp.concatenate([a, d, p], axis=-1)
    return jnp.transpose(out, (0, 3, 1, 2))


if __name__ == "__main__":
    key = jax.random.PRNGKey(0)
    kx, kp = jax.random.split(key)

    N, C_in, H, W = 2, 4, 16, 16
    x = jax.random.normal(kx, (N, C_in, H, W), jnp.float32)
    params = init_inception_b(kp, C_in)

    out = inception_b_forward(x, params, stride=2, padding=1)
    out = jax.block_until_ready(out)

    expected = (N, 384 + 96 + C_in, (H + 2 - 3) // 2 + 1, (W + 2 - 3) // 2 + 1)
    assert out.shape == expected, (out.shape, expected)
    assert out.dtype == jnp.float32
    assert bool(jnp.all(jnp.isfinite(out)))

    ref = _ref_forward(x, params, stride=2, padding=1)
    max_err = float(jnp.max(jnp.abs(out - ref)))
    assert bool(jnp.allclose(out, ref, atol=2e-2, rtol=2e-2)), max_err

    print("KERNEL_OK")
</pallas_src>

<mosaic_0001>
module attributes {stable_mosaic.version = 11 : i64} {
  func.func @kernel(%arg0: i32, %arg1: memref<512x4xbf16, #tpu.memory_space<vmem>>, %arg2: memref<1x4x128xbf16, #tpu.memory_space<vmem>>, %arg3: memref<1x128xf32, #tpu.memory_space<vmem>>, %arg4: memref<1x128xf32, #tpu.memory_space<vmem>>, %arg5: memref<512x128xbf16, #tpu.memory_space<vmem>>) attributes {dimension_semantics = [#tpu.dimension_semantics<parallel>], iteration_bounds = array<i64: 1>, scalar_prefetch = 0 : i64, scratch_operands = 0 : i64, tpu.core_type = #tpu.core_type<tc>, window_params = [{transform_indices = @transform_0, window_bounds = array<i64: 512, 4>}, {pipeline_mode = #tpu.pipeline_mode<synchronous>, transform_indices = @transform_1, window_bounds = array<i64: 1, 4, 128>}, {pipeline_mode = #tpu.pipeline_mode<synchronous>, transform_indices = @transform_2, window_bounds = array<i64: 1, 128>}, {pipeline_mode = #tpu.pipeline_mode<synchronous>, transform_indices = @transform_3, window_bounds = array<i64: 1, 128>}, {transform_indices = @transform_4, window_bounds = array<i64: 512, 128>}]} {
    %c0 = arith.constant 0 : index
    %c0_0 = arith.constant 0 : index
    %0 = vector.load %arg1[%c0, %c0_0] : memref<512x4xbf16, #tpu.memory_space<vmem>>, vector<512x4xbf16>
    %c0_1 = arith.constant 0 : index
    %c0_2 = arith.constant 0 : index
    %c0_3 = arith.constant 0 : index
    %1 = vector.load %arg2[%c0_1, %c0_2, %c0_3] : memref<1x4x128xbf16, #tpu.memory_space<vmem>>, vector<1x4x128xbf16>
    %2 = vector.shape_cast %1 : vector<1x4x128xbf16> to vector<4x128xbf16>
    %cst = arith.constant dense<0.000000e+00> : vector<512x128xf32>
    %3 = tpu.matmul %0, %2, %cst {dimension_numbers = #tpu.dot_dimension_numbers<[1], [0], [0], [1], [0, 0, 1, 1], [], []>} : vector<512x4xbf16>, vector<4x128xbf16>, vector<512x128xf32> -> vector<512x128xf32>
    %c0_4 = arith.constant 0 : index
    %c0_5 = arith.constant 0 : index
    %4 = vector.load %arg3[%c0_4, %c0_5] : memref<1x128xf32, #tpu.memory_space<vmem>>, vector<1x128xf32>
    %5 = vector.broadcast %4 : vector<1x128xf32> to vector<512x128xf32>
    %6 = arith.mulf %3, %5 : vector<512x128xf32>
    %c0_6 = arith.constant 0 : index
    %c0_7 = arith.constant 0 : index
    %7 = vector.load %arg4[%c0_6, %c0_7] : memref<1x128xf32, #tpu.memory_space<vmem>>, vector<1x128xf32>
    %8 = vector.broadcast %7 : vector<1x128xf32> to vector<512x128xf32>
    %9 = arith.addf %6, %8 : vector<512x128xf32>
    %cst_8 = arith.constant 0.000000e+00 : f32
    %10 = vector.broadcast %cst_8 : f32 to vector<512x128xf32>
    %11 = arith.maximumf %9, %10 : vector<512x128xf32>
    %12 = arith.truncf %11 : vector<512x128xf32> to vector<512x128xbf16>
    %c0_9 = arith.constant 0 : index
    %c0_10 = arith.constant 0 : index
    %13 = vector.load %arg5[%c0_9, %c0_10] : memref<512x128xbf16, #tpu.memory_space<vmem>>, vector<512x128xbf16>
    tpu.vector_store %arg5[%c0_9, %c0_10], %12 {strides = array<i32>} : memref<512x128xbf16, #tpu.memory_space<vmem>>, vector<512x128xbf16>,
    return
  }
  func.func @transform_0(%arg0: i32) -> (i32, i32) {
    %c0_i32 = arith.constant 0 : i32
    %c0_i32_0 = arith.constant 0 : i32
    return %arg0, %c0_i32 : i32, i32
  }
  func.func @transform_1(%arg0: i32) -> (i32, i32, i32) {
    %c0_i32 = arith.constant 0 : i32
    %c0_i32_0 = arith.constant 0 : i32
    %c0_i32_1 = arith.constant 0 : i32
    %c0_i32_2 = arith.constant 0 : i32
    return %c0_i32, %c0_i32_0, %c0_i32_1 : i32, i32, i32
  }
  func.func @transform_2(%arg0: i32) -> (i32, i32) {
    %c0_i32 = arith.constant 0 : i32
    %c0_i32_0 = arith.constant 0 : i32
    %c0_i32_1 = arith.constant 0 : i32
    return %c0_i32, %c0_i32_0 : i32, i32
  }
  func.func @transform_3(%arg0: i32) -> (i32, i32) {
    %c0_i32 = arith.constant 0 : i32
    %c0_i32_0 = arith.constant 0 : i32
    %c0_i32_1 = arith.constant 0 : i32
    return %c0_i32, %c0_i32_0 : i32, i32
  }
  func.func @transform_4(%arg0: i32) -> (i32, i32) {
    %c0_i32 = arith.constant 0 : i32
    %c0_i32_0 = arith.constant 0 : i32
    return %arg0, %c0_i32 : i32, i32
  }
}

module attributes {stable_mosaic.version = 11 : i64} {
  func.func @kernel(%arg0: i32, %arg1: memref<512x128xbf16, #tpu.memory_space<vmem>>, %arg2: memref<512x128xbf16, #tpu.memory_space<vmem>>, %arg3: memref<512x128xbf16, #tpu.memory_space<vmem>>, %arg4: memref<512x128xbf16, #tpu.memory_space<vmem>>, %arg5: memref<512x128xbf16, #tpu.memory_space<vmem>>, %arg6: memref<512x128xbf16, #tpu.memory_space<vmem>>, %arg7: memref<512x128xbf16, #tpu.memory_space<vmem>>, %arg8: memref<512x128xbf16, #tpu.memory_space<vmem>>, %arg9: memref<512x128xbf16, #tpu.memory_space<vmem>>, %arg10: memref<9x128x128xbf16, #tpu.memory_space<vmem>>, %arg11: memref<1x128xf32, #tpu.memory_space<vmem>>, %arg12: memref<1x128xf32, #tpu.memory_space<vmem>>, %arg13: memref<512x128xbf16, #tpu.memory_space<vmem>>) attributes {dimension_semantics = [#tpu.dimension_semantics<parallel>], iteration_bounds = array<i64: 1>, scalar_prefetch = 0 : i64, scratch_operands = 0 : i64, tpu.core_type = #tpu.core_type<tc>, window_params = [{transform_indices = @transform_0, window_bounds = array<i64: 512, 128>}, {transform_indices = @transform_1, window_bounds = array<i64: 512, 128>}, {transform_indices = @transform_2, window_bounds = array<i64: 512, 128>}, {transform_indices = @transform_3, window_bounds = array<i64: 512, 128>}, {transform_indices = @transform_4, window_bounds = array<i64: 512, 128>}, {transform_indices = @transform_5, window_bounds = array<i64: 512, 128>}, {transform_indices = @transform_6, window_bounds = array<i64: 512, 128>}, {transform_indices = @transform_7, window_bounds = array<i64: 512, 128>}, {transform_indices = @transform_8, window_bounds = array<i64: 512, 128>}, {pipeline_mode = #tpu.pipeline_mode<synchronous>, transform_indices = @transform_9, window_bounds = array<i64: 9, 128, 128>}, {pipeline_mode = #tpu.pipeline_mode<synchronous>, transform_indices = @transform_10, window_bounds = array<i64: 1, 128>}, {pipeline_mode = #tpu.pipeline_mode<synchronous>, transform_indices = @transform_11, window_bounds = array<i64: 1, 128>}, {transform_indices = @transform_12, window_bounds = array<i64: 512, 128>}]} {
    %c0 = arith.constant 0 : index
    %c0_0 = arith.constant 0 : index
    %0 = vector.load %arg1[%c0, %c0_0] : memref<512x128xbf16, #tpu.memory_space<vmem>>, vector<512x128xbf16>
    %c0_1 = arith.constant 0 : index
    %c0_2 = arith.constant 0 : index
    %c0_3 = arith.constant 0 : index
    %1 = vector.load %arg10[%c0_1, %c0_2, %c0_3] : memref<9x128x128xbf16, #tpu.memory_space<vmem>>, vector<1x128x128xbf16>
    %2 = vector.shape_cast %1 : vector<1x128x128xbf16> to vector<128x128xbf16>
    %cst = arith.constant dense<0.000000e+00> : vector<512x128xf32>
    %3 = tpu.matmul %0, %2, %cst {dimension_numbers = #tpu.dot_dimension_numbers<[1], [0], [0], [1], [0, 0, 1, 1], [], []>} : vector<512x128xbf16>, vector<128x128xbf16>, vector<512x128xf32> -> vector<512x128xf32>
    %c0_4 = arith.constant 0 : index
    %c0_5 = arith.constant 0 : index
    %4 = vector.load %arg2[%c0_4, %c0_5] : memref<512x128xbf16, #tpu.memory_space<vmem>>, vector<512x128xbf16>
    %c1 = arith.constant 1 : index
    %c0_6 = arith.constant 0 : index
    %c0_7 = arith.constant 0 : index
    %5 = vector.load %arg10[%c1, %c0_6, %c0_7] : memref<9x128x128xbf16, #tpu.memory_space<vmem>>, vector<1x128x128xbf16>
    %6 = vector.shape_cast %5 : vector<1x128x128xbf16> to vector<128x128xbf16>
    %cst_8 = arith.constant dense<0.000000e+00> : vector<512x128xf32>
    %7 = tpu.matmul %4, %6, %cst_8 {dimension_numbers = #tpu.dot_dimension_numbers<[1], [0], [0], [1], [0, 0, 1, 1], [], []>} : vector<512x128xbf16>, vector<128x128xbf16>, vector<512x128xf32> -> vector<512x128xf32>
    %8 = arith.addf %3, %7 : vector<512x128xf32>
    %c0_9 = arith.constant 0 : index
    %c0_10 = arith.constant 0 : index
    %9 = vector.load %arg3[%c0_9, %c0_10] : memref<512x128xbf16, #tpu.memory_space<vmem>>, vector<512x128xbf16>
    %c2 = arith.constant 2 : index
    %c0_11 = arith.constant 0 : index
    %c0_12 = arith.constant 0 : index
    %10 = vector.load %arg10[%c2, %c0_11, %c0_12] : memref<9x128x128xbf16, #tpu.memory_space<vmem>>, vector<1x128x128xbf16>
    %11 = vector.shape_cast %10 : vector<1x128x128xbf16> to vector<128x128xbf16>
    %cst_13 = arith.constant dense<0.000000e+00> : vector<512x128xf32>
    %12 = tpu.matmul %9, %11, %cst_13 {dimension_numbers = #tpu.dot_dimension_numbers<[1], [0], [0], [1], [0, 0, 1, 1], [], []>} : vector<512x128xbf16>, vector<128x128xbf16>, vector<512x128xf32> -> vector<512x128xf32>
    %13 = arith.addf %8, %12 : vector<512x128xf32>
    %c0_14 = arith.constant 0 : index
    %c0_15 = arith.constant 0 : index
    %14 = vector.load %arg4[%c0_14, %c0_15] : memref<512x128xbf16, #tpu.memory_space<vmem>>, vector<512x128xbf16>
    %c3 = arith.constant 3 : index
    %c0_16 = arith.constant 0 : index
    %c0_17 = arith.constant 0 : index
    %15 = vector.load %arg10[%c3, %c0_16, %c0_17] : memref<9x128x128xbf16, #tpu.memory_space<vmem>>, vector<1x128x128xbf16>
    %16 = vector.shape_cast %15 : vector<1x128x128xbf16> to vector<128x128xbf16>
    %cst_18 = arith.constant dense<0.000000e+00> : vector<512x128xf32>
    %17 = tpu.matmul %14, %16, %cst_18 {dimension_numbers = #tpu.dot_dimension_numbers<[1], [0], [0], [1], [0, 0, 1, 1], [], []>} : vector<512x128xbf16>, vector<128x128xbf16>, vector<512x128xf32> -> vector<512x128xf32>
    %18 = arith.addf %13, %17 : vector<512x128xf32>
    %c0_19 = arith.constant 0 : index
    %c0_20 = arith.constant 0 : index
    %19 = vector.load %arg5[%c0_19, %c0_20] : memref<512x128xbf16, #tpu.memory_space<vmem>>, vector<512x128xbf16>
    %c4 = arith.constant 4 : index
    %c0_21 = arith.constant 0 : index
    %c0_22 = arith.constant 0 : index
    %20 = vector.load %arg10[%c4, %c0_21, %c0_22] : memref<9x128x128xbf16, #tpu.memory_space<vmem>>, vector<1x128x128xbf16>
    %21 = vector.shape_cast %20 : vector<1x128x128xbf16> to vector<128x128xbf16>
    %cst_23 = arith.constant dense<0.000000e+00> : vector<512x128xf32>
    %22 = tpu.matmul %19, %21, %cst_23 {dimension_numbers = #tpu.dot_dimension_numbers<[1], [0], [0], [1], [0, 0, 1, 1], [], []>} : vector<512x128xbf16>, vector<128x128xbf16>, vector<512x128xf32> -> vector<512x128xf32>
    %23 = arith.addf %18, %22 : vector<512x128xf32>
    %c0_24 = arith.constant 0 : index
    %c0_25 = arith.constant 0 : index
    %24 = vector.load %arg6[%c0_24, %c0_25] : memref<512x128xbf16, #tpu.memory_space<vmem>>, vector<512x128xbf16>
    %c5 = arith.constant 5 : index
    %c0_26 = arith.constant 0 : index
    %c0_27 = arith.constant 0 : index
    %25 = vector.load %arg10[%c5, %c0_26, %c0_27] : memref<9x128x128xbf16, #tpu.memory_space<vmem>>, vector<1x128x128xbf16>
    %26 = vector.shape_cast %25 : vector<1x128x128xbf16> to vector<128x128xbf16>
    %cst_28 = arith.constant dense<0.000000e+00> : vector<512x128xf32>
    %27 = tpu.matmul %24, %26, %cst_28 {dimension_numbers = #tpu.dot_dimension_numbers<[1], [0], [0], [1], [0, 0, 1, 1], [], []>} : vector<512x128xbf16>, vector<128x128xbf16>, vector<512x128xf32> -> vector<512x128xf32>
    %28 = arith.addf %23, %27 : vector<512x128xf32>
    %c0_29 = arith.constant 0 : index
    %c0_30 = arith.constant 0 : index
    %29 = vector.load %arg7[%c0_29, %c0_30] : memref<512x128xbf16, #tpu.memory_space<vmem>>, vector<512x128xbf16>
    %c6 = arith.constant 6 : index
    %c0_31 = arith.constant 0 : index
    %c0_32 = arith.constant 0 : index
    %30 = vector.load %arg10[%c6, %c0_31, %c0_32] : memref<9x128x128xbf16, #tpu.memory_space<vmem>>, vector<1x128x128xbf16>
    %31 = vector.shape_cast %30 : vector<1x128x128xbf16> to vector<128x128xbf16>
    %cst_33 = arith.constant dense<0.000000e+00> : vector<512x128xf32>
    %32 = tpu.matmul %29, %31, %cst_33 {dimension_numbers = #tpu.dot_dimension_numbers<[1], [0], [0], [1], [0, 0, 1, 1], [], []>} : vector<512x128xbf16>, vector<128x128xbf16>, vector<512x128xf32> -> vector<512x128xf32>
    %33 = arith.addf %28, %32 : vector<512x128xf32>
    %c0_34 = arith.constant 0 : index
    %c0_35 = arith.constant 0 : index
    %34 = vector.load %arg8[%c0_34, %c0_35] : memref<512x128xbf16, #tpu.memory_space<vmem>>, vector<512x128xbf16>
    %c7 = arith.constant 7 : index
    %c0_36 = arith.constant 0 : index
    %c0_37 = arith.constant 0 : index
    %35 = vector.load %arg10[%c7, %c0_36, %c0_37] : memref<9x128x128xbf16, #tpu.memory_space<vmem>>, vector<1x128x128xbf16>
    %36 = vector.shape_cast %35 : vector<1x128x128xbf16> to vector<128x128xbf16>
    %cst_38 = arith.constant dense<0.000000e+00> : vector<512x128xf32>
    %37 = tpu.matmul %34, %36, %cst_38 {dimension_numbers = #tpu.dot_dimension_numbers<[1], [0], [0], [1], [0, 0, 1, 1], [], []>} : vector<512x128xbf16>, vector<128x128xbf16>, vector<512x128xf32> -> vector<512x128xf32>
    %38 = arith.addf %33, %37 : vector<512x128xf32>
    %c0_39 = arith.constant 0 : index
    %c0_40 = arith.constant 0 : index
    %39 = vector.load %arg9[%c0_39, %c0_40] : memref<512x128xbf16, #tpu.memory_space<vmem>>, vector<512x128xbf16>
    %c8 = arith.constant 8 : index
    %c0_41 = arith.constant 0 : index
    %c0_42 = arith.constant 0 : index
    %40 = vector.load %arg10[%c8, %c0_41, %c0_42] : memref<9x128x128xbf16, #tpu.memory_space<vmem>>, vector<1x128x128xbf16>
    %41 = vector.shape_cast %40 : vector<1x128x128xbf16> to vector<128x128xbf16>
    %cst_43 = arith.constant dense<0.000000e+00> : vector<512x128xf32>
    %42 = tpu.matmul %39, %41, %cst_43 {dimension_numbers = #tpu.dot_dimension_numbers<[1], [0], [0], [1], [0, 0, 1, 1], [], []>} : vector<512x128xbf16>, vector<128x128xbf16>, vector<512x128xf32> -> vector<512x128xf32>
    %43 = arith.addf %38, %42 : vector<512x128xf32>
    %c0_44 = arith.constant 0 : index
    %c0_45 = arith.constant 0 : index
    %44 = vector.load %arg11[%c0_44, %c0_45] : memref<1x128xf32, #tpu.memory_space<vmem>>, vector<1x128xf32>
    %45 = vector.broadcast %44 : vector<1x128xf32> to vector<512x128xf32>
    %46 = arith.mulf %43, %45 : vector<512x128xf32>
    %c0_46 = arith.constant 0 : index
    %c0_47 = arith.constant 0 : index
    %47 = vector.load %arg12[%c0_46, %c0_47] : memref<1x128xf32, #tpu.memory_space<vmem>>, vector<1x128xf32>
    %48 = vector.broadcast %47 : vector<1x128xf32> to vector<512x128xf32>
    %49 = arith.addf %46, %48 : vector<512x128xf32>
    %cst_48 = arith.constant 0.000000e+00 : f32
    %50 = vector.broadcast %cst_48 : f32 to vector<512x128xf32>
    %51 = arith.maximumf %49, %50 : vector<512x128xf32>
    %52 = arith.truncf %51 : vector<512x128xf32> to vector<512x128xbf16>
    %c0_49 = arith.constant 0 : index
    %c0_50 = arith.constant 0 : index
    %53 = vector.load %arg13[%c0_49, %c0_50] : memref<512x128xbf16, #tpu.memory_space<vmem>>, vector<512x128xbf16>
    tpu.vector_store %arg13[%c0_49, %c0_50], %52 {strides = array<i32>} : memref<512x128xbf16, #tpu.memory_space<vmem>>, vector<512x128xbf16>,
    return
  }
  func.func @transform_0(%arg0: i32) -> (i32, i32) {
    %c0_i32 = arith.constant 0 : i32
    %c0_i32_0 = arith.constant 0 : i32
    return %arg0, %c0_i32 : i32, i32
  }
  func.func @transform_1(%arg0: i32) -> (i32, i32) {
    %c0_i32 = arith.constant 0 : i32
    %c0_i32_0 = arith.constant 0 : i32
    return %arg0, %c0_i32 : i32, i32
  }
  func.func @transform_2(%arg0: i32) -> (i32, i32) {
    %c0_i32 = arith.constant 0 : i32
    %c0_i32_0 = arith.constant 0 : i32
    return %arg0, %c0_i32 : i32, i32
  }
  func.func @transform_3(%arg0: i32) -> (i32, i32) {
    %c0_i32 = arith.constant 0 : i32
    %c0_i32_0 = arith.constant 0 : i32
    return %arg0, %c0_i32 : i32, i32
  }
  func.func @transform_4(%arg0: i32) -> (i32, i32) {
    %c0_i32 = arith.constant 0 : i32
    %c0_i32_0 = arith.constant 0 : i32
    return %arg0, %c0_i32 : i32, i32
  }
  func.func @transform_5(%arg0: i32) -> (i32, i32) {
    %c0_i32 = arith.constant 0 : i32
    %c0_i32_0 = arith.constant 0 : i32
    return %arg0, %c0_i32 : i32, i32
  }
  func.func @transform_6(%arg0: i32) -> (i32, i32) {
    %c0_i32 = arith.constant 0 : i32
    %c0_i32_0 = arith.constant 0 : i32
    return %arg0, %c0_i32 : i32, i32
  }
  func.func @transform_7(%arg0: i32) -> (i32, i32) {
    %c0_i32 = arith.constant 0 : i32
    %c0_i32_0 = arith.constant 0 : i32
    return %arg0, %c0_i32 : i32, i32
  }
  func.func @transform_8(%arg0: i32) -> (i32, i32) {
    %c0_i32 = arith.constant 0 : i32
    %c0_i32_0 = arith.constant 0 : i32
    return %arg0, %c0_i32 : i32, i32
  }
  func.func @transform_9(%arg0: i32) -> (i32, i32, i32) {
    %c0_i32 = arith.constant 0 : i32
    %c0_i32_0 = arith.constant 0 : i32
    %c0_i32_1 = arith.constant 0 : i32
    %c0_i32_2 = arith.constant 0 : i32
    return %c0_i32, %c0_i32_0, %c0_i32_1 : i32, i32, i32
  }
  func.func @transform_10(%arg0: i32) -> (i32, i32) {
    %c0_i32 = arith.constant 0 : i32
    %c0_i32_0 = arith.constant 0 : i32
    %c0_i32_1 = arith.constant 0 : i32
    return %c0_i32, %c0_i32_0 : i32, i32
  }
  func.func @transform_11(%arg0: i32) -> (i32, i32) {
    %c0_i32 = arith.constant 0 : i32
    %c0_i32_0 = arith.constant 0 : i32
    %c0_i32_1 = arith.constant 0 : i32
    return %c0_i32, %c0_i32_0 : i32, i32
  }
  func.func @transform_12(%arg0: i32) -> (i32, i32) {
    %c0_i32 = arith.constant 0 : i32
    %c0_i32_0 = arith.constant 0 : i32
    return %arg0, %c0_i32 : i32, i32
  }
}

module attributes {stable_mosaic.version = 11 : i64} {
  func.func @kernel(%arg0: i32, %arg1: memref<128x4xbf16, #tpu.memory_space<vmem>>, %arg2: memref<128x4xbf16, #tpu.memory_space<vmem>>, %arg3: memref<128x4xbf16, #tpu.memory_space<vmem>>, %arg4: memref<128x4xbf16, #tpu.memory_space<vmem>>, %arg5: memref<128x4xbf16, #tpu.memory_space<vmem>>, %arg6: memref<128x4xbf16, #tpu.memory_space<vmem>>, %arg7: memref<128x4xbf16, #tpu.memory_space<vmem>>, %arg8: memref<128x4xbf16, #tpu.memory_space<vmem>>, %arg9: memref<128x4xbf16, #tpu.memory_space<vmem>>, %arg10: memref<9x4x384xbf16, #tpu.memory_space<vmem>>, %arg11: memref<1x384xf32, #tpu.memory_space<vmem>>, %arg12: memref<1x384xf32, #tpu.memory_space<vmem>>, %arg13: memref<128x128xbf16, #tpu.memory_space<vmem>>, %arg14: memref<128x128xbf16, #tpu.memory_space<vmem>>, %arg15: memref<128x128xbf16, #tpu.memory_space<vmem>>, %arg16: memref<128x128xbf16, #tpu.memory_space<vmem>>, %arg17: memref<128x128xbf16, #tpu.memory_space<vmem>>, %arg18: memref<128x128xbf16, #tpu.memory_space<vmem>>, %arg19: memref<128x128xbf16, #tpu.memory_space<vmem>>, %arg20: memref<128x128xbf16, #tpu.memory_space<vmem>>, %arg21: memref<128x128xbf16, #tpu.memory_space<vmem>>, %arg22: memref<9x128x96xbf16, #tpu.memory_space<vmem>>, %arg23: memref<1x96xf32, #tpu.memory_space<vmem>>, %arg24: memref<1x96xf32, #tpu.memory_space<vmem>>, %arg25: memref<128x9xbf16, #tpu.memory_space<vmem>>, %arg26: memref<128x484xf32, #tpu.memory_space<vmem>>) attributes {dimension_semantics = [#tpu.dimension_semantics<parallel>], iteration_bounds = array<i64: 1>, scalar_prefetch = 0 : i64, scratch_operands = 0 : i64, tpu.core_type = #tpu.core_type<tc>, window_params = [{transform_indices = @transform_0, window_bounds = array<i64: 128, 4>}, {transform_indices = @transform_1, window_bounds = array<i64: 128, 4>}, {transform_indices = @transform_2, window_bounds = array<i64: 128, 4>}, {transform_indices = @transform_3, window_bounds = array<i64: 128, 4>}, {transform_indices = @transform_4, window_bounds = array<i64: 128, 4>}, {transform_indices = @transform_5, window_bounds = array<i64: 128, 4>}, {transform_indices = @transform_6, window_bounds = array<i64: 128, 4>}, {transform_indices = @transform_7, window_bounds = array<i64: 128, 4>}, {transform_indices = @transform_8, window_bounds = array<i64: 128, 4>}, {pipeline_mode = #tpu.pipeline_mode<synchronous>, transform_indices = @transform_9, window_bounds = array<i64: 9, 4, 384>}, {pipeline_mode = #tpu.pipeline_mode<synchronous>, transform_indices = @transform_10, window_bounds = array<i64: 1, 384>}, {pipeline_mode = #tpu.pipeline_mode<synchronous>, transform_indices = @transform_11, window_bounds = array<i64: 1, 384>}, {transform_indices = @transform_12, window_bounds = array<i64: 128, 128>}, {transform_indices = @transform_13, window_bounds = array<i64: 128, 128>}, {transform_indices = @transform_14, window_bounds = array<i64: 128, 128>}, {transform_indices = @transform_15, window_bounds = array<i64: 128, 128>}, {transform_indices = @transform_16, window_bounds = array<i64: 128, 128>}, {transform_indices = @transform_17, window_bounds = array<i64: 128, 128>}, {transform_indices = @transform_18, window_bounds = array<i64: 128, 128>}, {transform_indices = @transform_19, window_bounds = array<i64: 128, 128>}, {transform_indices = @transform_20, window_bounds = array<i64: 128, 128>}, {pipeline_mode = #tpu.pipeline_mode<synchronous>, transform_indices = @transform_21, window_bounds = array<i64: 9, 128, 96>}, {pipeline_mode = #tpu.pipeline_mode<synchronous>, transform_indices = @transform_22, window_bounds = array<i64: 1, 96>}, {pipeline_mode = #tpu.pipeline_mode<synchronous>, transform_indices = @transform_23, window_bounds = array<i64: 1, 96>}, {transform_indices = @transform_24, window_bounds = array<i64: 128, 9>}, {transform_indices = @transform_25, window_bounds = array<i64: 128, 484>}]} {
    %c0 = arith.constant 0 : index
    %c0_0 = arith.constant 0 : index
    %0 = vector.load %arg1[%c0, %c0_0] : memref<128x4xbf16, #tpu.memory_space<vmem>>, vector<128x4xbf16>
    %c0_1 = arith.constant 0 : index
    %c0_2 = arith.constant 0 : index
    %c0_3 = arith.constant 0 : index
    %1 = vector.load %arg10[%c0_1, %c0_2, %c0_3] : memref<9x4x384xbf16, #tpu.memory_space<vmem>>, vector<1x4x384xbf16>
    %2 = vector.shape_cast %1 : vector<1x4x384xbf16> to vector<4x384xbf16>
    %cst = arith.constant dense<0.000000e+00> : vector<128x384xf32>
    %3 = tpu.matmul %0, %2, %cst {dimension_numbers = #tpu.dot_dimension_numbers<[1], [0], [0], [1], [0, 0, 1, 1], [], []>} : vector<128x4xbf16>, vector<4x384xbf16>, vector<128x384xf32> -> vector<128x384xf32>
    %c0_4 = arith.constant 0 : index
    %c0_5 = arith.constant 0 : index
    %4 = vector.load %arg2[%c0_4, %c0_5] : memref<128x4xbf16, #tpu.memory_space<vmem>>, vector<128x4xbf16>
    %c1 = arith.constant 1 : index
    %c0_6 = arith.constant 0 : index
    %c0_7 = arith.constant 0 : index
    %5 = vector.load %arg10[%c1, %c0_6, %c0_7] : memref<9x4x384xbf16, #tpu.memory_space<vmem>>, vector<1x4x384xbf16>
    %6 = vector.shape_cast %5 : vector<1x4x384xbf16> to vector<4x384xbf16>
    %cst_8 = arith.constant dense<0.000000e+00> : vector<128x384xf32>
    %7 = tpu.matmul %4, %6, %cst_8 {dimension_numbers = #tpu.dot_dimension_numbers<[1], [0], [0], [1], [0, 0, 1, 1], [], []>} : vector<128x4xbf16>, vector<4x384xbf16>, vector<128x384xf32> -> vector<128x384xf32>
    %8 = arith.addf %3, %7 : vector<128x384xf32>
    %c0_9 = arith.constant 0 : index
    %c0_10 = arith.constant 0 : index
    %9 = vector.load %arg3[%c0_9, %c0_10] : memref<128x4xbf16, #tpu.memory_space<vmem>>, vector<128x4xbf16>
    %c2 = arith.constant 2 : index
    %c0_11 = arith.constant 0 : index
    %c0_12 = arith.constant 0 : index
    %10 = vector.load %arg10[%c2, %c0_11, %c0_12] : memref<9x4x384xbf16, #tpu.memory_space<vmem>>, vector<1x4x384xbf16>
    %11 = vector.shape_cast %10 : vector<1x4x384xbf16> to vector<4x384xbf16>
    %cst_13 = arith.constant dense<0.000000e+00> : vector<128x384xf32>
    %12 = tpu.matmul %9, %11, %cst_13 {dimension_numbers = #tpu.dot_dimension_numbers<[1], [0], [0], [1], [0, 0, 1, 1], [], []>} : vector<128x4xbf16>, vector<4x384xbf16>, vector<128x384xf32> -> vector<128x384xf32>
    %13 = arith.addf %8, %12 : vector<128x384xf32>
    %c0_14 = arith.constant 0 : index
    %c0_15 = arith.constant 0 : index
    %14 = vector.load %arg4[%c0_14, %c0_15] : memref<128x4xbf16, #tpu.memory_space<vmem>>, vector<128x4xbf16>
    %c3 = arith.constant 3 : index
    %c0_16 = arith.constant 0 : index
    %c0_17 = arith.constant 0 : index
    %15 = vector.load %arg10[%c3, %c0_16, %c0_17] : memref<9x4x384xbf16, #tpu.memory_space<vmem>>, vector<1x4x384xbf16>
    %16 = vector.shape_cast %15 : vector<1x4x384xbf16> to vector<4x384xbf16>
    %cst_18 = arith.constant dense<0.000000e+00> : vector<128x384xf32>
    %17 = tpu.matmul %14, %16, %cst_18 {dimension_numbers = #tpu.dot_dimension_numbers<[1], [0], [0], [1], [0, 0, 1, 1], [], []>} : vector<128x4xbf16>, vector<4x384xbf16>, vector<128x384xf32> -> vector<128x384xf32>
    %18 = arith.addf %13, %17 : vector<128x384xf32>
    %c0_19 = arith.constant 0 : index
    %c0_20 = arith.constant 0 : index
    %19 = vector.load %arg5[%c0_19, %c0_20] : memref<128x4xbf16, #tpu.memory_space<vmem>>, vector<128x4xbf16>
    %c4 = arith.constant 4 : index
    %c0_21 = arith.constant 0 : index
    %c0_22 = arith.constant 0 : index
    %20 = vector.load %arg10[%c4, %c0_21, %c0_22] : memref<9x4x384xbf16, #tpu.memory_space<vmem>>, vector<1x4x384xbf16>
    %21 = vector.shape_cast %20 : vector<1x4x384xbf16> to vector<4x384xbf16>
    %cst_23 = arith.constant dense<0.000000e+00> : vector<128x384xf32>
    %22 = tpu.matmul %19, %21, %cst_23 {dimension_numbers = #tpu.dot_dimension_numbers<[1], [0], [0], [1], [0, 0, 1, 1], [], []>} : vector<128x4xbf16>, vector<4x384xbf16>, vector<128x384xf32> -> vector<128x384xf32>
    %23 = arith.addf %18, %22 : vector<128x384xf32>
    %c0_24 = arith.constant 0 : index
    %c0_25 = arith.constant 0 : index
    %24 = vector.load %arg6[%c0_24, %c0_25] : memref<128x4xbf16, #tpu.memory_space<vmem>>, vector<128x4xbf16>
    %c5 = arith.constant 5 : index
    %c0_26 = arith.constant 0 : index
    %c0_27 = arith.constant 0 : index
    %25 = vector.load %arg10[%c5, %c0_26, %c0_27] : memref<9x4x384xbf16, #tpu.memory_space<vmem>>, vector<1x4x384xbf16>
    %26 = vector.shape_cast %25 : vector<1x4x384xbf16> to vector<4x384xbf16>
    %cst_28 = arith.constant dense<0.000000e+00> : vector<128x384xf32>
    %27 = tpu.matmul %24, %26, %cst_28 {dimension_numbers = #tpu.dot_dimension_numbers<[1], [0], [0], [1], [0, 0, 1, 1], [], []>} : vector<128x4xbf16>, vector<4x384xbf16>, vector<128x384xf32> -> vector<128x384xf32>
    %28 = arith.addf %23, %27 : vector<128x384xf32>
    %c0_29 = arith.constant 0 : index
    %c0_30 = arith.constant 0 : index
    %29 = vector.load %arg7[%c0_29, %c0_30] : memref<128x4xbf16, #tpu.memory_space<vmem>>, vector<128x4xbf16>
    %c6 = arith.constant 6 : index
    %c0_31 = arith.constant 0 : index
    %c0_32 = arith.constant 0 : index
    %30 = vector.load %arg10[%c6, %c0_31, %c0_32] : memref<9x4x384xbf16, #tpu.memory_space<vmem>>, vector<1x4x384xbf16>
    %31 = vector.shape_cast %30 : vector<1x4x384xbf16> to vector<4x384xbf16>
    %cst_33 = arith.constant dense<0.000000e+00> : vector<128x384xf32>
    %32 = tpu.matmul %29, %31, %cst_33 {dimension_numbers = #tpu.dot_dimension_numbers<[1], [0], [0], [1], [0, 0, 1, 1], [], []>} : vector<128x4xbf16>, vector<4x384xbf16>, vector<128x384xf32> -> vector<128x384xf32>
    %33 = arith.addf %28, %32 : vector<128x384xf32>
    %c0_34 = arith.constant 0 : index
    %c0_35 = arith.constant 0 : index
    %34 = vector.load %arg8[%c0_34, %c0_35] : memref<128x4xbf16, #tpu.memory_space<vmem>>, vector<128x4xbf16>
    %c7 = arith.constant 7 : index
    %c0_36 = arith.constant 0 : index
    %c0_37 = arith.constant 0 : index
    %35 = vector.load %arg10[%c7, %c0_36, %c0_37] : memref<9x4x384xbf16, #tpu.memory_space<vmem>>, vector<1x4x384xbf16>
    %36 = vector.shape_cast %35 : vector<1x4x384xbf16> to vector<4x384xbf16>
    %cst_38 = arith.constant dense<0.000000e+00> : vector<128x384xf32>
    %37 = tpu.matmul %34, %36, %cst_38 {dimension_numbers = #tpu.dot_dimension_numbers<[1], [0], [0], [1], [0, 0, 1, 1], [], []>} : vector<128x4xbf16>, vector<4x384xbf16>, vector<128x384xf32> -> vector<128x384xf32>
    %38 = arith.addf %33, %37 : vector<128x384xf32>
    %c0_39 = arith.constant 0 : index
    %c0_40 = arith.constant 0 : index
    %39 = vector.load %arg9[%c0_39, %c0_40] : memref<128x4xbf16, #tpu.memory_space<vmem>>, vector<128x4xbf16>
    %c8 = arith.constant 8 : index
    %c0_41 = arith.constant 0 : index
    %c0_42 = arith.constant 0 : index
    %40 = vector.load %arg10[%c8, %c0_41, %c0_42] : memref<9x4x384xbf16, #tpu.memory_space<vmem>>, vector<1x4x384xbf16>
    %41 = vector.shape_cast %40 : vector<1x4x384xbf16> to vector<4x384xbf16>
    %cst_43 = arith.constant dense<0.000000e+00> : vector<128x384xf32>
    %42 = tpu.matmul %39, %41, %cst_43 {dimension_numbers = #tpu.dot_dimension_numbers<[1], [0], [0], [1], [0, 0, 1, 1], [], []>} : vector<128x4xbf16>, vector<4x384xbf16>, vector<128x384xf32> -> vector<128x384xf32>
    %43 = arith.addf %38, %42 : vector<128x384xf32>
    %c0_44 = arith.constant 0 : index
    %c0_45 = arith.constant 0 : index
    %44 = vector.load %arg11[%c0_44, %c0_45] : memref<1x384xf32, #tpu.memory_space<vmem>>, vector<1x384xf32>
    %45 = vector.broadcast %44 : vector<1x384xf32> to vector<128x384xf32>
    %46 = arith.mulf %43, %45 : vector<128x384xf32>
    %c0_46 = arith.constant 0 : index
    %c0_47 = arith.constant 0 : index
    %47 = vector.load %arg12[%c0_46, %c0_47] : memref<1x384xf32, #tpu.memory_space<vmem>>, vector<1x384xf32>
    %48 = vector.broadcast %47 : vector<1x384xf32> to vector<128x384xf32>
    %49 = arith.addf %46, %48 : vector<128x384xf32>
    %cst_48 = arith.constant 0.000000e+00 : f32
    %50 = vector.broadcast %cst_48 : f32 to vector<128x384xf32>
    %51 = arith.maximumf %49, %50 : vector<128x384xf32>
    %c0_49 = arith.constant 0 : index
    %c0_50 = arith.constant 0 : index
    %52 = vector.load %arg26[%c0_49, %c0_50] : memref<128x484xf32, #tpu.memory_space<vmem>>, vector<128x384xf32>
    tpu.vector_store %arg26[%c0_49, %c0_50], %51 {strides = array<i32>} : memref<128x484xf32, #tpu.memory_space<vmem>>, vector<128x384xf32>,
    %c0_51 = arith.constant 0 : index
    %c0_52 = arith.constant 0 : index
    %53 = vector.load %arg13[%c0_51, %c0_52] : memref<128x128xbf16, #tpu.memory_space<vmem>>, vector<128x128xbf16>
    %c0_53 = arith.constant 0 : index
    %c0_54 = arith.constant 0 : index
    %c0_55 = arith.constant 0 : index
    %54 = vector.load %arg22[%c0_53, %c0_54, %c0_55] : memref<9x128x96xbf16, #tpu.memory_space<vmem>>, vector<1x128x96xbf16>
    %55 = vector.shape_cast %54 : vector<1x128x96xbf16> to vector<128x96xbf16>
    %cst_56 = arith.constant dense<0.000000e+00> : vector<128x96xf32>
    %56 = tpu.matmul %53, %55, %cst_56 {dimension_numbers = #tpu.dot_dimension_numbers<[1], [0], [0], [1], [0, 0, 1, 1], [], []>} : vector<128x128xbf16>, vector<128x96xbf16>, vector<128x96xf32> -> vector<128x96xf32>
    %c0_57 = arith.constant 0 : index
    %c0_58 = arith.constant 0 : index
    %57 = vector.load %arg14[%c0_57, %c0_58] : memref<128x128xbf16, #tpu.memory_space<vmem>>, vector<128x128xbf16>
    %c1_59 = arith.constant 1 : index
    %c0_60 = arith.constant 0 : index
    %c0_61 = arith.constant 0 : index
    %58 = vector.load %arg22[%c1_59, %c0_60, %c0_61] : memref<9x128x96xbf16, #tpu.memory_space<vmem>>, vector<1x128x96xbf16>
    %59 = vector.shape_cast %58 : vector<1x128x96xbf16> to vector<128x96xbf16>
    %cst_62 = arith.constant dense<0.000000e+00> : vector<128x96xf32>
    %60 = tpu.matmul %57, %59, %cst_62 {dimension_numbers = #tpu.dot_dimension_numbers<[1], [0], [0], [1], [0, 0, 1, 1], [], []>} : vector<128x128xbf16>, vector<128x96xbf16>, vector<128x96xf32> -> vector<128x96xf32>
    %61 = arith.addf %56, %60 : vector<128x96xf32>
    %c0_63 = arith.constant 0 : index
    %c0_64 = arith.constant 0 : index
    %62 = vector.load %arg15[%c0_63, %c0_64] : memref<128x128xbf16, #tpu.memory_space<vmem>>, vector<128x128xbf16>
    %c2_65 = arith.constant 2 : index
    %c0_66 = arith.constant 0 : index
    %c0_67 = arith.constant 0 : index
    %63 = vector.load %arg22[%c2_65, %c0_66, %c0_67] : memref<9x128x96xbf16, #tpu.memory_space<vmem>>, vector<1x128x96xbf16>
    %64 = vector.shape_cast %63 : vector<1x128x96xbf16> to vector<128x96xbf16>
    %cst_68 = arith.constant dense<0.000000e+00> : vector<128x96xf32>
    %65 = tpu.matmul %62, %64, %cst_68 {dimension_numbers = #tpu.dot_dimension_numbers<[1], [0], [0], [1], [0, 0, 1, 1], [], []>} : vector<128x128xbf16>, vector<128x96xbf16>, vector<128x96xf32> -> vector<128x96xf32>
    %66 = arith.addf %61, %65 : vector<128x96xf32>
    %c0_69 = arith.constant 0 : index
    %c0_70 = arith.constant 0 : index
    %67 = vector.load %arg16[%c0_69, %c0_70] : memref<128x128xbf16, #tpu.memory_space<vmem>>, vector<128x128xbf16>
    %c3_71 = arith.constant 3 : index
    %c0_72 = arith.constant 0 : index
    %c0_73 = arith.constant 0 : index
    %68 = vector.load %arg22[%c3_71, %c0_72, %c0_73] : memref<9x128x96xbf16, #tpu.memory_space<vmem>>, vector<1x128x96xbf16>
    %69 = vector.shape_cast %68 : vector<1x128x96xbf16> to vector<128x96xbf16>
    %cst_74 = arith.constant dense<0.000000e+00> : vector<128x96xf32>
    %70 = tpu.matmul %67, %69, %cst_74 {dimension_numbers = #tpu.dot_dimension_numbers<[1], [0], [0], [1], [0, 0, 1, 1], [], []>} : vector<128x128xbf16>, vector<128x96xbf16>, vector<128x96xf32> -> vector<128x96xf32>
    %71 = arith.addf %66, %70 : vector<128x96xf32>
    %c0_75 = arith.constant 0 : index
    %c0_76 = arith.constant 0 : index
    %72 = vector.load %arg17[%c0_75, %c0_76] : memref<128x128xbf16, #tpu.memory_space<vmem>>, vector<128x128xbf16>
    %c4_77 = arith.constant 4 : index
    %c0_78 = arith.constant 0 : index
    %c0_79 = arith.constant 0 : index
    %73 = vector.load %arg22[%c4_77, %c0_78, %c0_79] : memref<9x128x96xbf16, #tpu.memory_space<vmem>>, vector<1x128x96xbf16>
    %74 = vector.shape_cast %73 : vector<1x128x96xbf16> to vector<128x96xbf16>
    %cst_80 = arith.constant dense<0.000000e+00> : vector<128x96xf32>
    %75 = tpu.matmul %72, %74, %cst_80 {dimension_numbers = #tpu.dot_dimension_numbers<[1], [0], [0], [1], [0, 0, 1, 1], [], []>} : vector<128x128xbf16>, vector<128x96xbf16>, vector<128x96xf32> -> vector<128x96xf32>
    %76 = arith.addf %71, %75 : vector<128x96xf32>
    %c0_81 = arith.constant 0 : index
    %c0_82 = arith.constant 0 : index
    %77 = vector.load %arg18[%c0_81, %c0_82] : memref<128x128xbf16, #tpu.memory_space<vmem>>, vector<128x128xbf16>
    %c5_83 = arith.constant 5 : index
    %c0_84 = arith.constant 0 : index
    %c0_85 = arith.constant 0 : index
    %78 = vector.load %arg22[%c5_83, %c0_84, %c0_85] : memref<9x128x96xbf16, #tpu.memory_space<vmem>>, vector<1x128x96xbf16>
    %79 = vector.shape_cast %78 : vector<1x128x96xbf16> to vector<128x96xbf16>
    %cst_86 = arith.constant dense<0.000000e+00> : vector<128x96xf32>
    %80 = tpu.matmul %77, %79, %cst_86 {dimension_numbers = #tpu.dot_dimension_numbers<[1], [0], [0], [1], [0, 0, 1, 1], [], []>} : vector<128x128xbf16>, vector<128x96xbf16>, vector<128x96xf32> -> vector<128x96xf32>
    %81 = arith.addf %76, %80 : vector<128x96xf32>
    %c0_87 = arith.constant 0 : index
    %c0_88 = arith.constant 0 : index
    %82 = vector.load %arg19[%c0_87, %c0_88] : memref<128x128xbf16, #tpu.memory_space<vmem>>, vector<128x128xbf16>
    %c6_89 = arith.constant 6 : index
    %c0_90 = arith.constant 0 : index
    %c0_91 = arith.constant 0 : index
    %83 = vector.load %arg22[%c6_89, %c0_90, %c0_91] : memref<9x128x96xbf16, #tpu.memory_space<vmem>>, vector<1x128x96xbf16>
    %84 = vector.shape_cast %83 : vector<1x128x96xbf16> to vector<128x96xbf16>
    %cst_92 = arith.constant dense<0.000000e+00> : vector<128x96xf32>
    %85 = tpu.matmul %82, %84, %cst_92 {dimension_numbers = #tpu.dot_dimension_numbers<[1], [0], [0], [1], [0, 0, 1, 1], [], []>} : vector<128x128xbf16>, vector<128x96xbf16>, vector<128x96xf32> -> vector<128x96xf32>
    %86 = arith.addf %81, %85 : vector<128x96xf32>
    %c0_93 = arith.constant 0 : index
    %c0_94 = arith.constant 0 : index
    %87 = vector.load %arg20[%c0_93, %c0_94] : memref<128x128xbf16, #tpu.memory_space<vmem>>, vector<128x128xbf16>
    %c7_95 = arith.constant 7 : index
    %c0_96 = arith.constant 0 : index
    %c0_97 = arith.constant 0 : index
    %88 = vector.load %arg22[%c7_95, %c0_96, %c0_97] : memref<9x128x96xbf16, #tpu.memory_space<vmem>>, vector<1x128x96xbf16>
    %89 = vector.shape_cast %88 : vector<1x128x96xbf16> to vector<128x96xbf16>
    %cst_98 = arith.constant dense<0.000000e+00> : vector<128x96xf32>
    %90 = tpu.matmul %87, %89, %cst_98 {dimension_numbers = #tpu.dot_dimension_numbers<[1], [0], [0], [1], [0, 0, 1, 1], [], []>} : vector<128x128xbf16>, vector<128x96xbf16>, vector<128x96xf32> -> vector<128x96xf32>
    %91 = arith.addf %86, %90 : vector<128x96xf32>
    %c0_99 = arith.constant 0 : index
    %c0_100 = arith.constant 0 : index
    %92 = vector.load %arg21[%c0_99, %c0_100] : memref<128x128xbf16, #tpu.memory_space<vmem>>, vector<128x128xbf16>
    %c8_101 = arith.constant 8 : index
    %c0_102 = arith.constant 0 : index
    %c0_103 = arith.constant 0 : index
    %93 = vector.load %arg22[%c8_101, %c0_102, %c0_103] : memref<9x128x96xbf16, #tpu.memory_space<vmem>>, vector<1x128x96xbf16>
    %94 = vector.shape_cast %93 : vector<1x128x96xbf16> to vector<128x96xbf16>
    %cst_104 = arith.constant dense<0.000000e+00> : vector<128x96xf32>
    %95 = tpu.matmul %92, %94, %cst_104 {dimension_numbers = #tpu.dot_dimension_numbers<[1], [0], [0], [1], [0, 0, 1, 1], [], []>} : vector<128x128xbf16>, vector<128x96xbf16>, vector<128x96xf32> -> vector<128x96xf32>
    %96 = arith.addf %91, %95 : vector<128x96xf32>
    %c0_105 = arith.constant 0 : index
    %c0_106 = arith.constant 0 : index
    %97 = vector.load %arg23[%c0_105, %c0_106] : memref<1x96xf32, #tpu.memory_space<vmem>>, vector<1x96xf32>
    %98 = vector.broadcast %97 : vector<1x96xf32> to vector<128x96xf32>
    %99 = arith.mulf %96, %98 : vector<128x96xf32>
    %c0_107 = arith.constant 0 : index
    %c0_108 = arith.constant 0 : index
    %100 = vector.load %arg24[%c0_107, %c0_108] : memref<1x96xf32, #tpu.memory_space<vmem>>, vector<1x96xf32>
    %101 = vector.broadcast %100 : vector<1x96xf32> to vector<128x96xf32>
    %102 = arith.addf %99, %101 : vector<128x96xf32>
    %cst_109 = arith.constant 0.000000e+00 : f32
    %103 = vector.broadcast %cst_109 : f32 to vector<128x96xf32>
    %104 = arith.maximumf %102, %103 : vector<128x96xf32>
    %c0_110 = arith.constant 0 : index
    %c384 = arith.constant 384 : index
    %105 = vector.load %arg26[%c0_110, %c384] : memref<128x484xf32, #tpu.memory_space<vmem>>, vector<128x96xf32>
    tpu.vector_store %arg26[%c0_110, %c384], %104 {strides = array<i32>} : memref<128x484xf32, #tpu.memory_space<vmem>>, vector<128x96xf32>,
    %c0_111 = arith.constant 0 : index
    %c0_112 = arith.constant 0 : index
    %106 = vector.load %arg1[%c0_111, %c0_112] : memref<128x4xbf16, #tpu.memory_space<vmem>>, vector<128x4xbf16>
    %c0_113 = arith.constant 0 : index
    %c0_114 = arith.constant 0 : index
    %107 = vector.load %arg25[%c0_113, %c0_114] : memref<128x9xbf16, #tpu.memory_space<vmem>>, vector<128x1xbf16>
    %108 = vector.broadcast %107 : vector<128x1xbf16> to vector<128x4xbf16>
    %109 = arith.addf %106, %108 : vector<128x4xbf16>
    %c0_115 = arith.constant 0 : index
    %c0_116 = arith.constant 0 : index
    %110 = vector.load %arg2[%c0_115, %c0_116] : memref<128x4xbf16, #tpu.memory_space<vmem>>, vector<128x4xbf16>
    %c0_117 = arith.constant 0 : index
    %c1_118 = arith.constant 1 : index
    %111 = vector.load %arg25[%c0_117, %c1_118] : memref<128x9xbf16, #tpu.memory_space<vmem>>, vector<128x1xbf16>
    %112 = vector.broadcast %111 : vector<128x1xbf16> to vector<128x4xbf16>
    %113 = arith.addf %110, %112 : vector<128x4xbf16>
    %114 = arith.maximumf %109, %113 : vector<128x4xbf16>
    %c0_119 = arith.constant 0 : index
    %c0_120 = arith.constant 0 : index
    %115 = vector.load %arg3[%c0_119, %c0_120] : memref<128x4xbf16, #tpu.memory_space<vmem>>, vector<128x4xbf16>
    %c0_121 = arith.constant 0 : index
    %c2_122 = arith.constant 2 : index
    %116 = vector.load %arg25[%c0_121, %c2_122] : memref<128x9xbf16, #tpu.memory_space<vmem>>, vector<128x1xbf16>
    %117 = vector.broadcast %116 : vector<128x1xbf16> to vector<128x4xbf16>
    %118 = arith.addf %115, %117 : vector<128x4xbf16>
    %119 = arith.maximumf %114, %118 : vector<128x4xbf16>
    %c0_123 = arith.constant 0 : index
    %c0_124 = arith.constant 0 : index
    %120 = vector.load %arg4[%c0_123, %c0_124] : memref<128x4xbf16, #tpu.memory_space<vmem>>, vector<128x4xbf16>
    %c0_125 = arith.constant 0 : index
    %c3_126 = arith.constant 3 : index
    %121 = vector.load %arg25[%c0_125, %c3_126] : memref<128x9xbf16, #tpu.memory_space<vmem>>, vector<128x1xbf16>
    %122 = vector.broadcast %121 : vector<128x1xbf16> to vector<128x4xbf16>
    %123 = arith.addf %120, %122 : vector<128x4xbf16>
    %124 = arith.maximumf %119, %123 : vector<128x4xbf16>
    %c0_127 = arith.constant 0 : index
    %c0_128 = arith.constant 0 : index
    %125 = vector.load %arg5[%c0_127, %c0_128] : memref<128x4xbf16, #tpu.memory_space<vmem>>, vector<128x4xbf16>
    %c0_129 = arith.constant 0 : index
    %c4_130 = arith.constant 4 : index
    %126 = vector.load %arg25[%c0_129, %c4_130] : memref<128x9xbf16, #tpu.memory_space<vmem>>, vector<128x1xbf16>
    %127 = vector.broadcast %126 : vector<128x1xbf16> to vector<128x4xbf16>
    %128 = arith.addf %125, %127 : vector<128x4xbf16>
    %129 = arith.maximumf %124, %128 : vector<128x4xbf16>
    %c0_131 = arith.constant 0 : index
    %c0_132 = arith.constant 0 : index
    %130 = vector.load %arg6[%c0_131, %c0_132] : memref<128x4xbf16, #tpu.memory_space<vmem>>, vector<128x4xbf16>
    %c0_133 = arith.constant 0 : index
    %c5_134 = arith.constant 5 : index
    %131 = vector.load %arg25[%c0_133, %c5_134] : memref<128x9xbf16, #tpu.memory_space<vmem>>, vector<128x1xbf16>
    %132 = vector.broadcast %131 : vector<128x1xbf16> to vector<128x4xbf16>
    %133 = arith.addf %130, %132 : vector<128x4xbf16>
    %134 = arith.maximumf %129, %133 : vector<128x4xbf16>
    %c0_135 = arith.constant 0 : index
    %c0_136 = arith.constant 0 : index
    %135 = vector.load %arg7[%c0_135, %c0_136] : memref<128x4xbf16, #tpu.memory_space<vmem>>, vector<128x4xbf16>
    %c0_137 = arith.constant 0 : index
    %c6_138 = arith.constant 6 : index
    %136 = vector.load %arg25[%c0_137, %c6_138] : memref<128x9xbf16, #tpu.memory_space<vmem>>, vector<128x1xbf16>
    %137 = vector.broadcast %136 : vector<128x1xbf16> to vector<128x4xbf16>
    %138 = arith.addf %135, %137 : vector<128x4xbf16>
    %139 = arith.maximumf %134, %138 : vector<128x4xbf16>
    %c0_139 = arith.constant 0 : index
    %c0_140 = arith.constant 0 : index
    %140 = vector.load %arg8[%c0_139, %c0_140] : memref<128x4xbf16, #tpu.memory_space<vmem>>, vector<128x4xbf16>
    %c0_141 = arith.constant 0 : index
    %c7_142 = arith.constant 7 : index
    %141 = vector.load %arg25[%c0_141, %c7_142] : memref<128x9xbf16, #tpu.memory_space<vmem>>, vector<128x1xbf16>
    %142 = vector.broadcast %141 : vector<128x1xbf16> to vector<128x4xbf16>
    %143 = arith.addf %140, %142 : vector<128x4xbf16>
    %144 = arith.maximumf %139, %143 : vector<128x4xbf16>
    %c0_143 = arith.constant 0 : index
    %c0_144 = arith.constant 0 : index
    %145 = vector.load %arg9[%c0_143, %c0_144] : memref<128x4xbf16, #tpu.memory_space<vmem>>, vector<128x4xbf16>
    %c0_145 = arith.constant 0 : index
    %c8_146 = arith.constant 8 : index
    %146 = vector.load %arg25[%c0_145, %c8_146] : memref<128x9xbf16, #tpu.memory_space<vmem>>, vector<128x1xbf16>
    %147 = vector.broadcast %146 : vector<128x1xbf16> to vector<128x4xbf16>
    %148 = arith.addf %145, %147 : vector<128x4xbf16>
    %149 = arith.maximumf %144, %148 : vector<128x4xbf16>
    %150 = arith.extf %149 : vector<128x4xbf16> to vector<128x4xf32>
    %c0_147 = arith.constant 0 : index
    %c480 = arith.constant 480 : index
    %151 = vector.load %arg26[%c0_147, %c480] : memref<128x484xf32, #tpu.memory_space<vmem>>, vector<128x4xf32>
    tpu.vector_store %arg26[%c0_147, %c480], %150 {strides = array<i32>} : memref<128x484xf32, #tpu.memory_space<vmem>>, vector<128x4xf32>,
    return
  }
  func.func @transform_0(%arg0: i32) -> (i32, i32) {
    %c0_i32 = arith.constant 0 : i32
    %c0_i32_0 = arith.constant 0 : i32
    return %arg0, %c0_i32 : i32, i32
  }
  func.func @transform_1(%arg0: i32) -> (i32, i32) {
    %c0_i32 = arith.constant 0 : i32
    %c0_i32_0 = arith.constant 0 : i32
    return %arg0, %c0_i32 : i32, i32
  }
  func.func @transform_2(%arg0: i32) -> (i32, i32) {
    %c0_i32 = arith.constant 0 : i32
    %c0_i32_0 = arith.constant 0 : i32
    return %arg0, %c0_i32 : i32, i32
  }
  func.func @transform_3(%arg0: i32) -> (i32, i32) {
    %c0_i32 = arith.constant 0 : i32
    %c0_i32_0 = arith.constant 0 : i32
    return %arg0, %c0_i32 : i32, i32
  }
  func.func @transform_4(%arg0: i32) -> (i32, i32) {
    %c0_i32 = arith.constant 0 : i32
    %c0_i32_0 = arith.constant 0 : i32
    return %arg0, %c0_i32 : i32, i32
  }
  func.func @transform_5(%arg0: i32) -> (i32, i32) {
    %c0_i32 = arith.constant 0 : i32
    %c0_i32_0 = arith.constant 0 : i32
    return %arg0, %c0_i32 : i32, i32
  }
  func.func @transform_6(%arg0: i32) -> (i32, i32) {
    %c0_i32 = arith.constant 0 : i32
    %c0_i32_0 = arith.constant 0 : i32
    return %arg0, %c0_i32 : i32, i32
  }
  func.func @transform_7(%arg0: i32) -> (i32, i32) {
    %c0_i32 = arith.constant 0 : i32
    %c0_i32_0 = arith.constant 0 : i32
    return %arg0, %c0_i32 : i32, i32
  }
  func.func @transform_8(%arg0: i32) -> (i32, i32) {
    %c0_i32 = arith.constant 0 : i32
    %c0_i32_0 = arith.constant 0 : i32
    return %arg0, %c0_i32 : i32, i32
  }
  func.func @transform_9(%arg0: i32) -> (i32, i32, i32) {
    %c0_i32 = arith.constant 0 : i32
    %c0_i32_0 = arith.constant 0 : i32
    %c0_i32_1 = arith.constant 0 : i32
    %c0_i32_2 = arith.constant 0 : i32
    return %c0_i32, %c0_i32_0, %c0_i32_1 : i32, i32, i32
  }
  func.func @transform_10(%arg0: i32) -> (i32, i32) {
    %c0_i32 = arith.constant 0 : i32
    %c0_i32_0 = arith.constant 0 : i32
    %c0_i32_1 = arith.constant 0 : i32
    return %c0_i32, %c0_i32_0 : i32, i32
  }
  func.func @transform_11(%arg0: i32) -> (i32, i32) {
    %c0_i32 = arith.constant 0 : i32
    %c0_i32_0 = arith.constant 0 : i32
    %c0_i32_1 = arith.constant 0 : i32
    return %c0_i32, %c0_i32_0 : i32, i32
  }
  func.func @transform_12(%arg0: i32) -> (i32, i32) {
    %c0_i32 = arith.constant 0 : i32
    %c0_i32_0 = arith.constant 0 : i32
    return %arg0, %c0_i32 : i32, i32
  }
  func.func @transform_13(%arg0: i32) -> (i32, i32) {
    %c0_i32 = arith.constant 0 : i32
    %c0_i32_0 = arith.constant 0 : i32
    return %arg0, %c0_i32 : i32, i32
  }
  func.func @transform_14(%arg0: i32) -> (i32, i32) {
    %c0_i32 = arith.constant 0 : i32
    %c0_i32_0 = arith.constant 0 : i32
    return %arg0, %c0_i32 : i32, i32
  }
  func.func @transform_15(%arg0: i32) -> (i32, i32) {
    %c0_i32 = arith.constant 0 : i32
    %c0_i32_0 = arith.constant 0 : i32
    return %arg0, %c0_i32 : i32, i32
  }
  func.func @transform_16(%arg0: i32) -> (i32, i32) {
    %c0_i32 = arith.constant 0 : i32
    %c0_i32_0 = arith.constant 0 : i32
    return %arg0, %c0_i32 : i32, i32
  }
  func.func @transform_17(%arg0: i32) -> (i32, i32) {
    %c0_i32 = arith.constant 0 : i32
    %c0_i32_0 = arith.constant 0 : i32
    return %arg0, %c0_i32 : i32, i32
  }
  func.func @transform_18(%arg0: i32) -> (i32, i32) {
    %c0_i32 = arith.constant 0 : i32
    %c0_i32_0 = arith.constant 0 : i32
    return %arg0, %c0_i32 : i32, i32
  }
  func.func @transform_19(%arg0: i32) -> (i32, i32) {
    %c0_i32 = arith.constant 0 : i32
    %c0_i32_0 = arith.constant 0 : i32
    return %arg0, %c0_i32 : i32, i32
  }
  func.func @transform_20(%arg0: i32) -> (i32, i32) {
    %c0_i32 = arith.constant 0 : i32
    %c0_i32_0 = arith.constant 0 : i32
    return %arg0, %c0_i32 : i32, i32
  }
  func.func @transform_21(%arg0: i32) -> (i32, i32, i32) {
    %c0_i32 = arith.constant 0 : i32
    %c0_i32_0 = arith.constant 0 : i32
    %c0_i32_1 = arith.constant 0 : i32
    %c0_i32_2 = arith.constant 0 : i32
    return %c0_i32, %c0_i32_0, %c0_i32_1 : i32, i32, i32
  }
  func.func @transform_22(%arg0: i32) -> (i32, i32) {
    %c0_i32 = arith.constant 0 : i32
    %c0_i32_0 = arith.constant 0 : i32
    %c0_i32_1 = arith.constant 0 : i32
    return %c0_i32, %c0_i32_0 : i32, i32
  }
  func.func @transform_23(%arg0: i32) -> (i32, i32) {
    %c0_i32 = arith.constant 0 : i32
    %c0_i32_0 = arith.constant 0 : i32
    %c0_i32_1 = arith.constant 0 : i32
    return %c0_i32, %c0_i32_0 : i32, i32
  }
  func.func @transform_24(%arg0: i32) -> (i32, i32) {
    %c0_i32 = arith.constant 0 : i32
    %c0_i32_0 = arith.constant 0 : i32
    return %arg0, %c0_i32 : i32, i32
  }
  func.func @transform_25(%arg0: i32) -> (i32, i32) {
    %c0_i32 = arith.constant 0 : i32
    %c0_i32_0 = arith.constant 0 : i32
    return %arg0, %c0_i32 : i32, i32
  }
}

</mosaic_0001>

<bundles_post_ra>
// kernel: inception_b_forward.3
= control target key start
LH: loop header
LB: loop body
LE: loop exit
PB: predicated region body
PF: predicated region fallthrough
CT: control target
= control target key end

     0   :  { %vm340_vm0 = vcmask 1041408   ;;  %vm243_vm1 = vcmask 31744   ;;  %s2073_s1 = inlined_call_operand.vmem [shape: bf16[1,4,128], index: 1, kind: input, shape index: {}]   ;;  %s2074_s0 = inlined_call_operand.vmem [shape: bf16[512,4], index: 0, kind: input, shape index: {}]   ;;  %s2075_s2 = inlined_call_operand.vmem [shape: f32[1,128], index: 2, kind: input, shape index: {}]   ;;  %s2076_s3 = inlined_call_operand.vmem [shape: f32[1,128], index: 3, kind: input, shape index: {}]   ;;  %s2077_s4 = inlined_call_operand.vmem [shape: bf16[512,128], index: 4, kind: output, shape index: {}]  }
   0x1   :  { %v82_v0 = vld [vmem:[%s2073_s1] sm:$0x3]  ;;  %v1653_v4 = vld [vmem:[%s2074_s0 + $0x8] sm:$0xff]   ;;  %v1655_v6 = vld [vmem:[%s2074_s0 + $0x10] sm:$0xff]  }
   0x2   :  { %1649 = vmatprep.subr.msk.bf16.mxu0 %vm340_vm0, %v82_v0  ;;  %1650 = vmatprep.subr.msk.bf16.mxu1 %vm340_vm0, %v82_v0  ;;  %v342_v1 = vsel %vm340_vm0, %v82_v0, 0  ;;  %v1651_v2 = vld [vmem:[%s2074_s0] sm:$0xff]   ;;  %v1654_v5 = vld [vmem:[%s2074_s0 + $0x88] sm:$0xff]   ;;  %v1656_v7 = vld [vmem:[%s2074_s0 + $0x90] sm:$0xff]  }
   0x3   :  { %1582 = vmatpush3.bf16.msra.mxu0 %v342_v1  ;;  %1648 = vmatpush3.bf16.msra.mxu1 %v342_v1  ;;  %v1652_v3 = vld [vmem:[%s2074_s0 + $0x80] sm:$0xff]   ;;  %v1657_v8 = vld [vmem:[%s2074_s0 + $0x18] sm:$0xff]   ;;  %v1661_v12 = vld [vmem:[%s2074_s0 + $0x28] sm:$0xff]  }
   0x4   :  { %1583 = vmatprep.mubr.msk.bf16.mxu0 %vm243_vm1, %v1651_v2  ;;  %1615 = vmatprep.mubr.msk.bf16.mxu1 %vm243_vm1, %v1652_v3  ;;  %v1658_v9 = vld [vmem:[%s2074_s0 + $0x98] sm:$0xff]   ;;  %v1659_v10 = vld [vmem:[%s2074_s0 + $0x20] sm:$0xff]   ;;  %v1662_v13 = vld [vmem:[%s2074_s0 + $0xa8] sm:$0xff]  }
   0x5   :  { %v1660_v11 = vld [vmem:[%s2074_s0 + $0xa0] sm:$0xff]   ;;  %v1663_v14 = vld [vmem:[%s2074_s0 + $0x30] sm:$0xff]   ;;  %v1665_v16 = vld [vmem:[%s2074_s0 + $0x38] sm:$0xff]  }
   0x6   :  { %1584 = vmatmul.mubr.msk.bf16.vlgmr.msra.gmra.mrb[0].mxu0 %vm243_vm1, %v1653_v4  ;;  %1616 = vmatmul.mubr.msk.bf16.vlgmr.msra.gmra.mrb[0].mxu1 %vm243_vm1, %v1654_v5  ;;  %v1664_v15 = vld [vmem:[%s2074_s0 + $0xb0] sm:$0xff]   ;;  %v1666_v17 = vld [vmem:[%s2074_s0 + $0xb8] sm:$0xff]   ;;  %v1667_v18 = vld [vmem:[%s2074_s0 + $0x40] sm:$0xff]  }
   0x7   :  { %1587 = vmatprep.mubr.msk.bf16.mxu0 %vm243_vm1, %v1655_v6  ;;  %1619 = vmatprep.mubr.msk.bf16.mxu1 %vm243_vm1, %v1656_v7  ;;  %v1668_v19 = vld [vmem:[%s2074_s0 + $0xc0] sm:$0xff]   ;;  %v1669_v20 = vld [vmem:[%s2074_s0 + $0x48] sm:$0xff]   ;;  %v1671_v22 = vld [vmem:[%s2074_s0 + $0x50] sm:$0xff]  }
   0x8   :  { %v1670_v21 = vld [vmem:[%s2074_s0 + $0xc8] sm:$0xff]   ;;  %v1672_v23 = vld [vmem:[%s2074_s0 + $0xd0] sm:$0xff]   ;;  %v1673_v24 = vld [vmem:[%s2074_s0 + $0x58] sm:$0xff]  }
   0x9   :  { %v1674_v25 = vld [vmem:[%s2074_s0 + $0xd8] sm:$0xff]   ;;  %v1675_v26 = vld [vmem:[%s2074_s0 + $0x60] sm:$0xff]   ;;  %v1677_v28 = vld [vmem:[%s2074_s0 + $0x68] sm:$0xff]  }
   0xa   :  { %v1676_v27 = vld [vmem:[%s2074_s0 + $0xe0] sm:$0xff]   ;;  %v1678_v29 = vld [vmem:[%s2074_s0 + $0xe8] sm:$0xff]   ;;  %v1679_v30 = vld [vmem:[%s2074_s0 + $0x70] sm:$0xff]  }
   0xb   :  { %v1680_v31 = vld [vmem:[%s2074_s0 + $0xf0] sm:$0xff]   ;;  %v1681_v32 = vld [vmem:[%s2074_s0 + $0x78] sm:$0xff]   ;;  %v1842_v34 = vld [vmem:[%s2075_s2] ss:$0 sm:$0xff] }
   0xc   :  { %v1682_v33 = vld [vmem:[%s2074_s0 + $0xf8] sm:$0xff]   ;;  %v1847_v36 = vld [vmem:[%s2076_s3] ss:$0 sm:$0xff] }
   0xe   :  { %1588 = vmatmul.mubr.msk.bf16.gmra.mrb[4].mxu0 %vm243_vm1, %v1657_v8  ;;  %1620 = vmatmul.mubr.msk.bf16.gmra.mrb[4].mxu1 %vm243_vm1, %v1658_v9 }
   0xf   :  { %1591 = vmatprep.mubr.msk.bf16.mxu0 %vm243_vm1, %v1659_v10  ;;  %1623 = vmatprep.mubr.msk.bf16.mxu1 %vm243_vm1, %v1660_v11 }
  0x16   :  { %1592 = vmatmul.mubr.msk.bf16.gmra.mrb[8].mxu0 %vm243_vm1, %v1661_v12  ;;  %1624 = vmatmul.mubr.msk.bf16.gmra.mrb[8].mxu1 %vm243_vm1, %v1662_v13 }
  0x17   :  { %1595 = vmatprep.mubr.msk.bf16.mxu0 %vm243_vm1, %v1663_v14  ;;  %1627 = vmatprep.mubr.msk.bf16.mxu1 %vm243_vm1, %v1664_v15 }
  0x1e   :  { %1596 = vmatmul.mubr.msk.bf16.gmra.mrb[12].mxu0 %vm243_vm1, %v1665_v16  ;;  %1628 = vmatmul.mubr.msk.bf16.gmra.mrb[12].mxu1 %vm243_vm1, %v1666_v17 }
  0x1f   :  { %1599 = vmatprep.mubr.msk.bf16.mxu0 %vm243_vm1, %v1667_v18  ;;  %1631 = vmatprep.mubr.msk.bf16.mxu1 %vm243_vm1, %v1668_v19 }
  0x26   :  { %1600 = vmatmul.mubr.msk.bf16.gmra.mrb[16].mxu0 %vm243_vm1, %v1669_v20  ;;  %1632 = vmatmul.mubr.msk.bf16.gmra.mrb[16].mxu1 %vm243_vm1, %v1670_v21 }
  0x27   :  { %1603 = vmatprep.mubr.msk.bf16.mxu0 %vm243_vm1, %v1671_v22  ;;  %1635 = vmatprep.mubr.msk.bf16.mxu1 %vm243_vm1, %v1672_v23 }
  0x2e   :  { %1604 = vmatmul.mubr.msk.bf16.gmra.mrb[20].mxu0 %vm243_vm1, %v1673_v24  ;;  %1636 = vmatmul.mubr.msk.bf16.gmra.mrb[20].mxu1 %vm243_vm1, %v1674_v25 }
  0x2f   :  { %1607 = vmatprep.mubr.msk.bf16.mxu0 %vm243_vm1, %v1675_v26  ;;  %1639 = vmatprep.mubr.msk.bf16.mxu1 %vm243_vm1, %v1676_v27 }
  0x36   :  { %1608 = vmatmul.mubr.msk.bf16.gmra.mrb[24].mxu0 %vm243_vm1, %v1677_v28  ;;  %1640 = vmatmul.mubr.msk.bf16.gmra.mrb[24].mxu1 %vm243_vm1, %v1678_v29 }
  0x37   :  { %1611 = vmatprep.mubr.msk.bf16.mxu0 %vm243_vm1, %v1679_v30  ;;  %1643 = vmatprep.mubr.msk.bf16.mxu1 %vm243_vm1, %v1680_v31 }
  0x3e   :  { %1612 = vmatmul.mubr.msk.bf16.gmra.mrb[28].mxu0 %vm243_vm1, %v1681_v32  ;;  %1644 = vmatmul.mubr.msk.bf16.gmra.mrb[28].mxu1 %vm243_vm1, %v1682_v33 }
  0xd9   :  { %v1585_v35 = vpop.f32.mrb[0].mxu0  ;;  %v1617_v38 = vpop.f32.mrb[0].mxu1 }
  0xda   :  { %v642_v37 = vmul.f32 %v1585_v35, %v1842_v34  ;;  %v378_v39 = vpop.f32.mrb[1].mxu0  ;;  %v674_v40 = vmul.f32 %v1617_v38, %v1842_v34  ;;  %v506_v42 = vpop.f32.mrb[1].mxu1 }
  0xdb   :  { %v640_v41 = vmul.f32 %v1842_v34, %v378_v39  ;;  %v1586_v43 = vpop.f32.mrb[2].mxu0  ;;  %v672_v45 = vmul.f32 %v1842_v34, %v506_v42  ;;  %v1618_v47 = vpop.f32.mrb[2].mxu1 }
  0xdc   :  { %v713_v44 = vadd.f32 %v1847_v36, %v642_v37  ;;  %v643_v46 = vmul.f32 %v1586_v43, %v1842_v34  ;;  %v381_v48 = vpop.f32.mrb[3].mxu0  ;;  %v745_v49 = vadd.f32 %v1847_v36, %v674_v40  ;;  %v675_v51 = vmul.f32 %v1618_v47, %v1842_v34  ;;  %v509_v53 = vpop.f32.mrb[3].mxu1 }
  0xdd   :  { %v711_v50 = vadd.f32 %v1847_v36, %v640_v41  ;;  %v641_v52 = vmul.f32 %v1842_v34, %v381_v48  ;;  %v743_v54 = vadd.f32 %v1847_v36, %v672_v45  ;;  %v673_v56 = vmul.f32 %v1842_v34, %v509_v53 }
  0xde   :  { %v714_v55 = vadd.f32 %v1847_v36, %v643_v46  ;;  %v746_v57 = vadd.f32 %v1847_v36, %v675_v51  ;;  %v777_v59 = vmax.f32 %v713_v44, 0.0  ;;  %v809_v62 = vmax.f32 %v745_v49, 0.0 }
  0xdf   :  { %v712_v58 = vadd.f32 %v1847_v36, %v641_v52  ;;  %v744_v61 = vadd.f32 %v1847_v36, %v673_v56  ;;  %v775_v63 = vmax.f32 %v711_v50, 0.0  ;;  %v807_v3 = vmax.f32 %v743_v54, 0.0 }
  0xe0   :  { %v778_v60 = vmax.f32 %v714_v55, 0.0  ;;  %v810_v0 = vmax.f32 %v746_v57, 0.0 }
  0xe1   :  { %v776_v1 = vmax.f32 %v712_v58, 0.0  ;;  %v1589_v2 = vpop.f32.mrb[4].mxu0  ;;  %v808_v5 = vmax.f32 %v744_v61, 0.0  ;;  %v1621_v7 = vpop.f32.mrb[4].mxu1 }
  0xe2   :  { %v1365_v4 = vpack.c.bf16 %v778_v60, %v777_v59  ;;  %v646_v6 = vmul.f32 %v1589_v2, %v1842_v34  ;;  %v394_v8 = vpop.f32.mrb[5].mxu0  ;;  %v1445_v9 = vpack.c.bf16 %v810_v0, %v809_v62  ;;  %v678_v11 = vmul.f32 %v1621_v7, %v1842_v34  ;;  %v522_v13 = vpop.f32.mrb[5].mxu1 }
  0xe3   :  { %v1360_v10 = vpack.c.bf16 %v776_v1, %v775_v63  ;;  %v644_v12 = vmul.f32 %v1842_v34, %v394_v8  ;;  %v1590_v14 = vpop.f32.mrb[6].mxu0  ;;  %v1440_v15 = vpack.c.bf16 %v808_v5, %v807_v3  ;;  %v676_v17 = vmul.f32 %v1842_v34, %v522_v13  ;;  %v1622_v19 = vpop.f32.mrb[6].mxu1 }
  0xe4   :  { %1517 = vst [vmem:[%s2077_s4 + $0x8] sm:$0xff] %v1365_v4   ;;  %v717_v16 = vadd.f32 %v1847_v36, %v646_v6  ;;  %v647_v18 = vmul.f32 %v1590_v14, %v1842_v34  ;;  %v397_v20 = vpop.f32.mrb[7].mxu0  ;;  %1533 = vst [vmem:[%s2077_s4 + $0x88] sm:$0xff] %v1445_v9   ;;  %v749_v21 = vadd.f32 %v1847_v36, %v678_v11  ;;  %v525_v25 = vpop.f32.mrb[7].mxu1 }
  0xe5   :  { %1361 = vst [vmem:[%s2077_s4] sm:$0xff] %v1360_v10   ;;  %v715_v22 = vadd.f32 %v1847_v36, %v644_v12  ;;  %v679_v23 = vmul.f32 %v1622_v19, %v1842_v34  ;;  %v645_v24 = vmul.f32 %v1842_v34, %v397_v20  ;;  %1532 = vst [vmem:[%s2077_s4 + $0x80] sm:$0xff] %v1440_v15  }
  0xe6   :  { %v747_v26 = vadd.f32 %v1847_v36, %v676_v17  ;;  %v718_v27 = vadd.f32 %v1847_v36, %v647_v18  ;;  %v677_v28 = vmul.f32 %v1842_v34, %v525_v25  ;;  %v781_v31 = vmax.f32 %v717_v16, 0.0 }
  0xe7   :  { %v750_v29 = vadd.f32 %v1847_v36, %v679_v23  ;;  %v716_v30 = vadd.f32 %v1847_v36, %v645_v24  ;;  %v813_v35 = vmax.f32 %v749_v21, 0.0  ;;  %v779_v37 = vmax.f32 %v715_v22, 0.0 }
  0xe8   :  { %v782_v32 = vmax.f32 %v718_v27, 0.0  ;;  %v748_v33 = vadd.f32 %v1847_v36, %v677_v28  ;;  %v811_v41 = vmax.f32 %v747_v26, 0.0 }
  0xe9   :  { %v814_v38 = vmax.f32 %v750_v29, 0.0  ;;  %v780_v39 = vmax.f32 %v716_v30, 0.0  ;;  %v1593_v40 = vpop.f32.mrb[8].mxu0  ;;  %v1625_v45 = vpop.f32.mrb[8].mxu1 }
  0xea   :  { %v1375_v42 = vpack.c.bf16 %v782_v32, %v781_v31  ;;  %v812_v43 = vmax.f32 %v748_v33, 0.0  ;;  %v650_v44 = vmul.f32 %v1593_v40, %v1842_v34  ;;  %v410_v46 = vpop.f32.mrb[9].mxu0  ;;  %v682_v49 = vmul.f32 %v1625_v45, %v1842_v34  ;;  %v538_v51 = vpop.f32.mrb[9].mxu1 }
  0xeb   :  { %v1455_v47 = vpack.c.bf16 %v814_v38, %v813_v35  ;;  %v1370_v48 = vpack.c.bf16 %v780_v39, %v779_v37  ;;  %v648_v50 = vmul.f32 %v1842_v34, %v410_v46  ;;  %v1594_v52 = vpop.f32.mrb[10].mxu0  ;;  %v680_v55 = vmul.f32 %v1842_v34, %v538_v51  ;;  %v1626_v57 = vpop.f32.mrb[10].mxu1 }
  0xec   :  { %1519 = vst [vmem:[%s2077_s4 + $0x18] sm:$0xff] %v1375_v42   ;;  %v1450_v53 = vpack.c.bf16 %v812_v43, %v811_v41  ;;  %v721_v54 = vadd.f32 %v1847_v36, %v650_v44  ;;  %v651_v56 = vmul.f32 %v1594_v52, %v1842_v34  ;;  %v413_v58 = vpop.f32.mrb[11].mxu0  ;;  %v753_v59 = vadd.f32 %v1847_v36, %v682_v49  ;;  %v541_v63 = vpop.f32.mrb[11].mxu1 }
  0xed   :  { %1535 = vst [vmem:[%s2077_s4 + $0x98] sm:$0xff] %v1455_v47   ;;  %1518 = vst [vmem:[%s2077_s4 + $0x10] sm:$0xff] %v1370_v48   ;;  %v719_v60 = vadd.f32 %v1847_v36, %v648_v50  ;;  %v683_v61 = vmul.f32 %v1626_v57, %v1842_v34  ;;  %v649_v62 = vmul.f32 %v1842_v34, %v413_v58 }
  0xee   :  { %1534 = vst [vmem:[%s2077_s4 + $0x90] sm:$0xff] %v1450_v53   ;;  %v751_v0 = vadd.f32 %v1847_v36, %v680_v55  ;;  %v722_v1 = vadd.f32 %v1847_v36, %v651_v56  ;;  %v681_v2 = vmul.f32 %v1842_v34, %v541_v63  ;;  %v785_v5 = vmax.f32 %v721_v54, 0.0 }
  0xef   :  { %v754_v3 = vadd.f32 %v1847_v36, %v683_v61  ;;  %v720_v4 = vadd.f32 %v1847_v36, %v649_v62  ;;  %v817_v8 = vmax.f32 %v753_v59, 0.0  ;;  %v783_v9 = vmax.f32 %v719_v60, 0.0 }
  0xf0   :  { %v786_v6 = vmax.f32 %v722_v1, 0.0  ;;  %v752_v7 = vadd.f32 %v1847_v36, %v681_v2  ;;  %v815_v13 = vmax.f32 %v751_v0, 0.0 }
  0xf1   :  { %v818_v10 = vmax.f32 %v754_v3, 0.0  ;;  %v784_v11 = vmax.f32 %v720_v4, 0.0  ;;  %v1597_v12 = vpop.f32.mrb[12].mxu0  ;;  %v1629_v17 = vpop.f32.mrb[12].mxu1 }
  0xf2   :  { %v1385_v14 = vpack.c.bf16 %v786_v6, %v785_v5  ;;  %v816_v15 = vmax.f32 %v752_v7, 0.0  ;;  %v654_v16 = vmul.f32 %v1597_v12, %v1842_v34  ;;  %v426_v18 = vpop.f32.mrb[13].mxu0  ;;  %v686_v21 = vmul.f32 %v1629_v17, %v1842_v34  ;;  %v554_v23 = vpop.f32.mrb[13].mxu1 }
  0xf3   :  { %v1465_v19 = vpack.c.bf16 %v818_v10, %v817_v8  ;;  %v1380_v20 = vpack.c.bf16 %v784_v11, %v783_v9  ;;  %v652_v22 = vmul.f32 %v1842_v34, %v426_v18  ;;  %v1598_v24 = vpop.f32.mrb[14].mxu0  ;;  %v684_v27 = vmul.f32 %v1842_v34, %v554_v23  ;;  %v1630_v29 = vpop.f32.mrb[14].mxu1 }
  0xf4   :  { %1521 = vst [vmem:[%s2077_s4 + $0x28] sm:$0xff] %v1385_v14   ;;  %v1460_v25 = vpack.c.bf16 %v816_v15, %v815_v13  ;;  %v725_v26 = vadd.f32 %v1847_v36, %v654_v16  ;;  %v655_v28 = vmul.f32 %v1598_v24, %v1842_v34  ;;  %v429_v30 = vpop.f32.mrb[15].mxu0  ;;  %v757_v31 = vadd.f32 %v1847_v36, %v686_v21  ;;  %v557_v37 = vpop.f32.mrb[15].mxu1 }
  0xf5   :  { %1537 = vst [vmem:[%s2077_s4 + $0xa8] sm:$0xff] %v1465_v19   ;;  %1520 = vst [vmem:[%s2077_s4 + $0x20] sm:$0xff] %v1380_v20   ;;  %v723_v32 = vadd.f32 %v1847_v36, %v652_v22  ;;  %v687_v33 = vmul.f32 %v1630_v29, %v1842_v34  ;;  %v653_v35 = vmul.f32 %v1842_v34, %v429_v30 }
  0xf6   :  { %1536 = vst [vmem:[%s2077_s4 + $0xa0] sm:$0xff] %v1460_v25   ;;  %v755_v38 = vadd.f32 %v1847_v36, %v684_v27  ;;  %v726_v39 = vadd.f32 %v1847_v36, %v655_v28  ;;  %v685_v40 = vmul.f32 %v1842_v34, %v557_v37  ;;  %v789_v43 = vmax.f32 %v725_v26, 0.0 }
  0xf7   :  { %v758_v41 = vadd.f32 %v1847_v36, %v687_v33  ;;  %v724_v42 = vadd.f32 %v1847_v36, %v653_v35  ;;  %v821_v46 = vmax.f32 %v757_v31, 0.0  ;;  %v787_v47 = vmax.f32 %v723_v32, 0.0 }
  0xf8   :  { %v790_v44 = vmax.f32 %v726_v39, 0.0  ;;  %v756_v45 = vadd.f32 %v1847_v36, %v685_v40  ;;  %v819_v51 = vmax.f32 %v755_v38, 0.0 }
  0xf9   :  { %v822_v48 = vmax.f32 %v758_v41, 0.0  ;;  %v788_v49 = vmax.f32 %v724_v42, 0.0  ;;  %v1601_v50 = vpop.f32.mrb[16].mxu0  ;;  %v1633_v55 = vpop.f32.mrb[16].mxu1 }
  0xfa   :  { %v1395_v52 = vpack.c.bf16 %v790_v44, %v789_v43  ;;  %v820_v53 = vmax.f32 %v756_v45, 0.0  ;;  %v658_v54 = vmul.f32 %v1601_v50, %v1842_v34  ;;  %v442_v56 = vpop.f32.mrb[17].mxu0  ;;  %v690_v59 = vmul.f32 %v1633_v55, %v1842_v34  ;;  %v570_v61 = vpop.f32.mrb[17].mxu1 }
  0xfb   :  { %v1475_v57 = vpack.c.bf16 %v822_v48, %v821_v46  ;;  %v1390_v58 = vpack.c.bf16 %v788_v49, %v787_v47  ;;  %v656_v60 = vmul.f32 %v1842_v34, %v442_v56  ;;  %v1602_v62 = vpop.f32.mrb[18].mxu0  ;;  %v688_v1 = vmul.f32 %v1842_v34, %v570_v61  ;;  %v1634_v3 = vpop.f32.mrb[18].mxu1 }
  0xfc   :  { %1523 = vst [vmem:[%s2077_s4 + $0x38] sm:$0xff] %v1395_v52   ;;  %v1470_v63 = vpack.c.bf16 %v820_v53, %v819_v51  ;;  %v729_v0 = vadd.f32 %v1847_v36, %v658_v54  ;;  %v659_v2 = vmul.f32 %v1602_v62, %v1842_v34  ;;  %v445_v4 = vpop.f32.mrb[19].mxu0  ;;  %v761_v5 = vadd.f32 %v1847_v36, %v690_v59  ;;  %v573_v9 = vpop.f32.mrb[19].mxu1 }
  0xfd   :  { %1539 = vst [vmem:[%s2077_s4 + $0xb8] sm:$0xff] %v1475_v57   ;;  %1522 = vst [vmem:[%s2077_s4 + $0x30] sm:$0xff] %v1390_v58   ;;  %v727_v6 = vadd.f32 %v1847_v36, %v656_v60  ;;  %v691_v7 = vmul.f32 %v1634_v3, %v1842_v34  ;;  %v657_v8 = vmul.f32 %v1842_v34, %v445_v4 }
  0xfe   :  { %1538 = vst [vmem:[%s2077_s4 + $0xb0] sm:$0xff] %v1470_v63   ;;  %v759_v10 = vadd.f32 %v1847_v36, %v688_v1  ;;  %v730_v11 = vadd.f32 %v1847_v36, %v659_v2  ;;  %v689_v12 = vmul.f32 %v1842_v34, %v573_v9  ;;  %v793_v15 = vmax.f32 %v729_v0, 0.0 }
  0xff   :  { %v762_v13 = vadd.f32 %v1847_v36, %v691_v7  ;;  %v728_v14 = vadd.f32 %v1847_v36, %v657_v8  ;;  %v825_v18 = vmax.f32 %v761_v5, 0.0  ;;  %v791_v19 = vmax.f32 %v727_v6, 0.0 }
 0x100   :  { %v794_v16 = vmax.f32 %v730_v11, 0.0  ;;  %v760_v17 = vadd.f32 %v1847_v36, %v689_v12  ;;  %v823_v23 = vmax.f32 %v759_v10, 0.0 }
 0x101   :  { %v826_v20 = vmax.f32 %v762_v13, 0.0  ;;  %v792_v21 = vmax.f32 %v728_v14, 0.0  ;;  %v1605_v22 = vpop.f32.mrb[20].mxu0  ;;  %v1637_v27 = vpop.f32.mrb[20].mxu1 }
 0x102   :  { %v1405_v24 = vpack.c.bf16 %v794_v16, %v793_v15  ;;  %v824_v25 = vmax.f32 %v760_v17, 0.0  ;;  %v662_v26 = vmul.f32 %v1605_v22, %v1842_v34  ;;  %v458_v28 = vpop.f32.mrb[21].mxu0  ;;  %v694_v31 = vmul.f32 %v1637_v27, %v1842_v34  ;;  %v586_v33 = vpop.f32.mrb[21].mxu1 }
 0x103   :  { %v1485_v29 = vpack.c.bf16 %v826_v20, %v825_v18  ;;  %v1400_v30 = vpack.c.bf16 %v792_v21, %v791_v19  ;;  %v660_v32 = vmul.f32 %v1842_v34, %v458_v28  ;;  %v1606_v35 = vpop.f32.mrb[22].mxu0  ;;  %v692_v39 = vmul.f32 %v1842_v34, %v586_v33  ;;  %v1638_v41 = vpop.f32.mrb[22].mxu1 }
 0x104   :  { %1525 = vst [vmem:[%s2077_s4 + $0x48] sm:$0xff] %v1405_v24   ;;  %v1480_v37 = vpack.c.bf16 %v824_v25, %v823_v23  ;;  %v733_v38 = vadd.f32 %v1847_v36, %v662_v26  ;;  %v663_v40 = vmul.f32 %v1606_v35, %v1842_v34  ;;  %v461_v42 = vpop.f32.mrb[23].mxu0  ;;  %v765_v43 = vadd.f32 %v1847_v36, %v694_v31  ;;  %v589_v47 = vpop.f32.mrb[23].mxu1 }
 0x105   :  { %1541 = vst [vmem:[%s2077_s4 + $0xc8] sm:$0xff] %v1485_v29   ;;  %1524 = vst [vmem:[%s2077_s4 + $0x40] sm:$0xff] %v1400_v30   ;;  %v731_v44 = vadd.f32 %v1847_v36, %v660_v32  ;;  %v695_v45 = vmul.f32 %v1638_v41, %v1842_v34  ;;  %v661_v46 = vmul.f32 %v1842_v34, %v461_v42 }
 0x106   :  { %1540 = vst [vmem:[%s2077_s4 + $0xc0] sm:$0xff] %v1480_v37   ;;  %v763_v48 = vadd.f32 %v1847_v36, %v692_v39  ;;  %v734_v49 = vadd.f32 %v1847_v36, %v663_v40  ;;  %v693_v50 = vmul.f32 %v1842_v34, %v589_v47  ;;  %v797_v53 = vmax.f32 %v733_v38, 0.0 }
 0x107   :  { %v766_v51 = vadd.f32 %v1847_v36, %v695_v45  ;;  %v732_v52 = vadd.f32 %v1847_v36, %v661_v46  ;;  %v829_v56 = vmax.f32 %v765_v43, 0.0  ;;  %v795_v57 = vmax.f32 %v731_v44, 0.0 }
 0x108   :  { %v798_v54 = vmax.f32 %v734_v49, 0.0  ;;  %v764_v55 = vadd.f32 %v1847_v36, %v693_v50  ;;  %v827_v61 = vmax.f32 %v763_v48, 0.0 }
 0x109   :  { %v830_v58 = vmax.f32 %v766_v51, 0.0  ;;  %v796_v59 = vmax.f32 %v732_v52, 0.0  ;;  %v1609_v60 = vpop.f32.mrb[24].mxu0  ;;  %v1641_v1 = vpop.f32.mrb[24].mxu1 }
 0x10a   :  { %v1415_v62 = vpack.c.bf16 %v798_v54, %v797_v53  ;;  %v828_v63 = vmax.f32 %v764_v55, 0.0  ;;  %v666_v0 = vmul.f32 %v1609_v60, %v1842_v34  ;;  %v474_v2 = vpop.f32.mrb[25].mxu0  ;;  %v698_v5 = vmul.f32 %v1641_v1, %v1842_v34  ;;  %v602_v7 = vpop.f32.mrb[25].mxu1 }
 0x10b   :  { %v1495_v3 = vpack.c.bf16 %v830_v58, %v829_v56  ;;  %v1410_v4 = vpack.c.bf16 %v796_v59, %v795_v57  ;;  %v664_v6 = vmul.f32 %v1842_v34, %v474_v2  ;;  %v1610_v8 = vpop.f32.mrb[26].mxu0  ;;  %v696_v11 = vmul.f32 %v1842_v34, %v602_v7  ;;  %v1642_v13 = vpop.f32.mrb[26].mxu1 }
 0x10c   :  { %1527 = vst [vmem:[%s2077_s4 + $0x58] sm:$0xff] %v1415_v62   ;;  %v1490_v9 = vpack.c.bf16 %v828_v63, %v827_v61  ;;  %v737_v10 = vadd.f32 %v1847_v36, %v666_v0  ;;  %v667_v12 = vmul.f32 %v1610_v8, %v1842_v34  ;;  %v477_v14 = vpop.f32.mrb[27].mxu0  ;;  %v769_v15 = vadd.f32 %v1847_v36, %v698_v5  ;;  %v605_v19 = vpop.f32.mrb[27].mxu1 }
 0x10d   :  { %1543 = vst [vmem:[%s2077_s4 + $0xd8] sm:$0xff] %v1495_v3   ;;  %1526 = vst [vmem:[%s2077_s4 + $0x50] sm:$0xff] %v1410_v4   ;;  %v735_v16 = vadd.f32 %v1847_v36, %v664_v6  ;;  %v699_v17 = vmul.f32 %v1642_v13, %v1842_v34  ;;  %v665_v18 = vmul.f32 %v1842_v34, %v477_v14 }
 0x10e   :  { %1542 = vst [vmem:[%s2077_s4 + $0xd0] sm:$0xff] %v1490_v9   ;;  %v767_v20 = vadd.f32 %v1847_v36, %v696_v11  ;;  %v738_v21 = vadd.f32 %v1847_v36, %v667_v12  ;;  %v697_v22 = vmul.f32 %v1842_v34, %v605_v19  ;;  %v801_v25 = vmax.f32 %v737_v10, 0.0 }
 0x10f   :  { %v770_v23 = vadd.f32 %v1847_v36, %v699_v17  ;;  %v736_v24 = vadd.f32 %v1847_v36, %v665_v18  ;;  %v833_v28 = vmax.f32 %v769_v15, 0.0  ;;  %v799_v29 = vmax.f32 %v735_v16, 0.0 }
 0x110   :  { %v802_v26 = vmax.f32 %v738_v21, 0.0  ;;  %v768_v27 = vadd.f32 %v1847_v36, %v697_v22  ;;  %v831_v33 = vmax.f32 %v767_v20, 0.0 }
 0x111   :  { %v834_v30 = vmax.f32 %v770_v23, 0.0  ;;  %v800_v31 = vmax.f32 %v736_v24, 0.0  ;;  %v1613_v32 = vpop.f32.mrb[28].mxu0  ;;  %v1645_v39 = vpop.f32.mrb[28].mxu1 }
 0x112   :  { %v1425_v35 = vpack.c.bf16 %v802_v26, %v801_v25  ;;  %v832_v37 = vmax.f32 %v768_v27, 0.0  ;;  %v670_v38 = vmul.f32 %v1613_v32, %v1842_v34  ;;  %v490_v40 = vpop.f32.mrb[29].mxu0  ;;  %v702_v43 = vmul.f32 %v1645_v39, %v1842_v34  ;;  %v618_v45 = vpop.f32.mrb[29].mxu1 }
 0x113   :  { %v1505_v41 = vpack.c.bf16 %v834_v30, %v833_v28  ;;  %v1420_v42 = vpack.c.bf16 %v800_v31, %v799_v29  ;;  %v668_v44 = vmul.f32 %v1842_v34, %v490_v40  ;;  %v1614_v46 = vpop.f32.mrb[30].mxu0  ;;  %v700_v49 = vmul.f32 %v1842_v34, %v618_v45  ;;  %v1646_v51 = vpop.f32.mrb[30].mxu1 }
 0x114   :  { %1529 = vst [vmem:[%s2077_s4 + $0x68] sm:$0xff] %v1425_v35   ;;  %v1500_v47 = vpack.c.bf16 %v832_v37, %v831_v33  ;;  %v741_v48 = vadd.f32 %v1847_v36, %v670_v38  ;;  %v671_v50 = vmul.f32 %v1614_v46, %v1842_v34  ;;  %v493_v52 = vpop.f32.mrb[31].mxu0  ;;  %v773_v53 = vadd.f32 %v1847_v36, %v702_v43  ;;  %v621_v57 = vpop.f32.mrb[31].mxu1 }
 0x115   :  { %1545 = vst [vmem:[%s2077_s4 + $0xe8] sm:$0xff] %v1505_v41   ;;  %1528 = vst [vmem:[%s2077_s4 + $0x60] sm:$0xff] %v1420_v42   ;;  %v739_v54 = vadd.f32 %v1847_v36, %v668_v44  ;;  %v703_v55 = vmul.f32 %v1646_v51, %v1842_v34  ;;  %v669_v56 = vmul.f32 %v1842_v34, %v493_v52 }
 0x116   :  { %1544 = vst [vmem:[%s2077_s4 + $0xe0] sm:$0xff] %v1500_v47   ;;  %v771_v58 = vadd.f32 %v1847_v36, %v700_v49  ;;  %v742_v59 = vadd.f32 %v1847_v36, %v671_v50  ;;  %v701_v60 = vmul.f32 %v1842_v34, %v621_v57  ;;  %v805_v63 = vmax.f32 %v741_v48, 0.0 }
 0x117   :  { %v774_v61 = vadd.f32 %v1847_v36, %v703_v55  ;;  %v740_v62 = vadd.f32 %v1847_v36, %v669_v56  ;;  %v837_v2 = vmax.f32 %v773_v53, 0.0  ;;  %v803_v3 = vmax.f32 %v739_v54, 0.0 }
 0x118   :  { %v806_v0 = vmax.f32 %v742_v59, 0.0  ;;  %v772_v1 = vadd.f32 %v1847_v36, %v701_v60  ;;  %v835_v6 = vmax.f32 %v771_v58, 0.0 }
 0x119   :  { %v838_v4 = vmax.f32 %v774_v61, 0.0  ;;  %v804_v5 = vmax.f32 %v740_v62, 0.0 }
 0x11a   :  { %v1435_v7 = vpack.c.bf16 %v806_v0, %v805_v63  ;;  %v836_v8 = vmax.f32 %v772_v1, 0.0 }
 0x11b   :  { %v1515_v9 = vpack.c.bf16 %v838_v4, %v837_v2  ;;  %v1430_v10 = vpack.c.bf16 %v804_v5, %v803_v3 }
 0x11c   :  { %1531 = vst [vmem:[%s2077_s4 + $0x78] sm:$0xff] %v1435_v7   ;;  %v1510_v34 = vpack.c.bf16 %v836_v8, %v835_v6 }
 0x11d   :  { %1547 = vst [vmem:[%s2077_s4 + $0xf8] sm:$0xff] %v1515_v9   ;;  %1530 = vst [vmem:[%s2077_s4 + $0x70] sm:$0xff] %v1430_v10  }
 0x11e   :  { %1546 = vst [vmem:[%s2077_s4 + $0xf0] sm:$0xff] %v1510_v34  }

// kernel: inception_b_forward.4
= control target key start
LH: loop header
LB: loop body
LE: loop exit
PB: predicated region body
PF: predicated region fallthrough
CT: control target
= control target key end

     0   :  { %s10789_s9 = inlined_call_operand.vmem [shape: bf16[9,128,128], index: 9, kind: input, shape index: {}]   ;;  %s10790_s1 = inlined_call_operand.vmem [shape: bf16[512,128], index: 1, kind: input, shape index: {}]   ;;  %s10791_s4 = inlined_call_operand.vmem [shape: bf16[512,128], index: 4, kind: input, shape index: {}]   ;;  %s10792_s5 = inlined_call_operand.vmem [shape: bf16[512,128], index: 5, kind: input, shape index: {}]   ;;  %s10793_s0 = inlined_call_operand.vmem [shape: bf16[512,128], index: 0, kind: input, shape index: {}]   ;;  %s10794_s6 = inlined_call_operand.vmem [shape: bf16[512,128], index: 6, kind: input, shape index: {}]   ;;  %s10795_s2 = inlined_call_operand.vmem [shape: bf16[512,128], index: 2, kind: input, shape index: {}]   ;;  %s10796_s7 = inlined_call_operand.vmem [shape: bf16[512,128], index: 7, kind: input, shape index: {}]   ;;  %s10797_s3 = inlined_call_operand.vmem [shape: bf16[512,128], index: 3, kind: input, shape index: {}]   ;;  %s10798_s8 = inlined_call_operand.vmem [shape: bf16[512,128], index: 8, kind: input, shape index: {}]   ;;  %s10799_s10 = inlined_call_operand.vmem [shape: f32[1,128], index: 10, kind: input, shape index: {}]   ;;  %s10800_s11 = inlined_call_operand.vmem [shape: f32[1,128], index: 11, kind: input, shape index: {}]   ;;  %s10801_s12 = inlined_call_operand.vmem [shape: bf16[512,128], index: 12, kind: output, shape index: {}]  }
   0x1   :  { %v8926_v0 = vld [vmem:[%s10789_s9 + $0x40] sm:$0xff]   ;;  %v8928_v2 = vld [vmem:[%s10789_s9 + $0x48] sm:$0xff]   ;;  %v8930_v4 = vld [vmem:[%s10789_s9 + $0x50] sm:$0xff]  }
   0x2   :  { %v8927_v1 = vld [vmem:[%s10789_s9 + $0x100] sm:$0xff]   ;;  %7678 = vmatprep.subr.bf16.mxu1 %v8926_v0  ;;  %v8929_v3 = vld [vmem:[%s10789_s9 + $0x108] sm:$0xff]   ;;  %v8931_v5 = vld [vmem:[%s10789_s9 + $0x110] sm:$0xff]  }
   0x3   :  { %7998 = vmatprep.subr.bf16.mxu0 %v8927_v1  ;;  %7679 = vmatpush3.bf16.msra.mxu1 %v8926_v0  ;;  %v8932_v6 = vld [vmem:[%s10789_s9 + $0x58] sm:$0xff]   ;;  %v8934_v8 = vld [vmem:[%s10789_s9 + $0x60] sm:$0xff]   ;;  %v8936_v10 = vld [vmem:[%s10789_s9 + $0x68] sm:$0xff]  }
   0x4   :  { %7999 = vmatpush3.bf16.msra.mxu0 %v8927_v1  ;;  %7680 = vmatprep.subr.bf16.mxu1 %v8928_v2  ;;  %v8933_v7 = vld [vmem:[%s10789_s9 + $0x118] sm:$0xff]   ;;  %v8935_v9 = vld [vmem:[%s10789_s9 + $0x120] sm:$0xff]   ;;  %v8937_v11 = vld [vmem:[%s10789_s9 + $0x128] sm:$0xff]  }
   0x5   :  { %8000 = vmatprep.subr.bf16.mxu0 %v8929_v3  ;;  %v8942_v12 = vld [vmem:[%s10790_s1] sm:$0xff]   ;;  %v8938_v14 = vld [vmem:[%s10789_s9 + $0x70] sm:$0xff]   ;;  %v8940_v16 = vld [vmem:[%s10789_s9 + $0x78] sm:$0xff]  }
   0x6   :  { %v8943_v13 = vld [vmem:[%s10791_s4] sm:$0xff]   ;;  %7694 = vmatprep.mubr.bf16.mxu1 %v8942_v12  ;;  %v8939_v15 = vld [vmem:[%s10789_s9 + $0x130] sm:$0xff]   ;;  %v8941_v17 = vld [vmem:[%s10789_s9 + $0x138] sm:$0xff]  }
   0x7   :  { %7681 = vmatpush3.bf16.msra.mxu1 %v8928_v2  ;;  %8014 = vmatprep.mubr.bf16.mxu0 %v8943_v13  ;;  %v8944_v18 = vld [vmem:[%s10790_s1 + $0x8] sm:$0xff]   ;;  %v8945_v19 = vld [vmem:[%s10789_s9] sm:$0xff]   ;;  %v8948_v22 = vld [vmem:[%s10790_s1 + $0x10] sm:$0xff]  }
   0x8   :  { %8001 = vmatpush3.bf16.msra.mxu0 %v8929_v3  ;;  %7682 = vmatprep.subr.bf16.mxu1 %v8930_v4  ;;  %v8947_v20 = vld [vmem:[%s10789_s9 + $0x140] sm:$0xff]   ;;  %v8946_v21 = vld [vmem:[%s10791_s4 + $0x8] sm:$0xff]   ;;  %v8949_v23 = vld [vmem:[%s10791_s4 + $0x10] sm:$0xff]  }
   0x9   :  { %8002 = vmatprep.subr.bf16.mxu0 %v8931_v5  ;;  %v8952_v24 = vld [vmem:[%s10789_s9 + $0x148] sm:$0xff]   ;;  %v8950_v26 = vld [vmem:[%s10790_s1 + $0x18] sm:$0xff]   ;;  %v8958_v28 = vld [vmem:[%s10789_s9 + $0x150] sm:$0xff]  }
   0xa   :  { %v8956_v25 = vld [vmem:[%s10789_s9 + $0x8] sm:$0xff]   ;;  %v8951_v27 = vld [vmem:[%s10791_s4 + $0x18] sm:$0xff]   ;;  %v8953_v29 = vld [vmem:[%s10790_s1 + $0x20] sm:$0xff]  }
   0xb   :  { %7683 = vmatpush3.bf16.msra.mxu1 %v8930_v4  ;;  %v8954_v30 = vld [vmem:[%s10791_s4 + $0x20] sm:$0xff]   ;;  %v8963_v31 = vld [vmem:[%s10789_s9 + $0x158] sm:$0xff]   ;;  %v8967_v32 = vld [vmem:[%s10789_s9 + $0x10] sm:$0xff]  }
   0xc   :  { %8003 = vmatpush3.bf16.msra.mxu0 %v8931_v5  ;;  %7684 = vmatprep.subr.bf16.mxu1 %v8932_v6  ;;  %v8955_v33 = vld [vmem:[%s10790_s1 + $0x28] sm:$0xff]   ;;  %v8969_v34 = vld [vmem:[%s10789_s9 + $0x160] sm:$0xff]   ;;  %v8959_v36 = vld [vmem:[%s10790_s1 + $0x30] sm:$0xff]  }
   0xd   :  { %8004 = vmatprep.subr.bf16.mxu0 %v8933_v7  ;;  %v8957_v35 = vld [vmem:[%s10791_s4 + $0x28] sm:$0xff]   ;;  %v8960_v37 = vld [vmem:[%s10791_s4 + $0x30] sm:$0xff]   ;;  %v8961_v39 = vld [vmem:[%s10790_s1 + $0x38] sm:$0xff]  }
   0xe   :  { %v8974_v38 = vld [vmem:[%s10789_s9 + $0x168] sm:$0xff]   ;;  %v8978_v40 = vld [vmem:[%s10789_s9 + $0x18] sm:$0xff]   ;;  %v8980_v42 = vld [vmem:[%s10789_s9 + $0x170] sm:$0xff]  }
   0xf   :  { %7685 = vmatpush3.bf16.msra.mxu1 %v8932_v6  ;;  %v8962_v41 = vld [vmem:[%s10791_s4 + $0x38] sm:$0xff]   ;;  %v8964_v43 = vld [vmem:[%s10790_s1 + $0x40] sm:$0xff]   ;;  %v8966_v46 = vld [vmem:[%s10790_s1 + $0x48] sm:$0xff]  }
  0x10   :  { %8005 = vmatpush3.bf16.msra.mxu0 %v8933_v7  ;;  %7686 = vmatprep.subr.bf16.mxu1 %v8934_v8  ;;  %v8965_v44 = vld [vmem:[%s10791_s4 + $0x40] sm:$0xff]   ;;  %v8985_v45 = vld [vmem:[%s10789_s9 + $0x178] sm:$0xff]   ;;  %v8968_v47 = vld [vmem:[%s10791_s4 + $0x48] sm:$0xff]  }
  0x11   :  { %8006 = vmatprep.subr.bf16.mxu0 %v8935_v9  ;;  %v8970_v48 = vld [vmem:[%s10790_s1 + $0x50] sm:$0xff]   ;;  %v8989_v49 = vld [vmem:[%s10789_s9 + $0x20] sm:$0xff]   ;;  %v8972_v52 = vld [vmem:[%s10790_s1 + $0x58] sm:$0xff]  }
  0x12   :  { %v8971_v50 = vld [vmem:[%s10791_s4 + $0x50] sm:$0xff]   ;;  %v8991_v51 = vld [vmem:[%s10789_s9 + $0x180] sm:$0xff]   ;;  %v8973_v53 = vld [vmem:[%s10791_s4 + $0x58] sm:$0xff]  }
  0x13   :  { %7687 = vmatpush3.bf16.msra.mxu1 %v8934_v8  ;;  %v8975_v54 = vld [vmem:[%s10790_s1 + $0x60] sm:$0xff]   ;;  %v8999_v56 = vld [vmem:[%s10789_s9 + $0x28] sm:$0xff]   ;;  %v8981_v59 = vld [vmem:[%s10790_s1 + $0x70] sm:$0xff]  }
  0x14   :  { %8007 = vmatpush3.bf16.msra.mxu0 %v8935_v9  ;;  %7688 = vmatprep.subr.bf16.mxu1 %v8936_v10  ;;  %v8976_v55 = vld [vmem:[%s10791_s4 + $0x60] sm:$0xff]   ;;  %v8977_v57 = vld [vmem:[%s10790_s1 + $0x68] sm:$0xff]   ;;  %v8982_v60 = vld [vmem:[%s10791_s4 + $0x70] sm:$0xff]  }
  0x15   :  { %8008 = vmatprep.subr.bf16.mxu0 %v8937_v11  ;;  %v8979_v58 = vld [vmem:[%s10791_s4 + $0x68] sm:$0xff]   ;;  %v9009_v61 = vld [vmem:[%s10789_s9 + $0x30] sm:$0xff]   ;;  %v8983_v62 = vld [vmem:[%s10790_s1 + $0x78] sm:$0xff]  }
  0x16   :  { %v8984_v63 = vld [vmem:[%s10791_s4 + $0x78] sm:$0xff]   ;;  %v8986_v0 = vld [vmem:[%s10790_s1 + $0x80] sm:$0xff]   ;;  %v8988_v2 = vld [vmem:[%s10790_s1 + $0x88] sm:$0xff]  }
  0x17   :  { %7689 = vmatpush3.bf16.msra.mxu1 %v8936_v10  ;;  %v8987_v1 = vld [vmem:[%s10792_s5] sm:$0xff]   ;;  %v9019_v3 = vld [vmem:[%s10789_s9 + $0x38] sm:$0xff]   ;;  %v8990_v4 = vld [vmem:[%s10792_s5 + $0x8] sm:$0xff]  }
  0x18   :  { %8009 = vmatpush3.bf16.msra.mxu0 %v8937_v11  ;;  %7690 = vmatprep.subr.bf16.mxu1 %v8938_v14  ;;  %v8992_v5 = vld [vmem:[%s10790_s1 + $0x90] sm:$0xff]   ;;  %v9001_v7 = vld [vmem:[%s10789_s9 + $0x188] sm:$0xff]   ;;  %v8994_v8 = vld [vmem:[%s10790_s1 + $0x98] sm:$0xff]  }
  0x19   :  { %8010 = vmatprep.subr.bf16.mxu0 %v8939_v15  ;;  %v8993_v6 = vld [vmem:[%s10792_s5 + $0x10] sm:$0xff]   ;;  %v8995_v9 = vld [vmem:[%s10792_s5 + $0x18] sm:$0xff]   ;;  %v8996_v11 = vld [vmem:[%s10790_s1 + $0xa0] sm:$0xff]  }
  0x1a   :  { %v9011_v10 = vld [vmem:[%s10789_s9 + $0x190] sm:$0xff]   ;;  %v9590_v12 = vld [vmem:[%s10789_s9 + $0x80] sm:$0xff]  }
  0x1b   :  { %7691 = vmatpush3.bf16.msra.mxu1 %v8938_v14  ;;  %v8997_v13 = vld [vmem:[%s10792_s5 + $0x20] sm:$0xff]   ;;  %v9021_v14 = vld [vmem:[%s10789_s9 + $0x198] sm:$0xff]  }
  0x1c   :  { %8011 = vmatpush3.bf16.msra.mxu0 %v8939_v15  ;;  %7692 = vmatprep.subr.bf16.mxu1 %v8940_v16  ;;  %v8998_v15 = vld [vmem:[%s10790_s1 + $0xa8] sm:$0xff]  }
  0x1d   :  { %8012 = vmatprep.subr.bf16.mxu0 %v8941_v17 }
  0x1f   :  { %7693 = vmatpush3.bf16.msra.mxu1 %v8940_v16  ;;  %v9031_v16 = vld [vmem:[%s10789_s9 + $0x1a0] sm:$0xff]  }
  0x20   :  { %8013 = vmatpush3.bf16.msra.mxu0 %v8941_v17  ;;  %7758 = vmatprep.subr.bf16.mxu1 %v8945_v19  ;;  %v9000_v17 = vld [vmem:[%s10792_s5 + $0x28] sm:$0xff]  }
  0x21   :  { %8078 = vmatprep.subr.bf16.mxu0 %v8947_v20 }
  0x22   :  { %7695 = vmatmul.mubr.bf16.vlgmr.msra.gmra.mrb[0].mxu1 %v8944_v18  ;;  %v9002_v18 = vld [vmem:[%s10790_s1 + $0xb0] sm:$0xff]  }
  0x23   :  { %8015 = vmatmul.mubr.bf16.vlgmr.msra.gmra.mrb[0].mxu0 %v8946_v21  ;;  %7759 = vmatpush3.bf16.msra.mxu1 %v8945_v19  ;;  %v9003_v19 = vld [vmem:[%s10792_s5 + $0x30] sm:$0xff]   ;;  %v9004_v21 = vld [vmem:[%s10790_s1 + $0xb8] sm:$0xff]  }
  0x24   :  { %8079 = vmatpush3.bf16.msra.mxu0 %v8947_v20  ;;  %7698 = vmatprep.mubr.bf16.mxu1 %v8948_v22  ;;  %v9041_v20 = vld [vmem:[%s10789_s9 + $0x1a8] sm:$0xff]   ;;  %v9005_v22 = vld [vmem:[%s10792_s5 + $0x38] sm:$0xff]  }
  0x25   :  { %8018 = vmatprep.mubr.bf16.mxu0 %v8949_v23  ;;  %8080 = vmatprep.subr.bf16.mxu0 %v8952_v24  ;;  %v9006_v23 = vld [vmem:[%s10790_s1 + $0xc0] sm:$0xff]  }
  0x26   :  { %7760 = vmatprep.subr.bf16.mxu1 %v8956_v25 }
  0x27   :  { %7761 = vmatpush3.bf16.msra.mxu1 %v8956_v25  ;;  %v9008_v25 = vld [vmem:[%s10790_s1 + $0xc8] sm:$0xff]  }
  0x28   :  { %8081 = vmatpush3.bf16.msra.mxu0 %v8952_v24  ;;  %7762 = vmatprep.subr.bf16.mxu1 %v8967_v32  ;;  %v9007_v24 = vld [vmem:[%s10792_s5 + $0x40] sm:$0xff]  }
  0x29   :  { %8082 = vmatprep.subr.bf16.mxu0 %v8958_v28 }
  0x2a   :  { %7699 = vmatmul.mubr.bf16.gmra.mrb[4].mxu1 %v8950_v26  ;;  %v9051_v26 = vld [vmem:[%s10789_s9 + $0x1b0] sm:$0xff]  }
  0x2b   :  { %8019 = vmatmul.mubr.bf16.gmra.mrb[4].mxu0 %v8951_v27  ;;  %7702 = vmatprep.mubr.bf16.mxu1 %v8953_v29  ;;  %v9010_v27 = vld [vmem:[%s10792_s5 + $0x48] sm:$0xff]   ;;  %v9013_v29 = vld [vmem:[%s10792_s5 + $0x50] sm:$0xff]  }
  0x2c   :  { %8022 = vmatprep.mubr.bf16.mxu0 %v8954_v30  ;;  %8083 = vmatpush3.bf16.msra.mxu0 %v8958_v28  ;;  %v9012_v28 = vld [vmem:[%s10790_s1 + $0xd0] sm:$0xff]   ;;  %v9014_v30 = vld [vmem:[%s10790_s1 + $0xd8] sm:$0xff]  }
  0x2d   :  { %8084 = vmatprep.subr.bf16.mxu0 %v8963_v31  ;;  %7763 = vmatpush3.bf16.msra.mxu1 %v8967_v32  ;;  %v9016_v32 = vld [vmem:[%s10790_s1 + $0xe0] sm:$0xff]  }
  0x2e   :  { %7764 = vmatprep.subr.bf16.mxu1 %v8978_v40 }
  0x30   :  { %8085 = vmatpush3.bf16.msra.mxu0 %v8963_v31  ;;  %v9015_v31 = vld [vmem:[%s10792_s5 + $0x58] sm:$0xff]  }
  0x31   :  { %8086 = vmatprep.subr.bf16.mxu0 %v8969_v34  ;;  %7765 = vmatpush3.bf16.msra.mxu1 %v8978_v40  ;;  %v9024_v40 = vld [vmem:[%s10790_s1 + $0xf8] sm:$0xff]  }
  0x32   :  { %7703 = vmatmul.mubr.bf16.gmra.mrb[8].mxu1 %v8955_v33  ;;  %7766 = vmatprep.subr.bf16.mxu1 %v8989_v49  ;;  %v9061_v33 = vld [vmem:[%s10789_s9 + $0x1b8] sm:$0xff]  }
  0x33   :  { %8023 = vmatmul.mubr.bf16.gmra.mrb[8].mxu0 %v8957_v35  ;;  %7706 = vmatprep.mubr.bf16.mxu1 %v8959_v36  ;;  %v9018_v35 = vld [vmem:[%s10790_s1 + $0xe8] sm:$0xff]  }
  0x34   :  { %8026 = vmatprep.mubr.bf16.mxu0 %v8960_v37  ;;  %8087 = vmatpush3.bf16.msra.mxu0 %v8969_v34  ;;  %v9017_v34 = vld [vmem:[%s10792_s5 + $0x60] sm:$0xff]   ;;  %v9020_v36 = vld [vmem:[%s10792_s5 + $0x68] sm:$0xff]   ;;  %v9022_v37 = vld [vmem:[%s10790_s1 + $0xf0] sm:$0xff]  }
  0x35   :  { %8088 = vmatprep.subr.bf16.mxu0 %v8974_v38  ;;  %7767 = vmatpush3.bf16.msra.mxu1 %v8989_v49  ;;  %v9049_v49 = vld [vmem:[%s10789_s9 + $0x90] sm:$0xff]  }
  0x36   :  { %7768 = vmatprep.subr.bf16.mxu1 %v8999_v56 }
  0x38   :  { %8089 = vmatpush3.bf16.msra.mxu0 %v8974_v38  ;;  %v9023_v38 = vld [vmem:[%s10792_s5 + $0x70] sm:$0xff]  }
  0x39   :  { %8090 = vmatprep.subr.bf16.mxu0 %v8980_v42  ;;  %7769 = vmatpush3.bf16.msra.mxu1 %v8999_v56  ;;  %v9069_v56 = vld [vmem:[%s10789_s9 + $0xa0] sm:$0xff]  }
  0x3a   :  { %7707 = vmatmul.mubr.bf16.gmra.mrb[12].mxu1 %v8961_v39  ;;  %7770 = vmatprep.subr.bf16.mxu1 %v9009_v61  ;;  %v9674_v39 = vld [vmem:[%s10789_s9 + $0x1c0] sm:$0xff]  }
  0x3b   :  { %8027 = vmatmul.mubr.bf16.gmra.mrb[12].mxu0 %v8962_v41  ;;  %7710 = vmatprep.mubr.bf16.mxu1 %v8964_v43  ;;  %v9025_v41 = vld [vmem:[%s10792_s5 + $0x78] sm:$0xff]   ;;  %v9027_v43 = vld [vmem:[%s10792_s5 + $0x80] sm:$0xff]  }
  0x3c   :  { %8030 = vmatprep.mubr.bf16.mxu0 %v8965_v44  ;;  %8091 = vmatpush3.bf16.msra.mxu0 %v8980_v42  ;;  %v9026_v42 = vld [vmem:[%s10793_s0] sm:$0xff]   ;;  %v9028_v44 = vld [vmem:[%s10793_s0 + $0x8] sm:$0xff]  }
  0x3d   :  { %8092 = vmatprep.subr.bf16.mxu0 %v8985_v45  ;;  %7771 = vmatpush3.bf16.msra.mxu1 %v9009_v61  ;;  %v9044_v61 = vld [vmem:[%s10793_s0 + $0x38] sm:$0xff]  }
  0x3e   :  { %7772 = vmatprep.subr.bf16.mxu1 %v9019_v3 }
  0x40   :  { %8093 = vmatpush3.bf16.msra.mxu0 %v8985_v45  ;;  %v9030_v45 = vld [vmem:[%s10792_s5 + $0x88] sm:$0xff]  }
  0x41   :  { %8158 = vmatprep.subr.bf16.mxu0 %v8991_v51  ;;  %7773 = vmatpush3.bf16.msra.mxu1 %v9019_v3  ;;  %v9048_v3 = vld [vmem:[%s10793_s0 + $0x48] sm:$0xff]  }
  0x42   :  { %7711 = vmatmul.mubr.bf16.gmra.mrb[16].mxu1 %v8966_v46  ;;  %7838 = vmatprep.subr.bf16.mxu1 %v9590_v12  ;;  %v9032_v46 = vld [vmem:[%s10793_s0 + $0x10] sm:$0xff]  }
  0x43   :  { %8031 = vmatmul.mubr.bf16.gmra.mrb[16].mxu0 %v8968_v47  ;;  %7714 = vmatprep.mubr.bf16.mxu1 %v8970_v48  ;;  %v9033_v47 = vld [vmem:[%s10792_s5 + $0x90] sm:$0xff]   ;;  %v9039_v48 = vld [vmem:[%s10789_s9 + $0x88] sm:$0xff]  }
  0x44   :  { %8034 = vmatprep.mubr.bf16.mxu0 %v8971_v50  ;;  %v9034_v50 = vld [vmem:[%s10793_s0 + $0x18] sm:$0xff]  }
  0x4a   :  { %7715 = vmatmul.mubr.bf16.gmra.mrb[20].mxu1 %v8972_v52  ;;  %v9036_v52 = vld [vmem:[%s10793_s0 + $0x20] sm:$0xff]  }
  0x4b   :  { %8035 = vmatmul.mubr.bf16.gmra.mrb[20].mxu0 %v8973_v53  ;;  %7718 = vmatprep.mubr.bf16.mxu1 %v8975_v54  ;;  %v9037_v53 = vld [vmem:[%s10792_s5 + $0xa0] sm:$0xff]   ;;  %v9059_v54 = vld [vmem:[%s10789_s9 + $0x98] sm:$0xff]  }
  0x4c   :  { %8038 = vmatprep.mubr.bf16.mxu0 %v8976_v55  ;;  %v9038_v55 = vld [vmem:[%s10793_s0 + $0x28] sm:$0xff]  }
  0x52   :  { %7719 = vmatmul.mubr.bf16.gmra.mrb[24].mxu1 %v8977_v57  ;;  %v9040_v57 = vld [vmem:[%s10792_s5 + $0xa8] sm:$0xff]  }
  0x53   :  { %8039 = vmatmul.mubr.bf16.gmra.mrb[24].mxu0 %v8979_v58  ;;  %7722 = vmatprep.mubr.bf16.mxu1 %v8981_v59  ;;  %v9042_v58 = vld [vmem:[%s10793_s0 + $0x30] sm:$0xff]  }
  0x54   :  { %8042 = vmatprep.mubr.bf16.mxu0 %v8982_v60  ;;  %v9043_v59 = vld [vmem:[%s10792_s5 + $0xb0] sm:$0xff]   ;;  %v9079_v60 = vld [vmem:[%s10789_s9 + $0xa8] sm:$0xff]  }
  0x5a   :  { %7723 = vmatmul.mubr.bf16.gmra.mrb[28].mxu1 %v8983_v62  ;;  %v9089_v62 = vld [vmem:[%s10789_s9 + $0xb0] sm:$0xff]  }
  0x5b   :  { %8043 = vmatmul.mubr.bf16.gmra.mrb[28].mxu0 %v8984_v63  ;;  %7726 = vmatprep.mubr.bf16.mxu1 %v8986_v0  ;;  %v9045_v63 = vld [vmem:[%s10792_s5 + $0xb8] sm:$0xff]   ;;  %v9046_v0 = vld [vmem:[%s10793_s0 + $0x40] sm:$0xff]  }
  0x5c   :  { %8094 = vmatprep.mubr.bf16.mxu0 %v8987_v1  ;;  %v9047_v1 = vld [vmem:[%s10792_s5 + $0xc0] sm:$0xff]  }
  0x62   :  { %7727 = vmatmul.mubr.bf16.gmra.mrb[32].mxu1 %v8988_v2  ;;  %v9099_v2 = vld [vmem:[%s10789_s9 + $0xb8] sm:$0xff]  }
  0x63   :  { %8095 = vmatmul.mubr.bf16.vlgmr.msra.gmra.mrb[0].mxu0 %v8990_v4  ;;  %7730 = vmatprep.mubr.bf16.mxu1 %v8992_v5  ;;  %v9765_v4 = vld [vmem:[%s10789_s9 + $0xc0] sm:$0xff]   ;;  %v9050_v5 = vld [vmem:[%s10792_s5 + $0xc8] sm:$0xff]  }
  0x64   :  { %8159 = vmatpush3.bf16.msra.mxu0 %v8991_v51  ;;  %8098 = vmatprep.mubr.bf16.mxu0 %v8993_v6  ;;  %v9035_v51 = vld [vmem:[%s10792_s5 + $0x98] sm:$0xff]   ;;  %v9052_v6 = vld [vmem:[%s10793_s0 + $0x50] sm:$0xff]  }
  0x65   :  { %8160 = vmatprep.subr.bf16.mxu0 %v9001_v7 }
  0x68   :  { %8161 = vmatpush3.bf16.msra.mxu0 %v9001_v7  ;;  %v9053_v7 = vld [vmem:[%s10792_s5 + $0xd0] sm:$0xff]  }
  0x69   :  { %8162 = vmatprep.subr.bf16.mxu0 %v9011_v10 }
  0x6a   :  { %7731 = vmatmul.mubr.bf16.gmra.mrb[36].mxu1 %v8994_v8  ;;  %v9054_v8 = vld [vmem:[%s10793_s0 + $0x58] sm:$0xff]  }
  0x6b   :  { %8099 = vmatmul.mubr.bf16.gmra.mrb[4].mxu0 %v8995_v9  ;;  %7734 = vmatprep.mubr.bf16.mxu1 %v8996_v11  ;;  %v9055_v9 = vld [vmem:[%s10792_s5 + $0xd8] sm:$0xff]   ;;  %v9057_v11 = vld [vmem:[%s10792_s5 + $0xe0] sm:$0xff]  }
  0x6c   :  { %8102 = vmatprep.mubr.bf16.mxu0 %v8997_v13  ;;  %8163 = vmatpush3.bf16.msra.mxu0 %v9011_v10  ;;  %v9056_v10 = vld [vmem:[%s10793_s0 + $0x60] sm:$0xff]   ;;  %v9060_v13 = vld [vmem:[%s10792_s5 + $0xe8] sm:$0xff]  }
  0x6d   :  { %8164 = vmatprep.subr.bf16.mxu0 %v9021_v14 }
  0x70   :  { %8165 = vmatpush3.bf16.msra.mxu0 %v9021_v14  ;;  %v9062_v14 = vld [vmem:[%s10793_s0 + $0x70] sm:$0xff]  }
  0x71   :  { %8166 = vmatprep.subr.bf16.mxu0 %v9031_v16 }
  0x72   :  { %7735 = vmatmul.mubr.bf16.gmra.mrb[40].mxu1 %v8998_v15  ;;  %v9063_v15 = vld [vmem:[%s10792_s5 + $0xf0] sm:$0xff]  }
  0x73   :  { %8103 = vmatmul.mubr.bf16.gmra.mrb[8].mxu0 %v9000_v17  ;;  %7738 = vmatprep.mubr.bf16.mxu1 %v9002_v18  ;;  %v9065_v17 = vld [vmem:[%s10792_s5 + $0xf8] sm:$0xff]   ;;  %v9066_v18 = vld [vmem:[%s10793_s0 + $0x80] sm:$0xff]  }
  0x74   :  { %8106 = vmatprep.mubr.bf16.mxu0 %v9003_v19  ;;  %8167 = vmatpush3.bf16.msra.mxu0 %v9031_v16  ;;  %v9064_v16 = vld [vmem:[%s10793_s0 + $0x78] sm:$0xff]   ;;  %v9067_v19 = vld [vmem:[%s10794_s6] sm:$0xff]  }
  0x75   :  { %8168 = vmatprep.subr.bf16.mxu0 %v9041_v20 }
  0x78   :  { %8169 = vmatpush3.bf16.msra.mxu0 %v9041_v20  ;;  %v9068_v20 = vld [vmem:[%s10793_s0 + $0x88] sm:$0xff]  }
  0x79   :  { %8170 = vmatprep.subr.bf16.mxu0 %v9051_v26 }
  0x7a   :  { %7739 = vmatmul.mubr.bf16.gmra.mrb[44].mxu1 %v9004_v21  ;;  %v9070_v21 = vld [vmem:[%s10794_s6 + $0x8] sm:$0xff]  }
  0x7b   :  { %8107 = vmatmul.mubr.bf16.gmra.mrb[12].mxu0 %v9005_v22  ;;  %7742 = vmatprep.mubr.bf16.mxu1 %v9006_v23  ;;  %v9072_v22 = vld [vmem:[%s10793_s0 + $0x90] sm:$0xff]  }
  0x7c   :  { %8110 = vmatprep.mubr.bf16.mxu0 %v9007_v24  ;;  %8171 = vmatpush3.bf16.msra.mxu0 %v9051_v26  ;;  %v9073_v23 = vld [vmem:[%s10794_s6 + $0x10] sm:$0xff]   ;;  %v9081_v24 = vld [vmem:[%s10789_s9 + $0x1c8] sm:$0xff]  }
  0x7d   :  { %8172 = vmatprep.subr.bf16.mxu0 %v9061_v33  ;;  %v9091_v26 = vld [vmem:[%s10789_s9 + $0x1d0] sm:$0xff]  }
  0x80   :  { %8173 = vmatpush3.bf16.msra.mxu0 %v9061_v33  ;;  %v9080_v33 = vld [vmem:[%s10794_s6 + $0x28] sm:$0xff]  }
  0x81   :  { %8238 = vmatprep.subr.bf16.mxu0 %v9674_v39 }
  0x82   :  { %7743 = vmatmul.mubr.bf16.gmra.mrb[48].mxu1 %v9008_v25  ;;  %v9074_v25 = vld [vmem:[%s10793_s0 + $0x98] sm:$0xff]  }
  0x83   :  { %8111 = vmatmul.mubr.bf16.gmra.mrb[16].mxu0 %v9010_v27  ;;  %7746 = vmatprep.mubr.bf16.mxu1 %v9012_v28  ;;  %v9075_v27 = vld [vmem:[%s10794_s6 + $0x18] sm:$0xff]   ;;  %v9076_v28 = vld [vmem:[%s10793_s0 + $0xa0] sm:$0xff]  }
  0x84   :  { %8114 = vmatprep.mubr.bf16.mxu0 %v9013_v29  ;;  %v9077_v29 = vld [vmem:[%s10794_s6 + $0x20] sm:$0xff]  }
  0x8a   :  { %7747 = vmatmul.mubr.bf16.gmra.mrb[52].mxu1 %v9014_v30  ;;  %v9101_v30 = vld [vmem:[%s10789_s9 + $0x1d8] sm:$0xff]  }
  0x8b   :  { %8115 = vmatmul.mubr.bf16.gmra.mrb[20].mxu0 %v9015_v31  ;;  %7750 = vmatprep.mubr.bf16.mxu1 %v9016_v32  ;;  %v9078_v31 = vld [vmem:[%s10793_s0 + $0xa8] sm:$0xff]   ;;  %v9111_v32 = vld [vmem:[%s10789_s9 + $0x1e0] sm:$0xff]  }
  0x8c   :  { %8118 = vmatprep.mubr.bf16.mxu0 %v9017_v34  ;;  %v9082_v34 = vld [vmem:[%s10793_s0 + $0xb0] sm:$0xff]  }
  0x92   :  { %7751 = vmatmul.mubr.bf16.gmra.mrb[56].mxu1 %v9018_v35  ;;  %v9083_v35 = vld [vmem:[%s10794_s6 + $0x30] sm:$0xff]  }
  0x93   :  { %8119 = vmatmul.mubr.bf16.gmra.mrb[24].mxu0 %v9020_v36  ;;  %7754 = vmatprep.mubr.bf16.mxu1 %v9022_v37  ;;  %v9121_v36 = vld [vmem:[%s10789_s9 + $0x1e8] sm:$0xff]   ;;  %v9084_v37 = vld [vmem:[%s10793_s0 + $0xb8] sm:$0xff]  }
  0x94   :  { %8122 = vmatprep.mubr.bf16.mxu0 %v9023_v38  ;;  %v9131_v38 = vld [vmem:[%s10789_s9 + $0x1f0] sm:$0xff]  }
  0x9a   :  { %7755 = vmatmul.mubr.bf16.gmra.mrb[60].mxu1 %v9024_v40  ;;  %v9086_v40 = vld [vmem:[%s10793_s0 + $0xc0] sm:$0xff]  }
  0x9b   :  { %8123 = vmatmul.mubr.bf16.gmra.mrb[28].mxu0 %v9025_v41  ;;  %7774 = vmatprep.mubr.bf16.mxu1 %v9026_v42  ;;  %v9087_v41 = vld [vmem:[%s10794_s6 + $0x40] sm:$0xff]   ;;  %v9141_v42 = vld [vmem:[%s10789_s9 + $0x1f8] sm:$0xff]  }
  0x9c   :  { %8126 = vmatprep.mubr.bf16.mxu0 %v9027_v43  ;;  %v9088_v43 = vld [vmem:[%s10793_s0 + $0xc8] sm:$0xff]  }
  0xa2   :  { %7775 = vmatmul.mubr.bf16.vlgmr.msra.gmra.mrb[0].mxu1 %v9028_v44  ;;  %v9889_v44 = vld [vmem:[%s10789_s9 + $0x200] sm:$0xff]  }
  0xa3   :  { %8127 = vmatmul.mubr.bf16.gmra.mrb[32].mxu0 %v9030_v45  ;;  %7839 = vmatpush3.bf16.msra.mxu1 %v9590_v12  ;;  %v9058_v12 = vld [vmem:[%s10793_s0 + $0x68] sm:$0xff]  }
  0xa4   :  { %7778 = vmatprep.mubr.bf16.mxu1 %v9032_v46  ;;  %8130 = vmatprep.mubr.bf16.mxu0 %v9033_v47  ;;  %v9090_v45 = vld [vmem:[%s10794_s6 + $0x48] sm:$0xff]   ;;  %v9092_v46 = vld [vmem:[%s10793_s0 + $0xd0] sm:$0xff]  }
  0xa5   :  { %7840 = vmatprep.subr.bf16.mxu1 %v9039_v48  ;;  %v9093_v47 = vld [vmem:[%s10794_s6 + $0x50] sm:$0xff]  }
  0xa7   :  { %7841 = vmatpush3.bf16.msra.mxu1 %v9039_v48  ;;  %v9094_v48 = vld [vmem:[%s10793_s0 + $0xd8] sm:$0xff]  }
  0xa8   :  { %7842 = vmatprep.subr.bf16.mxu1 %v9049_v49 }
  0xaa   :  { %7779 = vmatmul.mubr.bf16.gmra.mrb[4].mxu1 %v9034_v50  ;;  %v9096_v50 = vld [vmem:[%s10793_s0 + $0xe0] sm:$0xff]  }
  0xab   :  { %8131 = vmatmul.mubr.bf16.gmra.mrb[36].mxu0 %v9035_v51  ;;  %7782 = vmatprep.mubr.bf16.mxu1 %v9036_v52  ;;  %v9097_v51 = vld [vmem:[%s10794_s6 + $0x60] sm:$0xff]   ;;  %v9098_v52 = vld [vmem:[%s10793_s0 + $0xe8] sm:$0xff]  }
  0xac   :  { %8134 = vmatprep.mubr.bf16.mxu0 %v9037_v53  ;;  %7843 = vmatpush3.bf16.msra.mxu1 %v9049_v49  ;;  %v9095_v49 = vld [vmem:[%s10794_s6 + $0x58] sm:$0xff]   ;;  %v9100_v53 = vld [vmem:[%s10794_s6 + $0x68] sm:$0xff]  }
  0xad   :  { %7844 = vmatprep.subr.bf16.mxu1 %v9059_v54 }
  0xb0   :  { %7845 = vmatpush3.bf16.msra.mxu1 %v9059_v54  ;;  %v9102_v54 = vld [vmem:[%s10793_s0 + $0xf0] sm:$0xff]  }
  0xb1   :  { %7846 = vmatprep.subr.bf16.mxu1 %v9069_v56 }
  0xb2   :  { %7783 = vmatmul.mubr.bf16.gmra.mrb[8].mxu1 %v9038_v55  ;;  %v9103_v55 = vld [vmem:[%s10794_s6 + $0x70] sm:$0xff]  }
  0xb3   :  { %8135 = vmatmul.mubr.bf16.gmra.mrb[40].mxu0 %v9040_v57  ;;  %7786 = vmatprep.mubr.bf16.mxu1 %v9042_v58  ;;  %v9105_v57 = vld [vmem:[%s10794_s6 + $0x78] sm:$0xff]   ;;  %v9106_v58 = vld [vmem:[%s10795_s2] sm:$0xff]  }
  0xb4   :  { %8138 = vmatprep.mubr.bf16.mxu0 %v9043_v59  ;;  %7847 = vmatpush3.bf16.msra.mxu1 %v9069_v56  ;;  %v9104_v56 = vld [vmem:[%s10793_s0 + $0xf8] sm:$0xff]   ;;  %v9107_v59 = vld [vmem:[%s10794_s6 + $0x80] sm:$0xff]  }
  0xb5   :  { %7848 = vmatprep.subr.bf16.mxu1 %v9079_v60 }
  0xb8   :  { %7849 = vmatpush3.bf16.msra.mxu1 %v9079_v60  ;;  %v9108_v60 = vld [vmem:[%s10795_s2 + $0x8] sm:$0xff]  }
  0xb9   :  { %7850 = vmatprep.subr.bf16.mxu1 %v9089_v62 }
  0xba   :  { %7787 = vmatmul.mubr.bf16.gmra.mrb[12].mxu1 %v9044_v61  ;;  %v9110_v61 = vld [vmem:[%s10794_s6 + $0x88] sm:$0xff]  }
  0xbb   :  { %8139 = vmatmul.mubr.bf16.gmra.mrb[44].mxu0 %v9045_v63  ;;  %7790 = vmatprep.mubr.bf16.mxu1 %v9046_v0  ;;  %v9113_v63 = vld [vmem:[%s10794_s6 + $0x90] sm:$0xff]   ;;  %v9119_v0 = vld [vmem:[%s10789_s9 + $0xc8] sm:$0xff]  }
  0xbc   :  { %8142 = vmatprep.mubr.bf16.mxu0 %v9047_v1  ;;  %7851 = vmatpush3.bf16.msra.mxu1 %v9089_v62  ;;  %v9112_v62 = vld [vmem:[%s10795_s2 + $0x10] sm:$0xff]   ;;  %v9114_v1 = vld [vmem:[%s10795_s2 + $0x18] sm:$0xff]  }
  0xbd   :  { %7852 = vmatprep.subr.bf16.mxu1 %v9099_v2 }
  0xc0   :  { %7853 = vmatpush3.bf16.msra.mxu1 %v9099_v2  ;;  %v9129_v2 = vld [vmem:[%s10789_s9 + $0xd0] sm:$0xff]  }
  0xc1   :  { %7918 = vmatprep.subr.bf16.mxu1 %v9765_v4 }
  0xc2   :  { %7791 = vmatmul.mubr.bf16.gmra.mrb[16].mxu1 %v9048_v3  ;;  %v9115_v3 = vld [vmem:[%s10794_s6 + $0x98] sm:$0xff]  }
  0xc3   :  { %8143 = vmatmul.mubr.bf16.gmra.mrb[48].mxu0 %v9050_v5  ;;  %7794 = vmatprep.mubr.bf16.mxu1 %v9052_v6  ;;  %v9116_v5 = vld [vmem:[%s10795_s2 + $0x20] sm:$0xff]   ;;  %v9139_v6 = vld [vmem:[%s10789_s9 + $0xd8] sm:$0xff]  }
  0xc4   :  { %8146 = vmatprep.mubr.bf16.mxu0 %v9053_v7  ;;  %v9118_v7 = vld [vmem:[%s10795_s2 + $0x28] sm:$0xff]  }
  0xca   :  { %7795 = vmatmul.mubr.bf16.gmra.mrb[20].mxu1 %v9054_v8  ;;  %v9149_v8 = vld [vmem:[%s10789_s9 + $0xe0] sm:$0xff]  }
  0xcb   :  { %8147 = vmatmul.mubr.bf16.gmra.mrb[52].mxu0 %v9055_v9  ;;  %7798 = vmatprep.mubr.bf16.mxu1 %v9056_v10  ;;  %v9120_v9 = vld [vmem:[%s10794_s6 + $0xa8] sm:$0xff]   ;;  %v9122_v10 = vld [vmem:[%s10795_s2 + $0x30] sm:$0xff]  }
  0xcc   :  { %8150 = vmatprep.mubr.bf16.mxu0 %v9057_v11  ;;  %v9123_v11 = vld [vmem:[%s10794_s6 + $0xb0] sm:$0xff]  }
  0xd2   :  { %7799 = vmatmul.mubr.bf16.gmra.mrb[24].mxu1 %v9058_v12  ;;  %v9159_v12 = vld [vmem:[%s10789_s9 + $0xe8] sm:$0xff]  }
  0xd3   :  { %8151 = vmatmul.mubr.bf16.gmra.mrb[56].mxu0 %v9060_v13  ;;  %7802 = vmatprep.mubr.bf16.mxu1 %v9062_v14  ;;  %v9124_v13 = vld [vmem:[%s10795_s2 + $0x38] sm:$0xff]   ;;  %v9169_v14 = vld [vmem:[%s10789_s9 + $0xf0] sm:$0xff]  }
  0xd4   :  { %8154 = vmatprep.mubr.bf16.mxu0 %v9063_v15  ;;  %v9125_v15 = vld [vmem:[%s10794_s6 + $0xb8] sm:$0xff]  }
  0xda   :  { %7803 = vmatmul.mubr.bf16.gmra.mrb[28].mxu1 %v9064_v16  ;;  %v9126_v16 = vld [vmem:[%s10795_s2 + $0x40] sm:$0xff]  }
  0xdb   :  { %8155 = vmatmul.mubr.bf16.gmra.mrb[60].mxu0 %v9065_v17  ;;  %7806 = vmatprep.mubr.bf16.mxu1 %v9066_v18  ;;  %v9127_v17 = vld [vmem:[%s10794_s6 + $0xc0] sm:$0xff]   ;;  %v9179_v18 = vld [vmem:[%s10789_s9 + $0xf8] sm:$0xff]  }
  0xdc   :  { %8174 = vmatprep.mubr.bf16.mxu0 %v9067_v19  ;;  %v9128_v19 = vld [vmem:[%s10795_s2 + $0x48] sm:$0xff]  }
  0xe2   :  { %7807 = vmatmul.mubr.bf16.gmra.mrb[32].mxu1 %v9068_v20  ;;  %v9130_v20 = vld [vmem:[%s10794_s6 + $0xc8] sm:$0xff]  }
  0xe3   :  { %8175 = vmatmul.mubr.bf16.vlgmr.msra.gmra.mrb[0].mxu0 %v9070_v21  ;;  %7810 = vmatprep.mubr.bf16.mxu1 %v9072_v22  ;;  %v9132_v21 = vld [vmem:[%s10795_s2 + $0x50] sm:$0xff]  }
  0xe4   :  { %8239 = vmatpush3.bf16.msra.mxu0 %v9674_v39  ;;  %8178 = vmatprep.mubr.bf16.mxu0 %v9073_v23  ;;  %v9085_v39 = vld [vmem:[%s10794_s6 + $0x38] sm:$0xff]   ;;  %v9133_v22 = vld [vmem:[%s10794_s6 + $0xd0] sm:$0xff]   ;;  %v10022_v23 = vld [vmem:[%s10789_s9 + $0x100] sm:$0xff]  }
  0xe5   :  { %8240 = vmatprep.subr.bf16.mxu0 %v9081_v24 }
  0xe8   :  { %8241 = vmatpush3.bf16.msra.mxu0 %v9081_v24  ;;  %v9134_v24 = vld [vmem:[%s10795_s2 + $0x58] sm:$0xff]  }
  0xe9   :  { %8242 = vmatprep.subr.bf16.mxu0 %v9091_v26 }
  0xea   :  { %7811 = vmatmul.mubr.bf16.gmra.mrb[36].mxu1 %v9074_v25  ;;  %v9135_v25 = vld [vmem:[%s10794_s6 + $0xd8] sm:$0xff]  }
  0xeb   :  { %8179 = vmatmul.mubr.bf16.gmra.mrb[4].mxu0 %v9075_v27  ;;  %7814 = vmatprep.mubr.bf16.mxu1 %v9076_v28  ;;  %v9137_v27 = vld [vmem:[%s10794_s6 + $0xe0] sm:$0xff]   ;;  %v9138_v28 = vld [vmem:[%s10795_s2 + $0x68] sm:$0xff]  }
  0xec   :  { %8182 = vmatprep.mubr.bf16.mxu0 %v9077_v29  ;;  %8243 = vmatpush3.bf16.msra.mxu0 %v9091_v26  ;;  %v9136_v26 = vld [vmem:[%s10795_s2 + $0x60] sm:$0xff]   ;;  %v9140_v29 = vld [vmem:[%s10794_s6 + $0xe8] sm:$0xff]  }
  0xed   :  { %8244 = vmatprep.subr.bf16.mxu0 %v9101_v30 }
  0xf0   :  { %8245 = vmatpush3.bf16.msra.mxu0 %v9101_v30  ;;  %v9142_v30 = vld [vmem:[%s10795_s2 + $0x70] sm:$0xff]  }
  0xf1   :  { %8246 = vmatprep.subr.bf16.mxu0 %v9111_v32 }
  0xf2   :  { %7815 = vmatmul.mubr.bf16.gmra.mrb[40].mxu1 %v9078_v31  ;;  %v9143_v31 = vld [vmem:[%s10794_s6 + $0xf0] sm:$0xff]  }
  0xf3   :  { %8183 = vmatmul.mubr.bf16.gmra.mrb[8].mxu0 %v9080_v33  ;;  %7818 = vmatprep.mubr.bf16.mxu1 %v9082_v34  ;;  %v9145_v33 = vld [vmem:[%s10794_s6 + $0xf8] sm:$0xff]   ;;  %v9146_v34 = vld [vmem:[%s10795_s2 + $0x80] sm:$0xff]  }
  0xf4   :  { %8186 = vmatprep.mubr.bf16.mxu0 %v9083_v35  ;;  %8247 = vmatpush3.bf16.msra.mxu0 %v9111_v32  ;;  %v9144_v32 = vld [vmem:[%s10795_s2 + $0x78] sm:$0xff]   ;;  %v9147_v35 = vld [vmem:[%s10796_s7] sm:$0xff]  }
  0xf5   :  { %8248 = vmatprep.subr.bf16.mxu0 %v9121_v36 }
  0xf8   :  { %8249 = vmatpush3.bf16.msra.mxu0 %v9121_v36  ;;  %v9148_v36 = vld [vmem:[%s10795_s2 + $0x88] sm:$0xff]  }
  0xf9   :  { %8250 = vmatprep.subr.bf16.mxu0 %v9131_v38 }
  0xfa   :  { %7819 = vmatmul.mubr.bf16.gmra.mrb[44].mxu1 %v9084_v37  ;;  %v9150_v37 = vld [vmem:[%s10796_s7 + $0x8] sm:$0xff]  }
  0xfb   :  { %8187 = vmatmul.mubr.bf16.gmra.mrb[12].mxu0 %v9085_v39  ;;  %7822 = vmatprep.mubr.bf16.mxu1 %v9086_v40  ;;  %v9153_v39 = vld [vmem:[%s10796_s7 + $0x10] sm:$0xff]   ;;  %v9161_v40 = vld [vmem:[%s10789_s9 + $0x208] sm:$0xff]  }
  0xfc   :  { %8190 = vmatprep.mubr.bf16.mxu0 %v9087_v41  ;;  %8251 = vmatpush3.bf16.msra.mxu0 %v9131_v38  ;;  %v9152_v38 = vld [vmem:[%s10795_s2 + $0x90] sm:$0xff]   ;;  %v9154_v41 = vld [vmem:[%s10795_s2 + $0x98] sm:$0xff]  }
  0xfd   :  { %8252 = vmatprep.subr.bf16.mxu0 %v9141_v42 }
 0x100   :  { %8253 = vmatpush3.bf16.msra.mxu0 %v9141_v42  ;;  %v9171_v42 = vld [vmem:[%s10789_s9 + $0x210] sm:$0xff]  }
 0x101   :  { %8318 = vmatprep.subr.bf16.mxu0 %v9889_v44 }
 0x102   :  { %7823 = vmatmul.mubr.bf16.gmra.mrb[48].mxu1 %v9088_v43  ;;  %v9155_v43 = vld [vmem:[%s10796_s7 + $0x18] sm:$0xff]  }
 0x103   :  { %8191 = vmatmul.mubr.bf16.gmra.mrb[16].mxu0 %v9090_v45  ;;  %7826 = vmatprep.mubr.bf16.mxu1 %v9092_v46  ;;  %v9156_v45 = vld [vmem:[%s10795_s2 + $0xa0] sm:$0xff]   ;;  %v9181_v46 = vld [vmem:[%s10789_s9 + $0x218] sm:$0xff]  }
 0x104   :  { %8194 = vmatprep.mubr.bf16.mxu0 %v9093_v47  ;;  %v9158_v47 = vld [vmem:[%s10795_s2 + $0xa8] sm:$0xff]  }
 0x10a   :  { %7827 = vmatmul.mubr.bf16.gmra.mrb[52].mxu1 %v9094_v48  ;;  %v9190_v48 = vld [vmem:[%s10789_s9 + $0x220] sm:$0xff]  }
 0x10b   :  { %8195 = vmatmul.mubr.bf16.gmra.mrb[20].mxu0 %v9095_v49  ;;  %7830 = vmatprep.mubr.bf16.mxu1 %v9096_v50  ;;  %v9160_v49 = vld [vmem:[%s10796_s7 + $0x28] sm:$0xff]   ;;  %v9162_v50 = vld [vmem:[%s10795_s2 + $0xb0] sm:$0xff]  }
 0x10c   :  { %8198 = vmatprep.mubr.bf16.mxu0 %v9097_v51  ;;  %v9163_v51 = vld [vmem:[%s10796_s7 + $0x30] sm:$0xff]  }
 0x112   :  { %7831 = vmatmul.mubr.bf16.gmra.mrb[56].mxu1 %v9098_v52  ;;  %v9199_v52 = vld [vmem:[%s10789_s9 + $0x228] sm:$0xff]  }
 0x113   :  { %8199 = vmatmul.mubr.bf16.gmra.mrb[24].mxu0 %v9100_v53  ;;  %7834 = vmatprep.mubr.bf16.mxu1 %v9102_v54  ;;  %v9208_v53 = vld [vmem:[%s10789_s9 + $0x230] sm:$0xff]   ;;  %v9164_v54 = vld [vmem:[%s10795_s2 + $0xb8] sm:$0xff]  }
 0x114   :  { %8202 = vmatprep.mubr.bf16.mxu0 %v9103_v55  ;;  %v9165_v55 = vld [vmem:[%s10796_s7 + $0x38] sm:$0xff]  }
 0x11a   :  { %7835 = vmatmul.mubr.bf16.gmra.mrb[60].mxu1 %v9104_v56  ;;  %v9166_v56 = vld [vmem:[%s10795_s2 + $0xc0] sm:$0xff]  }
 0x11b   :  { %8203 = vmatmul.mubr.bf16.gmra.mrb[28].mxu0 %v9105_v57  ;;  %7854 = vmatprep.mubr.bf16.mxu1 %v9106_v58  ;;  %v9167_v57 = vld [vmem:[%s10796_s7 + $0x40] sm:$0xff]   ;;  %v9217_v58 = vld [vmem:[%s10789_s9 + $0x238] sm:$0xff]  }
 0x11c   :  { %8206 = vmatprep.mubr.bf16.mxu0 %v9107_v59  ;;  %v9168_v59 = vld [vmem:[%s10795_s2 + $0xc8] sm:$0xff]  }
 0x122   :  { %7855 = vmatmul.mubr.bf16.vlgmr.msra.gmra.mrb[0].mxu1 %v9108_v60  ;;  %v9170_v60 = vld [vmem:[%s10796_s7 + $0x48] sm:$0xff]  }
 0x123   :  { %8207 = vmatmul.mubr.bf16.gmra.mrb[32].mxu0 %v9110_v61  ;;  %7919 = vmatpush3.bf16.msra.mxu1 %v9765_v4  ;;  %v9117_v4 = vld [vmem:[%s10794_s6 + $0xa0] sm:$0xff]   ;;  %v9172_v61 = vld [vmem:[%s10795_s2 + $0xd0] sm:$0xff]  }
 0x124   :  { %7858 = vmatprep.mubr.bf16.mxu1 %v9112_v62  ;;  %8210 = vmatprep.mubr.bf16.mxu0 %v9113_v63  ;;  %v9173_v62 = vld [vmem:[%s10796_s7 + $0x50] sm:$0xff]   ;;  %v9174_v63 = vld [vmem:[%s10795_s2 + $0xd8] sm:$0xff]  }
 0x125   :  { %7920 = vmatprep.subr.bf16.mxu1 %v9119_v0 }
 0x127   :  { %7921 = vmatpush3.bf16.msra.mxu1 %v9119_v0  ;;  %v9175_v0 = vld [vmem:[%s10796_s7 + $0x58] sm:$0xff]  }
 0x128   :  { %7922 = vmatprep.subr.bf16.mxu1 %v9129_v2 }
 0x12a   :  { %7859 = vmatmul.mubr.bf16.gmra.mrb[4].mxu1 %v9114_v1  ;;  %v9176_v1 = vld [vmem:[%s10795_s2 + $0xe0] sm:$0xff]  }
 0x12b   :  { %8211 = vmatmul.mubr.bf16.gmra.mrb[36].mxu0 %v9115_v3  ;;  %7862 = vmatprep.mubr.bf16.mxu1 %v9116_v5  ;;  %v9178_v3 = vld [vmem:[%s10795_s2 + $0xe8] sm:$0xff]  }
 0x12c   :  { %8214 = vmatprep.mubr.bf16.mxu0 %v9117_v4  ;;  %7923 = vmatpush3.bf16.msra.mxu1 %v9129_v2  ;;  %v9177_v2 = vld [vmem:[%s10796_s7 + $0x60] sm:$0xff]   ;;  %v9180_v5 = vld [vmem:[%s10796_s7 + $0x68] sm:$0xff]   ;;  %v9182_v4 = vld [vmem:[%s10795_s2 + $0xf0] sm:$0xff]  }
 0x12d   :  { %7924 = vmatprep.subr.bf16.mxu1 %v9139_v6 }
 0x130   :  { %7925 = vmatpush3.bf16.msra.mxu1 %v9139_v6  ;;  %v9183_v6 = vld [vmem:[%s10796_s7 + $0x70] sm:$0xff]  }
 0x131   :  { %7926 = vmatprep.subr.bf16.mxu1 %v9149_v8 }
 0x132   :  { %7863 = vmatmul.mubr.bf16.gmra.mrb[8].mxu1 %v9118_v7  ;;  %v9184_v7 = vld [vmem:[%s10795_s2 + $0xf8] sm:$0xff]  }
 0x133   :  { %8215 = vmatmul.mubr.bf16.gmra.mrb[40].mxu0 %v9120_v9  ;;  %7866 = vmatprep.mubr.bf16.mxu1 %v9122_v10  ;;  %v9186_v9 = vld [vmem:[%s10797_s3] sm:$0xff]  }
 0x134   :  { %8218 = vmatprep.mubr.bf16.mxu0 %v9123_v11  ;;  %7927 = vmatpush3.bf16.msra.mxu1 %v9149_v8  ;;  %v9185_v8 = vld [vmem:[%s10796_s7 + $0x78] sm:$0xff]   ;;  %v9187_v10 = vld [vmem:[%s10796_s7 + $0x80] sm:$0xff]   ;;  %v9188_v11 = vld [vmem:[%s10797_s3 + $0x8] sm:$0xff]  }
 0x135   :  { %7928 = vmatprep.subr.bf16.mxu1 %v9159_v12 }
 0x138   :  { %7929 = vmatpush3.bf16.msra.mxu1 %v9159_v12  ;;  %v9189_v12 = vld [vmem:[%s10796_s7 + $0x88] sm:$0xff]  }
 0x139   :  { %7930 = vmatprep.subr.bf16.mxu1 %v9169_v14 }
 0x13a   :  { %7867 = vmatmul.mubr.bf16.gmra.mrb[12].mxu1 %v9124_v13  ;;  %v9191_v13 = vld [vmem:[%s10797_s3 + $0x10] sm:$0xff]  }
 0x13b   :  { %8219 = vmatmul.mubr.bf16.gmra.mrb[44].mxu0 %v9125_v15  ;;  %7870 = vmatprep.mubr.bf16.mxu1 %v9126_v16  ;;  %v9287_v15 = vld [vmem:[%s10789_s9 + $0x108] sm:$0xff]   ;;  %v9193_v16 = vld [vmem:[%s10797_s3 + $0x18] sm:$0xff]  }
 0x13c   :  { %8222 = vmatprep.mubr.bf16.mxu0 %v9127_v17  ;;  %7931 = vmatpush3.bf16.msra.mxu1 %v9169_v14  ;;  %v9192_v14 = vld [vmem:[%s10796_s7 + $0x90] sm:$0xff]   ;;  %v9194_v17 = vld [vmem:[%s10796_s7 + $0x98] sm:$0xff]  }
 0x13d   :  { %7932 = vmatprep.subr.bf16.mxu1 %v9179_v18 }
 0x140   :  { %7933 = vmatpush3.bf16.msra.mxu1 %v9179_v18  ;;  %v9195_v18 = vld [vmem:[%s10797_s3 + $0x20] sm:$0xff]  }
 0x141   :  { %8398 = vmatprep.subr.bf16.mxu1 %v10022_v23 }
 0x142   :  { %7871 = vmatmul.mubr.bf16.gmra.mrb[16].mxu1 %v9128_v19  ;;  %v9196_v19 = vld [vmem:[%s10796_s7 + $0xa0] sm:$0xff]  }
 0x143   :  { %8223 = vmatmul.mubr.bf16.gmra.mrb[48].mxu0 %v9130_v20  ;;  %7874 = vmatprep.mubr.bf16.mxu1 %v9132_v21  ;;  %v9288_v20 = vld [vmem:[%s10789_s9 + $0x110] sm:$0xff]   ;;  %v9289_v21 = vld [vmem:[%s10789_s9 + $0x118] sm:$0xff]  }
 0x144   :  { %8226 = vmatprep.mubr.bf16.mxu0 %v9133_v22  ;;  %v9197_v22 = vld [vmem:[%s10797_s3 + $0x28] sm:$0xff]  }
 0x14a   :  { %7875 = vmatmul.mubr.bf16.gmra.mrb[20].mxu1 %v9134_v24  ;;  %v9200_v24 = vld [vmem:[%s10797_s3 + $0x30] sm:$0xff]  }
 0x14b   :  { %8227 = vmatmul.mubr.bf16.gmra.mrb[52].mxu0 %v9135_v25  ;;  %7878 = vmatprep.mubr.bf16.mxu1 %v9136_v26  ;;  %v9201_v25 = vld [vmem:[%s10796_s7 + $0xb0] sm:$0xff]   ;;  %v9290_v26 = vld [vmem:[%s10789_s9 + $0x120] sm:$0xff]  }
 0x14c   :  { %8230 = vmatprep.mubr.bf16.mxu0 %v9137_v27  ;;  %v9291_v27 = vld [vmem:[%s10789_s9 + $0x128] sm:$0xff]  }
 0x152   :  { %7879 = vmatmul.mubr.bf16.gmra.mrb[24].mxu1 %v9138_v28  ;;  %v9202_v28 = vld [vmem:[%s10797_s3 + $0x38] sm:$0xff]  }
 0x153   :  { %8231 = vmatmul.mubr.bf16.gmra.mrb[56].mxu0 %v9140_v29  ;;  %7882 = vmatprep.mubr.bf16.mxu1 %v9142_v30  ;;  %v9203_v29 = vld [vmem:[%s10796_s7 + $0xb8] sm:$0xff]   ;;  %v9204_v30 = vld [vmem:[%s10797_s3 + $0x40] sm:$0xff]  }
 0x154   :  { %8234 = vmatprep.mubr.bf16.mxu0 %v9143_v31  ;;  %v9205_v31 = vld [vmem:[%s10796_s7 + $0xc0] sm:$0xff]  }
 0x15a   :  { %7883 = vmatmul.mubr.bf16.gmra.mrb[28].mxu1 %v9144_v32  ;;  %v9292_v32 = vld [vmem:[%s10789_s9 + $0x130] sm:$0xff]  }
 0x15b   :  { %8235 = vmatmul.mubr.bf16.gmra.mrb[60].mxu0 %v9145_v33  ;;  %7886 = vmatprep.mubr.bf16.mxu1 %v9146_v34  ;;  %v9293_v33 = vld [vmem:[%s10789_s9 + $0x138] sm:$0xff]   ;;  %v9206_v34 = vld [vmem:[%s10797_s3 + $0x48] sm:$0xff]  }
 0x15c   :  { %8254 = vmatprep.mubr.bf16.mxu0 %v9147_v35  ;;  %v9207_v35 = vld [vmem:[%s10796_s7 + $0xc8] sm:$0xff]  }
 0x162   :  { %7887 = vmatmul.mubr.bf16.gmra.mrb[32].mxu1 %v9148_v36  ;;  %v9209_v36 = vld [vmem:[%s10797_s3 + $0x50] sm:$0xff]  }
 0x163   :  { %8255 = vmatmul.mubr.bf16.vlgmr.msra.gmra.mrb[0].mxu0 %v9150_v37  ;;  %7890 = vmatprep.mubr.bf16.mxu1 %v9152_v38  ;;  %v9210_v37 = vld [vmem:[%s10796_s7 + $0xd0] sm:$0xff]   ;;  %v9211_v38 = vld [vmem:[%s10797_s3 + $0x58] sm:$0xff]  }
 0x164   :  { %8319 = vmatpush3.bf16.msra.mxu0 %v9889_v44  ;;  %8258 = vmatprep.mubr.bf16.mxu0 %v9153_v39  ;;  %v9157_v44 = vld [vmem:[%s10796_s7 + $0x20] sm:$0xff]   ;;  %v9212_v39 = vld [vmem:[%s10796_s7 + $0xd8] sm:$0xff]  }
 0x165   :  { %8320 = vmatprep.subr.bf16.mxu0 %v9161_v40 }
 0x168   :  { %8321 = vmatpush3.bf16.msra.mxu0 %v9161_v40  ;;  %v9213_v40 = vld [vmem:[%s10797_s3 + $0x60] sm:$0xff]  }
 0x169   :  { %8322 = vmatprep.subr.bf16.mxu0 %v9171_v42 }
 0x16a   :  { %7891 = vmatmul.mubr.bf16.gmra.mrb[36].mxu1 %v9154_v41  ;;  %v9214_v41 = vld [vmem:[%s10796_s7 + $0xe0] sm:$0xff]  }
 0x16b   :  { %8259 = vmatmul.mubr.bf16.gmra.mrb[4].mxu0 %v9155_v43  ;;  %7894 = vmatprep.mubr.bf16.mxu1 %v9156_v45  ;;  %v9216_v43 = vld [vmem:[%s10796_s7 + $0xe8] sm:$0xff]   ;;  %v9218_v45 = vld [vmem:[%s10797_s3 + $0x70] sm:$0xff]  }
 0x16c   :  { %8262 = vmatprep.mubr.bf16.mxu0 %v9157_v44  ;;  %8323 = vmatpush3.bf16.msra.mxu0 %v9171_v42  ;;  %v9215_v42 = vld [vmem:[%s10797_s3 + $0x68] sm:$0xff]   ;;  %v9219_v44 = vld [vmem:[%s10796_s7 + $0xf0] sm:$0xff]  }
 0x16d   :  { %8324 = vmatprep.subr.bf16.mxu0 %v9181_v46 }
 0x170   :  { %8325 = vmatpush3.bf16.msra.mxu0 %v9181_v46  ;;  %v9220_v46 = vld [vmem:[%s10797_s3 + $0x78] sm:$0xff]  }
 0x171   :  { %8326 = vmatprep.subr.bf16.mxu0 %v9190_v48 }
 0x172   :  { %7895 = vmatmul.mubr.bf16.gmra.mrb[40].mxu1 %v9158_v47  ;;  %v9221_v47 = vld [vmem:[%s10796_s7 + $0xf8] sm:$0xff]  }
 0x173   :  { %8263 = vmatmul.mubr.bf16.gmra.mrb[8].mxu0 %v9160_v49  ;;  %7898 = vmatprep.mubr.bf16.mxu1 %v9162_v50  ;;  %v9223_v49 = vld [vmem:[%s10798_s8] sm:$0xff]   ;;  %v9224_v50 = vld [vmem:[%s10797_s3 + $0x88] sm:$0xff]  }
 0x174   :  { %8266 = vmatprep.mubr.bf16.mxu0 %v9163_v51  ;;  %8327 = vmatpush3.bf16.msra.mxu0 %v9190_v48  ;;  %v9222_v48 = vld [vmem:[%s10797_s3 + $0x80] sm:$0xff]   ;;  %v9225_v51 = vld [vmem:[%s10798_s8 + $0x8] sm:$0xff]  }
 0x175   :  { %8328 = vmatprep.subr.bf16.mxu0 %v9199_v52 }
 0x178   :  { %8329 = vmatpush3.bf16.msra.mxu0 %v9199_v52  ;;  %v9226_v52 = vld [vmem:[%s10797_s3 + $0x90] sm:$0xff]  }
 0x179   :  { %8330 = vmatprep.subr.bf16.mxu0 %v9208_v53 }
 0x17a   :  { %7899 = vmatmul.mubr.bf16.gmra.mrb[44].mxu1 %v9164_v54  ;;  %v9228_v54 = vld [vmem:[%s10797_s3 + $0x98] sm:$0xff]  }
 0x17b   :  { %8267 = vmatmul.mubr.bf16.gmra.mrb[12].mxu0 %v9165_v55  ;;  %7902 = vmatprep.mubr.bf16.mxu1 %v9166_v56  ;;  %v9229_v55 = vld [vmem:[%s10798_s8 + $0x18] sm:$0xff]   ;;  %v9230_v56 = vld [vmem:[%s10797_s3 + $0xa0] sm:$0xff]  }
 0x17c   :  { %8270 = vmatprep.mubr.bf16.mxu0 %v9167_v57  ;;  %8331 = vmatpush3.bf16.msra.mxu0 %v9208_v53  ;;  %v9227_v53 = vld [vmem:[%s10798_s8 + $0x10] sm:$0xff]   ;;  %v9231_v57 = vld [vmem:[%s10798_s8 + $0x20] sm:$0xff]  }
 0x17d   :  { %8332 = vmatprep.subr.bf16.mxu0 %v9217_v58 }
 0x180   :  { %8333 = vmatpush3.bf16.msra.mxu0 %v9217_v58  ;;  %v9232_v58 = vld [vmem:[%s10797_s3 + $0xa8] sm:$0xff]  }
 0x182   :  { %7903 = vmatmul.mubr.bf16.gmra.mrb[48].mxu1 %v9168_v59  ;;  %v9233_v59 = vld [vmem:[%s10798_s8 + $0x28] sm:$0xff]  }
 0x183   :  { %8271 = vmatmul.mubr.bf16.gmra.mrb[16].mxu0 %v9170_v60  ;;  %7906 = vmatprep.mubr.bf16.mxu1 %v9172_v61  ;;  %v9234_v60 = vld [vmem:[%s10797_s3 + $0xb0] sm:$0xff]  }
 0x184   :  { %8274 = vmatprep.mubr.bf16.mxu0 %v9173_v62  ;;  %v9235_v61 = vld [vmem:[%s10798_s8 + $0x30] sm:$0xff]   ;;  %v9236_v62 = vld [vmem:[%s10797_s3 + $0xb8] sm:$0xff]  }
 0x18a   :  { %7907 = vmatmul.mubr.bf16.gmra.mrb[52].mxu1 %v9174_v63  ;;  %v9237_v63 = vld [vmem:[%s10798_s8 + $0x38] sm:$0xff]  }
 0x18b   :  { %8275 = vmatmul.mubr.bf16.gmra.mrb[20].mxu0 %v9175_v0  ;;  %7910 = vmatprep.mubr.bf16.mxu1 %v9176_v1  ;;  %v9238_v0 = vld [vmem:[%s10797_s3 + $0xc0] sm:$0xff]  }
 0x18c   :  { %8278 = vmatprep.mubr.bf16.mxu0 %v9177_v2  ;;  %v9239_v1 = vld [vmem:[%s10798_s8 + $0x40] sm:$0xff]   ;;  %v9240_v2 = vld [vmem:[%s10797_s3 + $0xc8] sm:$0xff]  }
 0x192   :  { %7911 = vmatmul.mubr.bf16.gmra.mrb[56].mxu1 %v9178_v3  ;;  %v9241_v3 = vld [vmem:[%s10798_s8 + $0x48] sm:$0xff]  }
 0x193   :  { %8279 = vmatmul.mubr.bf16.gmra.mrb[24].mxu0 %v9180_v5  ;;  %7914 = vmatprep.mubr.bf16.mxu1 %v9182_v4  ;;  %v9242_v5 = vld [vmem:[%s10797_s3 + $0xd0] sm:$0xff]  }
 0x194   :  { %8282 = vmatprep.mubr.bf16.mxu0 %v9183_v6  ;;  %v9243_v4 = vld [vmem:[%s10798_s8 + $0x50] sm:$0xff]   ;;  %v9244_v6 = vld [vmem:[%s10797_s3 + $0xd8] sm:$0xff]  }
 0x19a   :  { %7915 = vmatmul.mubr.bf16.gmra.mrb[60].mxu1 %v9184_v7  ;;  %v9245_v7 = vld [vmem:[%s10798_s8 + $0x58] sm:$0xff]  }
 0x19b   :  { %8283 = vmatmul.mubr.bf16.gmra.mrb[28].mxu0 %v9185_v8  ;;  %7934 = vmatprep.mubr.bf16.mxu1 %v9186_v9  ;;  %v9246_v8 = vld [vmem:[%s10797_s3 + $0xe0] sm:$0xff]  }
 0x19c   :  { %8286 = vmatprep.mubr.bf16.mxu0 %v9187_v10  ;;  %v9247_v9 = vld [vmem:[%s10798_s8 + $0x60] sm:$0xff]   ;;  %v9248_v10 = vld [vmem:[%s10797_s3 + $0xe8] sm:$0xff]  }
 0x1a2   :  { %7935 = vmatmul.mubr.bf16.vlgmr.msra.gmra.mrb[0].mxu1 %v9188_v11  ;;  %v9249_v11 = vld [vmem:[%s10798_s8 + $0x68] sm:$0xff]  }
 0x1a3   :  { %8287 = vmatmul.mubr.bf16.gmra.mrb[32].mxu0 %v9189_v12  ;;  %8406 = vmatpush3.bf16.msra.mxu1 %v10022_v23  ;;  %v9198_v23 = vld [vmem:[%s10796_s7 + $0xa8] sm:$0xff]   ;;  %v9250_v12 = vld [vmem:[%s10797_s3 + $0xf0] sm:$0xff]  }
 0x1a4   :  { %7938 = vmatprep.mubr.bf16.mxu1 %v9191_v13  ;;  %8290 = vmatprep.mubr.bf16.mxu0 %v9192_v14  ;;  %v9251_v13 = vld [vmem:[%s10798_s8 + $0x70] sm:$0xff]   ;;  %v9252_v14 = vld [vmem:[%s10797_s3 + $0xf8] sm:$0xff]  }
 0x1a5   :  { %8399 = vmatprep.subr.bf16.mxu1 %v9287_v15 }
 0x1a7   :  { %8407 = vmatpush3.bf16.msra.mxu1 %v9287_v15  ;;  %v9253_v15 = vld [vmem:[%s10798_s8 + $0x78] sm:$0xff]  }
 0x1a8   :  { %8400 = vmatprep.subr.bf16.mxu1 %v9288_v20 }
 0x1aa   :  { %7939 = vmatmul.mubr.bf16.gmra.mrb[4].mxu1 %v9193_v16  ;;  %v9254_v16 = vld [vmem:[%s10791_s4 + $0x80] sm:$0xff]  }
 0x1ab   :  { %8291 = vmatmul.mubr.bf16.gmra.mrb[36].mxu0 %v9194_v17  ;;  %7942 = vmatprep.mubr.bf16.mxu1 %v9195_v18  ;;  %v9255_v17 = vld [vmem:[%s10798_s8 + $0x80] sm:$0xff]   ;;  %v9256_v18 = vld [vmem:[%s10791_s4 + $0x88] sm:$0xff]  }
 0x1ac   :  { %8294 = vmatprep.mubr.bf16.mxu0 %v9196_v19  ;;  %8408 = vmatpush3.bf16.msra.mxu1 %v9288_v20  ;;  %v9257_v19 = vld [vmem:[%s10798_s8 + $0x88] sm:$0xff]   ;;  %v9258_v20 = vld [vmem:[%s10791_s4 + $0x90] sm:$0xff]  }
 0x1ad   :  { %8401 = vmatprep.subr.bf16.mxu1 %v9289_v21 }
 0x1b0   :  { %8409 = vmatpush3.bf16.msra.mxu1 %v9289_v21  ;;  %v9259_v21 = vld [vmem:[%s10798_s8 + $0x90] sm:$0xff]  }
 0x1b1   :  { %8402 = vmatprep.subr.bf16.mxu1 %v9290_v26 }
 0x1b2   :  { %7943 = vmatmul.mubr.bf16.gmra.mrb[8].mxu1 %v9197_v22  ;;  %v9260_v22 = vld [vmem:[%s10791_s4 + $0x98] sm:$0xff]  }
 0x1b3   :  { %8295 = vmatmul.mubr.bf16.gmra.mrb[40].mxu0 %v9198_v23  ;;  %7946 = vmatprep.mubr.bf16.mxu1 %v9200_v24  ;;  %v9261_v23 = vld [vmem:[%s10798_s8 + $0x98] sm:$0xff]   ;;  %v9262_v24 = vld [vmem:[%s10791_s4 + $0xa0] sm:$0xff]  }
 0x1b4   :  { %8298 = vmatprep.mubr.bf16.mxu0 %v9201_v25  ;;  %8410 = vmatpush3.bf16.msra.mxu1 %v9290_v26  ;;  %v9263_v25 = vld [vmem:[%s10798_s8 + $0xa0] sm:$0xff]   ;;  %v9264_v26 = vld [vmem:[%s10791_s4 + $0xa8] sm:$0xff]  }
 0x1b5   :  { %8403 = vmatprep.subr.bf16.mxu1 %v9291_v27 }
 0x1b8   :  { %8411 = vmatpush3.bf16.msra.mxu1 %v9291_v27  ;;  %v9265_v27 = vld [vmem:[%s10798_s8 + $0xa8] sm:$0xff]  }
 0x1b9   :  { %8404 = vmatprep.subr.bf16.mxu1 %v9292_v32 }
 0x1ba   :  { %7947 = vmatmul.mubr.bf16.gmra.mrb[12].mxu1 %v9202_v28  ;;  %v9266_v28 = vld [vmem:[%s10791_s4 + $0xb0] sm:$0xff]  }
 0x1bb   :  { %8299 = vmatmul.mubr.bf16.gmra.mrb[44].mxu0 %v9203_v29  ;;  %7950 = vmatprep.mubr.bf16.mxu1 %v9204_v30  ;;  %v9267_v29 = vld [vmem:[%s10798_s8 + $0xb0] sm:$0xff]   ;;  %v9268_v30 = vld [vmem:[%s10791_s4 + $0xb8] sm:$0xff]  }
 0x1bc   :  { %8302 = vmatprep.mubr.bf16.mxu0 %v9205_v31  ;;  %8412 = vmatpush3.bf16.msra.mxu1 %v9292_v32  ;;  %v9269_v31 = vld [vmem:[%s10798_s8 + $0xb8] sm:$0xff]   ;;  %v9270_v32 = vld [vmem:[%s10791_s4 + $0xc0] sm:$0xff]  }
 0x1bd   :  { %8405 = vmatprep.subr.bf16.mxu1 %v9293_v33 }
 0x1c0   :  { %8413 = vmatpush3.bf16.msra.mxu1 %v9293_v33  ;;  %v9271_v33 = vld [vmem:[%s10798_s8 + $0xc0] sm:$0xff]  }
 0x1c2   :  { %7951 = vmatmul.mubr.bf16.gmra.mrb[16].mxu1 %v9206_v34  ;;  %v9272_v34 = vld [vmem:[%s10791_s4 + $0xc8] sm:$0xff]  }
 0x1c3   :  { %8303 = vmatmul.mubr.bf16.gmra.mrb[48].mxu0 %v9207_v35  ;;  %7954 = vmatprep.mubr.bf16.mxu1 %v9209_v36  ;;  %v9273_v35 = vld [vmem:[%s10798_s8 + $0xc8] sm:$0xff]   ;;  %v9274_v36 = vld [vmem:[%s10791_s4 + $0xd0] sm:$0xff]  }
 0x1c4   :  { %8306 = vmatprep.mubr.bf16.mxu0 %v9210_v37  ;;  %v9275_v37 = vld [vmem:[%s10798_s8 + $0xd0] sm:$0xff]  }
 0x1ca   :  { %7955 = vmatmul.mubr.bf16.gmra.mrb[20].mxu1 %v9211_v38  ;;  %v9276_v38 = vld [vmem:[%s10791_s4 + $0xd8] sm:$0xff]  }
 0x1cb   :  { %8307 = vmatmul.mubr.bf16.gmra.mrb[52].mxu0 %v9212_v39  ;;  %7958 = vmatprep.mubr.bf16.mxu1 %v9213_v40  ;;  %v9277_v39 = vld [vmem:[%s10798_s8 + $0xd8] sm:$0xff]   ;;  %v9278_v40 = vld [vmem:[%s10791_s4 + $0xe0] sm:$0xff]  }
 0x1cc   :  { %8310 = vmatprep.mubr.bf16.mxu0 %v9214_v41  ;;  %v9279_v41 = vld [vmem:[%s10798_s8 + $0xe0] sm:$0xff]  }
 0x1d2   :  { %7959 = vmatmul.mubr.bf16.gmra.mrb[24].mxu1 %v9215_v42  ;;  %v9280_v42 = vld [vmem:[%s10791_s4 + $0xe8] sm:$0xff]  }
 0x1d3   :  { %8311 = vmatmul.mubr.bf16.gmra.mrb[56].mxu0 %v9216_v43  ;;  %7962 = vmatprep.mubr.bf16.mxu1 %v9218_v45  ;;  %v9281_v43 = vld [vmem:[%s10798_s8 + $0xe8] sm:$0xff]   ;;  %v9282_v45 = vld [vmem:[%s10791_s4 + $0xf0] sm:$0xff]  }
 0x1d4   :  { %8314 = vmatprep.mubr.bf16.mxu0 %v9219_v44  ;;  %v9283_v44 = vld [vmem:[%s10798_s8 + $0xf0] sm:$0xff]  }
 0x1da   :  { %7963 = vmatmul.mubr.bf16.gmra.mrb[28].mxu1 %v9220_v46  ;;  %v9284_v46 = vld [vmem:[%s10791_s4 + $0xf8] sm:$0xff]  }
 0x1db   :  { %8315 = vmatmul.mubr.bf16.gmra.mrb[60].mxu0 %v9221_v47  ;;  %7966 = vmatprep.mubr.bf16.mxu1 %v9222_v48  ;;  %v9285_v47 = vld [vmem:[%s10798_s8 + $0xf8] sm:$0xff]  }
 0x1dc   :  { %8334 = vmatprep.mubr.bf16.mxu0 %v9223_v49 }
 0x1e2   :  { %7967 = vmatmul.mubr.bf16.gmra.mrb[32].mxu1 %v9224_v50 }
 0x1e3   :  { %8335 = vmatmul.mubr.bf16.vlgmr.msra.gmra.mrb[0].mxu0 %v9225_v51  ;;  %7970 = vmatprep.mubr.bf16.mxu1 %v9226_v52 }
 0x1e4   :  { %8338 = vmatprep.mubr.bf16.mxu0 %v9227_v53 }
 0x1ea   :  { %7971 = vmatmul.mubr.bf16.gmra.mrb[36].mxu1 %v9228_v54 }
 0x1eb   :  { %8339 = vmatmul.mubr.bf16.gmra.mrb[4].mxu0 %v9229_v55  ;;  %7974 = vmatprep.mubr.bf16.mxu1 %v9230_v56 }
 0x1ec   :  { %8342 = vmatprep.mubr.bf16.mxu0 %v9231_v57 }
 0x1f2   :  { %7975 = vmatmul.mubr.bf16.gmra.mrb[40].mxu1 %v9232_v58 }
 0x1f3   :  { %8343 = vmatmul.mubr.bf16.gmra.mrb[8].mxu0 %v9233_v59  ;;  %7978 = vmatprep.mubr.bf16.mxu1 %v9234_v60 }
 0x1f4   :  { %8346 = vmatprep.mubr.bf16.mxu0 %v9235_v61 }
 0x1fa   :  { %7979 = vmatmul.mubr.bf16.gmra.mrb[44].mxu1 %v9236_v62 }
 0x1fb   :  { %8347 = vmatmul.mubr.bf16.gmra.mrb[12].mxu0 %v9237_v63  ;;  %7982 = vmatprep.mubr.bf16.mxu1 %v9238_v0 }
 0x1fc   :  { %8350 = vmatprep.mubr.bf16.mxu0 %v9239_v1 }
 0x202   :  { %7983 = vmatmul.mubr.bf16.gmra.mrb[48].mxu1 %v9240_v2 }
 0x203   :  { %8351 = vmatmul.mubr.bf16.gmra.mrb[16].mxu0 %v9241_v3  ;;  %7986 = vmatprep.mubr.bf16.mxu1 %v9242_v5 }
 0x204   :  { %8354 = vmatprep.mubr.bf16.mxu0 %v9243_v4 }
 0x20a   :  { %7987 = vmatmul.mubr.bf16.gmra.mrb[52].mxu1 %v9244_v6 }
 0x20b   :  { %8355 = vmatmul.mubr.bf16.gmra.mrb[20].mxu0 %v9245_v7  ;;  %7990 = vmatprep.mubr.bf16.mxu1 %v9246_v8 }
 0x20c   :  { %8358 = vmatprep.mubr.bf16.mxu0 %v9247_v9 }
 0x212   :  { %7991 = vmatmul.mubr.bf16.gmra.mrb[56].mxu1 %v9248_v10 }
 0x213   :  { %8359 = vmatmul.mubr.bf16.gmra.mrb[24].mxu0 %v9249_v11  ;;  %7994 = vmatprep.mubr.bf16.mxu1 %v9250_v12 }
 0x214   :  { %8362 = vmatprep.mubr.bf16.mxu0 %v9251_v13 }
 0x21a   :  { %7995 = vmatmul.mubr.bf16.gmra.mrb[60].mxu1 %v9252_v14 }
 0x21b   :  { %8363 = vmatmul.mubr.bf16.gmra.mrb[28].mxu0 %v9253_v15  ;;  %8046 = vmatprep.mubr.bf16.mxu1 %v9254_v16 }
 0x21c   :  { %8366 = vmatprep.mubr.bf16.mxu0 %v9255_v17  ;;  %v10534_v17 = vld [vmem:[%s10799_s10] ss:$0 sm:$0xff] }
 0x222   :  { %8047 = vmatmul.mubr.bf16.vlgmr.msra.gmra.mrb[32].mxu1 %v9256_v18 }
 0x223   :  { %8367 = vmatmul.mubr.bf16.gmra.mrb[32].mxu0 %v9257_v19  ;;  %8050 = vmatprep.mubr.bf16.mxu1 %v9258_v20  ;;  %v10539_v20 = vld [vmem:[%s10800_s11] ss:$0 sm:$0xff] }
 0x224   :  { %8370 = vmatprep.mubr.bf16.mxu0 %v9259_v21 }
 0x22a   :  { %8051 = vmatmul.mubr.bf16.gmra.mrb[36].mxu1 %v9260_v22 }
 0x22b   :  { %8371 = vmatmul.mubr.bf16.gmra.mrb[36].mxu0 %v9261_v23  ;;  %8054 = vmatprep.mubr.bf16.mxu1 %v9262_v24 }
 0x22c   :  { %8374 = vmatprep.mubr.bf16.mxu0 %v9263_v25 }
 0x232   :  { %8055 = vmatmul.mubr.bf16.gmra.mrb[40].mxu1 %v9264_v26 }
 0x233   :  { %8375 = vmatmul.mubr.bf16.gmra.mrb[40].mxu0 %v9265_v27  ;;  %8058 = vmatprep.mubr.bf16.mxu1 %v9266_v28 }
 0x234   :  { %8378 = vmatprep.mubr.bf16.mxu0 %v9267_v29 }
 0x23a   :  { %8059 = vmatmul.mubr.bf16.gmra.mrb[44].mxu1 %v9268_v30 }
 0x23b   :  { %8379 = vmatmul.mubr.bf16.gmra.mrb[44].mxu0 %v9269_v31  ;;  %8062 = vmatprep.mubr.bf16.mxu1 %v9270_v32 }
 0x23c   :  { %8382 = vmatprep.mubr.bf16.mxu0 %v9271_v33 }
 0x242   :  { %8063 = vmatmul.mubr.bf16.gmra.mrb[48].mxu1 %v9272_v34 }
 0x243   :  { %8383 = vmatmul.mubr.bf16.gmra.mrb[48].mxu0 %v9273_v35  ;;  %8066 = vmatprep.mubr.bf16.mxu1 %v9274_v36 }
 0x244   :  { %8386 = vmatprep.mubr.bf16.mxu0 %v9275_v37 }
 0x24a   :  { %8067 = vmatmul.mubr.bf16.gmra.mrb[52].mxu1 %v9276_v38 }
 0x24b   :  { %8387 = vmatmul.mubr.bf16.gmra.mrb[52].mxu0 %v9277_v39  ;;  %8070 = vmatprep.mubr.bf16.mxu1 %v9278_v40 }
 0x24c   :  { %8390 = vmatprep.mubr.bf16.mxu0 %v9279_v41 }
 0x252   :  { %8071 = vmatmul.mubr.bf16.gmra.mrb[56].mxu1 %v9280_v42 }
 0x253   :  { %8391 = vmatmul.mubr.bf16.gmra.mrb[56].mxu0 %v9281_v43  ;;  %8074 = vmatprep.mubr.bf16.mxu1 %v9282_v45 }
 0x254   :  { %8394 = vmatprep.mubr.bf16.mxu0 %v9283_v44 }
 0x25a   :  { %8075 = vmatmul.mubr.bf16.gmra.mrb[60].mxu1 %v9284_v46 }
 0x25b   :  { %8395 = vmatmul.mubr.bf16.gmra.mrb[60].mxu0 %v9285_v47 }
 0x275   :  { %v7936_v48 = vpop.f32.mrb[0].mxu1 }
 0x276   :  { %v2290_v49 = vpop.f32.mrb[1].mxu1 }
 0x277   :  { %v7937_v50 = vpop.f32.mrb[2].mxu1 }
 0x278   :  { %v2293_v51 = vpop.f32.mrb[3].mxu1 }
 0x27d   :  { %v7940_v52 = vpop.f32.mrb[4].mxu1 }
 0x27e   :  { %v2306_v53 = vpop.f32.mrb[5].mxu1 }
 0x27f   :  { %v7941_v54 = vpop.f32.mrb[6].mxu1 }
 0x280   :  { %v2309_v55 = vpop.f32.mrb[7].mxu1 }
 0x285   :  { %v10483_v56 = vpop.f32.mrb[8].mxu1 }
 0x286   :  { %v10485_v57 = vpop.f32.mrb[9].mxu1 }
 0x287   :  { %v10487_v58 = vpop.f32.mrb[10].mxu1 }
 0x288   :  { %v10489_v59 = vpop.f32.mrb[11].mxu1 }
 0x28d   :  { %v10491_v60 = vpop.f32.mrb[12].mxu1 }
 0x28e   :  { %v10493_v61 = vpop.f32.mrb[13].mxu1 }
 0x28f   :  { %v10495_v62 = vpop.f32.mrb[14].mxu1 }
 0x290   :  { %v10497_v63 = vpop.f32.mrb[15].mxu1 }
 0x295   :  { %v10499_v0 = vpop.f32.mrb[16].mxu1 }
 0x296   :  { %v10501_v1 = vpop.f32.mrb[17].mxu1 }
 0x297   :  { %v10503_v2 = vpop.f32.mrb[18].mxu1 }
 0x298   :  { %v10505_v3 = vpop.f32.mrb[19].mxu1 }
 0x29d   :  { %v10507_v5 = vpop.f32.mrb[20].mxu1 }
 0x29e   :  { %v10509_v4 = vpop.f32.mrb[21].mxu1 }
 0x29f   :  { %v10511_v6 = vpop.f32.mrb[22].mxu1 }
 0x2a0   :  { %v10513_v7 = vpop.f32.mrb[23].mxu1 }
 0x2a5   :  { %v10515_v8 = vpop.f32.mrb[24].mxu1 }
 0x2a6   :  { %v10517_v9 = vpop.f32.mrb[25].mxu1 }
 0x2a7   :  { %v10519_v10 = vpop.f32.mrb[26].mxu1 }
 0x2a8   :  { %v10521_v11 = vpop.f32.mrb[27].mxu1 }
 0x2ad   :  { %v10523_v12 = vpop.f32.mrb[28].mxu1 }
 0x2ae   :  { %v10525_v13 = vpop.f32.mrb[29].mxu1 }
 0x2af   :  { %v10527_v14 = vpop.f32.mrb[30].mxu1 }
 0x2b0   :  { %v10529_v15 = vpop.f32.mrb[31].mxu1 }
 0x2b6   :  { %v8336_v16 = vpop.f32.mrb[0].mxu0 }
 0x2b7   :  { %v8414_v18 = vadd.f32 %v8336_v16, %v7936_v48  ;;  %v5660_v19 = vpop.f32.mrb[1].mxu0 }
 0x2b8   :  { %v8415_v21 = vadd.f32 %v5660_v19, %v2290_v49  ;;  %v8337_v22 = vpop.f32.mrb[2].mxu0 }
 0x2b9   :  { %v5988_v23 = vmul.f32 %v8414_v18, %v10534_v17  ;;  %v8416_v24 = vadd.f32 %v8337_v22, %v7937_v50  ;;  %v5663_v25 = vpop.f32.mrb[3].mxu0 }
 0x2ba   :  { %v5986_v26 = vmul.f32 %v8415_v21, %v10534_v17  ;;  %v8417_v27 = vadd.f32 %v5663_v25, %v2293_v51 }
 0x2bb   :  { %v6059_v28 = vadd.f32 %v10539_v20, %v5988_v23  ;;  %v5989_v29 = vmul.f32 %v8416_v24, %v10534_v17 }
 0x2bc   :  { %v6057_v30 = vadd.f32 %v10539_v20, %v5986_v26  ;;  %v5987_v31 = vmul.f32 %v8417_v27, %v10534_v17 }
 0x2bd   :  { %v6060_v32 = vadd.f32 %v10539_v20, %v5989_v29  ;;  %v6123_v35 = vmax.f32 %v6059_v28, 0.0 }
 0x2be   :  { %v6058_v33 = vadd.f32 %v10539_v20, %v5987_v31  ;;  %v8340_v34 = vpop.f32.mrb[4].mxu0  ;;  %v6121_v39 = vmax.f32 %v6057_v30, 0.0 }
 0x2bf   :  { %v6124_v36 = vmax.f32 %v6060_v32, 0.0  ;;  %v8418_v37 = vadd.f32 %v8340_v34, %v7940_v52  ;;  %v5676_v38 = vpop.f32.mrb[5].mxu0 }
 0x2c0   :  { %v6122_v40 = vmax.f32 %v6058_v33, 0.0  ;;  %v8419_v41 = vadd.f32 %v5676_v38, %v2306_v53  ;;  %v8341_v42 = vpop.f32.mrb[6].mxu0 }
 0x2c1   :  { %v7135_v43 = vpack.c.bf16 %v6124_v36, %v6123_v35  ;;  %v5992_v45 = vmul.f32 %v8418_v37, %v10534_v17  ;;  %v8420_v44 = vadd.f32 %v8341_v42, %v7941_v54  ;;  %v5679_v46 = vpop.f32.mrb[7].mxu0 }
 0x2c2   :  { %v7130_v47 = vpack.c.bf16 %v6122_v40, %v6121_v39  ;;  %v5990_v48 = vmul.f32 %v8419_v41, %v10534_v17  ;;  %v8421_v49 = vadd.f32 %v5679_v46, %v2309_v55 }
 0x2c3   :  { %7287 = vst [vmem:[%s10801_s12 + $0x8] sm:$0xff] %v7135_v43   ;;  %v6063_v50 = vadd.f32 %v10539_v20, %v5992_v45  ;;  %v5993_v51 = vmul.f32 %v8420_v44, %v10534_v17 }
 0x2c4   :  { %7131 = vst [vmem:[%s10801_s12] sm:$0xff] %v7130_v47   ;;  %v6061_v52 = vadd.f32 %v10539_v20, %v5990_v48  ;;  %v5991_v53 = vmul.f32 %v8421_v49, %v10534_v17 }
 0x2c5   :  { %v6064_v54 = vadd.f32 %v10539_v20, %v5993_v51  ;;  %v6127_v18 = vmax.f32 %v6063_v50, 0.0 }
 0x2c6   :  { %v6062_v55 = vadd.f32 %v10539_v20, %v5991_v53  ;;  %v8344_v16 = vpop.f32.mrb[8].mxu0  ;;  %v6125_v23 = vmax.f32 %v6061_v52, 0.0 }
 0x2c7   :  { %v6128_v19 = vmax.f32 %v6064_v54, 0.0  ;;  %v8422_v21 = vadd.f32 %v8344_v16, %v10483_v56  ;;  %v5692_v22 = vpop.f32.mrb[9].mxu0 }
 0x2c8   :  { %v6126_v24 = vmax.f32 %v6062_v55, 0.0  ;;  %v8423_v25 = vadd.f32 %v5692_v22, %v10485_v57  ;;  %v8345_v26 = vpop.f32.mrb[10].mxu0 }
 0x2c9   :  { %v7145_v27 = vpack.c.bf16 %v6128_v19, %v6127_v18  ;;  %v5996_v28 = vmul.f32 %v8422_v21, %v10534_v17  ;;  %v8424_v29 = vadd.f32 %v8345_v26, %v10487_v58  ;;  %v5695_v30 = vpop.f32.mrb[11].mxu0 }
 0x2ca   :  { %v7140_v31 = vpack.c.bf16 %v6126_v24, %v6125_v23  ;;  %v5994_v32 = vmul.f32 %v8423_v25, %v10534_v17  ;;  %v8425_v33 = vadd.f32 %v5695_v30, %v10489_v59 }
 0x2cb   :  { %7289 = vst [vmem:[%s10801_s12 + $0x18] sm:$0xff] %v7145_v27   ;;  %v6067_v56 = vadd.f32 %v10539_v20, %v5996_v28  ;;  %v5997_v57 = vmul.f32 %v8424_v29, %v10534_v17 }
 0x2cc   :  { %7288 = vst [vmem:[%s10801_s12 + $0x10] sm:$0xff] %v7140_v31   ;;  %v6065_v58 = vadd.f32 %v10539_v20, %v5994_v32  ;;  %v5995_v34 = vmul.f32 %v8425_v33, %v10534_v17 }
 0x2cd   :  { %v6068_v35 = vadd.f32 %v10539_v20, %v5997_v57  ;;  %v6131_v37 = vmax.f32 %v6067_v56, 0.0 }
 0x2ce   :  { %v6066_v59 = vadd.f32 %v10539_v20, %v5995_v34  ;;  %v8348_v36 = vpop.f32.mrb[12].mxu0  ;;  %v6129_v41 = vmax.f32 %v6065_v58, 0.0 }
 0x2cf   :  { %v6132_v38 = vmax.f32 %v6068_v35, 0.0  ;;  %v8426_v39 = vadd.f32 %v8348_v36, %v10491_v60  ;;  %v5708_v40 = vpop.f32.mrb[13].mxu0 }
 0x2d0   :  { %v6130_v42 = vmax.f32 %v6066_v59, 0.0  ;;  %v8427_v43 = vadd.f32 %v5708_v40, %v10493_v61  ;;  %v8349_v45 = vpop.f32.mrb[14].mxu0 }
 0x2d1   :  { %v7155_v44 = vpack.c.bf16 %v6132_v38, %v6131_v37  ;;  %v6000_v46 = vmul.f32 %v8426_v39, %v10534_v17  ;;  %v8428_v47 = vadd.f32 %v8349_v45, %v10495_v62  ;;  %v5711_v48 = vpop.f32.mrb[15].mxu0 }
 0x2d2   :  { %v7150_v49 = vpack.c.bf16 %v6130_v42, %v6129_v41  ;;  %v5998_v50 = vmul.f32 %v8427_v43, %v10534_v17  ;;  %v8429_v51 = vadd.f32 %v5711_v48, %v10497_v63 }
 0x2d3   :  { %7291 = vst [vmem:[%s10801_s12 + $0x28] sm:$0xff] %v7155_v44   ;;  %v6071_v60 = vadd.f32 %v10539_v20, %v6000_v46  ;;  %v6001_v61 = vmul.f32 %v8428_v47, %v10534_v17 }
 0x2d4   :  { %7290 = vst [vmem:[%s10801_s12 + $0x20] sm:$0xff] %v7150_v49   ;;  %v6069_v62 = vadd.f32 %v10539_v20, %v5998_v50  ;;  %v5999_v52 = vmul.f32 %v8429_v51, %v10534_v17 }
 0x2d5   :  { %v6072_v53 = vadd.f32 %v10539_v20, %v6001_v61  ;;  %v6135_v55 = vmax.f32 %v6071_v60, 0.0 }
 0x2d6   :  { %v6070_v63 = vadd.f32 %v10539_v20, %v5999_v52  ;;  %v8352_v54 = vpop.f32.mrb[16].mxu0  ;;  %v6133_v21 = vmax.f32 %v6069_v62, 0.0 }
 0x2d7   :  { %v6136_v16 = vmax.f32 %v6072_v53, 0.0  ;;  %v8430_v18 = vadd.f32 %v8352_v54, %v10499_v0  ;;  %v5724_v19 = vpop.f32.mrb[17].mxu0 }
 0x2d8   :  { %v6134_v22 = vmax.f32 %v6070_v63, 0.0  ;;  %v8431_v23 = vadd.f32 %v5724_v19, %v10501_v1  ;;  %v8353_v24 = vpop.f32.mrb[18].mxu0 }
 0x2d9   :  { %v7165_v25 = vpack.c.bf16 %v6136_v16, %v6135_v55  ;;  %v6004_v26 = vmul.f32 %v8430_v18, %v10534_v17  ;;  %v8432_v27 = vadd.f32 %v8353_v24, %v10503_v2  ;;  %v5727_v28 = vpop.f32.mrb[19].mxu0 }
 0x2da   :  { %v7160_v29 = vpack.c.bf16 %v6134_v22, %v6133_v21  ;;  %v6002_v30 = vmul.f32 %v8431_v23, %v10534_v17  ;;  %v8433_v31 = vadd.f32 %v5727_v28, %v10505_v3 }
 0x2db   :  { %7293 = vst [vmem:[%s10801_s12 + $0x38] sm:$0xff] %v7165_v25   ;;  %v6075_v0 = vadd.f32 %v10539_v20, %v6004_v26  ;;  %v6005_v1 = vmul.f32 %v8432_v27, %v10534_v17 }
 0x2dc   :  { %7292 = vst [vmem:[%s10801_s12 + $0x30] sm:$0xff] %v7160_v29   ;;  %v6073_v2 = vadd.f32 %v10539_v20, %v6002_v30  ;;  %v6003_v32 = vmul.f32 %v8433_v31, %v10534_v17 }
 0x2dd   :  { %v6076_v33 = vadd.f32 %v10539_v20, %v6005_v1  ;;  %v6139_v57 = vmax.f32 %v6075_v0, 0.0 }
 0x2de   :  { %v6074_v3 = vadd.f32 %v10539_v20, %v6003_v32  ;;  %v8356_v56 = vpop.f32.mrb[20].mxu0  ;;  %v6137_v59 = vmax.f32 %v6073_v2, 0.0 }
 0x2df   :  { %v6140_v58 = vmax.f32 %v6076_v33, 0.0  ;;  %v8434_v34 = vadd.f32 %v8356_v56, %v10507_v5  ;;  %v5740_v35 = vpop.f32.mrb[21].mxu0 }
 0x2e0   :  { %v6138_v36 = vmax.f32 %v6074_v3, 0.0  ;;  %v8435_v37 = vadd.f32 %v5740_v35, %v10509_v4  ;;  %v8357_v38 = vpop.f32.mrb[22].mxu0 }
 0x2e1   :  { %v7175_v39 = vpack.c.bf16 %v6140_v58, %v6139_v57  ;;  %v6008_v40 = vmul.f32 %v8434_v34, %v10534_v17  ;;  %v8436_v41 = vadd.f32 %v8357_v38, %v10511_v6  ;;  %v5743_v42 = vpop.f32.mrb[23].mxu0 }
 0x2e2   :  { %v7170_v43 = vpack.c.bf16 %v6138_v36, %v6137_v59  ;;  %v6006_v45 = vmul.f32 %v8435_v37, %v10534_v17  ;;  %v8437_v44 = vadd.f32 %v5743_v42, %v10513_v7 }
 0x2e3   :  { %7295 = vst [vmem:[%s10801_s12 + $0x48] sm:$0xff] %v7175_v39   ;;  %v6079_v5 = vadd.f32 %v10539_v20, %v6008_v40  ;;  %v6009_v4 = vmul.f32 %v8436_v41, %v10534_v17 }
 0x2e4   :  { %7294 = vst [vmem:[%s10801_s12 + $0x40] sm:$0xff] %v7170_v43   ;;  %v6077_v6 = vadd.f32 %v10539_v20, %v6006_v45  ;;  %v6007_v46 = vmul.f32 %v8437_v44, %v10534_v17 }
 0x2e5   :  { %v6080_v47 = vadd.f32 %v10539_v20, %v6009_v4  ;;  %v6143_v49 = vmax.f32 %v6079_v5, 0.0 }
 0x2e6   :  { %v6078_v7 = vadd.f32 %v10539_v20, %v6007_v46  ;;  %v8360_v48 = vpop.f32.mrb[24].mxu0  ;;  %v6141_v61 = vmax.f32 %v6077_v6, 0.0 }
 0x2e7   :  { %v6144_v50 = vmax.f32 %v6080_v47, 0.0  ;;  %v8438_v51 = vadd.f32 %v8360_v48, %v10515_v8  ;;  %v5756_v60 = vpop.f32.mrb[25].mxu0 }
 0x2e8   :  { %v6142_v62 = vmax.f32 %v6078_v7, 0.0  ;;  %v8439_v52 = vadd.f32 %v5756_v60, %v10517_v9  ;;  %v8361_v53 = vpop.f32.mrb[26].mxu0 }
 0x2e9   :  { %v7185_v63 = vpack.c.bf16 %v6144_v50, %v6143_v49  ;;  %v6012_v54 = vmul.f32 %v8438_v51, %v10534_v17  ;;  %v8440_v55 = vadd.f32 %v8361_v53, %v10519_v10  ;;  %v5759_v16 = vpop.f32.mrb[27].mxu0 }
 0x2ea   :  { %v7180_v18 = vpack.c.bf16 %v6142_v62, %v6141_v61  ;;  %v6010_v19 = vmul.f32 %v8439_v52, %v10534_v17  ;;  %v8441_v21 = vadd.f32 %v5759_v16, %v10521_v11 }
 0x2eb   :  { %7297 = vst [vmem:[%s10801_s12 + $0x58] sm:$0xff] %v7185_v63   ;;  %v6083_v8 = vadd.f32 %v10539_v20, %v6012_v54  ;;  %v6013_v9 = vmul.f32 %v8440_v55, %v10534_v17 }
 0x2ec   :  { %7296 = vst [vmem:[%s10801_s12 + $0x50] sm:$0xff] %v7180_v18   ;;  %v6081_v10 = vadd.f32 %v10539_v20, %v6010_v19  ;;  %v6011_v22 = vmul.f32 %v8441_v21, %v10534_v17 }
 0x2ed   :  { %v6084_v23 = vadd.f32 %v10539_v20, %v6013_v9  ;;  %v6147_v25 = vmax.f32 %v6083_v8, 0.0 }
 0x2ee   :  { %v6082_v11 = vadd.f32 %v10539_v20, %v6011_v22  ;;  %v8364_v24 = vpop.f32.mrb[28].mxu0  ;;  %v6145_v29 = vmax.f32 %v6081_v10, 0.0 }
 0x2ef   :  { %v6148_v26 = vmax.f32 %v6084_v23, 0.0  ;;  %v8442_v27 = vadd.f32 %v8364_v24, %v10523_v12  ;;  %v5772_v28 = vpop.f32.mrb[29].mxu0 }
 0x2f0   :  { %v6146_v30 = vmax.f32 %v6082_v11, 0.0  ;;  %v8443_v31 = vadd.f32 %v5772_v28, %v10525_v13  ;;  %v8365_v0 = vpop.f32.mrb[30].mxu0 }
 0x2f1   :  { %v7195_v1 = vpack.c.bf16 %v6148_v26, %v6147_v25  ;;  %v6016_v2 = vmul.f32 %v8442_v27, %v10534_v17  ;;  %v8444_v32 = vadd.f32 %v8365_v0, %v10527_v14  ;;  %v5775_v33 = vpop.f32.mrb[31].mxu0 }
 0x2f2   :  { %v7190_v3 = vpack.c.bf16 %v6146_v30, %v6145_v29  ;;  %v6014_v56 = vmul.f32 %v8443_v31, %v10534_v17  ;;  %v8445_v57 = vadd.f32 %v5775_v33, %v10529_v15 }
 0x2f3   :  { %7299 = vst [vmem:[%s10801_s12 + $0x68] sm:$0xff] %v7195_v1   ;;  %v6087_v12 = vadd.f32 %v10539_v20, %v6016_v2  ;;  %v6017_v13 = vmul.f32 %v8444_v32, %v10534_v17 }
 0x2f4   :  { %7298 = vst [vmem:[%s10801_s12 + $0x60] sm:$0xff] %v7190_v3   ;;  %v6085_v14 = vadd.f32 %v10539_v20, %v6014_v56  ;;  %v6015_v58 = vmul.f32 %v8445_v57, %v10534_v17 }
 0x2f5   :  { %v6088_v34 = vadd.f32 %v10539_v20, %v6017_v13  ;;  %v8048_v35 = vpop.f32.mrb[32].mxu1  ;;  %v6151_v37 = vmax.f32 %v6087_v12, 0.0 }
 0x2f6   :  { %v6086_v15 = vadd.f32 %v10539_v20, %v6015_v58  ;;  %v8368_v59 = vpop.f32.mrb[32].mxu0  ;;  %v3092_v36 = vpop.f32.mrb[33].mxu1  ;;  %v6149_v42 = vmax.f32 %v6085_v14, 0.0 }
 0x2f7   :  { %v6152_v38 = vmax.f32 %v6088_v34, 0.0  ;;  %v8446_v39 = vadd.f32 %v8368_v59, %v8048_v35  ;;  %v5788_v40 = vpop.f32.mrb[33].mxu0  ;;  %v8049_v41 = vpop.f32.mrb[34].mxu1 }
 0x2f8   :  { %v6150_v43 = vmax.f32 %v6086_v15, 0.0  ;;  %v8447_v45 = vadd.f32 %v5788_v40, %v3092_v36  ;;  %v8369_v44 = vpop.f32.mrb[34].mxu0  ;;  %v3095_v5 = vpop.f32.mrb[35].mxu1 }
 0x2f9   :  { %v7205_v4 = vpack.c.bf16 %v6152_v38, %v6151_v37  ;;  %v6020_v6 = vmul.f32 %v8446_v39, %v10534_v17  ;;  %v8448_v46 = vadd.f32 %v8369_v44, %v8049_v41  ;;  %v5791_v47 = vpop.f32.mrb[35].mxu0 }
 0x2fa   :  { %v7200_v7 = vpack.c.bf16 %v6150_v43, %v6149_v42  ;;  %v6018_v48 = vmul.f32 %v8447_v45, %v10534_v17  ;;  %v8449_v49 = vadd.f32 %v5791_v47, %v3095_v5 }
 0x2fb   :  { %7301 = vst [vmem:[%s10801_s12 + $0x78] sm:$0xff] %v7205_v4   ;;  %v6091_v50 = vadd.f32 %v10539_v20, %v6020_v6  ;;  %v6021_v51 = vmul.f32 %v8448_v46, %v10534_v17 }
 0x2fc   :  { %7300 = vst [vmem:[%s10801_s12 + $0x70] sm:$0xff] %v7200_v7   ;;  %v6089_v60 = vadd.f32 %v10539_v20, %v6018_v48  ;;  %v6019_v61 = vmul.f32 %v8449_v49, %v10534_v17 }
 0x2fd   :  { %v6092_v62 = vadd.f32 %v10539_v20, %v6021_v51  ;;  %v8052_v52 = vpop.f32.mrb[36].mxu1  ;;  %v6155_v55 = vmax.f32 %v6091_v50, 0.0 }
 0x2fe   :  { %v6090_v53 = vadd.f32 %v10539_v20, %v6019_v61  ;;  %v8372_v63 = vpop.f32.mrb[36].mxu0  ;;  %v3108_v54 = vpop.f32.mrb[37].mxu1  ;;  %v6153_v8 = vmax.f32 %v6089_v60, 0.0 }
 0x2ff   :  { %v6156_v16 = vmax.f32 %v6092_v62, 0.0  ;;  %v8450_v18 = vadd.f32 %v8372_v63, %v8052_v52  ;;  %v5804_v19 = vpop.f32.mrb[37].mxu0  ;;  %v8053_v21 = vpop.f32.mrb[38].mxu1 }
 0x300   :  { %v6154_v9 = vmax.f32 %v6090_v53, 0.0  ;;  %v8451_v10 = vadd.f32 %v5804_v19, %v3108_v54  ;;  %v8373_v22 = vpop.f32.mrb[38].mxu0  ;;  %v3111_v23 = vpop.f32.mrb[39].mxu1 }
 0x301   :  { %v7215_v11 = vpack.c.bf16 %v6156_v16, %v6155_v55  ;;  %v6024_v24 = vmul.f32 %v8450_v18, %v10534_v17  ;;  %v8452_v25 = vadd.f32 %v8373_v22, %v8053_v21  ;;  %v5807_v26 = vpop.f32.mrb[39].mxu0 }
 0x302   :  { %v7210_v27 = vpack.c.bf16 %v6154_v9, %v6153_v8  ;;  %v6022_v28 = vmul.f32 %v8451_v10, %v10534_v17  ;;  %v8453_v29 = vadd.f32 %v5807_v26, %v3111_v23 }
 0x303   :  { %7303 = vst [vmem:[%s10801_s12 + $0x88] sm:$0xff] %v7215_v11   ;;  %v6095_v30 = vadd.f32 %v10539_v20, %v6024_v24  ;;  %v6025_v31 = vmul.f32 %v8452_v25, %v10534_v17 }
 0x304   :  { %7302 = vst [vmem:[%s10801_s12 + $0x80] sm:$0xff] %v7210_v27   ;;  %v6093_v0 = vadd.f32 %v10539_v20, %v6022_v28  ;;  %v6023_v1 = vmul.f32 %v8453_v29, %v10534_v17 }
 0x305   :  { %v6096_v2 = vadd.f32 %v10539_v20, %v6025_v31  ;;  %v8056_v32 = vpop.f32.mrb[40].mxu1  ;;  %v6159_v57 = vmax.f32 %v6095_v30, 0.0 }
 0x306   :  { %v6094_v33 = vadd.f32 %v10539_v20, %v6023_v1  ;;  %v8376_v3 = vpop.f32.mrb[40].mxu0  ;;  %v3124_v56 = vpop.f32.mrb[41].mxu1  ;;  %v6157_v34 = vmax.f32 %v6093_v0, 0.0 }
 0x307   :  { %v6160_v12 = vmax.f32 %v6096_v2, 0.0  ;;  %v8454_v13 = vadd.f32 %v8376_v3, %v8056_v32  ;;  %v5820_v14 = vpop.f32.mrb[41].mxu0  ;;  %v8057_v58 = vpop.f32.mrb[42].mxu1 }
 0x308   :  { %v6158_v35 = vmax.f32 %v6094_v33, 0.0  ;;  %v8455_v15 = vadd.f32 %v5820_v14, %v3124_v56  ;;  %v8377_v59 = vpop.f32.mrb[42].mxu0  ;;  %v3127_v36 = vpop.f32.mrb[43].mxu1 }
 0x309   :  { %v7225_v37 = vpack.c.bf16 %v6160_v12, %v6159_v57  ;;  %v6028_v38 = vmul.f32 %v8454_v13, %v10534_v17  ;;  %v8456_v39 = vadd.f32 %v8377_v59, %v8057_v58  ;;  %v5823_v40 = vpop.f32.mrb[43].mxu0 }
 0x30a   :  { %v7220_v41 = vpack.c.bf16 %v6158_v35, %v6157_v34  ;;  %v6026_v42 = vmul.f32 %v8455_v15, %v10534_v17  ;;  %v8457_v43 = vadd.f32 %v5823_v40, %v3127_v36 }
 0x30b   :  { %7305 = vst [vmem:[%s10801_s12 + $0x98] sm:$0xff] %v7225_v37   ;;  %v6099_v45 = vadd.f32 %v10539_v20, %v6028_v38  ;;  %v6029_v44 = vmul.f32 %v8456_v39, %v10534_v17 }
 0x30c   :  { %7304 = vst [vmem:[%s10801_s12 + $0x90] sm:$0xff] %v7220_v41   ;;  %v6097_v5 = vadd.f32 %v10539_v20, %v6026_v42  ;;  %v6027_v4 = vmul.f32 %v8457_v43, %v10534_v17 }
 0x30d   :  { %v6100_v6 = vadd.f32 %v10539_v20, %v6029_v44  ;;  %v8060_v46 = vpop.f32.mrb[44].mxu1  ;;  %v6163_v49 = vmax.f32 %v6099_v45, 0.0 }
 0x30e   :  { %v6098_v47 = vadd.f32 %v10539_v20, %v6027_v4  ;;  %v8380_v7 = vpop.f32.mrb[44].mxu0  ;;  %v3140_v48 = vpop.f32.mrb[45].mxu1  ;;  %v6161_v62 = vmax.f32 %v6097_v5, 0.0 }
 0x30f   :  { %v6164_v50 = vmax.f32 %v6100_v6, 0.0  ;;  %v8458_v51 = vadd.f32 %v8380_v7, %v8060_v46  ;;  %v5836_v60 = vpop.f32.mrb[45].mxu0  ;;  %v8061_v61 = vpop.f32.mrb[46].mxu1 }
 0x310   :  { %v6162_v52 = vmax.f32 %v6098_v47, 0.0  ;;  %v8459_v53 = vadd.f32 %v5836_v60, %v3140_v48  ;;  %v8381_v63 = vpop.f32.mrb[46].mxu0  ;;  %v3143_v54 = vpop.f32.mrb[47].mxu1 }
 0x311   :  { %v7235_v55 = vpack.c.bf16 %v6164_v50, %v6163_v49  ;;  %v6032_v16 = vmul.f32 %v8458_v51, %v10534_v17  ;;  %v8460_v18 = vadd.f32 %v8381_v63, %v8061_v61  ;;  %v5839_v19 = vpop.f32.mrb[47].mxu0 }
 0x312   :  { %v7230_v21 = vpack.c.bf16 %v6162_v52, %v6161_v62  ;;  %v6030_v8 = vmul.f32 %v8459_v53, %v10534_v17  ;;  %v8461_v9 = vadd.f32 %v5839_v19, %v3143_v54 }
 0x313   :  { %7307 = vst [vmem:[%s10801_s12 + $0xa8] sm:$0xff] %v7235_v55   ;;  %v6103_v10 = vadd.f32 %v10539_v20, %v6032_v16  ;;  %v6033_v22 = vmul.f32 %v8460_v18, %v10534_v17 }
 0x314   :  { %7306 = vst [vmem:[%s10801_s12 + $0xa0] sm:$0xff] %v7230_v21   ;;  %v6101_v23 = vadd.f32 %v10539_v20, %v6030_v8  ;;  %v6031_v11 = vmul.f32 %v8461_v9, %v10534_v17 }
 0x315   :  { %v6104_v24 = vadd.f32 %v10539_v20, %v6033_v22  ;;  %v8064_v25 = vpop.f32.mrb[48].mxu1  ;;  %v6167_v29 = vmax.f32 %v6103_v10, 0.0 }
 0x316   :  { %v6102_v26 = vadd.f32 %v10539_v20, %v6031_v11  ;;  %v8384_v27 = vpop.f32.mrb[48].mxu0  ;;  %v3156_v28 = vpop.f32.mrb[49].mxu1  ;;  %v6165_v2 = vmax.f32 %v6101_v23, 0.0 }
 0x317   :  { %v6168_v30 = vmax.f32 %v6104_v24, 0.0  ;;  %v8462_v31 = vadd.f32 %v8384_v27, %v8064_v25  ;;  %v5852_v0 = vpop.f32.mrb[49].mxu0  ;;  %v8065_v1 = vpop.f32.mrb[50].mxu1 }
 0x318   :  { %v6166_v32 = vmax.f32 %v6102_v26, 0.0  ;;  %v8463_v33 = vadd.f32 %v5852_v0, %v3156_v28  ;;  %v8385_v3 = vpop.f32.mrb[50].mxu0  ;;  %v3159_v56 = vpop.f32.mrb[51].mxu1 }
 0x319   :  { %v7245_v57 = vpack.c.bf16 %v6168_v30, %v6167_v29  ;;  %v6036_v12 = vmul.f32 %v8462_v31, %v10534_v17  ;;  %v8464_v13 = vadd.f32 %v8385_v3, %v8065_v1  ;;  %v5855_v14 = vpop.f32.mrb[51].mxu0 }
 0x31a   :  { %v7240_v58 = vpack.c.bf16 %v6166_v32, %v6165_v2  ;;  %v6034_v34 = vmul.f32 %v8463_v33, %v10534_v17  ;;  %v8465_v35 = vadd.f32 %v5855_v14, %v3159_v56 }
 0x31b   :  { %7309 = vst [vmem:[%s10801_s12 + $0xb8] sm:$0xff] %v7245_v57   ;;  %v6107_v15 = vadd.f32 %v10539_v20, %v6036_v12  ;;  %v6037_v59 = vmul.f32 %v8464_v13, %v10534_v17 }
 0x31c   :  { %7308 = vst [vmem:[%s10801_s12 + $0xb0] sm:$0xff] %v7240_v58   ;;  %v6105_v36 = vadd.f32 %v10539_v20, %v6034_v34  ;;  %v6035_v37 = vmul.f32 %v8465_v35, %v10534_v17 }
 0x31d   :  { %v6108_v38 = vadd.f32 %v10539_v20, %v6037_v59  ;;  %v8068_v39 = vpop.f32.mrb[52].mxu1  ;;  %v6171_v43 = vmax.f32 %v6107_v15, 0.0 }
 0x31e   :  { %v6106_v40 = vadd.f32 %v10539_v20, %v6035_v37  ;;  %v8388_v41 = vpop.f32.mrb[52].mxu0  ;;  %v3172_v42 = vpop.f32.mrb[53].mxu1  ;;  %v6169_v6 = vmax.f32 %v6105_v36, 0.0 }
 0x31f   :  { %v6172_v45 = vmax.f32 %v6108_v38, 0.0  ;;  %v8466_v44 = vadd.f32 %v8388_v41, %v8068_v39  ;;  %v5868_v5 = vpop.f32.mrb[53].mxu0  ;;  %v8069_v4 = vpop.f32.mrb[54].mxu1 }
 0x320   :  { %v6170_v46 = vmax.f32 %v6106_v40, 0.0  ;;  %v8467_v47 = vadd.f32 %v5868_v5, %v3172_v42  ;;  %v8389_v7 = vpop.f32.mrb[54].mxu0  ;;  %v3175_v48 = vpop.f32.mrb[55].mxu1 }
 0x321   :  { %v7255_v49 = vpack.c.bf16 %v6172_v45, %v6171_v43  ;;  %v6040_v50 = vmul.f32 %v8466_v44, %v10534_v17  ;;  %v8468_v51 = vadd.f32 %v8389_v7, %v8069_v4  ;;  %v5871_v60 = vpop.f32.mrb[55].mxu0 }
 0x322   :  { %v7250_v61 = vpack.c.bf16 %v6170_v46, %v6169_v6  ;;  %v6038_v62 = vmul.f32 %v8467_v47, %v10534_v17  ;;  %v8469_v52 = vadd.f32 %v5871_v60, %v3175_v48 }
 0x323   :  { %7311 = vst [vmem:[%s10801_s12 + $0xc8] sm:$0xff] %v7255_v49   ;;  %v6111_v53 = vadd.f32 %v10539_v20, %v6040_v50  ;;  %v6041_v63 = vmul.f32 %v8468_v51, %v10534_v17 }
 0x324   :  { %7310 = vst [vmem:[%s10801_s12 + $0xc0] sm:$0xff] %v7250_v61   ;;  %v6109_v54 = vadd.f32 %v10539_v20, %v6038_v62  ;;  %v6039_v55 = vmul.f32 %v8469_v52, %v10534_v17 }
 0x325   :  { %v6112_v16 = vadd.f32 %v10539_v20, %v6041_v63  ;;  %v8072_v18 = vpop.f32.mrb[56].mxu1  ;;  %v6175_v9 = vmax.f32 %v6111_v53, 0.0 }
 0x326   :  { %v6110_v19 = vadd.f32 %v10539_v20, %v6039_v55  ;;  %v8392_v21 = vpop.f32.mrb[56].mxu0  ;;  %v3188_v8 = vpop.f32.mrb[57].mxu1  ;;  %v6173_v24 = vmax.f32 %v6109_v54, 0.0 }
 0x327   :  { %v6176_v10 = vmax.f32 %v6112_v16, 0.0  ;;  %v8470_v22 = vadd.f32 %v8392_v21, %v8072_v18  ;;  %v5884_v23 = vpop.f32.mrb[57].mxu0  ;;  %v8073_v11 = vpop.f32.mrb[58].mxu1 }
 0x328   :  { %v6174_v25 = vmax.f32 %v6110_v19, 0.0  ;;  %v8471_v26 = vadd.f32 %v5884_v23, %v3188_v8  ;;  %v8393_v27 = vpop.f32.mrb[58].mxu0  ;;  %v3191_v28 = vpop.f32.mrb[59].mxu1 }
 0x329   :  { %v7265_v29 = vpack.c.bf16 %v6176_v10, %v6175_v9  ;;  %v6044_v30 = vmul.f32 %v8470_v22, %v10534_v17  ;;  %v8472_v31 = vadd.f32 %v8393_v27, %v8073_v11  ;;  %v5887_v0 = vpop.f32.mrb[59].mxu0 }
 0x32a   :  { %v7260_v1 = vpack.c.bf16 %v6174_v25, %v6173_v24  ;;  %v6042_v2 = vmul.f32 %v8471_v26, %v10534_v17  ;;  %v8473_v32 = vadd.f32 %v5887_v0, %v3191_v28 }
 0x32b   :  { %7313 = vst [vmem:[%s10801_s12 + $0xd8] sm:$0xff] %v7265_v29   ;;  %v6115_v33 = vadd.f32 %v10539_v20, %v6044_v30  ;;  %v6045_v3 = vmul.f32 %v8472_v31, %v10534_v17 }
 0x32c   :  { %7312 = vst [vmem:[%s10801_s12 + $0xd0] sm:$0xff] %v7260_v1   ;;  %v6113_v56 = vadd.f32 %v10539_v20, %v6042_v2  ;;  %v6043_v57 = vmul.f32 %v8473_v32, %v10534_v17 }
 0x32d   :  { %v6116_v12 = vadd.f32 %v10539_v20, %v6045_v3  ;;  %v8076_v13 = vpop.f32.mrb[60].mxu1  ;;  %v6179_v35 = vmax.f32 %v6115_v33, 0.0 }
 0x32e   :  { %v6114_v14 = vadd.f32 %v10539_v20, %v6043_v57  ;;  %v8396_v58 = vpop.f32.mrb[60].mxu0  ;;  %v3204_v34 = vpop.f32.mrb[61].mxu1  ;;  %v6177_v38 = vmax.f32 %v6113_v56, 0.0 }
 0x32f   :  { %v6180_v15 = vmax.f32 %v6116_v12, 0.0  ;;  %v8474_v59 = vadd.f32 %v8396_v58, %v8076_v13  ;;  %v5900_v36 = vpop.f32.mrb[61].mxu0  ;;  %v8077_v37 = vpop.f32.mrb[62].mxu1 }
 0x330   :  { %v6178_v39 = vmax.f32 %v6114_v14, 0.0  ;;  %v8475_v40 = vadd.f32 %v5900_v36, %v3204_v34  ;;  %v8397_v41 = vpop.f32.mrb[62].mxu0  ;;  %v3207_v42 = vpop.f32.mrb[63].mxu1 }
 0x331   :  { %v7275_v43 = vpack.c.bf16 %v6180_v15, %v6179_v35  ;;  %v6048_v45 = vmul.f32 %v8474_v59, %v10534_v17  ;;  %v8476_v44 = vadd.f32 %v8397_v41, %v8077_v37  ;;  %v5903_v5 = vpop.f32.mrb[63].mxu0 }
 0x332   :  { %v7270_v4 = vpack.c.bf16 %v6178_v39, %v6177_v38  ;;  %v6046_v6 = vmul.f32 %v8475_v40, %v10534_v17  ;;  %v8477_v46 = vadd.f32 %v5903_v5, %v3207_v42 }
 0x333   :  { %7315 = vst [vmem:[%s10801_s12 + $0xe8] sm:$0xff] %v7275_v43   ;;  %v6119_v47 = vadd.f32 %v10539_v20, %v6048_v45  ;;  %v6049_v7 = vmul.f32 %v8476_v44, %v10534_v17 }
 0x334   :  { %7314 = vst [vmem:[%s10801_s12 + $0xe0] sm:$0xff] %v7270_v4   ;;  %v6117_v48 = vadd.f32 %v10539_v20, %v6046_v6  ;;  %v6047_v49 = vmul.f32 %v8477_v46, %v10534_v17 }
 0x335   :  { %v6120_v50 = vadd.f32 %v10539_v20, %v6049_v7  ;;  %v6183_v60 = vmax.f32 %v6119_v47, 0.0 }
 0x336   :  { %v6118_v51 = vadd.f32 %v10539_v20, %v6047_v49  ;;  %v6181_v62 = vmax.f32 %v6117_v48, 0.0 }
 0x337   :  { %v6184_v61 = vmax.f32 %v6120_v50, 0.0 }
 0x338   :  { %v6182_v52 = vmax.f32 %v6118_v51, 0.0 }
 0x339   :  { %v7285_v53 = vpack.c.bf16 %v6184_v61, %v6183_v60 }
 0x33a   :  { %v7280_v63 = vpack.c.bf16 %v6182_v52, %v6181_v62 }
 0x33b   :  { %7317 = vst [vmem:[%s10801_s12 + $0xf8] sm:$0xff] %v7285_v53  }
 0x33c   :  { %7316 = vst [vmem:[%s10801_s12 + $0xf0] sm:$0xff] %v7280_v63  }

// kernel: inception_b_forward.5
= control target key start
LH: loop header
LB: loop body
LE: loop exit
PB: predicated region body
PF: predicated region fallthrough
CT: control target
= control target key end

     0   :  { %s13165_s0 = inlined_call_operand.vmem [shape: bf16[128,4], index: 0, kind: input, shape index: {}]   ;;  %s13166_s1 = inlined_call_operand.vmem [shape: bf16[128,4], index: 1, kind: input, shape index: {}]   ;;  %s13167_s2 = inlined_call_operand.vmem [shape: bf16[128,4], index: 2, kind: input, shape index: {}]   ;;  %s13168_s3 = inlined_call_operand.vmem [shape: bf16[128,4], index: 3, kind: input, shape index: {}]   ;;  %s13169_s4 = inlined_call_operand.vmem [shape: bf16[128,4], index: 4, kind: input, shape index: {}]   ;;  %s13170_s5 = inlined_call_operand.vmem [shape: bf16[128,4], index: 5, kind: input, shape index: {}]   ;;  %s13171_s6 = inlined_call_operand.vmem [shape: bf16[128,4], index: 6, kind: input, shape index: {}]   ;;  %s13172_s7 = inlined_call_operand.vmem [shape: bf16[128,4], index: 7, kind: input, shape index: {}]   ;;  %s13173_s8 = inlined_call_operand.vmem [shape: bf16[128,4], index: 8, kind: input, shape index: {}]   ;;  %s13174_s9 = inlined_call_operand.vmem [shape: bf16[9,4,384], index: 9, kind: input, shape index: {}]   ;;  %s13175_s10 = inlined_call_operand.vmem [shape: f32[1,384], index: 10, kind: input, shape index: {}]   ;;  %s13176_s11 = inlined_call_operand.vmem [shape: f32[1,384], index: 11, kind: input, shape index: {}]   ;;  %s13177_s12 = inlined_call_operand.vmem [shape: bf16[128,128], index: 12, kind: input, shape index: {}]   ;;  %s13178_s13 = inlined_call_operand.vmem [shape: bf16[128,128], index: 13, kind: input, shape index: {}]   ;;  %s13179_s14 = inlined_call_operand.vmem [shape: bf16[128,128], index: 14, kind: input, shape index: {}]   ;;  %s13180_s15 = inlined_call_operand.vmem [shape: bf16[128,128], index: 15, kind: input, shape index: {}]   ;;  %s13181_s16 = inlined_call_operand.vmem [shape: bf16[128,128], index: 16, kind: input, shape index: {}]   ;;  %s13182_s17 = inlined_call_operand.vmem [shape: bf16[128,128], index: 17, kind: input, shape index: {}]   ;;  %s13183_s18 = inlined_call_operand.vmem [shape: bf16[128,128], index: 18, kind: input, shape index: {}]   ;;  %s13184_s19 = inlined_call_operand.vmem [shape: bf16[128,128], index: 19, kind: input, shape index: {}]   ;;  %s13185_s20 = inlined_call_operand.vmem [shape: bf16[128,128], index: 20, kind: input, shape index: {}]   ;;  %s13186_s21 = inlined_call_operand.vmem [shape: bf16[9,128,96], index: 21, kind: input, shape index: {}]   ;;  %s13187_s22 = inlined_call_operand.vmem [shape: f32[1,96], index: 22, kind: input, shape index: {}]   ;;  %s13188_s23 = inlined_call_operand.vmem [shape: f32[1,96], index: 23, kind: input, shape index: {}]   ;;  %s13189_s24 = inlined_call_operand.vmem [shape: bf16[128,9], index: 24, kind: input, shape index: {}]   ;;  %s13190_s25 = inlined_call_operand.hbm [shape: f32[128,484], index: 25, kind: output, shape index: {}]  }
   0x1   :  { %13215 = sst [smem:[#allocation36_spill]] %s13165_s0 }
   0x2   :  { %13216 = sst [smem:[#allocation37_spill]] %s13166_s1 }
   0x3   :  { %13217 = sst [smem:[#allocation38_spill]] %s13167_s2 }
   0x4   :  { %13218 = sst [smem:[#allocation39_spill]] %s13168_s3 }
   0x5   :  { %13219 = sst [smem:[#allocation40_spill]] %s13169_s4 }
   0x6   :  { %13220 = sst [smem:[#allocation41_spill]] %s13170_s5 }
   0x7   :  { %13221 = sst [smem:[#allocation42_spill]] %s13171_s6 }
   0x8   :  { %13222 = sst [smem:[#allocation43_spill]] %s13172_s7 }
   0x9   :  { %13223 = sst [smem:[#allocation44_spill]] %s13173_s8 }
   0xa   :  { %13224 = sst [smem:[#allocation45_spill]] %s13174_s9 }
   0xb   :  { %13225 = sst [smem:[#allocation46_spill]] %s13187_s22 }
   0xc   :  { %13226 = sst [smem:[#allocation47_spill]] %s13188_s23 }
   0xd   :  { %13227 = sst [smem:[#allocation48_spill]] %s13190_s25 }
   0xe   :  { %v10122_v0 = vld [vmem:[%s13189_s24 + $0x8] sm:$0xf]  ;;  %v162_v1 = vlaneseq  ;;  %v13201_v2 = vmov 0   ;;  %v10129_v3 = vld [vmem:[%s13189_s24] sm:$0xf]  ;;  %s13228_s26 = sld [smem:[#allocation45_spill]] }
   0xf   :  { %9595 = vset.pattern.permute.xlu1 %v13201_v2  ;;  %9594 = vset.pattern.permute.xlu0 %v13201_v2  ;;  %v10138_v5 = vld [vmem:[%s13189_s24 + $0xc] sm:$0xf]  ;;  %v9975_v6 = vmov 1983009808   ;;  %v10146_v9 = vld [vmem:[%s13189_s24 + $0x4] sm:$0xf] }
  0x10   :  { %5789 = vperm.xlu1 %9595, %v10122_v0   ;;  %5765 = vperm.xlu0 %9594, %v10129_v3   ;;  %v160_v7 = vunpack.c.l.s4 %v9975_v6  ;;  %v10141_v8 = vshrl.u32 %v162_v1, 7  ;;  %s13230_s5 = sld [smem:[#allocation37_spill]]  ;;  %vm174_vm0 = vcmask 31744   ;;  %vm199_vm1 = vcmask 1041408   ;;  %v10164_v16 = vld [vmem:[%s13189_s24 + $0x14] sm:$0xf] }
  0x11   :  { %241 = vmatprep.mubr.bf16.mxu0 %v13201_v2  ;;  %v10172_v20 = vld [vmem:[%s13189_s24 + $0x10] sm:$0xf]  ;;  %v10185_v26 = vld [vmem:[%s13189_s24 + $0x1c] sm:$0xf]  ;;  %v10194_v29 = vld [vmem:[%s13189_s24 + $0x18] sm:$0xf] }
  0x12   :  { %13229 = vst [vmem:[#allocation5_spill] sm:$0xff] %v10141_v8  ;;  %v161_v12 = vunpack.c.0.s8 %v160_v7  ;;  %v10206_v32 = vld [vmem:[%s13189_s24 + $0x24] sm:$0xf]  ;;  %v10216_v34 = vld [vmem:[%s13189_s24 + $0x20] sm:$0xf]  ;;  %v9976_v49 = vmov 1  }
  0x13   :  { %v10226_v36 = vld [vmem:[%s13189_s24 + $0x2c] sm:$0xf]  ;;  %v10240_v41 = vld [vmem:[%s13189_s24 + $0x28] sm:$0xf]  ;;  %v10249_v43 = vld [vmem:[%s13189_s24 + $0x34] sm:$0xf] }
  0x14   :  { %v7876_v4 = vld [vmem:[%s13228_s26 + $0x6] sm:$0x3f]  ;;  %v98_v13 = vld [vmem:[%s13228_s26] sm:$0x3f]  ;;  %5801 = vperm.xlu1 %9595, %v10138_v5   ;;  %v10158_v14 = vsub.s32 %v161_v12, %v10141_v8  ;;  %5777 = vperm.xlu0 %9594, %v10146_v9   ;;  %v7927_v35 = vld [vmem:[%s13228_s26 + $0xc] sm:$0x3f] }
  0x15   :  { %v158_v11 = vcombine.high %v7876_v4, %v7876_v4  ;;  %v460_v15 = vcombine.high %v98_v13, %v98_v13  ;;  %v778_v37 = vcombine.high %v7927_v35, %v7927_v35  ;;  %v10262_v45 = vld [vmem:[%s13189_s24 + $0x30] sm:$0xf]  ;;  %v10269_v46 = vld [vmem:[%s13189_s24 + $0x3c] sm:$0xf]  ;;  %v10278_v48 = vld [vmem:[%s13189_s24 + $0x38] sm:$0xf] }
  0x16   :  { %v9653_v10 = vld [vmem:[%s13230_s5] sm:$0xff]   ;;  %v165_v18 = vrot.slane %v7876_v4, %v10158_v14  ;;  %v467_v21 = vrot.slane %v98_v13, %v10158_v14  ;;  %v9654_v25 = vld [vmem:[%s13230_s5 + $0x8] sm:$0xff]   ;;  %v9656_v30 = vld [vmem:[%s13230_s5 + $0x10] sm:$0xff]   ;;  %v10230_v38 = vrot.slane %v7927_v35, %v10158_v14  ;;  %s13231_s7 = sld [smem:[#allocation36_spill]]  ;;  %v9977_v63 = vmov 2   ;;  %s13232_s9 = sld [smem:[#allocation38_spill]] }
  0x17   :  { %8610 = vmatprep.mubr.msk.bf16.mxu1 %vm174_vm0, %v9653_v10  ;;  %v172_v17 = vrot.slane %v158_v11, %v10158_v14  ;;  %v474_v19 = vrot.slane %v460_v15, %v10158_v14  ;;  %v9657_v33 = vld [vmem:[%s13230_s5 + $0x18] sm:$0xff]   ;;  %v9658_v39 = vld [vmem:[%s13230_s5 + $0x20] sm:$0xff]   ;;  %v792_v40 = vrot.slane %v778_v37, %v10158_v14  ;;  %v9659_v44 = vld [vmem:[%s13230_s5 + $0x28] sm:$0xff]   ;;  %s13233_s8 = sld [smem:[#allocation39_spill]]  ;;  %s13234_s3 = sld [smem:[#allocation40_spill]] }
  0x18   :  { %5825 = vperm.xlu1 %9595, %v10164_v16   ;;  %v173_v23 = vcombine.high %v165_v18, %v165_v18  ;;  %v201_v24 = vsel %vm199_vm1, %v165_v18, 0  ;;  %5813 = vperm.xlu0 %9594, %v10172_v20   ;;  %v475_v27 = vcombine.high %v467_v21, %v467_v21  ;;  %v501_v31 = vsel %vm199_vm1, %v467_v21, 0  ;;  %v9660_v47 = vld [vmem:[%s13230_s5 + $0x30] sm:$0xff]   ;;  %v9661_v50 = vld [vmem:[%s13230_s5 + $0x38] sm:$0xff]   ;;  %s13235_s29 = sld [smem:[#allocation41_spill]]  ;;  %s13243_s2 = sld [smem:[#allocation42_spill]] }
  0x19   :  { %9570 = vmatprep.subr.msk.bf16.mxu1 %vm199_vm1, %v172_v17  ;;  %v207_v22 = vsel %vm199_vm1, %v172_v17, 0  ;;  %v507_v28 = vsel %vm199_vm1, %v474_v19, 0  ;;  %v793_v42 = vcombine.high %v10230_v38, %v10230_v38  ;;  %v7953_v52 = vld [vmem:[%s13228_s26 + $0x12] sm:$0x3f]  ;;  %v825_v55 = vsel %vm199_vm1, %v792_v40, 0  ;;  %s13253_s30 = sld [smem:[#allocation43_spill]] }
  0x1a   :  { %8609 = vmatpush3.bf16.msra.mxu1 %v207_v22  ;;  %7885 = vmatprep.subr.msk.bf16.mxu0 %vm199_vm1, %v173_v23  ;;  %v1144_v54 = vcombine.high %v7953_v52, %v7953_v52  ;;  %v10383_v4 = vld [vmem:[%s13228_s26 + $0x18] sm:$0x3f]  ;;  %v10407_v11 = vrot.slane %v7953_v52, %v10158_v14  ;;  %v819_v13 = vsel %vm199_vm1, %v10230_v38, 0  ;;  %v10608_v52 = vld [vmem:[%s13189_s24 + $0x8] sm:$0xf] }
  0x1b   :  { %9571 = vmatprep.subr.msk.bf16.mxu1 %vm199_vm1, %v474_v19  ;;  %210 = vmatpush1.bf16.msra.mxu0 %v201_v24  ;;  %v1510_v7 = vcombine.high %v10383_v4, %v10383_v4  ;;  %v9978_v24 = vmov 3  }
  0x1c   :  { %5849 = vperm.xlu1 %9595, %v10185_v26   ;;  %7910 = vmatprep.subr.msk.bf16.mxu0 %vm199_vm1, %v475_v27  ;;  %v10293_v51 = vld [vmem:[%s13231_s7] sm:$0xff]   ;;  %v10309_v53 = vld [vmem:[%s13231_s7 + $0x8] sm:$0xff]   ;;  %v10316_v56 = vld [vmem:[%s13231_s7 + $0x10] sm:$0xff]   ;;  %v1158_v57 = vrot.slane %v1144_v54, %v10158_v14  ;;  %v1159_v17 = vcombine.high %v10407_v11, %v10407_v11 }
  0x1d   :  { %8611 = vmatmul.mubr.msk.bf16.vlgmr.msra.gmra.mrb[0].mxu1 %vm174_vm0, %v9654_v25  ;;  %5837 = vperm.xlu0 %9594, %v10194_v29   ;;  %v10331_v58 = vld [vmem:[%s13231_s7 + $0x18] sm:$0xff]   ;;  %v10338_v59 = vld [vmem:[%s13231_s7 + $0x20] sm:$0xff]   ;;  %v10352_v60 = vld [vmem:[%s13231_s7 + $0x28] sm:$0xff]   ;;  %v1524_v15 = vrot.slane %v1510_v7, %v10158_v14 }
  0x1e   :  { %8627 = vmatpush3.bf16.msra.mxu1 %v507_v28  ;;  %7886 = vmatmul.mubr.msk.bf16.vlgmr.msra.gmra.mrb[0].mxu0 %vm174_vm0, %v9653_v10  ;;  %v10358_v61 = vld [vmem:[%s13231_s7 + $0x30] sm:$0xff]   ;;  %v10370_v62 = vld [vmem:[%s13231_s7 + $0x38] sm:$0xff]   ;;  %v10377_v1 = vld [vmem:[%s13232_s9] sm:$0xff]   ;;  %v1191_v12 = vsel %vm199_vm1, %v1158_v57, 0 }
  0x1f   :  { %510 = vmatpush1.bf16.msra.mxu0 %v501_v31  ;;  %8614 = vmatprep.mubr.msk.bf16.mxu1 %vm174_vm0, %v9656_v30  ;;  %v10395_v6 = vld [vmem:[%s13232_s9 + $0x8] sm:$0xff]   ;;  %v10404_v10 = vld [vmem:[%s13232_s9 + $0x10] sm:$0xff]   ;;  %v10429_v18 = vld [vmem:[%s13232_s9 + $0x18] sm:$0xff]  }
  0x20   :  { %5873 = vperm.xlu1 %9595, %v10206_v32   ;;  %251 = vmatprep.mubr.bf16.mxu0 %v13201_v2  ;;  %v10435_v19 = vld [vmem:[%s13232_s9 + $0x20] sm:$0xff]   ;;  %v10450_v21 = vld [vmem:[%s13232_s9 + $0x28] sm:$0xff]   ;;  %v10457_v22 = vld [vmem:[%s13232_s9 + $0x30] sm:$0xff]  }
  0x21   :  { %5861 = vperm.xlu0 %9594, %v10216_v34   ;;  %9572 = vmatprep.subr.msk.bf16.mxu1 %vm199_vm1, %v792_v40  ;;  %v10471_v23 = vld [vmem:[%s13232_s9 + $0x38] sm:$0xff]   ;;  %v10496_v28 = vld [vmem:[%s13233_s8 + $0x8] sm:$0xff]   ;;  %v10507_v31 = vld [vmem:[%s13233_s8 + $0x10] sm:$0xff]  }
  0x22   :  { %7936 = vmatprep.subr.msk.bf16.mxu0 %vm199_vm1, %v793_v42  ;;  %v10484_v27 = vld [vmem:[%s13228_s26 + $0x1e] sm:$0x3f] }
  0x23   :  { %v9688_v35 = vld [vmem:[%s13233_s8 + $0x38] sm:$0xff]   ;;  %v9689_v37 = vld [vmem:[%s13234_s3] sm:$0xff]  }
  0x24   :  { %5897 = vperm.xlu1 %9595, %v10226_v36  }
  0x25   :  { %8615 = vmatmul.mubr.msk.bf16.gmra.mrb[4].mxu1 %vm174_vm0, %v9657_v33  ;;  %5885 = vperm.xlu0 %9594, %v10240_v41  }
  0x26   :  { %8618 = vmatprep.mubr.msk.bf16.mxu1 %vm174_vm0, %v9658_v39  ;;  %7887 = vmatmul.mubr.msk.bf16.gmra.mrb[4].mxu0 %vm174_vm0, %v9654_v25  ;;  %v10478_v25 = vld [vmem:[%s13233_s8] sm:$0xff]  }
  0x27   :  { %261 = vmatprep.mubr.bf16.mxu0 %v13201_v2 }
  0x28   :  { %5921 = vperm.xlu1 %9595, %v10249_v43  }
  0x29   :  { %5909 = vperm.xlu0 %9594, %v10262_v45  }
  0x2c   :  { %5945 = vperm.xlu1 %9595, %v10269_v46  }
  0x2d   :  { %8619 = vmatmul.mubr.msk.bf16.gmra.mrb[8].mxu1 %vm174_vm0, %v9659_v44  ;;  %5933 = vperm.xlu0 %9594, %v10278_v48  }
  0x2e   :  { %8622 = vmatprep.mubr.msk.bf16.mxu1 %vm174_vm0, %v9660_v47  ;;  %7888 = vmatmul.mubr.msk.bf16.gmra.mrb[8].mxu0 %vm174_vm0, %v9656_v30  ;;  %v1876_v30 = vcombine.high %v10484_v27, %v10484_v27 }
  0x2f   :  { %271 = vmatprep.mubr.bf16.mxu0 %v13201_v2 }
  0x30   :  { %9597 = vset.pattern.permute.xlu1 %v9976_v49 }
  0x31   :  { %5999 = vperm.xlu1 %9597, %v10146_v9   ;;  %9596 = vset.pattern.permute.xlu0 %v9976_v49 }
  0x32   :  { %5988 = vperm.xlu0 %9596, %v10129_v3  }
  0x35   :  { %8623 = vmatmul.mubr.msk.bf16.gmra.mrb[12].mxu1 %vm174_vm0, %v9661_v50  ;;  %6010 = vperm.xlu1 %9597, %v10122_v0  }
  0x36   :  { %8628 = vmatprep.mubr.msk.bf16.mxu1 %vm174_vm0, %v10293_v51  ;;  %7889 = vmatmul.mubr.msk.bf16.gmra.mrb[12].mxu0 %vm174_vm0, %v9657_v33  ;;  %v1890_v33 = vrot.slane %v1876_v30, %v10158_v14 }
  0x37   :  { %6021 = vperm.xlu0 %9596, %v10138_v5   ;;  %281 = vmatprep.mubr.bf16.mxu0 %v13201_v2 }
  0x39   :  { %6032 = vperm.xlu1 %9597, %v10172_v20  }
  0x3b   :  { %6043 = vperm.xlu0 %9596, %v10164_v16  }
  0x3d   :  { %8629 = vmatmul.mubr.msk.bf16.vlgmr.msra.gmra.mrb[0].mxu1 %vm174_vm0, %v10309_v53  ;;  %6054 = vperm.xlu1 %9597, %v10194_v29  }
  0x3e   :  { %8645 = vmatpush3.bf16.msra.mxu1 %v825_v55  ;;  %7890 = vmatmul.mubr.msk.bf16.gmra.mrb[16].mxu0 %vm174_vm0, %v9658_v39  ;;  %v9979_v39 = vmov 4  }
  0x3f   :  { %8632 = vmatprep.mubr.msk.bf16.mxu1 %vm174_vm0, %v10316_v56  ;;  %6065 = vperm.xlu0 %9596, %v10185_v26  }
  0x40   :  { %291 = vmatprep.mubr.bf16.mxu0 %v13201_v2  ;;  %9573 = vmatprep.subr.msk.bf16.mxu1 %vm199_vm1, %v1158_v57  ;;  %v9693_v57 = vld [vmem:[%s13234_s3 + $0x18] sm:$0xff]  }
  0x41   :  { %6076 = vperm.xlu1 %9597, %v10216_v34  }
  0x43   :  { %6087 = vperm.xlu0 %9596, %v10206_v32  }
  0x45   :  { %8633 = vmatmul.mubr.msk.bf16.gmra.mrb[4].mxu1 %vm174_vm0, %v10331_v58  ;;  %6098 = vperm.xlu1 %9597, %v10240_v41  }
  0x46   :  { %8636 = vmatprep.mubr.msk.bf16.mxu1 %vm174_vm0, %v10338_v59  ;;  %7891 = vmatmul.mubr.msk.bf16.gmra.mrb[20].mxu0 %vm174_vm0, %v9659_v44 }
  0x47   :  { %6109 = vperm.xlu0 %9596, %v10226_v36   ;;  %301 = vmatprep.mubr.bf16.mxu0 %v13201_v2 }
  0x49   :  { %6120 = vperm.xlu1 %9597, %v10262_v45  }
  0x4b   :  { %6131 = vperm.xlu0 %9596, %v10249_v43  }
  0x4d   :  { %8637 = vmatmul.mubr.msk.bf16.gmra.mrb[8].mxu1 %vm174_vm0, %v10352_v60  ;;  %6142 = vperm.xlu1 %9597, %v10278_v48  }
  0x4e   :  { %8640 = vmatprep.mubr.msk.bf16.mxu1 %vm174_vm0, %v10358_v61  ;;  %7892 = vmatmul.mubr.msk.bf16.gmra.mrb[24].mxu0 %vm174_vm0, %v9660_v47 }
  0x4f   :  { %6153 = vperm.xlu0 %9596, %v10269_v46   ;;  %311 = vmatprep.mubr.bf16.mxu0 %v13201_v2 }
  0x51   :  { %9598 = vset.pattern.permute.xlu1 %v9977_v63 }
  0x52   :  { %6212 = vperm.xlu1 %9598, %v10129_v3  }
  0x53   :  { %9599 = vset.pattern.permute.xlu0 %v9977_v63  ;;  %v9695_v63 = vld [vmem:[%s13234_s3 + $0x28] sm:$0xff]  }
  0x54   :  { %6223 = vperm.xlu0 %9599, %v10146_v9  }
  0x55   :  { %8641 = vmatmul.mubr.msk.bf16.gmra.mrb[12].mxu1 %vm174_vm0, %v10370_v62 }
  0x56   :  { %8646 = vmatprep.mubr.msk.bf16.mxu1 %vm174_vm0, %v10377_v1  ;;  %7893 = vmatmul.mubr.msk.bf16.gmra.mrb[28].mxu0 %vm174_vm0, %v9661_v50  ;;  %v1923_v50 = vsel %vm199_vm1, %v1890_v33, 0 }
  0x57   :  { %6234 = vperm.xlu1 %9598, %v10122_v0   ;;  %541 = vmatprep.mubr.bf16.mxu0 %v13201_v2 }
  0x58   :  { %6256 = vperm.xlu0 %9599, %v10172_v20  }
  0x5b   :  { %6245 = vperm.xlu1 %9598, %v10138_v5  }
  0x5c   :  { %6278 = vperm.xlu0 %9599, %v10194_v29  }
  0x5d   :  { %8647 = vmatmul.mubr.msk.bf16.vlgmr.msra.gmra.mrb[0].mxu1 %vm174_vm0, %v10395_v6 }
  0x5e   :  { %8663 = vmatpush3.bf16.msra.mxu1 %v1191_v12  ;;  %8650 = vmatprep.mubr.msk.bf16.mxu1 %vm174_vm0, %v10404_v10  ;;  %v10702_v12 = vld [vmem:[%s13189_s24 + $0x2c] sm:$0xf] }
  0x5f   :  { %7911 = vmatmul.mubr.msk.bf16.vlgmr.msra.gmra.mrb[0].mxu0 %vm174_vm0, %v10293_v51  ;;  %6267 = vperm.xlu1 %9598, %v10164_v16  }
  0x60   :  { %828 = vmatpush1.bf16.msra.mxu0 %v819_v13  ;;  %551 = vmatprep.mubr.bf16.mxu0 %v13201_v2 }
  0x61   :  { %6300 = vperm.xlu0 %9599, %v10216_v34   ;;  %9574 = vmatprep.subr.msk.bf16.mxu1 %vm199_vm1, %v1524_v15 }
  0x62   :  { %7962 = vmatprep.subr.msk.bf16.mxu0 %vm199_vm1, %v1159_v17 }
  0x63   :  { %6289 = vperm.xlu1 %9598, %v10185_v26  }
  0x65   :  { %8651 = vmatmul.mubr.msk.bf16.gmra.mrb[4].mxu1 %vm174_vm0, %v10429_v18  ;;  %6322 = vperm.xlu0 %9599, %v10240_v41  }
  0x66   :  { %8654 = vmatprep.mubr.msk.bf16.mxu1 %vm174_vm0, %v10435_v19 }
  0x67   :  { %7912 = vmatmul.mubr.msk.bf16.gmra.mrb[4].mxu0 %vm174_vm0, %v10309_v53  ;;  %6311 = vperm.xlu1 %9598, %v10206_v32  }
  0x68   :  { %561 = vmatprep.mubr.bf16.mxu0 %v13201_v2 }
  0x69   :  { %6344 = vperm.xlu0 %9599, %v10262_v45  }
  0x6b   :  { %6333 = vperm.xlu1 %9598, %v10226_v36  }
  0x6d   :  { %8655 = vmatmul.mubr.msk.bf16.gmra.mrb[8].mxu1 %vm174_vm0, %v10450_v21  ;;  %6366 = vperm.xlu0 %9599, %v10278_v48  }
  0x6e   :  { %8658 = vmatprep.mubr.msk.bf16.mxu1 %vm174_vm0, %v10457_v22 }
  0x6f   :  { %7913 = vmatmul.mubr.msk.bf16.gmra.mrb[8].mxu0 %vm174_vm0, %v10316_v56  ;;  %6355 = vperm.xlu1 %9598, %v10249_v43   ;;  %v10630_v56 = vld [vmem:[%s13189_s24 + $0xc] sm:$0xf] }
  0x70   :  { %571 = vmatprep.mubr.bf16.mxu0 %v13201_v2 }
  0x71   :  { %9600 = vset.pattern.permute.xlu0 %v9978_v24 }
  0x72   :  { %6436 = vperm.xlu0 %9600, %v10129_v3  }
  0x73   :  { %6377 = vperm.xlu1 %9598, %v10269_v46  }
  0x75   :  { %8659 = vmatmul.mubr.msk.bf16.gmra.mrb[12].mxu1 %vm174_vm0, %v10471_v23 }
  0x76   :  { %6469 = vperm.xlu0 %9600, %v10138_v5   ;;  %8664 = vmatprep.mubr.msk.bf16.mxu1 %vm174_vm0, %v10478_v25  ;;  %v1557_v5 = vsel %vm199_vm1, %v1524_v15, 0  ;;  %v9698_v15 = vld [vmem:[%s13235_s29] sm:$0xff]  }
  0x77   :  { %7914 = vmatmul.mubr.msk.bf16.gmra.mrb[12].mxu0 %vm174_vm0, %v10331_v58  ;;  %9601 = vset.pattern.permute.xlu1 %v9978_v24  ;;  %v10720_v24 = vld [vmem:[%s13189_s24 + $0x34] sm:$0xf] }
  0x78   :  { %6447 = vperm.xlu1 %9601, %v10146_v9   ;;  %581 = vmatprep.mubr.bf16.mxu0 %v13201_v2 }
  0x7a   :  { %6491 = vperm.xlu0 %9600, %v10164_v16   ;;  %v10530_v16 = vld [vmem:[%s13233_s8 + $0x20] sm:$0xff]  }
  0x7c   :  { %6458 = vperm.xlu1 %9601, %v10122_v0   ;;  %v10522_v0 = vld [vmem:[%s13233_s8 + $0x18] sm:$0xff]  }
  0x7d   :  { %8665 = vmatmul.mubr.msk.bf16.vlgmr.msra.gmra.mrb[0].mxu1 %vm174_vm0, %v10496_v28 }
  0x7e   :  { %8681 = vmatpush3.bf16.msra.mxu1 %v1557_v5  ;;  %6513 = vperm.xlu0 %9600, %v10185_v26   ;;  %v10544_v26 = vld [vmem:[%s13233_s8 + $0x28] sm:$0xff]  }
  0x7f   :  { %7915 = vmatmul.mubr.msk.bf16.gmra.mrb[16].mxu0 %vm174_vm0, %v10338_v59  ;;  %8668 = vmatprep.mubr.msk.bf16.mxu1 %vm174_vm0, %v10507_v31  ;;  %v8057_v5 = vld [vmem:[%s13228_s26 + $0x2a] sm:$0x3f] }
  0x80   :  { %6480 = vperm.xlu1 %9601, %v10172_v20   ;;  %591 = vmatprep.mubr.bf16.mxu0 %v13201_v2 }
  0x81   :  { %9575 = vmatprep.subr.msk.bf16.mxu1 %vm199_vm1, %v1890_v33 }
  0x82   :  { %6535 = vperm.xlu0 %9600, %v10206_v32   ;;  %v9687_v32 = vld [vmem:[%s13233_s8 + $0x30] sm:$0xff]  }
  0x84   :  { %6502 = vperm.xlu1 %9601, %v10194_v29  }
  0x85   :  { %8669 = vmatmul.mubr.msk.bf16.gmra.mrb[4].mxu1 %vm174_vm0, %v10522_v0 }
  0x86   :  { %6557 = vperm.xlu0 %9600, %v10226_v36   ;;  %8672 = vmatprep.mubr.msk.bf16.mxu1 %vm174_vm0, %v10530_v16 }
  0x87   :  { %7916 = vmatmul.mubr.msk.bf16.gmra.mrb[20].mxu0 %vm174_vm0, %v10352_v60  ;;  %v10651_v60 = vld [vmem:[%s13189_s24 + $0x14] sm:$0xf] }
  0x88   :  { %6524 = vperm.xlu1 %9601, %v10216_v34   ;;  %601 = vmatprep.mubr.bf16.mxu0 %v13201_v2 }
  0x8a   :  { %6579 = vperm.xlu0 %9600, %v10249_v43   ;;  %v8031_v43 = vld [vmem:[%s13228_s26 + $0x24] sm:$0x3f] }
  0x8b   :  { %v2242_v49 = vcombine.high %v8031_v43, %v8031_v43  ;;  %v9701_v43 = vld [vmem:[%s13235_s29 + $0x10] sm:$0xff]  }
  0x8c   :  { %6546 = vperm.xlu1 %9601, %v10240_v41  }
  0x8d   :  { %8673 = vmatmul.mubr.msk.bf16.gmra.mrb[8].mxu1 %vm174_vm0, %v10544_v26  ;;  %v10614_v53 = vrot.slane %v2242_v49, %v10158_v14 }
  0x8e   :  { %6601 = vperm.xlu0 %9600, %v10269_v46   ;;  %8676 = vmatprep.mubr.msk.bf16.mxu1 %vm174_vm0, %v9687_v32  ;;  %v9692_v46 = vld [vmem:[%s13234_s3 + $0x10] sm:$0xff]   ;;  %v10738_v32 = vld [vmem:[%s13189_s24 + $0x3c] sm:$0xf] }
  0x8f   :  { %7917 = vmatmul.mubr.msk.bf16.gmra.mrb[24].mxu0 %vm174_vm0, %v10358_v61  ;;  %v10563_v36 = vpop.permute.xlu1 %5789  ;;  %v10568_v38 = vpop.permute.xlu0 %5765 }
  0x90   :  { %6568 = vperm.xlu1 %9601, %v10262_v45   ;;  %611 = vmatprep.mubr.bf16.mxu0 %v13201_v2 }
  0x92   :  { %9603 = vset.pattern.permute.xlu0 %v9979_v39 }
  0x93   :  { %6671 = vperm.xlu0 %9603, %v10146_v9   ;;  %v10572_v40 = vpop.permute.xlu1 %5801  ;;  %v10574_v42 = vpop.permute.xlu0 %5777  ;;  %v9690_v9 = vld [vmem:[%s13234_s3 + $0x8] sm:$0xff]  }
  0x94   :  { %6590 = vperm.xlu1 %9601, %v10278_v48  }
  0x95   :  { %8677 = vmatmul.mubr.msk.bf16.gmra.mrb[12].mxu1 %vm174_vm0, %v9688_v35  ;;  %v9699_v35 = vld [vmem:[%s13235_s29 + $0x8] sm:$0xff]  }
  0x96   :  { %8682 = vmatprep.mubr.msk.bf16.mxu1 %vm174_vm0, %v9689_v37 }
  0x97   :  { %7918 = vmatmul.mubr.msk.bf16.gmra.mrb[28].mxu0 %vm174_vm0, %v10370_v62  ;;  %6704 = vperm.xlu0 %9603, %v10172_v20   ;;  %v10588_v44 = vpop.permute.xlu1 %5825  ;;  %v10594_v47 = vpop.permute.xlu0 %5813  ;;  %v10598_v20 = vrot.slane %v10383_v4, %v10158_v14  ;;  %v10666_v62 = vld [vmem:[%s13189_s24 + $0x1c] sm:$0xf] }
  0x98   :  { %9602 = vset.pattern.permute.xlu1 %v9979_v39  ;;  %859 = vmatprep.mubr.bf16.mxu0 %v13201_v2  ;;  %v2289_v39 = vsel %vm199_vm1, %v10614_v53, 0 }
  0x99   :  { %6660 = vperm.xlu1 %9602, %v10129_v3   ;;  %v1185_v3 = vsel %vm199_vm1, %v10407_v11, 0  ;;  %v1525_v54 = vcombine.high %v10598_v20, %v10598_v20  ;;  %v9980_v11 = vmov 5  }
  0x9b   :  { %6726 = vperm.xlu0 %9603, %v10194_v29   ;;  %v10602_v51 = vpop.permute.xlu1 %5849 }
  0x9c   :  { %v10617_v29 = vpop.permute.xlu0 %5837 }
  0x9d   :  { %8683 = vmatmul.mubr.msk.bf16.vlgmr.msra.gmra.mrb[0].mxu1 %vm174_vm0, %v9690_v9  ;;  %6682 = vperm.xlu1 %9602, %v10608_v52  }
  0x9e   :  { %8699 = vmatpush3.bf16.msra.mxu1 %v1923_v50  ;;  %8686 = vmatprep.mubr.msk.bf16.mxu1 %vm174_vm0, %v9692_v46  ;;  %v10763_v50 = vld [vmem:[%s13189_s24 + $0x4] sm:$0xf] }
  0x9f   :  { %7937 = vmatmul.mubr.msk.bf16.vlgmr.msra.gmra.mrb[0].mxu0 %vm174_vm0, %v10377_v1  ;;  %6748 = vperm.xlu0 %9603, %v10216_v34   ;;  %v10625_v55 = vpop.permute.xlu1 %5873  ;;  %v9694_v34 = vld [vmem:[%s13234_s3 + $0x20] sm:$0xff]   ;;  %v9696_v1 = vld [vmem:[%s13234_s3 + $0x30] sm:$0xff]  }
  0xa0   :  { %1194 = vmatpush1.bf16.msra.mxu0 %v1185_v3  ;;  %869 = vmatprep.mubr.bf16.mxu0 %v13201_v2  ;;  %v10641_v58 = vpop.permute.xlu0 %5861  ;;  %v9702_v3 = vld [vmem:[%s13235_s29 + $0x18] sm:$0xff]  }
  0xa1   :  { %6693 = vperm.xlu1 %9602, %v10630_v56   ;;  %9576 = vmatprep.subr.msk.bf16.mxu1 %vm199_vm1, %v10614_v53 }
  0xa2   :  { %7988 = vmatprep.subr.msk.bf16.mxu0 %vm199_vm1, %v1525_v54 }
  0xa3   :  { %6770 = vperm.xlu0 %9603, %v10240_v41   ;;  %v10645_v59 = vpop.permute.xlu1 %5897 }
  0xa4   :  { %v10655_v61 = vpop.permute.xlu0 %5885 }
  0xa5   :  { %8687 = vmatmul.mubr.msk.bf16.gmra.mrb[4].mxu1 %vm174_vm0, %v9693_v57  ;;  %6715 = vperm.xlu1 %9602, %v10651_v60  }
  0xa6   :  { %8690 = vmatprep.mubr.msk.bf16.mxu1 %vm174_vm0, %v9694_v34 }
  0xa7   :  { %7938 = vmatmul.mubr.msk.bf16.gmra.mrb[4].mxu0 %vm174_vm0, %v10395_v6  ;;  %6792 = vperm.xlu0 %9603, %v10262_v45   ;;  %v10661_v41 = vpop.permute.xlu1 %5921  ;;  %v10684_v6 = vld [vmem:[%s13189_s24 + $0x24] sm:$0xf] }
  0xa8   :  { %879 = vmatprep.mubr.bf16.mxu0 %v13201_v2  ;;  %v10675_v45 = vpop.permute.xlu0 %5909 }
  0xa9   :  { %6737 = vperm.xlu1 %9602, %v10666_v62  }
  0xab   :  { %6814 = vperm.xlu0 %9603, %v10278_v48   ;;  %v10678_v4 = vpop.permute.xlu1 %5945  ;;  %v10695_v48 = vld [vmem:[%s13189_s24] sm:$0xf] }
  0xac   :  { %v10688_v7 = vpop.permute.xlu0 %5933 }
  0xad   :  { %8691 = vmatmul.mubr.msk.bf16.gmra.mrb[8].mxu1 %vm174_vm0, %v9695_v63  ;;  %6759 = vperm.xlu1 %9602, %v10684_v6   ;;  %v10793_v63 = vld [vmem:[%s13189_s24 + $0x10] sm:$0xf] }
  0xae   :  { %8694 = vmatprep.mubr.msk.bf16.mxu1 %vm174_vm0, %v9696_v1  ;;  %v9704_v1 = vld [vmem:[%s13235_s29 + $0x28] sm:$0xff]  }
  0xaf   :  { %7939 = vmatmul.mubr.msk.bf16.gmra.mrb[8].mxu0 %vm174_vm0, %v10404_v10  ;;  %9604 = vset.pattern.permute.xlu0 %v9980_v11  ;;  %v9697_v10 = vld [vmem:[%s13234_s3 + $0x38] sm:$0xff]  }
  0xb0   :  { %6884 = vperm.xlu0 %9604, %v10695_v48   ;;  %889 = vmatprep.mubr.bf16.mxu0 %v13201_v2  ;;  %v10708_v13 = vpop.permute.xlu1 %5999 }
  0xb1   :  { %6781 = vperm.xlu1 %9602, %v10702_v12   ;;  %v10713_v17 = vpop.permute.xlu0 %5988 }
  0xb4   :  { %6917 = vperm.xlu0 %9604, %v10630_v56   ;;  %v10723_v30 = vpop.permute.xlu1 %6010 }
  0xb5   :  { %8695 = vmatmul.mubr.msk.bf16.gmra.mrb[12].mxu1 %vm174_vm0, %v9697_v10  ;;  %6803 = vperm.xlu1 %9602, %v10720_v24  }
  0xb6   :  { %8700 = vmatprep.mubr.msk.bf16.mxu1 %vm174_vm0, %v9698_v15  ;;  %v10731_v33 = vpop.permute.xlu0 %6021  ;;  %v10811_v15 = vld [vmem:[%s13189_s24 + $0x18] sm:$0xf] }
  0xb7   :  { %7940 = vmatmul.mubr.msk.bf16.gmra.mrb[12].mxu0 %vm174_vm0, %v10429_v18  ;;  %v2608_v18 = vcombine.high %v8057_v5, %v8057_v5 }
  0xb8   :  { %6939 = vperm.xlu0 %9604, %v10651_v60   ;;  %899 = vmatprep.mubr.bf16.mxu0 %v13201_v2  ;;  %v10744_v37 = vpop.permute.xlu1 %6032 }
  0xb9   :  { %6825 = vperm.xlu1 %9602, %v10738_v32   ;;  %v10758_v49 = vrot.slane %v2608_v18, %v10158_v14  ;;  %v10826_v18 = vld [vmem:[%s13189_s24 + $0x20] sm:$0xf] }
  0xba   :  { %v10751_v9 = vpop.permute.xlu0 %6043 }
  0xbc   :  { %6961 = vperm.xlu0 %9604, %v10666_v62   ;;  %v10755_v46 = vpop.permute.xlu1 %6054 }
  0xbd   :  { %8701 = vmatmul.mubr.msk.bf16.vlgmr.msra.gmra.mrb[0].mxu1 %vm174_vm0, %v9699_v35  ;;  %9605 = vset.pattern.permute.xlu1 %v9980_v11 }
  0xbe   :  { %6895 = vperm.xlu1 %9605, %v10763_v50   ;;  %8717 = vmatpush3.bf16.msra.mxu1 %v2289_v39  ;;  %v10772_v53 = vpop.permute.xlu0 %6065  ;;  %v9706_v39 = vld [vmem:[%s13235_s29 + $0x38] sm:$0xff]  }
  0xbf   :  { %7941 = vmatmul.mubr.msk.bf16.gmra.mrb[16].mxu0 %vm174_vm0, %v10435_v19  ;;  %8704 = vmatprep.mubr.msk.bf16.mxu1 %vm174_vm0, %v9701_v43  ;;  %v9703_v19 = vld [vmem:[%s13235_s29 + $0x20] sm:$0xff]  }
  0xc0   :  { %6983 = vperm.xlu0 %9604, %v10684_v6   ;;  %909 = vmatprep.mubr.bf16.mxu0 %v13201_v2  ;;  %v10776_v54 = vpop.permute.xlu1 %6076 }
  0xc1   :  { %9577 = vmatprep.subr.msk.bf16.mxu1 %vm199_vm1, %v10758_v49 }
  0xc2   :  { %6906 = vperm.xlu1 %9605, %v10608_v52   ;;  %v10784_v57 = vpop.permute.xlu0 %6087 }
  0xc3   :  { %13236 = vst [vmem:[#allocation6_spill] sm:$0xff] %v10784_v57 }
  0xc4   :  { %7005 = vperm.xlu0 %9604, %v10702_v12   ;;  %v10788_v34 = vpop.permute.xlu1 %6098 }
  0xc5   :  { %8705 = vmatmul.mubr.msk.bf16.gmra.mrb[4].mxu1 %vm174_vm0, %v9702_v3  ;;  %13237 = vst [vmem:[#allocation7_spill] sm:$0xff] %v10788_v34  ;;  %v9981_v3 = vmov 6   ;;  %v13246_v34 = vmov 0  }
  0xc6   :  { %6928 = vperm.xlu1 %9605, %v10793_v63   ;;  %8708 = vmatprep.mubr.msk.bf16.mxu1 %vm174_vm0, %v9703_v19  ;;  %v10802_v11 = vpop.permute.xlu0 %6109  ;;  %v10842_v19 = vld [vmem:[%s13189_s24 + $0x28] sm:$0xf] }
  0xc7   :  { %7942 = vmatmul.mubr.msk.bf16.gmra.mrb[20].mxu0 %vm174_vm0, %v10450_v21  ;;  %13238 = vst [vmem:[#allocation8_spill] sm:$0xff] %v10802_v11  ;;  %v9705_v21 = vld [vmem:[%s13235_s29 + $0x30] sm:$0xff]   ;;  %v2655_v11 = vsel %vm199_vm1, %v10758_v49, 0 }
  0xc8   :  { %7027 = vperm.xlu0 %9604, %v10720_v24   ;;  %919 = vmatprep.mubr.bf16.mxu0 %v13201_v2  ;;  %v10806_v10 = vpop.permute.xlu1 %6120 }
  0xc9   :  { %13239 = vst [vmem:[#allocation9_spill] sm:$0xff] %v10806_v10  ;;  %v9710_v10 = vld [vmem:[%s13243_s2 + $0x10] sm:$0xff]  }
  0xca   :  { %6950 = vperm.xlu1 %9605, %v10811_v15   ;;  %v10817_v5 = vpop.permute.xlu0 %6131 }
  0xcb   :  { %13240 = vst [vmem:[#allocation10_spill] sm:$0xff] %v10817_v5 }
  0xcc   :  { %7049 = vperm.xlu0 %9604, %v10738_v32   ;;  %v10821_v35 = vpop.permute.xlu1 %6142 }
  0xcd   :  { %8709 = vmatmul.mubr.msk.bf16.gmra.mrb[8].mxu1 %vm174_vm0, %v9704_v1  ;;  %13241 = vst [vmem:[#allocation11_spill] sm:$0xff] %v10821_v35  ;;  %v9707_v1 = vld [vmem:[%s13243_s2] sm:$0xff]   ;;  %v10885_v35 = vrot.slane %v10484_v27, %v10158_v14 }
  0xce   :  { %6972 = vperm.xlu1 %9605, %v10826_v18   ;;  %8712 = vmatprep.mubr.msk.bf16.mxu1 %vm174_vm0, %v9705_v21  ;;  %v10835_v43 = vpop.permute.xlu0 %6153 }
  0xcf   :  { %7943 = vmatmul.mubr.msk.bf16.gmra.mrb[24].mxu0 %vm174_vm0, %v10457_v22  ;;  %13242 = vst [vmem:[#allocation12_spill] sm:$0xff] %v10835_v43  ;;  %v1891_v49 = vcombine.high %v10885_v35, %v10885_v35 }
  0xd0   :  { %9607 = vset.pattern.permute.xlu0 %v9981_v3  ;;  %929 = vmatprep.mubr.bf16.mxu0 %v13201_v2  ;;  %v10857_v2 = vld [vmem:[%s13189_s24 + $0x30] sm:$0xf] }
  0xd1   :  { %7119 = vperm.xlu0 %9607, %v10763_v50   ;;  %v10845_v22 = vpop.permute.xlu1 %6212 }
  0xd2   :  { %6994 = vperm.xlu1 %9605, %v10842_v19  }
  0xd3   :  { %v10850_v21 = vpop.permute.xlu0 %6223 }
  0xd4   :  { %13244 = vst [vmem:[#allocation13_spill] sm:$0xff] %v10850_v21  ;;  %v8083_v21 = vld [vmem:[%s13228_s26 + $0x30] sm:$0x3f] }
  0xd5   :  { %8713 = vmatmul.mubr.msk.bf16.gmra.mrb[12].mxu1 %vm174_vm0, %v9706_v39  ;;  %7152 = vperm.xlu0 %9607, %v10793_v63   ;;  %v9708_v39 = vld [vmem:[%s13243_s2 + $0x8] sm:$0xff]  }
  0xd6   :  { %7016 = vperm.xlu1 %9605, %v10857_v2   ;;  %8718 = vmatprep.mubr.msk.bf16.mxu1 %vm174_vm0, %v9707_v1  ;;  %v10861_v43 = vpop.permute.xlu1 %6234  ;;  %v10878_v1 = vld [vmem:[%s13189_s24 + $0x38] sm:$0xf] }
  0xd7   :  { %13245 = vst [vmem:[#allocation14_spill] sm:$0xff] %v10861_v43  ;;  %7944 = vmatmul.mubr.msk.bf16.gmra.mrb[28].mxu0 %vm174_vm0, %v10471_v23  ;;  %v10872_v5 = vpop.permute.xlu0 %6256  ;;  %v2974_v43 = vcombine.high %v8083_v21, %v8083_v21 }
  0xd8   :  { %1225 = vmatprep.mubr.bf16.mxu0 %v13246_v34  ;;  %13247 = vst [vmem:[#allocation15_spill] sm:$0xff] %v10872_v5  ;;  %v1551_v5 = vsel %vm199_vm1, %v10598_v20, 0  ;;  %v9711_v20 = vld [vmem:[%s13243_s2 + $0x18] sm:$0xff]  }
  0xd9   :  { %7174 = vperm.xlu0 %9607, %v10811_v15   ;;  %v2988_v21 = vrot.slane %v2974_v43, %v10158_v14  ;;  %v9713_v43 = vld [vmem:[%s13243_s2 + $0x28] sm:$0xff]  }
  0xda   :  { %7038 = vperm.xlu1 %9605, %v10878_v1   ;;  %v10881_v23 = vpop.permute.xlu1 %6245 }
  0xdb   :  { %v10894_v57 = vpop.permute.xlu0 %6278 }
  0xdc   :  { %13248 = vst [vmem:[#allocation16_spill] sm:$0xff] %v10894_v57 }
  0xdd   :  { %8719 = vmatmul.mubr.msk.bf16.vlgmr.msra.gmra.mrb[0].mxu1 %vm174_vm0, %v9708_v39  ;;  %7196 = vperm.xlu0 %9607, %v10826_v18  }
  0xde   :  { %9606 = vset.pattern.permute.xlu1 %v9981_v3  ;;  %8735 = vmatpush3.bf16.msra.mxu1 %v2655_v11  ;;  %v10898_v27 = vpop.permute.xlu1 %6267 }
  0xdf   :  { %7963 = vmatmul.mubr.msk.bf16.vlgmr.msra.gmra.mrb[0].mxu0 %vm174_vm0, %v10478_v25  ;;  %7108 = vperm.xlu1 %9606, %v10695_v48   ;;  %v9712_v25 = vld [vmem:[%s13243_s2 + $0x20] sm:$0xff]  }
  0xe0   :  { %1560 = vmatpush1.bf16.msra.mxu0 %v1551_v5  ;;  %8722 = vmatprep.mubr.msk.bf16.mxu1 %vm174_vm0, %v9710_v10  ;;  %v10910_v11 = vpop.permute.xlu0 %6300 }
  0xe1   :  { %13249 = vst [vmem:[#allocation17_spill] sm:$0xff] %v10910_v11  ;;  %7218 = vperm.xlu0 %9607, %v10842_v19   ;;  %1235 = vmatprep.mubr.bf16.mxu0 %v13246_v34 }
  0xe2   :  { %v10914_v14 = vpop.permute.xlu1 %6289  ;;  %9578 = vmatprep.subr.msk.bf16.mxu1 %vm199_vm1, %v2988_v21  ;;  %8014 = vmatprep.subr.msk.bf16.mxu0 %vm199_vm1, %v1891_v49  ;;  %v9714_v49 = vld [vmem:[%s13243_s2 + $0x30] sm:$0xff]  }
  0xe3   :  { %7130 = vperm.xlu1 %9606, %v10608_v52  }
  0xe4   :  { %v10922_v10 = vpop.permute.xlu0 %6322 }
  0xe5   :  { %13250 = vst [vmem:[#allocation18_spill] sm:$0xff] %v10922_v10  ;;  %8723 = vmatmul.mubr.msk.bf16.gmra.mrb[4].mxu1 %vm174_vm0, %v9711_v20  ;;  %7240 = vperm.xlu0 %9607, %v10857_v2   ;;  %v9982_v20 = vmov 7   ;;  %v9715_v10 = vld [vmem:[%s13243_s2 + $0x38] sm:$0xff]  }
  0xe6   :  { %8726 = vmatprep.mubr.msk.bf16.mxu1 %vm174_vm0, %v9712_v25  ;;  %v10927_v5 = vpop.permute.xlu1 %6311 }
  0xe7   :  { %7964 = vmatmul.mubr.msk.bf16.gmra.mrb[4].mxu0 %vm174_vm0, %v10496_v28  ;;  %7141 = vperm.xlu1 %9606, %v10630_v56  }
  0xe8   :  { %1245 = vmatprep.mubr.bf16.mxu0 %v13246_v34  ;;  %v10936_v3 = vpop.permute.xlu0 %6344 }
  0xe9   :  { %7262 = vperm.xlu0 %9607, %v10878_v1  }
  0xea   :  { %v10939_v39 = vpop.permute.xlu1 %6333 }
  0xeb   :  { %7163 = vperm.xlu1 %9606, %v10651_v60  }
  0xec   :  { %v10945_v28 = vpop.permute.xlu0 %6366 }
  0xed   :  { %8727 = vmatmul.mubr.msk.bf16.gmra.mrb[8].mxu1 %vm174_vm0, %v9713_v43  ;;  %9608 = vset.pattern.permute.xlu0 %v9982_v20 }
  0xee   :  { %7332 = vperm.xlu0 %9608, %v10695_v48   ;;  %8730 = vmatprep.mubr.msk.bf16.mxu1 %vm174_vm0, %v9714_v49  ;;  %v10950_v25 = vpop.permute.xlu1 %6355  ;;  %v9716_v49 = vld [vmem:[%s13253_s30] sm:$0xff]  }
  0xef   :  { %13251 = vst [vmem:[#allocation19_spill] sm:$0xff] %v10950_v25  ;;  %7965 = vmatmul.mubr.msk.bf16.gmra.mrb[8].mxu0 %vm174_vm0, %v10507_v31  ;;  %7185 = vperm.xlu1 %9606, %v10666_v62  }
  0xf0   :  { %1255 = vmatprep.mubr.bf16.mxu0 %v13246_v34 }
  0xf1   :  { %v10959_v43 = vpop.permute.xlu0 %6436 }
  0xf2   :  { %7365 = vperm.xlu0 %9608, %v10630_v56   ;;  %v10962_v48 = vpop.permute.xlu1 %6377 }
  0xf3   :  { %13252 = vst [vmem:[#allocation20_spill] sm:$0xff] %v10962_v48 }
  0xf4   :  { %30 = vsyncpa [#allocation3], 0  ;;  %7207 = vperm.xlu1 %9606, %v10684_v6   ;;  %v9983_v31 = vmov 839922192   ;;  %s13273_s25 = sld [smem:[#allocation44_spill]]  ;;  %s13328_s28 = sld [smem:[#allocation47_spill]] }
  0xf5   :  { %v5769_v11 = vunpack.c.l.s4 %v9983_v31  ;;  %8731 = vmatmul.mubr.msk.bf16.gmra.mrb[12].mxu1 %vm174_vm0, %v9715_v10  ;;  %v10969_v57 = vpop.permute.xlu0 %6469  ;;  %v9717_v10 = vld [vmem:[%s13253_s30 + $0x8] sm:$0xff]   ;;  %vm5714_vm2 = vcmask 785408   ;;  %vm7843_vm3 = vcmask 818944  }
  0xf6   :  { %7387 = vperm.xlu0 %9608, %v10651_v60   ;;  %8736 = vmatprep.mubr.msk.bf16.mxu1 %vm174_vm0, %v9716_v49  ;;  %v3021_v60 = vsel %vm199_vm1, %v2988_v21, 0  ;;  %v9719_v49 = vld [vmem:[%s13253_s30 + $0x10] sm:$0xff]  }
  0xf7   :  { %7966 = vmatmul.mubr.msk.bf16.gmra.mrb[12].mxu0 %vm174_vm0, %v10522_v0  ;;  %v10976_v56 = vpop.permute.xlu1 %6447  ;;  %v5770_v48 = vunpack.c.0.s8 %v5769_v11 }
  0xf8   :  { %7229 = vperm.xlu1 %9606, %v10702_v12   ;;  %13254 = vst [vmem:[#allocation21_spill] sm:$0xff] %v10976_v56  ;;  %1265 = vmatprep.mubr.bf16.mxu0 %v13246_v34 }
  0xf9   :  { %v10982_v31 = vpop.permute.xlu0 %6491  ;;  %v10993_v11 = vsub.s32 %v5770_v48, %v10141_v8  ;;  %v5731_v8 = vld [vmem:[%s13231_s7] sm:$0xf] }
  0xfa   :  { %7409 = vperm.xlu0 %9608, %v10666_v62   ;;  %v11001_v62 = vld [vmem:[%s13186_s21 + $0x40] sm:$0xff]  }
  0xfb   :  { %v10987_v0 = vpop.permute.xlu1 %6458  ;;  %v5798_v48 = vrot.slane %v10563_v36, %v10993_v11  ;;  %v9721_v36 = vld [vmem:[%s13253_s30 + $0x20] sm:$0xff]  }
  0xfc   :  { %7251 = vperm.xlu1 %9606, %v10720_v24   ;;  %13255 = vst [vmem:[#allocation22_spill] sm:$0xff] %v10987_v0 }
  0xfd   :  { %8737 = vmatmul.mubr.msk.bf16.vlgmr.msra.gmra.mrb[0].mxu1 %vm174_vm0, %v9717_v10  ;;  %v10996_v56 = vpop.permute.xlu0 %6513  ;;  %v9720_v10 = vld [vmem:[%s13253_s30 + $0x18] sm:$0xff]  }
  0xfe   :  { %13256 = vst [vmem:[#allocation23_spill] sm:$0xff] %v10996_v56  ;;  %8753 = vmatpush3.bf16.msra.mxu1 %v3021_v60  ;;  %7431 = vperm.xlu0 %9608, %v10684_v6   ;;  %v5774_v6 = vrot.slane %v10568_v38, %v10993_v11  ;;  %v5734_v38 = vld [vmem:[%s13231_s7 + $0xc] sm:$0xf] }
  0xff   :  { %7967 = vmatmul.mubr.msk.bf16.gmra.mrb[16].mxu0 %vm174_vm0, %v10530_v16  ;;  %v11007_v21 = vpop.permute.xlu1 %6480  ;;  %8740 = vmatprep.mubr.msk.bf16.mxu1 %vm174_vm0, %v9719_v49  ;;  %v5733_v16 = vld [vmem:[%s13231_s7 + $0x8] sm:$0xf]  ;;  %v5810_v49 = vrot.slane %v10572_v40, %v10993_v11  ;;  %v5732_v40 = vld [vmem:[%s13231_s7 + $0x4] sm:$0xf] }
 0x100   :  { %7273 = vperm.xlu1 %9606, %v10738_v32   ;;  %13257 = vst [vmem:[#allocation24_spill] sm:$0xff] %v11007_v21  ;;  %1275 = vmatprep.mubr.bf16.mxu0 %v13246_v34  ;;  %v5786_v21 = vrot.slane %v10574_v42, %v10993_v11  ;;  %v11046_v25 = vadd.bf16 %v5798_v48, %v5733_v16  ;;  %v5736_v42 = vld [vmem:[%s13231_s7 + $0x14] sm:$0xf]  ;;  %v5738_v48 = vld [vmem:[%s13231_s7 + $0x1c] sm:$0xf] }
 0x101   :  { %v11016_v60 = vpop.permute.xlu0 %6535  ;;  %8770 = vmatprep.subr.bf16.mxu1 %v11001_v62  ;;  %v11060_v56 = vadd.bf16 %v5774_v6, %v5731_v8  ;;  %v11077_v8 = vadd.bf16 %v5810_v49, %v5734_v38  ;;  %v5740_v6 = vld [vmem:[%s13231_s7 + $0x24] sm:$0xf]  ;;  %v5741_v49 = vld [vmem:[%s13231_s7 + $0x28] sm:$0xf] }
 0x102   :  { %13258 = vst [vmem:[#allocation25_spill] sm:$0xff] %v11016_v60  ;;  %7453 = vperm.xlu0 %9608, %v10702_v12   ;;  %v5834_v12 = vrot.slane %v10588_v44, %v10993_v11  ;;  %v5846_v44 = vrot.slane %v10617_v29, %v10993_v11  ;;  %v5737_v29 = vld [vmem:[%s13231_s7 + $0x18] sm:$0xf]  ;;  %v11079_v16 = vadd.bf16 %v5786_v21, %v5732_v40 }
 0x103   :  { %v11035_v0 = vpop.permute.xlu1 %6502  ;;  %v5918_v40 = vrot.slane %v10675_v45, %v10993_v11  ;;  %v5743_v45 = vld [vmem:[%s13231_s7 + $0x30] sm:$0xf] }
 0x104   :  { %9609 = vset.pattern.permute.xlu1 %v9982_v20  ;;  %13259 = vst [vmem:[#allocation26_spill] sm:$0xff] %v11035_v0  ;;  %v5858_v20 = vrot.slane %v10602_v51, %v10993_v11  ;;  %v5822_v0 = vrot.slane %v10594_v47, %v10993_v11  ;;  %v5735_v51 = vld [vmem:[%s13231_s7 + $0x10] sm:$0xf]  ;;  %v5882_v47 = vrot.slane %v10625_v55, %v10993_v11 }
 0x105   :  { %7343 = vperm.xlu1 %9609, %v10763_v50   ;;  %8741 = vmatmul.mubr.msk.bf16.gmra.mrb[4].mxu1 %vm174_vm0, %v9720_v10  ;;  %v11058_v60 = vpop.permute.xlu0 %6557  ;;  %v5870_v10 = vrot.slane %v10641_v58, %v10993_v11  ;;  %v5906_v55 = vrot.slane %v10645_v59, %v10993_v11  ;;  %v5894_v58 = vrot.slane %v10655_v61, %v10993_v11 }
 0x106   :  { %13260 = vst [vmem:[#allocation27_spill] sm:$0xff] %v11058_v60  ;;  %7475 = vperm.xlu0 %9608, %v10720_v24   ;;  %8744 = vmatprep.mubr.msk.bf16.mxu1 %vm174_vm0, %v9721_v36  ;;  %v5739_v60 = vld [vmem:[%s13231_s7 + $0x20] sm:$0xf]  ;;  %v11095_v21 = vadd.bf16 %v5834_v12, %v5736_v42  ;;  %v5742_v36 = vld [vmem:[%s13231_s7 + $0x2c] sm:$0xf]  ;;  %v5930_v59 = vrot.slane %v10661_v41, %v10993_v11 }
 0x107   :  { %7968 = vmatmul.mubr.msk.bf16.gmra.mrb[20].mxu0 %vm174_vm0, %v10544_v26  ;;  %v11093_v24 = vpop.permute.xlu1 %6524  ;;  %v5997_v61 = vrot.slane %v10713_v17, %v10993_v11  ;;  %v11109_v26 = vadd.bf16 %v5858_v20, %v5738_v48  ;;  %v11111_v38 = vadd.bf16 %v5822_v0, %v5735_v51  ;;  %v11113_v12 = vadd.bf16 %v5846_v44, %v5737_v29  ;;  %v5744_v41 = vld [vmem:[%s13231_s7 + $0x34] sm:$0xf]  ;;  %v5971_v17 = vld [vmem:[%s13230_s5] sm:$0xf]  ;;  %v5972_v29 = vld [vmem:[%s13230_s5 + $0x4] sm:$0xf] }
 0x108   :  { %13261 = vst [vmem:[#allocation28_spill] sm:$0xff] %v11093_v24  ;;  %1285 = vmatprep.mubr.bf16.mxu0 %v13246_v34  ;;  %v11128_v0 = vadd.bf16 %v5882_v47, %v5740_v6  ;;  %v11130_v20 = vadd.bf16 %v5870_v10, %v5739_v60  ;;  %v5954_v44 = vrot.slane %v10678_v4, %v10993_v11  ;;  %v9723_v51 = vld [vmem:[%s13253_s30 + $0x30] sm:$0xff]   ;;  %v5746_v4 = vld [vmem:[%s13231_s7 + $0x3c] sm:$0xf] }
 0x109   :  { %7354 = vperm.xlu1 %9609, %v10608_v52   ;;  %13262 = vst [vmem:[#allocation29_spill] sm:$0xff] %v11111_v38  ;;  %13263 = vst [vmem:[#allocation30_spill] sm:$0xff] %v11113_v12  ;;  %v9722_v52 = vld [vmem:[%s13253_s30 + $0x28] sm:$0xff]   ;;  %v11126_v42 = vpop.permute.xlu0 %6579  ;;  %v6008_v48 = vrot.slane %v10708_v13, %v10993_v11  ;;  %v11143_v47 = vadd.bf16 %v5906_v55, %v5742_v36  ;;  %v11145_v60 = vadd.bf16 %v5894_v58, %v5741_v49 }
 0x10a   :  { %13264 = vst [vmem:[#allocation31_spill] sm:$0xff] %v11130_v20  ;;  %7497 = vperm.xlu0 %9608, %v10738_v32   ;;  %v6019_v13 = vrot.slane %v10723_v30, %v10993_v11  ;;  %v6030_v32 = vrot.slane %v10731_v33, %v10993_v11  ;;  %v11159_v6 = vadd.bf16 %v5930_v59, %v5744_v41  ;;  %v5973_v58 = vld [vmem:[%s13230_s5 + $0x8] sm:$0xf]  ;;  %v5974_v30 = vld [vmem:[%s13230_s5 + $0xc] sm:$0xf] }
 0x10b   :  { %13265 = vst [vmem:[#allocation32_spill] sm:$0xff] %v11145_v60  ;;  %v11157_v10 = vpop.permute.xlu1 %6546  ;;  %v5942_v55 = vrot.slane %v10688_v7, %v10993_v11  ;;  %v11166_v36 = vadd.bf16 %v5997_v61, %v5971_v17  ;;  %v6041_v49 = vrot.slane %v10744_v37, %v10993_v11  ;;  %v11174_v33 = vadd.bf16 %v5918_v40, %v5743_v45  ;;  %v5745_v7 = vld [vmem:[%s13231_s7 + $0x38] sm:$0xf]  ;;  %v5975_v59 = vld [vmem:[%s13230_s5 + $0x10] sm:$0xf] }
 0x10c   :  { %13266 = vst [vmem:[#allocation33_spill] sm:$0xff] %v11157_v10  ;;  %v6063_v61 = vrot.slane %v10755_v46, %v10993_v11  ;;  %v6052_v37 = vrot.slane %v10751_v9, %v10993_v11  ;;  %v6221_v41 = vrot.slane %v10845_v22, %v10993_v11  ;;  %v11191_v17 = vadd.bf16 %v5954_v44, %v5746_v4  ;;  %v5977_v10 = vld [vmem:[%s13230_s5 + $0x18] sm:$0xf]  ;;  %v5976_v46 = vld [vmem:[%s13230_s5 + $0x14] sm:$0xf] }
 0x10d   :  { %7376 = vperm.xlu1 %9609, %v10793_v63   ;;  %8745 = vmatmul.mubr.msk.bf16.gmra.mrb[8].mxu1 %vm174_vm0, %v9722_v52  ;;  %v11189_v40 = vpop.permute.xlu0 %6601  ;;  %v11193_v45 = vadd.bf16 %v6008_v48, %v5972_v29  ;;  %v6074_v9 = vrot.slane %v10772_v53, %v10993_v11  ;;  %v6195_v22 = vld [vmem:[%s13232_s9] sm:$0xf]  ;;  %v13208_v52 = vmov 8   ;;  %v11208_v44 = vadd.bf16 %v6019_v13, %v5973_v58  ;;  %v5978_v53 = vld [vmem:[%s13230_s5 + $0x1c] sm:$0xf]  ;;  %v9893_v29 = vld [vmem:[%s13233_s8 + $0x30] sm:$0xff]  }
 0x10e   :  { %8748 = vmatprep.mubr.msk.bf16.mxu1 %vm174_vm0, %v9723_v51  ;;  %9611 = vset.pattern.permute.xlu0 %v13208_v52  ;;  %v11210_v48 = vadd.bf16 %v6030_v32, %v5974_v30  ;;  %v6085_v4 = vrot.slane %v10776_v54, %v10993_v11  ;;  %v11224_v13 = vadd.bf16 %v5942_v55, %v5745_v7  ;;  %v5979_v58 = vld [vmem:[%s13230_s5 + $0x20] sm:$0xf] }
 0x10f   :  { %7969 = vmatmul.mubr.msk.bf16.gmra.mrb[24].mxu0 %vm174_vm0, %v9893_v29  ;;  %v11221_v51 = vpop.permute.xlu1 %6568  ;;  %7567 = vperm.xlu0 %9611, %v10763_v50   ;;  %v6179_v32 = vmax.bf16 %v11166_v36, %v11060_v56  ;;  %v11228_v54 = vadd.bf16 %v6041_v49, %v5975_v59  ;;  %v11235_v30 = vadd.bf16 %v6063_v61, %v5977_v10  ;;  %v9724_v56 = vld [vmem:[%s13253_s30 + $0x38] sm:$0xff]   ;;  %v13269_v49 = vld [vmem:[#allocation6_spill] sm:$0xff]  ;;  %v13270_v59 = vld [vmem:[#allocation9_spill] sm:$0xff] }
 0x110   :  { %1295 = vmatprep.mubr.bf16.mxu0 %v13246_v34  ;;  %v11237_v29 = vadd.bf16 %v6052_v37, %v5976_v46  ;;  %v6387_v50 = vadd.bf16 %v6221_v41, %v6195_v22  ;;  %v6445_v55 = vrot.slane %v10959_v43, %v10993_v11  ;;  %v11244_v36 = vadd.bf16 %v6074_v9, %v5978_v53  ;;  %v13271_v10 = vld [vmem:[#allocation8_spill] sm:$0xff]  ;;  %v6419_v37 = vld [vmem:[%s13233_s8] sm:$0xf]  ;;  %v13275_v22 = vld [vmem:[#allocation10_spill] sm:$0xff] }
 0x111   :  { %13267 = vst [vmem:[#allocation34_spill] sm:$0xff] %v11228_v54  ;;  %7398 = vperm.xlu1 %9609, %v10811_v15   ;;  %13268 = vst [vmem:[#allocation35_spill] sm:$0xff] %v11235_v30  ;;  %v6096_v7 = vrot.slane %v13269_v49, %v10993_v11  ;;  %v6129_v52 = vrot.slane %v13270_v59, %v10993_v11  ;;  %v6118_v61 = vrot.slane %v13271_v10, %v10993_v11  ;;  %v9725_v41 = vld [vmem:[%s13273_s25] sm:$0xff]   ;;  %v5983_v59 = vld [vmem:[%s13230_s5 + $0x30] sm:$0xf] }
 0x112   :  { %v11255_v43 = vpop.permute.xlu0 %6671  ;;  %v11266_v53 = vadd.bf16 %v6085_v4, %v5979_v58  ;;  %v5980_v49 = vld [vmem:[%s13230_s5 + $0x24] sm:$0xf]  ;;  %v5982_v10 = vld [vmem:[%s13230_s5 + $0x2c] sm:$0xf]  ;;  %v13274_v58 = vld [vmem:[#allocation11_spill] sm:$0xff]  ;;  %v6140_v60 = vrot.slane %v13275_v22, %v10993_v11  ;;  %v6254_v24 = vrot.slane %v10881_v23, %v10993_v11  ;;  %v6403_v22 = vmax.bf16 %v6387_v50, %v6179_v32 }
 0x113   :  { %13272 = vst [vmem:[#allocation6_spill] sm:$0xff] %v11255_v43  ;;  %v11277_v46 = vpop.permute.xlu1 %6590  ;;  %7600 = vperm.xlu0 %9611, %v10793_v63   ;;  %v6151_v9 = vrot.slane %v13274_v58, %v10993_v11  ;;  %v5985_v4 = vld [vmem:[%s13230_s5 + $0x38] sm:$0xf]  ;;  %v5984_v58 = vld [vmem:[%s13230_s5 + $0x34] sm:$0xf]  ;;  %v6611_v38 = vadd.bf16 %v6445_v55, %v6419_v37  ;;  %v11305_v63 = vadd.bf16 %v6096_v7, %v5980_v49  ;;  %v9728_v55 = vld [vmem:[%s13186_s21 + $0x48] sm:$0xff]  }
 0x114   :  { %v6198_v23 = vld [vmem:[%s13232_s9 + $0xc] sm:$0xf]  ;;  %v11307_v12 = vadd.bf16 %v6129_v52, %v5983_v59  ;;  %v11309_v30 = vadd.bf16 %v6118_v61, %v5982_v10  ;;  %v13276_v50 = vld [vmem:[#allocation7_spill] sm:$0xff]  ;;  %v9894_v52 = vld [vmem:[%s13233_s8 + $0x38] sm:$0xff]   ;;  %v11327_v61 = vadd.bf16 %v6140_v60, %v5984_v58 }
 0x115   :  { %7420 = vperm.xlu1 %9609, %v10826_v18   ;;  %8749 = vmatmul.mubr.msk.bf16.gmra.mrb[12].mxu1 %vm174_vm0, %v9724_v56  ;;  %v6276_v56 = vrot.slane %v10898_v27, %v10993_v11  ;;  %v11325_v7 = vadd.bf16 %v6151_v9, %v5985_v4  ;;  %v6390_v37 = vadd.bf16 %v6254_v24, %v6198_v23  ;;  %v6643_v27 = vld [vmem:[%s13234_s3] sm:$0xf]  ;;  %v9726_v59 = vld [vmem:[%s13273_s25 + $0x8] sm:$0xff]   ;;  %v9729_v23 = vld [vmem:[%s13273_s25 + $0x10] sm:$0xff]  }
 0x116   :  { %8754 = vmatprep.mubr.msk.bf16.mxu1 %vm174_vm0, %v9725_v41  ;;  %v11312_v54 = vpop.permute.xlu0 %6704  ;;  %v6200_v41 = vld [vmem:[%s13232_s9 + $0x14] sm:$0xf]  ;;  %v6627_v9 = vmax.bf16 %v6611_v38, %v6403_v22  ;;  %v6478_v24 = vrot.slane %v10969_v57, %v10993_v11  ;;  %v11348_v10 = vld.sshfl [vmem:[%s13228_s26 + $0x24] sm:$0x3f pattern:$0x76325410]  ;;  %v6353_v38 = vrot.slane %v10936_v3, %v10993_v11 }
 0x117   :  { %7970 = vmatmul.mubr.msk.bf16.gmra.mrb[28].mxu0 %vm174_vm0, %v9894_v52  ;;  %7622 = vperm.xlu0 %9611, %v10811_v15   ;;  %v1917_v15 = vsel %vm199_vm1, %v10885_v35, 0  ;;  %v6191_v35 = vmax.bf16 %v11307_v12, %v11174_v33  ;;  %v6422_v58 = vld [vmem:[%s13233_s8 + $0xc] sm:$0xf]  ;;  %v13277_v52 = vld [vmem:[#allocation12_spill] sm:$0xff]  ;;  %v6392_v12 = vadd.bf16 %v6276_v56, %v6200_v41  ;;  %v6298_v33 = vrot.slane %v10914_v14, %v10993_v11  ;;  %v6207_v3 = vld [vmem:[%s13232_s9 + $0x30] sm:$0xf] }
 0x118   :  { %v6661_v49 = vpop.permute.xlu1 %6660  ;;  %1591 = vmatprep.mubr.bf16.mxu0 %v13246_v34  ;;  %v5986_v14 = vld [vmem:[%s13230_s5 + $0x3c] sm:$0xf]  ;;  %v6204_v57 = vld [vmem:[%s13232_s9 + $0x24] sm:$0xf]  ;;  %v6614_v4 = vadd.bf16 %v6478_v24, %v6422_v58  ;;  %v6399_v20 = vadd.bf16 %v6353_v38, %v6207_v3  ;;  %v6342_v38 = vrot.slane %v10939_v39, %v10993_v11 }
 0x119   :  { %7442 = vperm.xlu1 %9609, %v10842_v19   ;;  %v6669_v60 = vrot.slane %v6661_v49, %v10993_v11  ;;  %v6162_v49 = vrot.slane %v13277_v52, %v10993_v11  ;;  %v6202_v41 = vld [vmem:[%s13232_s9 + $0x1c] sm:$0xf]  ;;  %v13278_v52 = vmax.bf16 %v11210_v48, %v11077_v8  ;;  %v6375_v8 = vrot.slane %v10945_v28, %v10993_v11  ;;  %v6209_v28 = vld [vmem:[%s13232_s9 + $0x38] sm:$0xf] }
 0x11a   :  { %v11361_v22 = vpop.permute.xlu0 %6726  ;;  %v6577_v48 = vrot.slane %v11221_v51, %v10993_v11  ;;  %v9896_v51 = vld [vmem:[%s13234_s3] sm:$0xff]   ;;  %v9730_v39 = vld [vmem:[%s13273_s25 + $0x18] sm:$0xff]  }
 0x11b   :  { %v6835_v32 = vadd.bf16 %v6669_v60, %v6643_v27  ;;  %7644 = vperm.xlu0 %9611, %v10826_v18   ;;  %v6320_v27 = vrot.slane %v10927_v5, %v10993_v11  ;;  %v6500_v18 = vrot.slane %v10982_v31, %v10993_v11  ;;  %v6406_v56 = vmax.bf16 %v6390_v37, %v13278_v52  ;;  %v6424_v5 = vld [vmem:[%s13233_s8 + $0x14] sm:$0xf]  ;;  %v13282_v52 = vld [vmem:[#allocation13_spill] sm:$0xff] }
 0x11c   :  { %v11392_v60 = vpop.permute.xlu1 %6682  ;;  %v2257_v31 = vcombine.high %v11348_v10, %v11348_v10 }
 0x11d   :  { %7464 = vperm.xlu1 %9609, %v10857_v2   ;;  %v11403_v43 = vmax.bf16 %v6835_v32, %v6627_v9  ;;  %8755 = vmatmul.mubr.msk.bf16.vlgmr.msra.gmra.mrb[0].mxu1 %vm174_vm0, %v9726_v59  ;;  %v11416_v32 = vadd.bf16 %v6162_v49, %v5986_v14  ;;  %v13279_v9 = vmax.bf16 %v11237_v29, %v11095_v21  ;;  %v9731_v21 = vld [vmem:[%s13186_s21 + $0x50] sm:$0xff]  }
 0x11e   :  { %8771 = vmatpush3.bf16.msra.mxu1 %v11001_v62  ;;  %8758 = vmatprep.mubr.msk.bf16.mxu1 %vm174_vm0, %v9729_v23  ;;  %v11414_v37 = vpop.permute.xlu0 %6748  ;;  %v6394_v59 = vadd.bf16 %v6298_v33, %v6202_v41  ;;  %v6431_v62 = vld [vmem:[%s13233_s8 + $0x30] sm:$0xf]  ;;  %v6396_v29 = vadd.bf16 %v6320_v27, %v6204_v57  ;;  %v11438_v58 = vadd.bf16 %v6500_v18, %v6424_v5  ;;  %v6646_v23 = vld [vmem:[%s13234_s3 + $0xc] sm:$0xf] }
 0x11f   :  { %v11421_v24 = vmax.bf16 %v6392_v12, %v13279_v9  ;;  %7989 = vmatmul.mubr.msk.bf16.vlgmr.msra.gmra.mrb[0].mxu0 %vm174_vm0, %v9896_v51  ;;  %8772 = vmatprep.subr.bf16.mxu1 %v9728_v55  ;;  %v6630_v12 = vmax.bf16 %v6614_v4, %v6406_v56  ;;  %v13280_v33 = vld [vmem:[#allocation23_spill] sm:$0xff]  ;;  %v6401_v57 = vadd.bf16 %v6375_v8, %v6209_v28  ;;  %v6426_v4 = vld [vmem:[%s13233_s8 + $0x1c] sm:$0xf]  ;;  %v13281_v27 = vld [vmem:[#allocation14_spill] sm:$0xff] }
 0x120   :  { %1926 = vmatpush1.bf16.msra.mxu0 %v1917_v15  ;;  %v6694_v49 = vpop.permute.xlu1 %6693  ;;  %v6522_v3 = vrot.slane %v13280_v33, %v10993_v11  ;;  %1601 = vmatprep.mubr.bf16.mxu0 %v13246_v34  ;;  %v11452_v15 = vmax.bf16 %v6399_v20, %v6191_v35  ;;  %v11457_v56 = vadd.bf16 %v6577_v48, %v6431_v62  ;;  %v6206_v20 = vld [vmem:[%s13232_s9 + $0x2c] sm:$0xf]  ;;  %v6433_v51 = vld [vmem:[%s13233_s8 + $0x38] sm:$0xf] }
 0x121   :  { %7486 = vperm.xlu1 %9609, %v10878_v1   ;;  %v6702_v14 = vrot.slane %v6694_v49, %v10993_v11  ;;  %7666 = vperm.xlu0 %9611, %v10842_v19   ;;  %v6243_v18 = vrot.slane %v13281_v27, %v10993_v11  ;;  %v6232_v19 = vrot.slane %v13282_v52, %v10993_v11  ;;  %v13289_v52 = vld [vmem:[#allocation27_spill] sm:$0xff] }
 0x122   :  { %8773 = vmatpush3.bf16.msra.mxu1 %v9728_v55  ;;  %v11459_v41 = vpop.permute.xlu0 %6770  ;;  %8040 = vmatprep.subr.msk.bf16.mxu0 %vm199_vm1, %v2257_v31  ;;  %v6599_v35 = vrot.slane %v11277_v46, %v10993_v11  ;;  %v9732_v55 = vld [vmem:[%s13186_s21 + $0x58] sm:$0xff]   ;;  %v13283_v31 = vmax.bf16 %v11244_v36, %v11109_v26  ;;  %v13284_v48 = vmax.bf16 %v11305_v63, %v11128_v0  ;;  %v13285_v46 = vld [vmem:[#allocation25_spill] sm:$0xff]  ;;  %v6648_v26 = vld [vmem:[%s13234_s3 + $0x14] sm:$0xf] }
 0x123   :  { %v6838_v5 = vadd.bf16 %v6702_v14, %v6646_v23  ;;  %8774 = vmatprep.subr.bf16.mxu1 %v9731_v21  ;;  %v6632_v28 = vmax.bf16 %v11438_v58, %v11421_v24  ;;  %v6544_v62 = vrot.slane %v13285_v46, %v10993_v11  ;;  %v13286_v23 = vmov 8   ;;  %v9733_v0 = vld [vmem:[%s13273_s25 + $0x20] sm:$0xff]   ;;  %v6430_v46 = vld [vmem:[%s13233_s8 + $0x2c] sm:$0xf]  ;;  %v9739_v27 = vld [vmem:[%s13186_s21 + $0x70] sm:$0xff]  }
 0x124   :  { %v11477_v8 = vmax.bf16 %v6394_v59, %v13283_v31  ;;  %v11482_v9 = vmax.bf16 %v6396_v29, %v13284_v48  ;;  %v6716_v36 = vpop.permute.xlu1 %6715  ;;  %v6618_v63 = vadd.bf16 %v6522_v3, %v6426_v4  ;;  %v6428_v24 = vld [vmem:[%s13233_s8 + $0x24] sm:$0xf]  ;;  %v9897_v29 = vld [vmem:[%s13189_s24] sm:$0xf]  ;;  %v6398_v49 = vadd.bf16 %v6342_v38, %v6206_v20  ;;  %v6208_v31 = vld [vmem:[%s13232_s9 + $0x34] sm:$0xf] }
 0x125   :  { %9610 = vset.pattern.permute.xlu1 %v13286_v23  ;;  %v11501_v59 = vmax.bf16 %v6838_v5, %v6630_v12  ;;  %8759 = vmatmul.mubr.msk.bf16.gmra.mrb[4].mxu1 %vm174_vm0, %v9730_v39  ;;  %v6724_v58 = vrot.slane %v6716_v36, %v10993_v11  ;;  %v13287_v33 = vmax.bf16 %v11325_v7, %v11224_v13  ;;  %v6655_v12 = vld [vmem:[%s13234_s3 + $0x30] sm:$0xf]  ;;  %v6196_v38 = vld [vmem:[%s13232_s9 + $0x4] sm:$0xf]  ;;  %v9898_v13 = vld [vmem:[%s13234_s3 + $0x8] sm:$0xff]  }
 0x126   :  { %7556 = vperm.xlu1 %9610, %v9897_v29   ;;  %v6639_v14 = vmax.bf16 %v11457_v56, %v11452_v15  ;;  %8775 = vmatpush3.bf16.msra.mxu1 %v9731_v21  ;;  %v6793_v39 = vpop.permute.xlu0 %6792  ;;  %v6625_v4 = vadd.bf16 %v6599_v35, %v6433_v51  ;;  %v9735_v21 = vld [vmem:[%s13186_s21 + $0x60] sm:$0xff]   ;;  %v13288_v15 = vld [vmem:[#allocation19_spill] sm:$0xff]  ;;  %v11532_v56 = vadd.bf16 %v6544_v62, %v6428_v24  ;;  %v6650_v35 = vld [vmem:[%s13234_s3 + $0x1c] sm:$0xf] }
 0x127   :  { %v11511_v3 = vmax.bf16 %v6401_v57, %v13287_v33  ;;  %7688 = vperm.xlu0 %9611, %v10857_v2   ;;  %7990 = vmatmul.mubr.msk.bf16.gmra.mrb[4].mxu0 %vm174_vm0, %v9898_v13  ;;  %v6840_v7 = vadd.bf16 %v6724_v58, %v6648_v26  ;;  %v6801_v2 = vrot.slane %v6793_v39, %v10993_v11  ;;  %v9899_v51 = vld [vmem:[%s13189_s24 + $0x8] sm:$0xf]  ;;  %v6657_v29 = vld [vmem:[%s13234_s3 + $0x38] sm:$0xf] }
 0x128   :  { %8776 = vmatprep.subr.bf16.mxu1 %v9732_v55  ;;  %v6364_v57 = vrot.slane %v13288_v15, %v10993_v11  ;;  %v6566_v20 = vrot.slane %v13289_v52, %v10993_v11  ;;  %8762 = vmatprep.mubr.msk.bf16.mxu1 %vm174_vm0, %v9733_v0  ;;  %v6738_v5 = vpop.permute.xlu1 %6737  ;;  %v6634_v48 = vmax.bf16 %v6618_v63, %v11477_v8  ;;  %v9734_v36 = vld [vmem:[%s13273_s25 + $0x28] sm:$0xff]  }
 0x129   :  { %1611 = vmatprep.mubr.bf16.mxu0 %v13246_v34  ;;  %v11548_v62 = vmax.bf16 %v6840_v7, %v6632_v28  ;;  %v6746_v23 = vrot.slane %v6738_v5, %v10993_v11  ;;  %v6847_v26 = vadd.bf16 %v6801_v2, %v6655_v12  ;;  %v6388_v0 = vadd.bf16 %v6232_v19, %v6196_v38  ;;  %v13291_v28 = vld [vmem:[#allocation20_spill] sm:$0xff]  ;;  %v9737_v19 = vld [vmem:[%s13273_s25 + $0x30] sm:$0xff]   ;;  %v9736_v12 = vld [vmem:[%s13186_s21 + $0x68] sm:$0xff]  }
 0x12a   :  { %7578 = vperm.xlu1 %9610, %v9899_v51   ;;  %v13290_v8 = vmax.bf16 %v11309_v30, %v11143_v47  ;;  %v6386_v24 = vrot.slane %v13291_v28, %v10993_v11  ;;  %8777 = vmatpush3.bf16.msra.mxu1 %v9732_v55  ;;  %v6815_v58 = vpop.permute.xlu0 %6814  ;;  %v6197_v47 = vld [vmem:[%s13232_s9 + $0x8] sm:$0xf]  ;;  %v6210_v30 = vld [vmem:[%s13232_s9 + $0x3c] sm:$0xf]  ;;  %v6641_v55 = vmax.bf16 %v6625_v4, %v11511_v3  ;;  %v6652_v3 = vld [vmem:[%s13234_s3 + $0x24] sm:$0xf] }
 0x12b   :  { %7710 = vperm.xlu0 %9611, %v10878_v1   ;;  %v6842_v1 = vadd.bf16 %v6746_v23, %v6650_v35  ;;  %8778 = vmatprep.subr.bf16.mxu1 %v9735_v21  ;;  %v6823_v33 = vrot.slane %v6815_v58, %v10993_v11  ;;  %v6400_v39 = vadd.bf16 %v6364_v57, %v6208_v31  ;;  %v6432_v4 = vld [vmem:[%s13233_s8 + $0x34] sm:$0xf] }
 0x12c   :  { %v11560_v63 = vmax.bf16 %v6398_v49, %v13290_v8  ;;  %v11578_v49 = vmax.bf16 %v6847_v26, %v6639_v14  ;;  %v6636_v38 = vmax.bf16 %v11532_v56, %v11482_v9  ;;  %v11586_v13 = vadd.bf16 %v6566_v20, %v6430_v46  ;;  %v6760_v14 = vpop.permute.xlu1 %6759  ;;  %v9900_v9 = vld [vmem:[%s13189_s24 + $0xc] sm:$0xf]  ;;  %v13292_v20 = vld [vmem:[#allocation21_spill] sm:$0xff]  ;;  %v9901_v5 = vld [vmem:[%s13234_s3 + $0x10] sm:$0xff]  }
 0x12d   :  { %v6588_v7 = vrot.slane %v11126_v42, %v10993_v11  ;;  %v11596_v2 = vmax.bf16 %v6842_v1, %v6634_v48  ;;  %8763 = vmatmul.mubr.msk.bf16.gmra.mrb[8].mxu1 %vm174_vm0, %v9734_v36  ;;  %v6768_v42 = vrot.slane %v6760_v14, %v10993_v11  ;;  %v6849_v15 = vadd.bf16 %v6823_v33, %v6657_v29  ;;  %v6420_v46 = vld [vmem:[%s13233_s8 + $0x4] sm:$0xf]  ;;  %v6654_v26 = vld [vmem:[%s13234_s3 + $0x2c] sm:$0xf]  ;;  %v9902_v29 = vld [vmem:[%s13189_s24 + $0x14] sm:$0xf] }
 0x12e   :  { %7589 = vperm.xlu1 %9610, %v9900_v9   ;;  %v6194_v57 = vmax.bf16 %v11416_v32, %v11191_v17  ;;  %v6389_v56 = vadd.bf16 %v6243_v18, %v6197_v47  ;;  %v6402_v52 = vadd.bf16 %v6386_v24, %v6210_v30  ;;  %8779 = vmatpush3.bf16.msra.mxu1 %v9735_v21  ;;  %v6867_v17 = vld [vmem:[%s13235_s29] sm:$0xf]  ;;  %v13297_v30 = vld [vmem:[#allocation16_spill] sm:$0xff] }
 0x12f   :  { %8766 = vmatprep.mubr.msk.bf16.mxu1 %vm174_vm0, %v9737_v19  ;;  %v6456_v35 = vrot.slane %v13292_v20, %v10993_v11  ;;  %7991 = vmatmul.mubr.msk.bf16.gmra.mrb[8].mxu0 %vm174_vm0, %v9901_v5  ;;  %v6844_v31 = vadd.bf16 %v6768_v42, %v6652_v3  ;;  %v11615_v48 = vmax.bf16 %v6849_v15, %v6641_v55  ;;  %v6885_v32 = vpop.permute.xlu0 %6884  ;;  %v13296_v19 = vld [vmem:[#allocation15_spill] sm:$0xff]  ;;  %v9741_v33 = vld [vmem:[%s13178_s13] sm:$0xff]   ;;  %v9740_v14 = vld [vmem:[%s13186_s21 + $0x78] sm:$0xff]  }
 0x130   :  { %8780 = vmatprep.subr.bf16.mxu1 %v9736_v12  ;;  %v13293_v18 = vmax.bf16 %v11327_v61, %v11159_v6  ;;  %v11631_v51 = vadd.bf16 %v6588_v7, %v6432_v4  ;;  %v6610_v23 = vrot.slane %v11189_v40, %v10993_v11  ;;  %v6782_v36 = vpop.permute.xlu1 %6781  ;;  %v6893_v8 = vrot.slane %v6885_v32, %v10993_v11  ;;  %v6434_v40 = vld [vmem:[%s13233_s8 + $0x3c] sm:$0xf]  ;;  %v6656_v15 = vld [vmem:[%s13234_s3 + $0x34] sm:$0xf]  ;;  %v13299_v20 = vld [vmem:[#allocation6_spill] sm:$0xff] }
 0x131   :  { %1621 = vmatprep.mubr.bf16.mxu0 %v13246_v34  ;;  %v13294_v6 = vmax.bf16 %v11193_v45, %v11079_v16  ;;  %v6638_v28 = vmax.bf16 %v11586_v13, %v11560_v63  ;;  %v11650_v24 = vmax.bf16 %v6844_v31, %v6636_v38  ;;  %v6790_v58 = vrot.slane %v6782_v36, %v10993_v11  ;;  %v9738_v16 = vld [vmem:[%s13273_s25 + $0x38] sm:$0xff]   ;;  %v6199_v63 = vld [vmem:[%s13232_s9 + $0x10] sm:$0xf]  ;;  %v13298_v38 = vld [vmem:[#allocation22_spill] sm:$0xff] }
 0x132   :  { %v11626_v21 = vmax.bf16 %v6400_v39, %v13293_v18  ;;  %7611 = vperm.xlu1 %9610, %v9902_v29   ;;  %v13295_v45 = vmax.bf16 %v11208_v44, %v11046_v25  ;;  %v6265_v47 = vrot.slane %v13296_v19, %v10993_v11  ;;  %v6287_v55 = vrot.slane %v13297_v30, %v10993_v11  ;;  %v6201_v25 = vld [vmem:[%s13232_s9 + $0x18] sm:$0xf]  ;;  %v9903_v31 = vld [vmem:[%s13189_s24 + $0x1c] sm:$0xf]  ;;  %v6423_v30 = vld [vmem:[%s13233_s8 + $0x10] sm:$0xf] }
 0x133   :  { %v11643_v61 = vmax.bf16 %v6388_v0, %v13294_v6  ;;  %8781 = vmatpush3.bf16.msra.mxu1 %v9736_v12  ;;  %v11671_v1 = vadd.bf16 %v6893_v8, %v6867_v17  ;;  %v11679_v44 = vmax.bf16 %v6402_v52, %v6194_v57  ;;  %v11681_v39 = vadd.bf16 %v6456_v35, %v6420_v46  ;;  %v6870_v12 = vld [vmem:[%s13235_s29 + $0xc] sm:$0xf]  ;;  %v6918_v3 = vpop.permute.xlu0 %6917  ;;  %v6421_v52 = vld [vmem:[%s13233_s8 + $0x8] sm:$0xf]  ;;  %v9904_v8 = vld [vmem:[%s13234_s3 + $0x18] sm:$0xff]  }
 0x134   :  { %v11662_v0 = vmax.bf16 %v6389_v56, %v13295_v45  ;;  %v6467_v13 = vrot.slane %v13298_v38, %v10993_v11  ;;  %v6846_v7 = vadd.bf16 %v6790_v58, %v6654_v26  ;;  %8782 = vmatprep.subr.bf16.mxu1 %v9739_v27  ;;  %v6640_v4 = vmax.bf16 %v11631_v51, %v11626_v21  ;;  %v6804_v57 = vpop.permute.xlu1 %6803  ;;  %v6644_v21 = vld [vmem:[%s13234_s3 + $0x4] sm:$0xf]  ;;  %v5981_v51 = vld [vmem:[%s13230_s5 + $0x28] sm:$0xf]  ;;  %v6872_v6 = vld [vmem:[%s13235_s29 + $0x14] sm:$0xf] }
 0x135   :  { %v11693_v9 = vadd.bf16 %v6610_v23, %v6434_v40  ;;  %v7075_v42 = vmax.bf16 %v11671_v1, %v11403_v43  ;;  %v6926_v56 = vrot.slane %v6918_v3, %v10993_v11  ;;  %v6680_v35 = vrot.slane %v13299_v20, %v10993_v11  ;;  %8767 = vmatmul.mubr.msk.bf16.gmra.mrb[12].mxu1 %vm174_vm0, %v9738_v16  ;;  %v13300_v23 = vld [vmem:[#allocation17_spill] sm:$0xff]  ;;  %v13301_v58 = vld [vmem:[#allocation24_spill] sm:$0xff]  ;;  %v13307_v20 = vld [vmem:[#allocation30_spill] sm:$0xff] }
 0x136   :  { %v11706_v5 = vmax.bf16 %v6846_v7, %v6638_v28  ;;  %7633 = vperm.xlu1 %9610, %v9903_v31   ;;  %v6812_v17 = vrot.slane %v6804_v57, %v10993_v11  ;;  %v6391_v32 = vadd.bf16 %v6265_v47, %v6199_v63  ;;  %v6393_v18 = vadd.bf16 %v6287_v55, %v6201_v25  ;;  %v9743_v40 = vld [vmem:[%s13186_s21] sm:$0xff]   ;;  %v6658_v63 = vld [vmem:[%s13234_s3 + $0x3c] sm:$0xf]  ;;  %v9915_v1 = vld [vmem:[%s13235_s29 + $0x8] sm:$0xff]  }
 0x137   :  { %8783 = vmatpush3.bf16.msra.mxu1 %v9739_v27  ;;  %v11716_v46 = vadd.bf16 %v6926_v56, %v6870_v12  ;;  %8786 = vmatprep.mubr.bf16.mxu1 %v9741_v33  ;;  %v6309_v26 = vrot.slane %v13300_v23, %v10993_v11  ;;  %v6628_v36 = vmax.bf16 %v11681_v39, %v11643_v61  ;;  %v6940_v28 = vpop.permute.xlu0 %6939  ;;  %v6203_v61 = vld [vmem:[%s13232_s9 + $0x20] sm:$0xf]  ;;  %v9905_v39 = vld [vmem:[%s13189_s24 + $0x24] sm:$0xf]  ;;  %v9745_v56 = vld [vmem:[%s13178_s13 + $0x10] sm:$0xff]  }
 0x138   :  { %7992 = vmatmul.mubr.msk.bf16.gmra.mrb[12].mxu0 %vm174_vm0, %v9904_v8  ;;  %v6848_v27 = vadd.bf16 %v6812_v17, %v6656_v15  ;;  %8784 = vmatprep.subr.bf16.mxu1 %v9740_v14  ;;  %v11738_v29 = vadd.bf16 %v6467_v13, %v6421_v52  ;;  %v6489_v16 = vrot.slane %v13301_v58, %v10993_v11  ;;  %v6826_v19 = vpop.permute.xlu1 %6825  ;;  %v9742_v13 = vld [vmem:[%s13178_s13 + $0x8] sm:$0xff]   ;;  %v13304_v3 = vld [vmem:[#allocation29_spill] sm:$0xff]  ;;  %v13306_v52 = vld [vmem:[#allocation35_spill] sm:$0xff] }
 0x139   :  { %v7078_v45 = vmax.bf16 %v11716_v46, %v11501_v59  ;;  %v6948_v47 = vrot.slane %v6940_v28, %v10993_v11  ;;  %1631 = vmatprep.mubr.bf16.mxu0 %v13246_v34  ;;  %v6642_v55 = vmax.bf16 %v11693_v9, %v11679_v44  ;;  %v6836_v33 = vadd.bf16 %v6680_v35, %v6644_v21  ;;  %v13303_v44 = vld [vmem:[#allocation34_spill] sm:$0xff]  ;;  %v6874_v21 = vld [vmem:[%s13235_s29 + $0x1c] sm:$0xf]  ;;  %v6425_v8 = vld [vmem:[%s13233_s8 + $0x18] sm:$0xf] }
 0x13a   :  { %v11754_v25 = vmax.bf16 %v6848_v27, %v6640_v4  ;;  %7655 = vperm.xlu1 %9610, %v9905_v39   ;;  %v6834_v38 = vrot.slane %v6826_v19, %v10993_v11  ;;  %v13302_v7 = vrot.slane %v13276_v50, %v10993_v11  ;;  %v13305_v4 = vmax.bf16 %v13303_v44, %v13304_v3  ;;  %v13309_v17 = vld [vmem:[#allocation26_spill] sm:$0xff]  ;;  %v6427_v3 = vld [vmem:[%s13233_s8 + $0x20] sm:$0xf]  ;;  %v9916_v46 = vld [vmem:[%s13235_s29 + $0x10] sm:$0xff]  }
 0x13b   :  { %v6691_v15 = vrot.slane %v11392_v60, %v10993_v11  ;;  %8785 = vmatpush3.bf16.msra.mxu1 %v9740_v14  ;;  %v11775_v57 = vadd.bf16 %v6948_v47, %v6872_v6  ;;  %v13308_v50 = vmax.bf16 %v13306_v52, %v13307_v20  ;;  %v6395_v31 = vadd.bf16 %v6309_v26, %v6203_v61  ;;  %v6645_v60 = vld [vmem:[%s13234_s3 + $0x8] sm:$0xf]  ;;  %v13312_v52 = vld [vmem:[#allocation32_spill] sm:$0xff] }
 0x13c   :  { %v11766_v12 = vadd.bf16 %v13302_v7, %v5981_v51  ;;  %v11771_v9 = vmax.bf16 %v6391_v32, %v13305_v4  ;;  %v6511_v32 = vrot.slane %v13309_v17, %v10993_v11  ;;  %v6850_v14 = vadd.bf16 %v6834_v38, %v6658_v63  ;;  %8802 = vmatprep.subr.bf16.mxu1 %v9743_v40  ;;  %v6962_v51 = vpop.permute.xlu0 %6961  ;;  %v13310_v47 = vld [vmem:[#allocation18_spill] sm:$0xff]  ;;  %v9907_v38 = vld [vmem:[%s13234_s3 + $0x20] sm:$0xff]   ;;  %v9747_v7 = vld [vmem:[%s13186_s21 + $0x10] sm:$0xff]  }
 0x13d   :  { %v11783_v35 = vmax.bf16 %v6393_v18, %v13308_v50  ;;  %v9744_v18 = vld [vmem:[%s13186_s21 + $0x8] sm:$0xff]   ;;  %v6629_v23 = vmax.bf16 %v11738_v29, %v11662_v0  ;;  %v6615_v26 = vadd.bf16 %v6489_v16, %v6423_v30  ;;  %v7080_v27 = vmax.bf16 %v11775_v57, %v11548_v62  ;;  %v6868_v29 = vld [vmem:[%s13235_s29 + $0x4] sm:$0xf]  ;;  %v6896_v16 = vpop.permute.xlu1 %6895  ;;  %v9770_v62 = vld [vmem:[%s13177_s12 + $0x38] sm:$0xff]  }
 0x13e   :  { %v6970_v6 = vrot.slane %v6962_v51, %v10993_v11  ;;  %v11804_v28 = vmax.bf16 %v6836_v33, %v6628_v36  ;;  %v6713_v61 = vrot.slane %v11312_v54, %v10993_v11  ;;  %v11808_v58 = vmax.bf16 %v6850_v14, %v6642_v55  ;;  %8787 = vmatmul.mubr.bf16.vlgmr.msra.gmra.mrb[16].mxu1 %v9742_v13  ;;  %v9906_v0 = vld [vmem:[%s13189_s24 + $0x2c] sm:$0xf]  ;;  %v6647_v36 = vld [vmem:[%s13234_s3 + $0x10] sm:$0xf]  ;;  %v13311_v33 = vld [vmem:[#allocation28_spill] sm:$0xff] }
 0x13f   :  { %7677 = vperm.xlu1 %9610, %v9906_v0   ;;  %v6837_v63 = vadd.bf16 %v6691_v15, %v6645_v60  ;;  %8803 = vmatpush3.bf16.msra.mxu1 %v9743_v40  ;;  %v6904_v54 = vrot.slane %v6896_v16, %v10993_v11  ;;  %v6331_v30 = vrot.slane %v13310_v47, %v10993_v11  ;;  %v6876_v40 = vld [vmem:[%s13235_s29 + $0x24] sm:$0xf]  ;;  %v6205_v44 = vld [vmem:[%s13232_s9 + $0x28] sm:$0xf]  ;;  %v9908_v60 = vld [vmem:[%s13189_s24 + $0x34] sm:$0xf] }
 0x140   :  { %v11820_v19 = vadd.bf16 %v6970_v6, %v6874_v21  ;;  %8790 = vmatprep.mubr.bf16.mxu1 %v9745_v56  ;;  %v11824_v55 = vadd.bf16 %v6511_v32, %v6425_v8  ;;  %v6533_v39 = vrot.slane %v13311_v33, %v10993_v11  ;;  %7993 = vmatmul.mubr.msk.bf16.gmra.mrb[16].mxu0 %vm174_vm0, %v9907_v38  ;;  %v6984_v13 = vpop.permute.xlu0 %6983  ;;  %v6869_v14 = vld [vmem:[%s13235_s29 + $0x8] sm:$0xf]  ;;  %v9749_v6 = vld [vmem:[%s13178_s13 + $0x20] sm:$0xff]   ;;  %v9909_v38 = vld [vmem:[%s13189_s24 + $0x3c] sm:$0xf] }
 0x141   :  { %8804 = vmatprep.subr.bf16.mxu1 %v9744_v18  ;;  %v11844_v4 = vadd.bf16 %v6904_v54, %v6868_v29  ;;  %v6992_v56 = vrot.slane %v6984_v13, %v10993_v11  ;;  %1641 = vmatprep.mubr.bf16.mxu0 %v13246_v34  ;;  %v6189_v20 = vmax.bf16 %v11766_v12, %v13312_v52  ;;  %v6907_v21 = vpop.permute.xlu1 %6906  ;;  %v9746_v12 = vld [vmem:[%s13178_s13 + $0x18] sm:$0xff]   ;;  %v13315_v47 = vld [vmem:[#allocation33_spill] sm:$0xff] }
 0x142   :  { %v7082_v15 = vmax.bf16 %v11820_v19, %v11596_v2  ;;  %v6631_v50 = vmax.bf16 %v6615_v26, %v11771_v9  ;;  %v6839_v17 = vadd.bf16 %v6713_v61, %v6647_v36  ;;  %v6735_v32 = vrot.slane %v11361_v22, %v10993_v11  ;;  %v6649_v22 = vld [vmem:[%s13234_s3 + $0x18] sm:$0xf]  ;;  %v13313_v61 = vld [vmem:[#allocation31_spill] sm:$0xff]  ;;  %v7100_v57 = vld [vmem:[%s13243_s2 + $0x24] sm:$0xf] }
 0x143   :  { %7699 = vperm.xlu1 %9610, %v9908_v60   ;;  %v11864_v51 = vmax.bf16 %v6837_v63, %v6629_v23  ;;  %v7076_v9 = vmax.bf16 %v11844_v4, %v11804_v28  ;;  %8805 = vmatpush3.bf16.msra.mxu1 %v9744_v18  ;;  %v6915_v26 = vrot.slane %v6907_v21, %v10993_v11  ;;  %v6878_v18 = vld [vmem:[%s13235_s29 + $0x2c] sm:$0xf]  ;;  %v9748_v54 = vld [vmem:[%s13186_s21 + $0x18] sm:$0xff]   ;;  %v7540_v28 = vld [vmem:[%s13273_s25 + $0x4] sm:$0xf] }
 0x144   :  { %v11872_v8 = vadd.bf16 %v6992_v56, %v6876_v40  ;;  %v13314_v23 = vmax.bf16 %v11266_v53, %v13313_v61  ;;  %v6397_v29 = vadd.bf16 %v6331_v30, %v6205_v44  ;;  %v6633_v16 = vmax.bf16 %v11824_v55, %v11783_v35  ;;  %8806 = vmatprep.subr.bf16.mxu1 %v9747_v7  ;;  %v7006_v63 = vpop.permute.xlu0 %7005  ;;  %v6871_v40 = vld [vmem:[%s13235_s29 + $0x10] sm:$0xf]  ;;  %v6429_v44 = vld [vmem:[%s13233_s8 + $0x28] sm:$0xf]  ;;  %v9917_v19 = vld [vmem:[%s13235_s29 + $0x18] sm:$0xff]  }
 0x145   :  { %v6619_v36 = vadd.bf16 %v6533_v39, %v6427_v3  ;;  %v6555_v33 = vrot.slane %v13315_v47, %v10993_v11  ;;  %v11890_v53 = vadd.bf16 %v6915_v26, %v6869_v14  ;;  %v7014_v35 = vrot.slane %v7006_v63, %v10993_v11  ;;  %v6929_v13 = vpop.permute.xlu1 %6928  ;;  %v6651_v3 = vld [vmem:[%s13234_s3 + $0x20] sm:$0xf]  ;;  %v9753_v47 = vld [vmem:[%s13178_s13 + $0x30] sm:$0xff]  }
 0x146   :  { %v6411_v0 = vmax.bf16 %v6395_v31, %v13314_v23  ;;  %v7084_v31 = vmax.bf16 %v11872_v8, %v11650_v24  ;;  %v11895_v30 = vmax.bf16 %v6839_v17, %v6631_v50  ;;  %v6841_v55 = vadd.bf16 %v6735_v32, %v6649_v22  ;;  %8791 = vmatmul.mubr.bf16.gmra.mrb[20].mxu1 %v9746_v12  ;;  %v9910_v50 = vld [vmem:[%s13234_s3 + $0x28] sm:$0xff]   ;;  %v6880_v17 = vld [vmem:[%s13235_s29 + $0x34] sm:$0xf]  ;;  %v6873_v23 = vld [vmem:[%s13235_s29 + $0x18] sm:$0xf] }
 0x147   :  { %v6757_v39 = vrot.slane %v11414_v37, %v10993_v11  ;;  %7721 = vperm.xlu1 %9610, %v9909_v38   ;;  %v7077_v37 = vmax.bf16 %v11890_v53, %v11864_v51  ;;  %8807 = vmatpush3.bf16.msra.mxu1 %v9747_v7  ;;  %v6937_v56 = vrot.slane %v6929_v13, %v10993_v11  ;;  %v9751_v7 = vld [vmem:[%s13186_s21 + $0x20] sm:$0xff]   ;;  %v9766_v53 = vld [vmem:[%s13177_s12 + $0x28] sm:$0xff]   ;;  %v7104_v8 = vld [vmem:[%s13243_s2 + $0x34] sm:$0xf] }
 0x148   :  { %v11914_v52 = vadd.bf16 %v7014_v35, %v6878_v18  ;;  %8794 = vmatprep.mubr.bf16.mxu1 %v9749_v6  ;;  %7994 = vmatmul.mubr.msk.bf16.gmra.mrb[20].mxu0 %vm174_vm0, %v9910_v50  ;;  %v7028_v32 = vpop.permute.xlu0 %7027  ;;  %v6413_v60 = vmax.bf16 %v6397_v29, %v6189_v20  ;;  %v6635_v22 = vmax.bf16 %v6619_v36, %v6411_v0  ;;  %v9750_v29 = vld [vmem:[%s13178_s13 + $0x28] sm:$0xff]  }
 0x149   :  { %8808 = vmatprep.subr.bf16.mxu1 %v9748_v54  ;;  %v11926_v14 = vadd.bf16 %v6937_v56, %v6871_v40  ;;  %v7036_v12 = vrot.slane %v7028_v32, %v10993_v11  ;;  %1651 = vmatprep.mubr.bf16.mxu0 %v13246_v34  ;;  %v6621_v26 = vadd.bf16 %v6555_v33, %v6429_v44  ;;  %v6951_v20 = vpop.permute.xlu1 %6950  ;;  %v6653_v0 = vld [vmem:[%s13234_s3 + $0x28] sm:$0xf]  ;;  %v6875_v44 = vld [vmem:[%s13235_s29 + $0x20] sm:$0xf]  ;;  %v9911_v32 = vld [vmem:[%s13234_s3 + $0x30] sm:$0xff]  }
 0x14a   :  { %v7086_v21 = vmax.bf16 %v11914_v52, %v11706_v5  ;;  %v6843_v6 = vadd.bf16 %v6757_v39, %v6651_v3  ;;  %v6779_v61 = vrot.slane %v11459_v41, %v10993_v11  ;;  %v11940_v18 = vmax.bf16 %v6841_v55, %v6633_v16  ;;  %v6882_v16 = vld [vmem:[%s13235_s29 + $0x3c] sm:$0xf]  ;;  %v9752_v35 = vld [vmem:[%s13186_s21 + $0x28] sm:$0xff]   ;;  %v9918_v52 = vld [vmem:[%s13235_s29 + $0x20] sm:$0xff]  }
 0x14b   :  { %8809 = vmatpush3.bf16.msra.mxu1 %v9748_v54  ;;  %v6959_v41 = vrot.slane %v6951_v20, %v10993_v11  ;;  %v11948_v63 = vadd.bf16 %v7036_v12, %v6880_v17  ;;  %v6637_v38 = vmax.bf16 %v6621_v26, %v6413_v60  ;;  %v9755_v60 = vld [vmem:[%s13186_s21 + $0x30] sm:$0xff]   ;;  %v6877_v26 = vld [vmem:[%s13235_s29 + $0x28] sm:$0xf]  ;;  %v7094_v20 = vld [vmem:[%s13243_s2 + $0xc] sm:$0xf] }
 0x14c   :  { %8810 = vmatprep.subr.bf16.mxu1 %v9751_v7  ;;  %v7050_v33 = vpop.permute.xlu0 %7049  ;;  %v11964_v40 = vmax.bf16 %v6843_v6, %v6635_v22  ;;  %v6845_v13 = vadd.bf16 %v6779_v61, %v6653_v0  ;;  %v9754_v61 = vld [vmem:[%s13178_s13 + $0x38] sm:$0xff]   ;;  %v9757_v0 = vld [vmem:[%s13177_s12] sm:$0xff]   ;;  %v9774_v24 = vld [vmem:[%s13179_s14 + $0x8] sm:$0xff]   ;;  %s9985_s13 = smov 96  }
 0x14d   :  { %v11959_v55 = vadd.bf16 %v6959_v41, %v6873_v23  ;;  %v7088_v54 = vmax.bf16 %v11948_v63, %v11754_v25  ;;  %v7058_v39 = vrot.slane %v7050_v33, %v10993_v11  ;;  %v6973_v3 = vpop.permute.xlu1 %6972  ;;  %v9756_v41 = vld [vmem:[%s13186_s21 + $0x38] sm:$0xff]   ;;  %v6879_v33 = vld [vmem:[%s13235_s29 + $0x30] sm:$0xf] }
 0x14e   :  { %8795 = vmatmul.mubr.bf16.gmra.mrb[24].mxu1 %v9750_v29  ;;  %v6981_v50 = vrot.slane %v6973_v3, %v10993_v11  ;;  %v11994_v23 = vmax.bf16 %v6845_v13, %v6637_v38  ;;  %v9912_v13 = vld [vmem:[%s13234_s3 + $0x38] sm:$0xff]  }
 0x14f   :  { %8811 = vmatpush3.bf16.msra.mxu1 %v9751_v7  ;;  %v11972_v17 = vadd.bf16 %v7058_v39, %v6882_v16  ;;  %8798 = vmatprep.mubr.bf16.mxu1 %v9753_v47  ;;  %v9778_v25 = vld [vmem:[%s13179_s14 + $0x18] sm:$0xff]  }
 0x150   :  { %7995 = vmatmul.mubr.msk.bf16.gmra.mrb[24].mxu0 %vm174_vm0, %v9911_v32  ;;  %8812 = vmatprep.subr.bf16.mxu1 %v9752_v35  ;;  %v11981_v12 = vadd.bf16 %v6981_v50, %v6875_v44  ;;  %v11985_v22 = vpop.permute.xlu0 %7119  ;;  %v9759_v44 = vld [vmem:[%s13186_s21 + $0x80] sm:$0xff]   ;;  %v6881_v32 = vld [vmem:[%s13235_s29 + $0x38] sm:$0xf] }
 0x151   :  { %v7090_v7 = vmax.bf16 %v11972_v17, %v11808_v58  ;;  %1661 = vmatprep.mubr.bf16.mxu0 %v13246_v34  ;;  %v6995_v6 = vpop.permute.xlu1 %6994  ;;  %v9783_v58 = vld [vmem:[%s13186_s21 + $0xe0] sm:$0xff]  }
 0x152   :  { %v7003_v29 = vrot.slane %v6995_v6, %v10993_v11  ;;  %v12036_v6 = vld.sshfl [vmem:[%s13228_s26 + $0x2a] sm:$0x3f pattern:$0x76325410] }
 0x153   :  { %8813 = vmatpush3.bf16.msra.mxu1 %v9752_v35 }
 0x154   :  { %8814 = vmatprep.subr.bf16.mxu1 %v9755_v60  ;;  %v12005_v47 = vadd.bf16 %v7003_v29, %v6877_v26  ;;  %v12007_v16 = vpop.permute.xlu0 %7152  ;;  %v9758_v26 = vld [vmem:[%s13177_s12 + $0x8] sm:$0xff]  }
 0x155   :  { %v7017_v35 = vpop.permute.xlu1 %7016 }
 0x156   :  { %8799 = vmatmul.mubr.bf16.gmra.mrb[28].mxu1 %v9754_v61  ;;  %v7025_v38 = vrot.slane %v7017_v35, %v10993_v11  ;;  %v7091_v61 = vld [vmem:[%s13243_s2] sm:$0xf] }
 0x157   :  { %8815 = vmatpush3.bf16.msra.mxu1 %v9755_v60  ;;  %8818 = vmatprep.mubr.bf16.mxu1 %v9757_v0  ;;  %v9761_v0 = vld [vmem:[%s13177_s12 + $0x10] sm:$0xff]  }
 0x158   :  { %7996 = vmatmul.mubr.msk.bf16.gmra.mrb[28].mxu0 %vm174_vm0, %v9912_v13  ;;  %8816 = vmatprep.subr.bf16.mxu1 %v9756_v41  ;;  %v12022_v3 = vadd.bf16 %v7025_v38, %v6879_v33  ;;  %v12024_v50 = vpop.permute.xlu0 %7174  ;;  %v9760_v33 = vld [vmem:[%s13186_s21 + $0x88] sm:$0xff]   ;;  %v2283_v13 = vsel %vm199_vm1, %v11348_v10, 0 }
 0x159   :  { %1957 = vmatprep.mubr.bf16.mxu0 %v13246_v34  ;;  %v7039_v60 = vpop.permute.xlu1 %7038 }
 0x15a   :  { %v7047_v29 = vrot.slane %v7039_v60, %v10993_v11 }
 0x15b   :  { %8817 = vmatpush3.bf16.msra.mxu1 %v9756_v41  ;;  %v2623_v41 = vcombine.high %v12036_v6, %v12036_v6 }
 0x15c   :  { %8834 = vmatprep.subr.bf16.mxu1 %v9759_v44  ;;  %v12047_v35 = vadd.bf16 %v7047_v29, %v6881_v32  ;;  %v12049_v38 = vpop.permute.xlu0 %7196  ;;  %v9914_v32 = vld [vmem:[%s13235_s29] sm:$0xff]  }
 0x15e   :  { %8819 = vmatmul.mubr.bf16.vlgmr.msra.gmra.mrb[16].mxu1 %v9758_v26  ;;  %v7109_v39 = vpop.permute.xlu1 %7108  ;;  %v9763_v26 = vld [vmem:[%s13186_s21 + $0x90] sm:$0xff]  }
 0x15f   :  { %8835 = vmatpush3.bf16.msra.mxu1 %v9759_v44  ;;  %8822 = vmatprep.mubr.bf16.mxu1 %v9761_v0  ;;  %v7117_v10 = vrot.slane %v7109_v39, %v10993_v11  ;;  %v9762_v0 = vld [vmem:[%s13177_s12 + $0x18] sm:$0xff]   ;;  %v7093_v39 = vld [vmem:[%s13243_s2 + $0x8] sm:$0xf] }
 0x160   :  { %8015 = vmatmul.mubr.msk.bf16.vlgmr.msra.gmra.mrb[0].mxu0 %vm174_vm0, %v9914_v32  ;;  %8836 = vmatprep.subr.bf16.mxu1 %v9760_v33  ;;  %v12068_v44 = vpop.permute.xlu0 %7218 }
 0x161   :  { %2292 = vmatpush1.bf16.msra.mxu0 %v2283_v13  ;;  %1967 = vmatprep.mubr.bf16.mxu0 %v13246_v34  ;;  %v7283_v29 = vadd.bf16 %v7117_v10, %v7091_v61  ;;  %v9765_v13 = vld [vmem:[%s13177_s12 + $0x20] sm:$0xff]  }
 0x162   :  { %8066 = vmatprep.subr.msk.bf16.mxu0 %vm199_vm1, %v2623_v41  ;;  %v7131_v32 = vpop.permute.xlu1 %7130 }
 0x163   :  { %8837 = vmatpush3.bf16.msra.mxu1 %v9760_v33  ;;  %v12084_v61 = vmax.bf16 %v7283_v29, %v7075_v42  ;;  %v7139_v10 = vrot.slane %v7131_v32, %v10993_v11  ;;  %v9764_v33 = vld [vmem:[%s13186_s21 + $0x98] sm:$0xff]  }
 0x164   :  { %8838 = vmatprep.subr.bf16.mxu1 %v9763_v26  ;;  %v12090_v41 = vpop.permute.xlu0 %7240 }
 0x165   :  { %v7285_v60 = vadd.bf16 %v7139_v10, %v7093_v39  ;;  %v9768_v39 = vld [vmem:[%s13186_s21 + $0xa8] sm:$0xff]   ;;  %v7098_v10 = vld [vmem:[%s13243_s2 + $0x1c] sm:$0xf] }
 0x166   :  { %8823 = vmatmul.mubr.bf16.gmra.mrb[20].mxu1 %v9762_v0  ;;  %v7142_v56 = vpop.permute.xlu1 %7141 }
 0x167   :  { %8839 = vmatpush3.bf16.msra.mxu1 %v9763_v26  ;;  %8826 = vmatprep.mubr.bf16.mxu1 %v9765_v13  ;;  %v12098_v43 = vmax.bf16 %v7285_v60, %v7077_v37  ;;  %v7150_v42 = vrot.slane %v7142_v56, %v10993_v11  ;;  %v9767_v26 = vld [vmem:[%s13186_s21 + $0xa0] sm:$0xff]   ;;  %v7096_v37 = vld [vmem:[%s13243_s2 + $0x14] sm:$0xf] }
 0x168   :  { %8016 = vmatmul.mubr.msk.bf16.gmra.mrb[4].mxu0 %vm174_vm0, %v9915_v1  ;;  %8840 = vmatprep.subr.bf16.mxu1 %v9764_v33  ;;  %v12108_v29 = vpop.permute.xlu0 %7262  ;;  %v9769_v60 = vld [vmem:[%s13177_s12 + $0x30] sm:$0xff]  }
 0x169   :  { %1977 = vmatprep.mubr.bf16.mxu0 %v13246_v34  ;;  %v7286_v51 = vadd.bf16 %v7150_v42, %v7094_v20  ;;  %v9771_v1 = vld [vmem:[%s13186_s21 + $0xb0] sm:$0xff]  }
 0x16a   :  { %v7164_v56 = vpop.permute.xlu1 %7163 }
 0x16b   :  { %8841 = vmatpush3.bf16.msra.mxu1 %v9764_v33  ;;  %v12123_v0 = vmax.bf16 %v7286_v51, %v7078_v45  ;;  %v7172_v20 = vrot.slane %v7164_v56, %v10993_v11  ;;  %v9773_v51 = vld [vmem:[%s13179_s14] sm:$0xff]   ;;  %v9772_v56 = vld [vmem:[%s13186_s21 + $0xb8] sm:$0xff]  }
 0x16c   :  { %8842 = vmatprep.subr.bf16.mxu1 %v9767_v26 }
 0x16d   :  { %v7288_v32 = vadd.bf16 %v7172_v20, %v7096_v37  ;;  %v12129_v13 = vpop.permute.xlu0 %7332  ;;  %v7102_v20 = vld [vmem:[%s13243_s2 + $0x2c] sm:$0xf] }
 0x16e   :  { %8827 = vmatmul.mubr.bf16.gmra.mrb[24].mxu1 %v9766_v53  ;;  %v7186_v33 = vpop.permute.xlu1 %7185 }
 0x16f   :  { %8843 = vmatpush3.bf16.msra.mxu1 %v9767_v26  ;;  %8830 = vmatprep.mubr.bf16.mxu1 %v9769_v60  ;;  %v12137_v59 = vmax.bf16 %v7288_v32, %v7080_v27  ;;  %v7194_v45 = vrot.slane %v7186_v33, %v10993_v11 }
 0x170   :  { %8017 = vmatmul.mubr.msk.bf16.gmra.mrb[8].mxu0 %vm174_vm0, %v9916_v46  ;;  %8844 = vmatprep.subr.bf16.mxu1 %v9768_v39  ;;  %v9777_v46 = vld [vmem:[%s13179_s14 + $0x10] sm:$0xff]  }
 0x171   :  { %1987 = vmatprep.mubr.bf16.mxu0 %v13246_v34  ;;  %v7290_v42 = vadd.bf16 %v7194_v45, %v7098_v10  ;;  %v12148_v26 = vpop.permute.xlu0 %7365  ;;  %v9775_v10 = vld [vmem:[%s13186_s21 + $0xc0] sm:$0xff]  }
 0x173   :  { %8845 = vmatpush3.bf16.msra.mxu1 %v9768_v39  ;;  %v7208_v27 = vpop.permute.xlu1 %7207  ;;  %v12162_v53 = vmax.bf16 %v7290_v42, %v7082_v15  ;;  %v9776_v42 = vld [vmem:[%s13186_s21 + $0xc8] sm:$0xff]  }
 0x174   :  { %v7216_v37 = vrot.slane %v7208_v27, %v10993_v11  ;;  %8846 = vmatprep.subr.bf16.mxu1 %v9771_v1  ;;  %v7106_v27 = vld [vmem:[%s13243_s2 + $0x3c] sm:$0xf] }
 0x175   :  { %v12171_v32 = vpop.permute.xlu0 %7387 }
 0x176   :  { %v7292_v60 = vadd.bf16 %v7216_v37, %v7100_v57  ;;  %8831 = vmatmul.mubr.bf16.gmra.mrb[28].mxu1 %v9770_v62  ;;  %v9779_v37 = vld [vmem:[%s13186_s21 + $0xd0] sm:$0xff]  }
 0x177   :  { %8847 = vmatpush3.bf16.msra.mxu1 %v9771_v1  ;;  %v7230_v39 = vpop.permute.xlu1 %7229  ;;  %8850 = vmatprep.mubr.bf16.mxu1 %v9773_v51 }
 0x178   :  { %v12176_v2 = vmax.bf16 %v7292_v60, %v7084_v31  ;;  %8018 = vmatmul.mubr.msk.bf16.gmra.mrb[12].mxu0 %vm174_vm0, %v9917_v19  ;;  %v7238_v15 = vrot.slane %v7230_v39, %v10993_v11  ;;  %8848 = vmatprep.subr.bf16.mxu1 %v9772_v56  ;;  %v9780_v39 = vld [vmem:[%s13186_s21 + $0xd8] sm:$0xff]   ;;  %v9919_v19 = vld [vmem:[%s13235_s29 + $0x28] sm:$0xff]  }
 0x179   :  { %1997 = vmatprep.mubr.bf16.mxu0 %v13246_v34  ;;  %v12205_v62 = vpop.permute.xlu0 %7409 }
 0x17a   :  { %v7294_v33 = vadd.bf16 %v7238_v15, %v7102_v20 }
 0x17b   :  { %8849 = vmatpush3.bf16.msra.mxu1 %v9772_v56  ;;  %v7252_v31 = vpop.permute.xlu1 %7251 }
 0x17c   :  { %v12199_v45 = vmax.bf16 %v7294_v33, %v7086_v21  ;;  %v7260_v1 = vrot.slane %v7252_v31, %v10993_v11  ;;  %8866 = vmatprep.subr.bf16.mxu1 %v9775_v10  ;;  %v9920_v31 = vld [vmem:[%s13235_s29 + $0x30] sm:$0xff]  }
 0x17d   :  { %v12227_v63 = vpop.permute.xlu0 %7431 }
 0x17e   :  { %v7296_v57 = vadd.bf16 %v7260_v1, %v7104_v8  ;;  %8851 = vmatmul.mubr.bf16.vlgmr.msra.gmra.mrb[16].mxu1 %v9774_v24  ;;  %v9784_v24 = vld [vmem:[%s13186_s21 + $0xe8] sm:$0xff]   ;;  %v9787_v1 = vld [vmem:[%s13186_s21 + $0xf0] sm:$0xff]  }
 0x17f   :  { %8867 = vmatpush3.bf16.msra.mxu1 %v9775_v10  ;;  %v7274_v51 = vpop.permute.xlu1 %7273  ;;  %8854 = vmatprep.mubr.bf16.mxu1 %v9777_v46  ;;  %v9785_v10 = vld [vmem:[%s13179_s14 + $0x30] sm:$0xff]  }
 0x180   :  { %v12213_v5 = vmax.bf16 %v7296_v57, %v7088_v54  ;;  %8019 = vmatmul.mubr.msk.bf16.gmra.mrb[16].mxu0 %vm174_vm0, %v9918_v52  ;;  %v7282_v21 = vrot.slane %v7274_v51, %v10993_v11  ;;  %8868 = vmatprep.subr.bf16.mxu1 %v9776_v42  ;;  %v9781_v54 = vld [vmem:[%s13179_s14 + $0x20] sm:$0xff]   ;;  %v9788_v51 = vld [vmem:[%s13186_s21 + $0xf8] sm:$0xff]   ;;  %v7128_v52 = vrot.slane %v11985_v22, %v10993_v11 }
 0x181   :  { %2007 = vmatprep.mubr.bf16.mxu0 %v13246_v34  ;;  %v12249_v17 = vpop.permute.xlu0 %7453  ;;  %v9789_v57 = vld [vmem:[%s13180_s15] sm:$0xff]  }
 0x182   :  { %v7298_v56 = vadd.bf16 %v7282_v21, %v7106_v27  ;;  %v9791_v22 = vld [vmem:[%s13186_s21 + $0x100] sm:$0xff]  }
 0x183   :  { %8869 = vmatpush3.bf16.msra.mxu1 %v9776_v42  ;;  %v9786_v42 = vld [vmem:[%s13179_s14 + $0x38] sm:$0xff]  }
 0x184   :  { %v12235_v60 = vmax.bf16 %v7298_v56, %v7090_v7  ;;  %v7344_v20 = vpop.permute.xlu1 %7343  ;;  %8870 = vmatprep.subr.bf16.mxu1 %v9779_v37  ;;  %v9782_v7 = vld [vmem:[%s13179_s14 + $0x28] sm:$0xff]   ;;  %v9921_v56 = vld [vmem:[%s13235_s29 + $0x38] sm:$0xff]  }
 0x185   :  { %v12263_v8 = vpop.permute.xlu0 %7475 }
 0x186   :  { %13316 = vst [vmem:[#allocation9_spill] sm:$0xff] %v12235_v60  ;;  %8855 = vmatmul.mubr.bf16.gmra.mrb[20].mxu1 %v9778_v25 }
 0x187   :  { %8871 = vmatpush3.bf16.msra.mxu1 %v9779_v37  ;;  %8858 = vmatprep.mubr.bf16.mxu1 %v9781_v54  ;;  %v7092_v37 = vld [vmem:[%s13243_s2 + $0x4] sm:$0xf] }
 0x188   :  { %8020 = vmatmul.mubr.msk.bf16.gmra.mrb[20].mxu0 %vm174_vm0, %v9919_v19  ;;  %v12244_v15 = vpop.permute.xlu1 %7354  ;;  %8872 = vmatprep.subr.bf16.mxu1 %v9780_v39  ;;  %v7284_v54 = vadd.bf16 %v7128_v52, %v7092_v37  ;;  %v7352_v19 = vrot.slane %v7344_v20, %v10993_v11  ;;  %v9792_v20 = vld [vmem:[%s13186_s21 + $0x108] sm:$0xff]  }
 0x189   :  { %2017 = vmatprep.mubr.bf16.mxu0 %v13246_v34  ;;  %v12288_v21 = vpop.permute.xlu0 %7497 }
 0x18b   :  { %8873 = vmatpush3.bf16.msra.mxu1 %v9780_v39 }
 0x18c   :  { %v12258_v33 = vpop.permute.xlu1 %7376  ;;  %8874 = vmatprep.subr.bf16.mxu1 %v9783_v58 }
 0x18d   :  { %v7385_v60 = vrot.slane %v12258_v33, %v10993_v11  ;;  %v9799_v33 = vld [vmem:[%s13186_s21 + $0x120] sm:$0xff]  }
 0x18e   :  { %8859 = vmatmul.mubr.bf16.gmra.mrb[24].mxu1 %v9782_v7  ;;  %v7568_v39 = vpop.permute.xlu0 %7567  ;;  %v12310_v7 = vld.sshfl [vmem:[%s13228_s26 + $0x30] sm:$0x3f pattern:$0x76325410] }
 0x18f   :  { %8875 = vmatpush3.bf16.msra.mxu1 %v9783_v58  ;;  %8862 = vmatprep.mubr.bf16.mxu1 %v9785_v10  ;;  %v9790_v58 = vld [vmem:[%s13180_s15 + $0x8] sm:$0xff]   ;;  %13317 = vst [vmem:[#allocation8_spill] sm:$0xff] %v12310_v7  ;;  %v7316_v10 = vld [vmem:[%s13253_s30 + $0x4] sm:$0xf]  ;;  %v7576_v52 = vrot.slane %v7568_v39, %v10993_v11  ;;  %v2989_v37 = vcombine.high %v12310_v7, %v12310_v7  ;;  %v7095_v39 = vld [vmem:[%s13243_s2 + $0x10] sm:$0xf] }
 0x190   :  { %8021 = vmatmul.mubr.msk.bf16.gmra.mrb[24].mxu0 %vm174_vm0, %v9920_v31  ;;  %v12269_v46 = vpop.permute.xlu1 %7398  ;;  %8876 = vmatprep.subr.bf16.mxu1 %v9784_v24  ;;  %v7317_v7 = vld [vmem:[%s13253_s30 + $0x8] sm:$0xf] }
 0x191   :  { %2027 = vmatprep.mubr.bf16.mxu0 %v13246_v34 }
 0x192   :  { %v12339_v4 = vpop.permute.xlu0 %7600 }
 0x193   :  { %8877 = vmatpush3.bf16.msra.mxu1 %v9784_v24  ;;  %v9793_v24 = vld [vmem:[%s13180_s15 + $0x10] sm:$0xff]  }
 0x194   :  { %v12281_v27 = vpop.permute.xlu1 %7420  ;;  %8878 = vmatprep.subr.bf16.mxu1 %v9787_v1 }
 0x196   :  { %8863 = vmatmul.mubr.bf16.gmra.mrb[28].mxu1 %v9786_v42  ;;  %v2649_v42 = vsel %vm199_vm1, %v12036_v6, 0 }
 0x197   :  { %8879 = vmatpush3.bf16.msra.mxu1 %v9787_v1  ;;  %8882 = vmatprep.mubr.bf16.mxu1 %v9789_v57  ;;  %v7300_v1 = vmax.bf16 %v7284_v54, %v7076_v9  ;;  %v7341_v57 = vrot.slane %v12129_v13, %v10993_v11  ;;  %v9923_v9 = vld [vmem:[%s13243_s2] sm:$0xff]   ;;  %v9795_v13 = vld [vmem:[%s13186_s21 + $0x110] sm:$0xff]   ;;  %v7161_v54 = vrot.slane %v12007_v16, %v10993_v11  ;;  %v9794_v16 = vld [vmem:[%s13180_s15 + $0x18] sm:$0xff]  }
 0x198   :  { %8022 = vmatmul.mubr.msk.bf16.gmra.mrb[28].mxu0 %vm174_vm0, %v9921_v56  ;;  %v12297_v25 = vpop.permute.xlu1 %7442  ;;  %8880 = vmatprep.subr.bf16.mxu1 %v9788_v51  ;;  %v7315_v56 = vld [vmem:[%s13253_s30] sm:$0xf] }
 0x199   :  { %2323 = vmatprep.mubr.bf16.mxu0 %v13246_v34 }
 0x19b   :  { %8881 = vmatpush3.bf16.msra.mxu1 %v9788_v51  ;;  %v7508_v51 = vadd.bf16 %v7352_v19, %v7316_v10  ;;  %v7097_v19 = vld [vmem:[%s13243_s2 + $0x18] sm:$0xf] }
 0x19c   :  { %v12318_v31 = vpop.permute.xlu1 %7464  ;;  %8898 = vmatprep.subr.bf16.mxu1 %v9791_v22 }
 0x19d   :  { %v7524_v10 = vmax.bf16 %v7508_v51, %v7300_v1  ;;  %v7227_v1 = vrot.slane %v12068_v44, %v10993_v11  ;;  %v7249_v51 = vrot.slane %v12090_v41, %v10993_v11  ;;  %v7374_v44 = vrot.slane %v12148_v26, %v10993_v11  ;;  %v7539_v41 = vld [vmem:[%s13273_s25] sm:$0xf] }
 0x19e   :  { %8883 = vmatmul.mubr.bf16.vlgmr.msra.gmra.mrb[16].mxu1 %v9790_v58  ;;  %v7507_v58 = vadd.bf16 %v7341_v57, %v7315_v56  ;;  %v7099_v57 = vld [vmem:[%s13243_s2 + $0x20] sm:$0xf]  ;;  %v7103_v56 = vld [vmem:[%s13243_s2 + $0x30] sm:$0xf] }
 0x19f   :  { %8899 = vmatpush3.bf16.msra.mxu1 %v9791_v22  ;;  %8886 = vmatprep.mubr.bf16.mxu1 %v9793_v24  ;;  %v7183_v22 = vrot.slane %v12024_v50, %v10993_v11  ;;  %v7732_v24 = vadd.bf16 %v7576_v52, %v7540_v28  ;;  %v7205_v50 = vrot.slane %v12049_v38, %v10993_v11  ;;  %v9796_v38 = vld [vmem:[%s13186_s21 + $0x118] sm:$0xff]   ;;  %v12388_v28 = vpop.permute.xlu0 %7622 }
 0x1a0   :  { %8041 = vmatmul.mubr.msk.bf16.vlgmr.msra.gmra.mrb[0].mxu0 %vm174_vm0, %v9923_v9  ;;  %v12345_v6 = vpop.permute.xlu1 %7486  ;;  %8900 = vmatprep.subr.bf16.mxu1 %v9792_v20 }
 0x1a1   :  { %2658 = vmatpush1.bf16.msra.mxu0 %v2649_v42  ;;  %2333 = vmatprep.mubr.bf16.mxu0 %v13246_v34  ;;  %v9797_v42 = vld [vmem:[%s13180_s15 + $0x20] sm:$0xff]   ;;  %v7289_v52 = vadd.bf16 %v7183_v22, %v7097_v19  ;;  %v7318_v22 = vld [vmem:[%s13253_s30 + $0xc] sm:$0xf]  ;;  %v7748_v19 = vmax.bf16 %v7732_v24, %v7524_v10  ;;  %v7291_v26 = vadd.bf16 %v7205_v50, %v7099_v57 }
 0x1a2   :  { %8092 = vmatprep.subr.msk.bf16.mxu0 %vm199_vm1, %v2989_v37  ;;  %v7101_v37 = vld [vmem:[%s13243_s2 + $0x28] sm:$0xf]  ;;  %v13319_v50 = vmax.bf16 %v11959_v55, %v11940_v18  ;;  %v7396_v57 = vrot.slane %v12171_v32, %v10993_v11  ;;  %v13320_v55 = vmax.bf16 %v11981_v12, %v11964_v40  ;;  %v9801_v40 = vld [vmem:[%s13180_s15 + $0x30] sm:$0xff]   ;;  %v13321_v12 = vmax.bf16 %v12005_v47, %v11994_v23 }
 0x1a3   :  { %8901 = vmatpush3.bf16.msra.mxu1 %v9792_v20  ;;  %v7287_v20 = vadd.bf16 %v7161_v54, %v7095_v39  ;;  %v7523_v54 = vmax.bf16 %v7507_v58, %v12084_v61  ;;  %v7363_v39 = vrot.slane %v12244_v15, %v10993_v11  ;;  %v7293_v61 = vadd.bf16 %v7227_v1, %v7101_v37  ;;  %v7319_v15 = vld [vmem:[%s13253_s30 + $0x10] sm:$0xf]  ;;  %v9924_v24 = vld [vmem:[%s13243_s2 + $0x8] sm:$0xff]  }
 0x1a4   :  { %8902 = vmatprep.subr.bf16.mxu1 %v9795_v13  ;;  %v7295_v58 = vadd.bf16 %v7249_v51, %v7103_v56  ;;  %v7541_v1 = vld [vmem:[%s13273_s25 + $0x8] sm:$0xf]  ;;  %v12440_v32 = vmax.bf16 %v7291_v26, %v13320_v55  ;;  %v7511_v56 = vadd.bf16 %v7385_v60, %v7319_v15  ;;  %v13322_v60 = vmax.bf16 %v12022_v3, %v11578_v49 }
 0x1a5   :  { %v7557_v9 = vpop.permute.xlu1 %7556  ;;  %v9798_v18 = vld [vmem:[%s13180_s15 + $0x28] sm:$0xff]   ;;  %v7271_v49 = vrot.slane %v12108_v29, %v10993_v11  ;;  %v7418_v3 = vrot.slane %v12205_v62, %v10993_v11 }
 0x1a6   :  { %v7565_v36 = vrot.slane %v7557_v9, %v10993_v11  ;;  %8887 = vmatmul.mubr.bf16.gmra.mrb[20].mxu1 %v9794_v16  ;;  %v12457_v9 = vmax.bf16 %v7293_v61, %v13321_v12  ;;  %v9800_v23 = vld [vmem:[%s13186_s21 + $0x128] sm:$0xff]  }
 0x1a7   :  { %8903 = vmatpush3.bf16.msra.mxu1 %v9795_v13  ;;  %8890 = vmatprep.mubr.bf16.mxu1 %v9797_v42  ;;  %v13318_v13 = vmax.bf16 %v11926_v14, %v11895_v30  ;;  %v12425_v42 = vadd.bf16 %v7374_v44, %v7318_v22  ;;  %v7509_v30 = vadd.bf16 %v7363_v39, %v7317_v7  ;;  %v7764_v14 = vunpack.c.l.bf16 %v7748_v19  ;;  %v7542_v19 = vld [vmem:[%s13273_s25 + $0xc] sm:$0xf] }
 0x1a8   :  { %v7731_v10 = vadd.bf16 %v7565_v36, %v7539_v41  ;;  %8042 = vmatmul.mubr.msk.bf16.gmra.mrb[4].mxu0 %vm174_vm0, %v9924_v24  ;;  %8904 = vmatprep.subr.bf16.mxu1 %v9796_v38  ;;  %v12423_v36 = vmax.bf16 %v7289_v52, %v13319_v50  ;;  %v7320_v52 = vld [vmem:[%s13253_s30 + $0x14] sm:$0xf]  ;;  %v7407_v7 = vrot.slane %v12269_v46, %v10993_v11  ;;  %v12449_v41 = vpop.permute.xlu0 %7644  ;;  %v7321_v46 = vld [vmem:[%s13253_s30 + $0x18] sm:$0xf] }
 0x1a9   :  { %v12418_v16 = vmax.bf16 %v7287_v20, %v13318_v13  ;;  %v7579_v51 = vpop.permute.xlu1 %7578  ;;  %2343 = vmatprep.mubr.bf16.mxu0 %v13246_v34  ;;  %v7609_v44 = vrot.slane %v12339_v4, %v10993_v11  ;;  %v7543_v4 = vld [vmem:[%s13273_s25 + $0x10] sm:$0xf]  ;;  %v7526_v47 = vmax.bf16 %v12425_v42, %v12123_v0  ;;  %v7429_v39 = vrot.slane %v12281_v27, %v10993_v11  ;;  %v7323_v0 = vld [vmem:[%s13253_s30 + $0x20] sm:$0xf]  ;;  %v7105_v27 = vld [vmem:[%s13243_s2 + $0x38] sm:$0xf] }
 0x1aa   :  { %v7747_v20 = vmax.bf16 %v7731_v10, %v7523_v54  ;;  %v7587_v37 = vrot.slane %v7579_v51, %v10993_v11  ;;  %v12462_v54 = vmax.bf16 %v7295_v58, %v13322_v60  ;;  %v7512_v61 = vadd.bf16 %v7396_v57, %v7320_v52  ;;  %v7322_v58 = vld [vmem:[%s13253_s30 + $0x1c] sm:$0xf]  ;;  %v9925_v57 = vld [vmem:[%s13243_s2 + $0x10] sm:$0xff]  }
 0x1ab   :  { %8905 = vmatpush3.bf16.msra.mxu1 %v9796_v38  ;;  %v7525_v29 = vmax.bf16 %v7509_v30, %v12098_v43  ;;  %v7527_v10 = vmax.bf16 %v7511_v56, %v12418_v16  ;;  %v7513_v24 = vadd.bf16 %v7407_v7, %v7321_v46  ;;  %v7735_v13 = vadd.bf16 %v7609_v44, %v7543_v4  ;;  %v9803_v16 = vld [vmem:[%s13186_s21 + $0x130] sm:$0xff]   ;;  %v9802_v56 = vld [vmem:[%s13180_s15 + $0x38] sm:$0xff]  }
 0x1ac   :  { %v7763_v38 = vunpack.c.l.bf16 %v7747_v20  ;;  %v7733_v22 = vadd.bf16 %v7587_v37, %v7541_v1  ;;  %8906 = vmatprep.subr.bf16.mxu1 %v9799_v33  ;;  %v7631_v43 = vrot.slane %v12388_v28, %v10993_v11  ;;  %v12505_v1 = vadd.bf16 %v7418_v3, %v7322_v58  ;;  %v7545_v28 = vld [vmem:[%s13273_s25 + $0x18] sm:$0xf]  ;;  %v12514_v30 = vpop.permute.xlu0 %7666 }
 0x1ad   :  { %v7590_v26 = vpop.permute.xlu1 %7589  ;;  %v12509_v51 = vadd.bf16 %v7429_v39, %v7323_v0  ;;  %v12521_v37 = vadd.bf16 %v7271_v49, %v7105_v27  ;;  %v7528_v7 = vmax.bf16 %v7512_v61, %v12137_v59  ;;  %v7529_v44 = vmax.bf16 %v7513_v24, %v12423_v36  ;;  %v7547_v59 = vld [vmem:[%s13273_s25 + $0x20] sm:$0xf]  ;;  %v9804_v39 = vld [vmem:[%s13186_s21 + $0x138] sm:$0xff]  }
 0x1ae   :  { %v9612_v62 = vpack.i.bf16 %v7764_v14, %v7763_v38  ;;  %v7598_v15 = vrot.slane %v7590_v26, %v10993_v11  ;;  %8891 = vmatmul.mubr.bf16.gmra.mrb[24].mxu1 %v9798_v18  ;;  %v7749_v50 = vmax.bf16 %v7733_v22, %v7525_v29  ;;  %v7544_v14 = vld [vmem:[%s13273_s25 + $0x14] sm:$0xf]  ;;  %v7451_v18 = vrot.slane %v12297_v25, %v10993_v11  ;;  %v9805_v25 = vld [vmem:[%s13181_s16] sm:$0xff]  }
 0x1af   :  { %8907 = vmatpush3.bf16.msra.mxu1 %v9799_v33  ;;  %8894 = vmatprep.mubr.bf16.mxu1 %v9801_v40  ;;  %v7440_v33 = vrot.slane %v12227_v63, %v10993_v11  ;;  %v7324_v63 = vld [vmem:[%s13253_s30 + $0x24] sm:$0xf]  ;;  %v7325_v40 = vld [vmem:[%s13253_s30 + $0x28] sm:$0xf]  ;;  %v7751_v12 = vmax.bf16 %v7735_v13, %v7527_v10  ;;  %v7653_v60 = vrot.slane %v12449_v41, %v10993_v11 }
 0x1b0   :  { %v7734_v42 = vadd.bf16 %v7598_v15, %v7542_v19  ;;  %8043 = vmatmul.mubr.msk.bf16.gmra.mrb[8].mxu0 %vm174_vm0, %v9925_v57  ;;  %8908 = vmatprep.subr.bf16.mxu1 %v9800_v23  ;;  %v7737_v46 = vadd.bf16 %v7631_v43, %v7545_v28  ;;  %v7765_v4 = vunpack.c.l.bf16 %v7749_v50  ;;  %v7530_v22 = vmax.bf16 %v12505_v1, %v12162_v53  ;;  %v7326_v53 = vld [vmem:[%s13253_s30 + $0x2c] sm:$0xf]  ;;  %v7689_v0 = vpop.permute.xlu0 %7688  ;;  %v7327_v15 = vld [vmem:[%s13253_s30 + $0x30] sm:$0xf]  ;;  %v7549_v10 = vld [vmem:[%s13273_s25 + $0x28] sm:$0xf] }
 0x1b1   :  { %v7612_v20 = vpop.permute.xlu1 %7611  ;;  %2353 = vmatprep.mubr.bf16.mxu0 %v13246_v34  ;;  %9613 = vrot.lane.b32.xlu0 %v9612_v62, %s9985_s13  ;;  %v12547_v49 = vadd.bf16 %v7440_v33, %v7324_v63  ;;  %v7462_v41 = vrot.slane %v12249_v17, %v10993_v11  ;;  %v12562_v19 = vadd.bf16 %v7451_v18, %v7325_v40  ;;  %v7767_v62 = vunpack.c.l.bf16 %v7751_v12  ;;  %v9807_v43 = vld [vmem:[%s13186_s21 + $0x140] sm:$0xff]   ;;  %v7328_v33 = vld [vmem:[%s13253_s30 + $0x34] sm:$0xf] }
 0x1b2   :  { %v7750_v55 = vmax.bf16 %v7734_v42, %v7526_v47  ;;  %v7620_v52 = vrot.slane %v7612_v20, %v10993_v11  ;;  %v7546_v47 = vld [vmem:[%s13273_s25 + $0x1c] sm:$0xf]  ;;  %v7739_v58 = vadd.bf16 %v7653_v60, %v7547_v59  ;;  %v7675_v29 = vrot.slane %v12514_v30, %v10993_v11  ;;  %v7550_v59 = vld [vmem:[%s13273_s25 + $0x2c] sm:$0xf] }
 0x1b3   :  { %8909 = vmatpush3.bf16.msra.mxu1 %v9800_v23  ;;  %v7531_v23 = vmax.bf16 %v12509_v51, %v12440_v32  ;;  %v7473_v32 = vrot.slane %v12318_v31, %v10993_v11  ;;  %v7753_v27 = vmax.bf16 %v7737_v46, %v7529_v44  ;;  %v9926_v31 = vld [vmem:[%s13243_s2 + $0x18] sm:$0xff]   ;;  %v7532_v50 = vmax.bf16 %v12547_v49, %v12176_v2 }
 0x1b4   :  { %v7766_v36 = vunpack.c.l.bf16 %v7750_v55  ;;  %v7736_v38 = vadd.bf16 %v7620_v52, %v7544_v14  ;;  %8910 = vmatprep.subr.bf16.mxu1 %v9803_v16  ;;  %v7518_v42 = vadd.bf16 %v7462_v41, %v7326_v53  ;;  %v7484_v57 = vrot.slane %v12263_v8, %v10993_v11  ;;  %v9806_v8 = vld [vmem:[%s13181_s16 + $0x8] sm:$0xff]   ;;  %v9809_v55 = vld [vmem:[%s13181_s16 + $0x10] sm:$0xff]   ;;  %v7329_v52 = vld [vmem:[%s13253_s30 + $0x38] sm:$0xf]  ;;  %v7711_v46 = vpop.permute.xlu0 %7710 }
 0x1b5   :  { %v7634_v3 = vpop.permute.xlu1 %7633  ;;  %v7533_v51 = vmax.bf16 %v12562_v19, %v12457_v9  ;;  %v7519_v14 = vadd.bf16 %v7473_v32, %v7327_v15  ;;  %v7495_v20 = vrot.slane %v12345_v6, %v10993_v11  ;;  %v7755_v63 = vmax.bf16 %v7739_v58, %v7531_v23  ;;  %v7330_v23 = vld [vmem:[%s13253_s30 + $0x3c] sm:$0xf]  ;;  %v9927_v53 = vld [vmem:[%s13243_s2 + $0x20] sm:$0xff]   ;;  %v7553_v19 = vld [vmem:[%s13273_s25 + $0x38] sm:$0xf] }
 0x1b6   :  { %v9617_v26 = vpack.i.bf16 %v7766_v36, %v7765_v4  ;;  %v7752_v17 = vmax.bf16 %v7736_v38, %v7528_v7  ;;  %v7642_v61 = vrot.slane %v7634_v3, %v10993_v11  ;;  %8895 = vmatmul.mubr.bf16.gmra.mrb[28].mxu1 %v9802_v56  ;;  %v7741_v18 = vadd.bf16 %v7675_v29, %v7549_v10  ;;  %v9808_v36 = vld [vmem:[%s13186_s21 + $0x148] sm:$0xff]   ;;  %v9810_v29 = vld [vmem:[%s13181_s16 + $0x18] sm:$0xff]   ;;  %v9813_v10 = vld [vmem:[%s13181_s16 + $0x20] sm:$0xff]  }
 0x1b7   :  { %8911 = vmatpush3.bf16.msra.mxu1 %v9803_v16  ;;  %8914 = vmatprep.mubr.bf16.mxu1 %v9805_v25  ;;  %v7548_v16 = vld [vmem:[%s13273_s25 + $0x24] sm:$0xf]  ;;  %v7769_v9 = vunpack.c.l.bf16 %v7753_v27  ;;  %v7697_v56 = vrot.slane %v7689_v0, %v10993_v11  ;;  %v13323_v6 = vmax.bf16 %v12047_v35, %v11615_v48  ;;  %v7534_v12 = vmax.bf16 %v7518_v42, %v12199_v45  ;;  %v7551_v25 = vld [vmem:[%s13273_s25 + $0x30] sm:$0xf]  ;;  %v9812_v42 = vld [vmem:[%s13186_s21 + $0x158] sm:$0xff]  }
 0x1b8   :  { %v7768_v24 = vunpack.c.l.bf16 %v7752_v17  ;;  %v7738_v13 = vadd.bf16 %v7642_v61, %v7546_v47  ;;  %8044 = vmatmul.mubr.msk.bf16.gmra.mrb[12].mxu0 %vm174_vm0, %v9926_v31  ;;  %9618 = vrot.lane.b32.xlu1 %v9617_v26, %s9985_s13  ;;  %v7520_v60 = vadd.bf16 %v7484_v57, %v7328_v33  ;;  %v7506_v48 = vrot.slane %v12288_v21, %v10993_v11  ;;  %v7552_v26 = vld [vmem:[%s13273_s25 + $0x34] sm:$0xf]  ;;  %v13324_v33 = vld [vmem:[#allocation9_spill] sm:$0xff] }
 0x1b9   :  { %v7656_v1 = vpop.permute.xlu1 %7655  ;;  %8912 = vmatprep.subr.bf16.mxu1 %v9804_v39  ;;  %2363 = vmatprep.mubr.bf16.mxu0 %v13246_v34  ;;  %v7313_v40 = vmax.bf16 %v12521_v37, %v13323_v6  ;;  %v7535_v38 = vmax.bf16 %v7519_v14, %v12462_v54  ;;  %v7771_v49 = vunpack.c.l.bf16 %v7755_v63  ;;  %v7757_v41 = vmax.bf16 %v7741_v18, %v7533_v51  ;;  %v9811_v54 = vld [vmem:[%s13186_s21 + $0x150] sm:$0xff]   ;;  %v9928_v14 = vld [vmem:[%s13243_s2 + $0x28] sm:$0xff]  }
 0x1ba   :  { %v9622_v2 = vpack.i.bf16 %v7768_v24, %v7767_v62  ;;  %v7754_v28 = vmax.bf16 %v7738_v13, %v7530_v22  ;;  %v7664_v30 = vrot.slane %v7656_v1, %v10993_v11  ;;  %v7521_v22 = vadd.bf16 %v7495_v20, %v7329_v52  ;;  %v9814_v18 = vld [vmem:[%s13181_s16 + $0x28] sm:$0xff]   ;;  %v9819_v6 = vld [vmem:[%s13186_s21 + $0x170] sm:$0xff]  }
 0x1bb   :  { %8913 = vmatpush3.bf16.msra.mxu1 %v9804_v39  ;;  %v7743_v47 = vadd.bf16 %v7697_v56, %v7551_v25  ;;  %v7719_v3 = vrot.slane %v7711_v46, %v10993_v11  ;;  %v7536_v0 = vmax.bf16 %v7520_v60, %v12213_v5  ;;  %v7522_v62 = vadd.bf16 %v7506_v48, %v7330_v23  ;;  %v9816_v56 = vld [vmem:[%s13186_s21 + $0x168] sm:$0xff]   ;;  %v9820_v60 = vld [vmem:[%s13186_s21 + $0x178] sm:$0xff]   ;;  %v9823_v46 = vld [vmem:[%s13186_s21 + $0x180] sm:$0xff]  }
 0x1bc   :  { %v7770_v7 = vunpack.c.l.bf16 %v7754_v28  ;;  %v7740_v44 = vadd.bf16 %v7664_v30, %v7548_v16  ;;  %9623 = vrot.lane.b32.xlu0 %v9622_v2, %s9985_s13  ;;  %8930 = vmatprep.subr.bf16.mxu1 %v9807_v43  ;;  %v7537_v15 = vmax.bf16 %v7521_v22, %v7313_v40  ;;  %v7773_v27 = vunpack.c.l.bf16 %v7757_v41  ;;  %v9818_v40 = vld [vmem:[%s13181_s16 + $0x38] sm:$0xff]   ;;  %v9829_v22 = vld [vmem:[%s13182_s17 + $0x20] sm:$0xff]   ;;  %v9932_v41 = vld [vmem:[%s13253_s30 + $0x8] sm:$0xff]  }
 0x1bd   :  { %v7759_v24 = vmax.bf16 %v7743_v47, %v7535_v38  ;;  %v7745_v13 = vadd.bf16 %v7719_v3, %v7553_v19  ;;  %v7538_v51 = vmax.bf16 %v7522_v62, %v13324_v33  ;;  %v9930_v25 = vld [vmem:[%s13243_s2 + $0x38] sm:$0xff]   ;;  %v9831_v23 = vld [vmem:[%s13186_s21 + $0x1a0] sm:$0xff]   ;;  %v9830_v47 = vld [vmem:[%s13182_s17 + $0x28] sm:$0xff]  }
 0x1be   :  { %v7678_v4 = vpop.permute.xlu1 %7677  ;;  %v9627_v35 = vpack.i.bf16 %v7770_v7, %v7769_v9  ;;  %v7756_v45 = vmax.bf16 %v7740_v44, %v7532_v50  ;;  %8915 = vmatmul.mubr.bf16.vlgmr.msra.gmra.mrb[16].mxu1 %v9806_v8  ;;  %v7554_v50 = vld [vmem:[%s13273_s25 + $0x3c] sm:$0xf]  ;;  %v9929_v44 = vld [vmem:[%s13243_s2 + $0x30] sm:$0xff]   ;;  %v13326_v3 = vld [vmem:[#allocation5_spill] sm:$0xff] }
 0x1bf   :  { %v7686_v37 = vrot.slane %v7678_v4, %v10993_v11  ;;  %8931 = vmatpush3.bf16.msra.mxu1 %v9807_v43  ;;  %8918 = vmatprep.mubr.bf16.mxu1 %v9809_v55  ;;  %v7775_v2 = vunpack.c.l.bf16 %v7759_v24  ;;  %v7761_v28 = vmax.bf16 %v7745_v13, %v7537_v15  ;;  %v9817_v55 = vld [vmem:[%s13181_s16 + $0x30] sm:$0xff]   ;;  %v13325_v48 = vld [vmem:[#allocation8_spill] sm:$0xff]  ;;  %v12763_v19 = vld [vmem:[%s13176_s11] sm:$0x7] }
 0x1c0   :  { %v7772_v21 = vunpack.c.l.bf16 %v7756_v45  ;;  %8045 = vmatmul.mubr.msk.bf16.gmra.mrb[16].mxu0 %vm174_vm0, %v9927_v53  ;;  %9628 = vrot.lane.b32.xlu1 %v9627_v35, %s9985_s13  ;;  %v9825_v4 = vld [vmem:[%s13182_s17 + $0x10] sm:$0xff]   ;;  %v3015_v35 = vsel %vm199_vm1, %v13325_v48, 0  ;;  %v9931_v45 = vld [vmem:[%s13253_s30] sm:$0xff]   ;;  %v9826_v38 = vld [vmem:[%s13182_s17 + $0x18] sm:$0xff]  }
 0x1c1   :  { %v7742_v39 = vadd.bf16 %v7686_v37, %v7550_v59  ;;  %8932 = vmatprep.subr.bf16.mxu1 %v9808_v36  ;;  %2373 = vmatprep.mubr.bf16.mxu0 %v13246_v34  ;;  %v7777_v9 = vunpack.c.l.bf16 %v7761_v28  ;;  %v9822_v59 = vld [vmem:[%s13182_s17 + $0x8] sm:$0xff]   ;;  %v9827_v37 = vld [vmem:[%s13186_s21 + $0x190] sm:$0xff]   ;;  %v9834_v62 = vld [vmem:[%s13182_s17 + $0x38] sm:$0xff]  }
 0x1c2   :  { %v7700_v17 = vpop.permute.xlu1 %7699  ;;  %v9632_v61 = vpack.i.bf16 %v7772_v21, %v7771_v49  ;;  %v9828_v49 = vld [vmem:[%s13186_s21 + $0x198] sm:$0xff]   ;;  %v3293_v21 = vsub.s32 2, %v13326_v3  ;;  %v9833_v53 = vld [vmem:[%s13182_s17 + $0x30] sm:$0xff]  }
 0x1c3   :  { %v7758_v32 = vmax.bf16 %v7742_v39, %v7534_v12  ;;  %v7708_v58 = vrot.slane %v7700_v17, %v10993_v11  ;;  %8933 = vmatpush3.bf16.msra.mxu1 %v9808_v36  ;;  %v9821_v12 = vld [vmem:[%s13182_s17] sm:$0xff]   ;;  %v9824_v36 = vld [vmem:[%s13186_s21 + $0x188] sm:$0xff]   ;;  %v9933_v17 = vld [vmem:[%s13253_s30 + $0x10] sm:$0xff]   ;;  %s9986_s17 = smov [#allocation2]  }
 0x1c4   :  { %9633 = vrot.lane.b32.xlu0 %v9632_v61, %s9985_s13  ;;  %8934 = vmatprep.subr.bf16.mxu1 %v9811_v54  ;;  %v12752_v39 = vld [vmem:[%s13175_s10] sm:$0x7]  ;;  %v12773_v61 = vrot.slane %v12763_v19, %v3293_v21  ;;  %s7865_s0 = sshll.u32 %s9986_s17, 4  ;;  %s7866_s0 = int_to_ptr.vmem [resolvable:$true] %s7865_s0 }
 0x1c5   :  { %v7774_v31 = vunpack.c.l.bf16 %v7758_v32  ;;  %v7744_v43 = vadd.bf16 %v7708_v58, %v7552_v26  ;;  %v12766_v26 = vrot.slane %v12752_v39, %v3293_v21  ;;  %v9835_v32 = vld [vmem:[%s13186_s21 + $0x1b0] sm:$0xff]   ;;  %s9950_s29 = scalar_lea.vmem %s7866_s0, 8192  ;;  %p9955_p1 = scmp.lt.s32.totalorder %s7866_s0, %s7866_s0 }
 0x1c6   :  { %v7722_v5 = vpop.permute.xlu1 %7721  ;;  %8919 = vmatmul.mubr.bf16.gmra.mrb[20].mxu1 %v9810_v29  ;;  %p9951_p0 = scmp.ne.s32.totalorder %s7866_s0, %s9950_s29  ;;  %p9956_p2 = scmp.lt.s32.totalorder %s9950_s29, %s9950_s29 }
 0x1c7   :  { %v9637_v57 = vpack.i.bf16 %v7774_v31, %v7773_v27  ;;  %v7760_v16 = vmax.bf16 %v7744_v43, %v7536_v0  ;;  %v7730_v1 = vrot.slane %v7722_v5, %v10993_v11  ;;  %8935 = vmatpush3.bf16.msra.mxu1 %v9811_v54  ;;  %8922 = vmatprep.mubr.bf16.mxu1 %v9813_v10  ;;  %v9815_v11 = vld [vmem:[%s13186_s21 + $0x160] sm:$0xff]   ;;  %v9832_v54 = vld [vmem:[%s13186_s21 + $0x1a8] sm:$0xff]   ;;  %v9836_v43 = vld [vmem:[%s13186_s21 + $0x1b8] sm:$0xff]  }
 0x1c8   :  { %8046 = vmatmul.mubr.msk.bf16.gmra.mrb[20].mxu0 %vm174_vm0, %v9928_v14  ;;  %8936 = vmatprep.subr.bf16.mxu1 %v9812_v42  ;;  %v9837_v10 = vld [vmem:[%s13183_s18] sm:$0xff]   ;;  %p9957_p3 = por %p9956_p2, %p9955_p1 }
 0x1c9   :  { %v7776_v30 = vunpack.c.l.bf16 %v7760_v16  ;;  %v7746_v8 = vadd.bf16 %v7730_v1, %v7554_v50  ;;  %9638 = vrot.lane.b32.xlu1 %v9637_v57, %s9985_s13  ;;  %2383 = vmatprep.mubr.bf16.mxu0 %v13246_v34 }
 0x1ca   :  { %p9958_p4 = pnand %p9957_p3, %p9951_p0 }
 0x1cb   :  { %v9642_v20 = vpack.i.bf16 %v7776_v30, %v7775_v2  ;;  %v7762_v63 = vmax.bf16 %v7746_v8, %v7538_v51  ;;  %8937 = vmatpush3.bf16.msra.mxu1 %v9812_v42  ;;  %v9934_v51 = vld [vmem:[%s13253_s30 + $0x18] sm:$0xff]   ;;  %v9839_v2 = vld [vmem:[%s13186_s21 + $0x1c0] sm:$0xff]  }
 0x1cc   :  { %8938 = vmatprep.subr.bf16.mxu1 %v9815_v11 }
 0x1cd   :  { %v7778_v52 = vunpack.c.l.bf16 %v7762_v63  ;;  %9643 = vrot.lane.b32.xlu0 %v9642_v20, %s9985_s13 }
 0x1ce   :  { %8923 = vmatmul.mubr.bf16.gmra.mrb[24].mxu1 %v9814_v18  ;;  %v9841_v18 = vld [vmem:[%s13183_s18 + $0x10] sm:$0xff]  }
 0x1cf   :  { %v9647_v7 = vpack.i.bf16 %v7778_v52, %v7777_v9  ;;  %8939 = vmatpush3.bf16.msra.mxu1 %v9815_v11  ;;  %8926 = vmatprep.mubr.bf16.mxu1 %v9817_v55  ;;  %v9838_v11 = vld [vmem:[%s13183_s18 + $0x8] sm:$0xff]  }
 0x1d0   :  { %8047 = vmatmul.mubr.msk.bf16.gmra.mrb[24].mxu0 %vm174_vm0, %v9929_v44  ;;  %8940 = vmatprep.subr.bf16.mxu1 %v9816_v56 }
 0x1d1   :  { %9648 = vrot.lane.b32.xlu1 %v9647_v7, %s9985_s13  ;;  %2393 = vmatprep.mubr.bf16.mxu0 %v13246_v34 }
 0x1d3   :  { %8941 = vmatpush3.bf16.msra.mxu1 %v9816_v56  ;;  %v9840_v56 = vld [vmem:[%s13186_s21 + $0x1c8] sm:$0xff]  }
 0x1d4   :  { %8942 = vmatprep.subr.bf16.mxu1 %v9819_v6 }
 0x1d6   :  { %8927 = vmatmul.mubr.bf16.gmra.mrb[28].mxu1 %v9818_v40 }
 0x1d7   :  { %8943 = vmatpush3.bf16.msra.mxu1 %v9819_v6  ;;  %8946 = vmatprep.mubr.bf16.mxu1 %v9821_v12 }
 0x1d8   :  { %8048 = vmatmul.mubr.msk.bf16.gmra.mrb[28].mxu0 %vm174_vm0, %v9930_v25  ;;  %8944 = vmatprep.subr.bf16.mxu1 %v9820_v60 }
 0x1d9   :  { %2689 = vmatprep.mubr.bf16.mxu0 %v13246_v34 }
 0x1db   :  { %8945 = vmatpush3.bf16.msra.mxu1 %v9820_v60 }
 0x1dc   :  { %8962 = vmatprep.subr.bf16.mxu1 %v9823_v46 }
 0x1de   :  { %8947 = vmatmul.mubr.bf16.vlgmr.msra.gmra.mrb[16].mxu1 %v9822_v59  ;;  %v9843_v59 = vld [vmem:[%s13186_s21 + $0x1d0] sm:$0xff]  }
 0x1df   :  { %8963 = vmatpush3.bf16.msra.mxu1 %v9823_v46  ;;  %8950 = vmatprep.mubr.bf16.mxu1 %v9825_v4  ;;  %v9935_v46 = vld [vmem:[%s13253_s30 + $0x20] sm:$0xff]  }
 0x1e0   :  { %8067 = vmatmul.mubr.msk.bf16.vlgmr.msra.gmra.mrb[0].mxu0 %vm174_vm0, %v9931_v45  ;;  %8964 = vmatprep.subr.bf16.mxu1 %v9824_v36  ;;  %v9842_v45 = vld [vmem:[%s13183_s18 + $0x18] sm:$0xff]  }
 0x1e1   :  { %3024 = vmatpush1.bf16.msra.mxu0 %v3015_v35  ;;  %2699 = vmatprep.mubr.bf16.mxu0 %v13246_v34 }
 0x1e3   :  { %8965 = vmatpush3.bf16.msra.mxu1 %v9824_v36 }
 0x1e4   :  { %8966 = vmatprep.subr.bf16.mxu1 %v9827_v37 }
 0x1e6   :  { %8951 = vmatmul.mubr.bf16.gmra.mrb[20].mxu1 %v9826_v38 }
 0x1e7   :  { %8967 = vmatpush3.bf16.msra.mxu1 %v9827_v37  ;;  %8954 = vmatprep.mubr.bf16.mxu1 %v9829_v22  ;;  %v9845_v22 = vld [vmem:[%s13183_s18 + $0x20] sm:$0xff]  }
 0x1e8   :  { %8068 = vmatmul.mubr.msk.bf16.gmra.mrb[4].mxu0 %vm174_vm0, %v9932_v41  ;;  %8968 = vmatprep.subr.bf16.mxu1 %v9828_v49 }
 0x1e9   :  { %2709 = vmatprep.mubr.bf16.mxu0 %v13246_v34 }
 0x1eb   :  { %8969 = vmatpush3.bf16.msra.mxu1 %v9828_v49 }
 0x1ec   :  { %8970 = vmatprep.subr.bf16.mxu1 %v9831_v23 }
 0x1ee   :  { %8955 = vmatmul.mubr.bf16.gmra.mrb[24].mxu1 %v9830_v47  ;;  %v9844_v47 = vld [vmem:[%s13186_s21 + $0x1d8] sm:$0xff]  }
 0x1ef   :  { %8971 = vmatpush3.bf16.msra.mxu1 %v9831_v23  ;;  %8958 = vmatprep.mubr.bf16.mxu1 %v9833_v53 }
 0x1f0   :  { %8069 = vmatmul.mubr.msk.bf16.gmra.mrb[8].mxu0 %vm174_vm0, %v9933_v17  ;;  %8972 = vmatprep.subr.bf16.mxu1 %v9832_v54  ;;  %v8756_v58 = vpop.f32.mrb[0].mxu1 }
 0x1f1   :  { %2719 = vmatprep.mubr.bf16.mxu0 %v13246_v34  ;;  %v3306_v29 = vmul.f32 %v8756_v58, %v12766_v26  ;;  %v3170_v0 = vpop.f32.mrb[1].mxu1 }
 0x1f2   :  { %v3300_v15 = vmul.f32 %v12766_v26, %v3170_v0  ;;  %v8757_v27 = vpop.f32.mrb[2].mxu1  ;;  %v9936_v0 = vld [vmem:[%s13253_s30 + $0x28] sm:$0xff]  }
 0x1f3   :  { %8973 = vmatpush3.bf16.msra.mxu1 %v9832_v54  ;;  %v3371_v24 = vadd.f32 %v12773_v61, %v3306_v29  ;;  %v3309_v13 = vmul.f32 %v8757_v27, %v12766_v26  ;;  %v3173_v31 = vpop.f32.mrb[3].mxu1 }
 0x1f4   :  { %8974 = vmatprep.subr.bf16.mxu1 %v9835_v32  ;;  %v3365_v50 = vadd.f32 %v12773_v61, %v3300_v15  ;;  %v3303_v5 = vmul.f32 %v12766_v26, %v3173_v31 }
 0x1f5   :  { %v3419_v42 = vmax.f32 %v3371_v24, 0.0  ;;  %v3374_v57 = vadd.f32 %v12773_v61, %v3309_v13  ;;  %v9846_v13 = vld [vmem:[%s13183_s18 + $0x28] sm:$0xff]  }
 0x1f6   :  { %8959 = vmatmul.mubr.bf16.gmra.mrb[28].mxu1 %v9834_v62  ;;  %v3413_v16 = vmax.f32 %v3365_v50, 0.0  ;;  %v3368_v1 = vadd.f32 %v12773_v61, %v3303_v5  ;;  %v9847_v62 = vld [vmem:[%s13186_s21 + $0x1e0] sm:$0xff]   ;;  %v9849_v50 = vld [vmem:[%s13183_s18 + $0x30] sm:$0xff]  }
 0x1f7   :  { %8975 = vmatpush3.bf16.msra.mxu1 %v9835_v32  ;;  %8978 = vmatprep.mubr.bf16.mxu1 %v9837_v10  ;;  %3467 = vst [vmem:[#allocation2 + $0x50] sm:$0xff] %v3419_v42  ;;  %v3422_v33 = vmax.f32 %v3374_v57, 0.0 }
 0x1f8   :  { %8070 = vmatmul.mubr.msk.bf16.gmra.mrb[12].mxu0 %vm174_vm0, %v9934_v51  ;;  %8976 = vmatprep.subr.bf16.mxu1 %v9836_v43  ;;  %3461 = vst [vmem:[#allocation2 + $0x10] sm:$0xff] %v3413_v16  ;;  %v3416_v28 = vmax.f32 %v3368_v1, 0.0  ;;  %v8760_v30 = vpop.f32.mrb[4].mxu1  ;;  %v9848_v16 = vld [vmem:[%s13186_s21 + $0x1e8] sm:$0xff]  }
 0x1f9   :  { %2729 = vmatprep.mubr.bf16.mxu0 %v13246_v34  ;;  %3470 = vst [vmem:[#allocation2 + $0x70] sm:$0xff] %v3422_v33  ;;  %v3318_v8 = vmul.f32 %v8760_v30, %v12766_v26  ;;  %v3186_v14 = vpop.f32.mrb[5].mxu1 }
 0x1fa   :  { %3464 = vst [vmem:[#allocation2 + $0x30] sm:$0xff] %v3416_v28  ;;  %v3312_v20 = vmul.f32 %v12766_v26, %v3186_v14  ;;  %v8761_v63 = vpop.f32.mrb[6].mxu1  ;;  %v9937_v14 = vld [vmem:[%s13253_s30 + $0x30] sm:$0xff]  }
 0x1fb   :  { %8977 = vmatpush3.bf16.msra.mxu1 %v9836_v43  ;;  %v3383_v55 = vadd.f32 %v12773_v61, %v3318_v8  ;;  %v3321_v9 = vmul.f32 %v8761_v63, %v12766_v26  ;;  %v3189_v52 = vpop.f32.mrb[7].mxu1  ;;  %v9852_v63 = vld [vmem:[%s13186_s21 + $0x1f8] sm:$0xff]  }
 0x1fc   :  { %8994 = vmatprep.subr.bf16.mxu1 %v9839_v2  ;;  %v3377_v7 = vadd.f32 %v12773_v61, %v3312_v20  ;;  %v3315_v44 = vmul.f32 %v12766_v26, %v3189_v52  ;;  %v9853_v20 = vld [vmem:[%s13184_s19] sm:$0xff]   ;;  %v9857_v52 = vld [vmem:[%s13184_s19 + $0x10] sm:$0xff]  }
 0x1fd   :  { %v3431_v6 = vmax.f32 %v3383_v55, 0.0  ;;  %v3386_v40 = vadd.f32 %v12773_v61, %v3321_v9  ;;  %v9855_v55 = vld [vmem:[%s13186_s21 + $0x200] sm:$0xff]   ;;  %v9854_v9 = vld [vmem:[%s13184_s19 + $0x8] sm:$0xff]  }
 0x1fe   :  { %8979 = vmatmul.mubr.bf16.vlgmr.msra.gmra.mrb[16].mxu1 %v9838_v11  ;;  %v3425_v12 = vmax.f32 %v3377_v7, 0.0  ;;  %v3380_v60 = vadd.f32 %v12773_v61, %v3315_v44  ;;  %v9939_v7 = vld [vmem:[%s13273_s25] sm:$0xff]   ;;  %v9859_v44 = vld [vmem:[%s13186_s21 + $0x210] sm:$0xff]  }
 0x1ff   :  { %8995 = vmatpush3.bf16.msra.mxu1 %v9839_v2  ;;  %8982 = vmatprep.mubr.bf16.mxu1 %v9841_v18  ;;  %3479 = vst [vmem:[#allocation2 + $0xd0] sm:$0xff] %v3431_v6  ;;  %v3434_v25 = vmax.f32 %v3386_v40, 0.0  ;;  %v9938_v18 = vld [vmem:[%s13253_s30 + $0x38] sm:$0xff]   ;;  %v9861_v40 = vld [vmem:[%s13184_s19 + $0x20] sm:$0xff]   ;;  %s13327_s30 = sld [smem:[#allocation46_spill]] }
 0x200   :  { %8071 = vmatmul.mubr.msk.bf16.gmra.mrb[16].mxu0 %vm174_vm0, %v9935_v46  ;;  %8996 = vmatprep.subr.bf16.mxu1 %v9840_v56  ;;  %3473 = vst [vmem:[#allocation2 + $0x90] sm:$0xff] %v3425_v12  ;;  %v3428_v4 = vmax.f32 %v3380_v60, 0.0  ;;  %v8764_v36 = vpop.f32.mrb[8].mxu1  ;;  %v9858_v6 = vld [vmem:[%s13184_s19 + $0x18] sm:$0xff]   ;;  %v9940_v60 = vld [vmem:[%s13273_s25 + $0x8] sm:$0xff]  }
 0x201   :  { %2739 = vmatprep.mubr.bf16.mxu0 %v13246_v34  ;;  %3482 = vst [vmem:[#allocation2 + $0xf0] sm:$0xff] %v3434_v25  ;;  %v3330_v48 = vmul.f32 %v8764_v36, %v12766_v26  ;;  %v3202_v35 = vpop.f32.mrb[9].mxu1  ;;  %v9860_v12 = vld [vmem:[%s13186_s21 + $0x218] sm:$0xff]   ;;  %v9863_v25 = vld [vmem:[%s13186_s21 + $0x220] sm:$0xff]   ;;  %v9862_v46 = vld [vmem:[%s13184_s19 + $0x28] sm:$0xff]  }
 0x202   :  { %3476 = vst [vmem:[#allocation2 + $0xb0] sm:$0xff] %v3428_v4  ;;  %v3324_v37 = vmul.f32 %v12766_v26, %v3202_v35  ;;  %v8765_v38 = vpop.f32.mrb[10].mxu1  ;;  %v9864_v4 = vld [vmem:[%s13186_s21 + $0x228] sm:$0xff]   ;;  %v9941_v36 = vld [vmem:[%s13273_s25 + $0x10] sm:$0xff]   ;;  %v9866_v35 = vld [vmem:[%s13184_s19 + $0x38] sm:$0xff]  }
 0x203   :  { %8997 = vmatpush3.bf16.msra.mxu1 %v9840_v56  ;;  %v3395_v49 = vadd.f32 %v12773_v61, %v3330_v48  ;;  %v3333_v41 = vmul.f32 %v8765_v38, %v12766_v26  ;;  %v3205_v23 = vpop.f32.mrb[11].mxu1  ;;  %v9856_v56 = vld [vmem:[%s13186_s21 + $0x208] sm:$0xff]   ;;  %v9867_v48 = vld [vmem:[%s13186_s21 + $0x230] sm:$0xff]   ;;  %v9942_v38 = vld [vmem:[%s13273_s25 + $0x18] sm:$0xff]  }
 0x204   :  { %8998 = vmatprep.subr.bf16.mxu1 %v9843_v59  ;;  %v3389_v21 = vadd.f32 %v12773_v61, %v3324_v37  ;;  %v3327_v53 = vmul.f32 %v12766_v26, %v3205_v23  ;;  %v9868_v37 = vld [vmem:[%s13186_s21 + $0x238] sm:$0xff]  }
 0x205   :  { %v3443_v54 = vmax.f32 %v3395_v49, 0.0  ;;  %v3398_v17 = vadd.f32 %v12773_v61, %v3333_v41  ;;  %v9871_v49 = vld [vmem:[%s13185_s20 + $0x10] sm:$0xff]   ;;  %v9943_v41 = vld [vmem:[%s13273_s25 + $0x20] sm:$0xff]   ;;  %v9872_v23 = vld [vmem:[%s13185_s20 + $0x18] sm:$0xff]  }
 0x206   :  { %8983 = vmatmul.mubr.bf16.gmra.mrb[20].mxu1 %v9842_v45  ;;  %v3437_v32 = vmax.f32 %v3389_v21, 0.0  ;;  %v3392_v58 = vadd.f32 %v12773_v61, %v3327_v53  ;;  %v9869_v45 = vld [vmem:[%s13185_s20] sm:$0xff]   ;;  %v9944_v21 = vld [vmem:[%s13273_s25 + $0x28] sm:$0xff]  }
 0x207   :  { %8999 = vmatpush3.bf16.msra.mxu1 %v9843_v59  ;;  %8986 = vmatprep.mubr.bf16.mxu1 %v9845_v22  ;;  %3491 = vst [vmem:[#allocation2 + $0x150] sm:$0xff] %v3443_v54  ;;  %v3446_v29 = vmax.f32 %v3398_v17, 0.0  ;;  %v9865_v59 = vld [vmem:[%s13184_s19 + $0x30] sm:$0xff]   ;;  %v9870_v22 = vld [vmem:[%s13185_s20 + $0x8] sm:$0xff]  }
 0x208   :  { %8072 = vmatmul.mubr.msk.bf16.gmra.mrb[20].mxu0 %vm174_vm0, %v9936_v0  ;;  %9000 = vmatprep.subr.bf16.mxu1 %v9844_v47  ;;  %3485 = vst [vmem:[#allocation2 + $0x110] sm:$0xff] %v3437_v32  ;;  %v3440_v15 = vmax.f32 %v3392_v58, 0.0  ;;  %v8768_v27 = vpop.f32.mrb[12].mxu1  ;;  %v9874_v53 = vld [vmem:[%s13185_s20 + $0x28] sm:$0xff]   ;;  %v9875_v54 = vld [vmem:[%s13185_s20 + $0x30] sm:$0xff]   ;;  %v9876_v32 = vld [vmem:[%s13185_s20 + $0x38] sm:$0xff]  }
 0x209   :  { %2749 = vmatprep.mubr.bf16.mxu0 %v13246_v34  ;;  %3494 = vst [vmem:[#allocation2 + $0x170] sm:$0xff] %v3446_v29  ;;  %v3342_v10 = vmul.f32 %v8768_v27, %v12766_v26  ;;  %v3218_v24 = vpop.f32.mrb[13].mxu1  ;;  %v9945_v17 = vld [vmem:[%s13273_s25 + $0x30] sm:$0xff]   ;;  %v9946_v58 = vld [vmem:[%s13273_s25 + $0x38] sm:$0xff]   ;;  %v3285_v29 = vsub.s32 0, %v13326_v3  ;;  %v3289_v0 = vsub.s32 1, %v13326_v3 }
 0x20a   :  { %3488 = vst [vmem:[#allocation2 + $0x130] sm:$0xff] %v3440_v15  ;;  %v3336_v31 = vmul.f32 %v12766_v26, %v3218_v24  ;;  %v8769_v43 = vpop.f32.mrb[14].mxu1 }
 0x20b   :  { %9001 = vmatpush3.bf16.msra.mxu1 %v9844_v47  ;;  %v3407_v5 = vadd.f32 %v12773_v61, %v3342_v10  ;;  %v3345_v42 = vmul.f32 %v8769_v43, %v12766_v26  ;;  %v3221_v57 = vpop.f32.mrb[15].mxu1  ;;  %v9873_v47 = vld [vmem:[%s13185_s20 + $0x20] sm:$0xff]   ;;  %v13010_v15 = vrot.slane %v12763_v19, %v3285_v29  ;;  %v13013_v10 = vrot.slane %v12763_v19, %v3289_v0 }
 0x20c   :  { %9002 = vmatprep.subr.bf16.mxu1 %v9847_v62  ;;  %v3401_v1 = vadd.f32 %v12773_v61, %v3336_v31  ;;  %v3339_v33 = vmul.f32 %v12766_v26, %v3221_v57  ;;  %v9851_v26 = vld [vmem:[%s13186_s21 + $0x1f0] sm:$0xff]  }
 0x20d   :  { %v3455_v51 = vmax.f32 %v3407_v5, 0.0  ;;  %v3410_v2 = vadd.f32 %v12773_v61, %v3345_v42 }
 0x20e   :  { %8987 = vmatmul.mubr.bf16.gmra.mrb[24].mxu1 %v9846_v13  ;;  %v3449_v28 = vmax.f32 %v3401_v1, 0.0  ;;  %v3404_v30 = vadd.f32 %v12773_v61, %v3339_v33  ;;  %v9850_v61 = vld [vmem:[%s13183_s18 + $0x38] sm:$0xff]  }
 0x20f   :  { %9003 = vmatpush3.bf16.msra.mxu1 %v9847_v62  ;;  %8990 = vmatprep.mubr.bf16.mxu1 %v9849_v50  ;;  %3503 = vst [vmem:[#allocation2 + $0x1d0] sm:$0xff] %v3455_v51  ;;  %v3458_v8 = vmax.f32 %v3410_v2, 0.0  ;;  %v13004_v62 = vrot.slane %v12752_v39, %v3285_v29  ;;  %v13048_v29 = vld [vmem:[%s13327_s30] ss:$0 sm:$0xff] }
 0x210   :  { %8073 = vmatmul.mubr.msk.bf16.gmra.mrb[24].mxu0 %vm174_vm0, %v9937_v14  ;;  %9004 = vmatprep.subr.bf16.mxu1 %v9848_v16  ;;  %3497 = vst [vmem:[#allocation2 + $0x190] sm:$0xff] %v3449_v28  ;;  %v3452_v11 = vmax.f32 %v3404_v30, 0.0 }
 0x211   :  { %2759 = vmatprep.mubr.bf16.mxu0 %v13246_v34  ;;  %3506 = vst [vmem:[#allocation2 + $0x1f0] sm:$0xff] %v3458_v8 }
 0x212   :  { %3500 = vst [vmem:[#allocation2 + $0x1b0] sm:$0xff] %v3452_v11 }
 0x213   :  { %9005 = vmatpush3.bf16.msra.mxu1 %v9848_v16 }
 0x214   :  { %9006 = vmatprep.subr.bf16.mxu1 %v9851_v26 }
 0x216   :  { %8991 = vmatmul.mubr.bf16.gmra.mrb[28].mxu1 %v9850_v61 }
 0x217   :  { %9007 = vmatpush3.bf16.msra.mxu1 %v9851_v26  ;;  %9010 = vmatprep.mubr.bf16.mxu1 %v9853_v20 }
 0x218   :  { %8074 = vmatmul.mubr.msk.bf16.gmra.mrb[28].mxu0 %vm174_vm0, %v9938_v18  ;;  %9008 = vmatprep.subr.bf16.mxu1 %v9852_v63 }
 0x219   :  { %3055 = vmatprep.mubr.bf16.mxu0 %v13246_v34 }
 0x21b   :  { %9009 = vmatpush3.bf16.msra.mxu1 %v9852_v63 }
 0x21c   :  { %9026 = vmatprep.subr.bf16.mxu1 %v9855_v55 }
 0x21e   :  { %9011 = vmatmul.mubr.bf16.vlgmr.msra.gmra.mrb[16].mxu1 %v9854_v9 }
 0x21f   :  { %9027 = vmatpush3.bf16.msra.mxu1 %v9855_v55  ;;  %9014 = vmatprep.mubr.bf16.mxu1 %v9857_v52 }
 0x220   :  { %8093 = vmatmul.mubr.msk.bf16.vlgmr.msra.gmra.mrb[0].mxu0 %vm174_vm0, %v9939_v7  ;;  %9028 = vmatprep.subr.bf16.mxu1 %v9856_v56 }
 0x221   :  { %3065 = vmatprep.mubr.bf16.mxu0 %v13246_v34 }
 0x223   :  { %9029 = vmatpush3.bf16.msra.mxu1 %v9856_v56 }
 0x224   :  { %9030 = vmatprep.subr.bf16.mxu1 %v9859_v44 }
 0x226   :  { %9015 = vmatmul.mubr.bf16.gmra.mrb[20].mxu1 %v9858_v6 }
 0x227   :  { %9031 = vmatpush3.bf16.msra.mxu1 %v9859_v44  ;;  %9018 = vmatprep.mubr.bf16.mxu1 %v9861_v40 }
 0x228   :  { %8094 = vmatmul.mubr.msk.bf16.gmra.mrb[4].mxu0 %vm174_vm0, %v9940_v60  ;;  %9032 = vmatprep.subr.bf16.mxu1 %v9860_v12 }
 0x229   :  { %3075 = vmatprep.mubr.bf16.mxu0 %v13246_v34 }
 0x22b   :  { %9033 = vmatpush3.bf16.msra.mxu1 %v9860_v12 }
 0x22c   :  { %9034 = vmatprep.subr.bf16.mxu1 %v9863_v25 }
 0x22e   :  { %9019 = vmatmul.mubr.bf16.gmra.mrb[24].mxu1 %v9862_v46 }
 0x22f   :  { %9035 = vmatpush3.bf16.msra.mxu1 %v9863_v25  ;;  %9022 = vmatprep.mubr.bf16.mxu1 %v9865_v59 }
 0x230   :  { %8095 = vmatmul.mubr.msk.bf16.gmra.mrb[8].mxu0 %vm174_vm0, %v9941_v36  ;;  %9036 = vmatprep.subr.bf16.mxu1 %v9864_v4 }
 0x231   :  { %3085 = vmatprep.mubr.bf16.mxu0 %v13246_v34 }
 0x233   :  { %9037 = vmatpush3.bf16.msra.mxu1 %v9864_v4 }
 0x234   :  { %9038 = vmatprep.subr.bf16.mxu1 %v9867_v48 }
 0x236   :  { %9023 = vmatmul.mubr.bf16.gmra.mrb[28].mxu1 %v9866_v35 }
 0x237   :  { %9039 = vmatpush3.bf16.msra.mxu1 %v9867_v48  ;;  %9042 = vmatprep.mubr.bf16.mxu1 %v9869_v45 }
 0x238   :  { %8096 = vmatmul.mubr.msk.bf16.gmra.mrb[12].mxu0 %vm174_vm0, %v9942_v38  ;;  %9040 = vmatprep.subr.bf16.mxu1 %v9868_v37 }
 0x239   :  { %3095 = vmatprep.mubr.bf16.mxu0 %v13246_v34 }
 0x23b   :  { %9041 = vmatpush3.bf16.msra.mxu1 %v9868_v37 }
 0x23e   :  { %9043 = vmatmul.mubr.bf16.vlgmr.msra.gmra.mrb[16].mxu1 %v9870_v22 }
 0x23f   :  { %9046 = vmatprep.mubr.bf16.mxu1 %v9871_v49 }
 0x240   :  { %8097 = vmatmul.mubr.msk.bf16.gmra.mrb[16].mxu0 %vm174_vm0, %v9943_v41 }
 0x241   :  { %3105 = vmatprep.mubr.bf16.mxu0 %v13246_v34 }
 0x246   :  { %9047 = vmatmul.mubr.bf16.gmra.mrb[20].mxu1 %v9872_v23 }
 0x247   :  { %9050 = vmatprep.mubr.bf16.mxu1 %v9873_v47 }
 0x248   :  { %8098 = vmatmul.mubr.msk.bf16.gmra.mrb[20].mxu0 %vm174_vm0, %v9944_v21 }
 0x249   :  { %3115 = vmatprep.mubr.bf16.mxu0 %v13246_v34 }
 0x24e   :  { %9051 = vmatmul.mubr.bf16.gmra.mrb[24].mxu1 %v9874_v53 }
 0x24f   :  { %9054 = vmatprep.mubr.bf16.mxu1 %v9875_v54 }
 0x250   :  { %8099 = vmatmul.mubr.msk.bf16.gmra.mrb[24].mxu0 %vm174_vm0, %v9945_v17 }
 0x251   :  { %3125 = vmatprep.mubr.bf16.mxu0 %v13246_v34  ;;  %v13007_v34 = vrot.slane %v12752_v39, %v3289_v0  ;;  %v9619_v0 = vpop.permute.xlu1 %9618 }
 0x256   :  { %9055 = vmatmul.mubr.bf16.gmra.mrb[28].mxu1 %v9876_v32 }
 0x258   :  { %8100 = vmatmul.mubr.msk.bf16.gmra.mrb[28].mxu0 %vm174_vm0, %v9946_v58 }
 0x2f3   :  { %v3057_v27 = vpop.f32.mrb[0].mxu0 }
 0x2f4   :  { %v3298_v24 = vmul.f32 %v13004_v62, %v3057_v27  ;;  %v3059_v13 = vpop.f32.mrb[1].mxu0 }
 0x2f5   :  { %v3299_v31 = vmul.f32 %v13007_v34, %v3059_v13  ;;  %v3061_v43 = vpop.f32.mrb[2].mxu0 }
 0x2f6   :  { %v3363_v3 = vadd.f32 %v13010_v15, %v3298_v24  ;;  %v3301_v50 = vmul.f32 %v13004_v62, %v3061_v43  ;;  %v3063_v5 = vpop.f32.mrb[3].mxu0 }
 0x2f7   :  { %v3364_v39 = vadd.f32 %v13013_v10, %v3299_v31  ;;  %v3302_v42 = vmul.f32 %v13007_v34, %v3063_v5 }
 0x2f8   :  { %v3411_v57 = vmax.f32 %v3363_v3, 0.0  ;;  %v3366_v16 = vadd.f32 %v13010_v15, %v3301_v50  ;;  %v13055_v3 = vld [vmem:[%s13328_s28] ss:$0 sm:$0xff] }
 0x2f9   :  { %v3412_v19 = vmax.f32 %v3364_v39, 0.0  ;;  %v3367_v1 = vadd.f32 %v13013_v10, %v3302_v42  ;;  %v9620_v42 = vunpack.i.l.bf16 %v9619_v0 }
 0x2fa   :  { %3459 = vst [vmem:[#allocation2] sm:$0xff] %v3411_v57  ;;  %v3414_v33 = vmax.f32 %v3366_v16, 0.0 }
 0x2fb   :  { %3460 = vst [vmem:[#allocation2 + $0x8] sm:$0xff] %v3412_v19  ;;  %v3415_v51 = vmax.f32 %v3367_v1, 0.0  ;;  %v3067_v2 = vpop.f32.mrb[4].mxu0 }
 0x2fc   :  { %3462 = vst [vmem:[#allocation2 + $0x20] sm:$0xff] %v3414_v33  ;;  %v3304_v28 = vmul.f32 %v13004_v62, %v3067_v2  ;;  %v3069_v30 = vpop.f32.mrb[5].mxu0 }
 0x2fd   :  { %3463 = vst [vmem:[#allocation2 + $0x28] sm:$0xff] %v3415_v51  ;;  %v3305_v8 = vmul.f32 %v13007_v34, %v3069_v30  ;;  %v3071_v14 = vpop.f32.mrb[6].mxu0 }
 0x2fe   :  { %v3369_v26 = vadd.f32 %v13010_v15, %v3304_v28  ;;  %v3307_v11 = vmul.f32 %v13004_v62, %v3071_v14  ;;  %v3073_v61 = vpop.f32.mrb[7].mxu0 }
 0x2ff   :  { %v3370_v20 = vadd.f32 %v13013_v10, %v3305_v8  ;;  %v3308_v63 = vmul.f32 %v13007_v34, %v3073_v61  ;;  %v9614_v8 = vpop.permute.xlu0 %9613 }
 0x300   :  { %v3417_v18 = vmax.f32 %v3369_v26, 0.0  ;;  %v3372_v55 = vadd.f32 %v13010_v15, %v3307_v11 }
 0x301   :  { %v3418_v9 = vmax.f32 %v3370_v20, 0.0  ;;  %v3373_v52 = vadd.f32 %v13013_v10, %v3308_v63 }
 0x302   :  { %3465 = vst [vmem:[#allocation2 + $0x40] sm:$0xff] %v3417_v18  ;;  %v3420_v56 = vmax.f32 %v3372_v55, 0.0 }
 0x303   :  { %3466 = vst [vmem:[#allocation2 + $0x48] sm:$0xff] %v3418_v9  ;;  %v3421_v7 = vmax.f32 %v3373_v52, 0.0  ;;  %v3077_v44 = vpop.f32.mrb[8].mxu0 }
 0x304   :  { %3468 = vst [vmem:[#allocation2 + $0x60] sm:$0xff] %v3420_v56  ;;  %v3310_v6 = vmul.f32 %v13004_v62, %v3077_v44  ;;  %v3079_v40 = vpop.f32.mrb[9].mxu0 }
 0x305   :  { %3469 = vst [vmem:[#allocation2 + $0x68] sm:$0xff] %v3421_v7  ;;  %v3311_v12 = vmul.f32 %v13007_v34, %v3079_v40  ;;  %v3081_v60 = vpop.f32.mrb[10].mxu0 }
 0x306   :  { %v3375_v25 = vadd.f32 %v13010_v15, %v3310_v6  ;;  %v3313_v46 = vmul.f32 %v13004_v62, %v3081_v60  ;;  %v3083_v59 = vpop.f32.mrb[11].mxu0  ;;  %v9615_v6 = vunpack.i.l.bf16 %v9614_v8 }
 0x307   :  { %v3376_v4 = vadd.f32 %v13013_v10, %v3311_v12  ;;  %v3314_v36 = vmul.f32 %v13007_v34, %v3083_v59 }
 0x308   :  { %v3423_v48 = vmax.f32 %v3375_v25, 0.0  ;;  %v3378_v35 = vadd.f32 %v13010_v15, %v3313_v46  ;;  %v9621_v25 = vunpack.i.h.bf16 %v9619_v0 }
 0x309   :  { %v3424_v45 = vmax.f32 %v3376_v4, 0.0  ;;  %v3379_v37 = vadd.f32 %v13013_v10, %v3314_v36 }
 0x30a   :  { %3471 = vst [vmem:[#allocation2 + $0x80] sm:$0xff] %v3423_v48  ;;  %v3426_v38 = vmax.f32 %v3378_v35, 0.0  ;;  %v9616_v48 = vunpack.i.h.bf16 %v9614_v8  ;;  %v9629_v35 = vpop.permute.xlu1 %9628 }
 0x30b   :  { %3472 = vst [vmem:[#allocation2 + $0x88] sm:$0xff] %v3424_v45  ;;  %v3427_v22 = vmax.f32 %v3379_v37, 0.0  ;;  %v3087_v49 = vpop.f32.mrb[12].mxu0 }
 0x30c   :  { %3474 = vst [vmem:[#allocation2 + $0xa0] sm:$0xff] %v3426_v38  ;;  %v3316_v41 = vmul.f32 %v13004_v62, %v3087_v49  ;;  %v3089_v23 = vpop.f32.mrb[13].mxu0 }
 0x30d   :  { %3475 = vst [vmem:[#allocation2 + $0xa8] sm:$0xff] %v3427_v22  ;;  %v3317_v47 = vmul.f32 %v13007_v34, %v3089_v23  ;;  %v3091_v21 = vpop.f32.mrb[14].mxu0 }
 0x30e   :  { %v3381_v53 = vadd.f32 %v13010_v15, %v3316_v41  ;;  %v3319_v54 = vmul.f32 %v13004_v62, %v3091_v21  ;;  %v3093_v17 = vpop.f32.mrb[15].mxu0 }
 0x30f   :  { %v3382_v32 = vadd.f32 %v13013_v10, %v3317_v47  ;;  %v3320_v58 = vmul.f32 %v13007_v34, %v3093_v17 }
 0x310   :  { %v3429_v27 = vmax.f32 %v3381_v53, 0.0  ;;  %v3384_v24 = vadd.f32 %v13010_v15, %v3319_v54 }
 0x311   :  { %v3430_v13 = vmax.f32 %v3382_v32, 0.0  ;;  %v3385_v31 = vadd.f32 %v13013_v10, %v3320_v58  ;;  %v9044_v43 = vpop.f32.mrb[16].mxu1  ;;  %v9624_v32 = vpop.permute.xlu0 %9623  ;;  %v9630_v58 = vunpack.i.l.bf16 %v9629_v35 }
 0x312   :  { %3477 = vst [vmem:[#allocation2 + $0xc0] sm:$0xff] %v3429_v27  ;;  %v3432_v50 = vmax.f32 %v3384_v24, 0.0  ;;  %v5661_v5 = vmul.f32 %v9044_v43, %v13048_v29  ;;  %v5573_v39 = vpop.f32.mrb[17].mxu1 }
 0x313   :  { %3478 = vst [vmem:[#allocation2 + $0xc8] sm:$0xff] %v3430_v13  ;;  %v3433_v57 = vmax.f32 %v3385_v31, 0.0  ;;  %v5659_v16 = vmul.f32 %v13048_v29, %v5573_v39  ;;  %v3097_v19 = vpop.f32.mrb[16].mxu0  ;;  %v9045_v1 = vpop.f32.mrb[18].mxu1 }
 0x314   :  { %3480 = vst [vmem:[#allocation2 + $0xe0] sm:$0xff] %v3432_v50  ;;  %v5684_v33 = vadd.f32 %v13055_v3, %v5661_v5  ;;  %v3322_v51 = vmul.f32 %v13004_v62, %v3097_v19  ;;  %v5662_v2 = vmul.f32 %v9045_v1, %v13048_v29  ;;  %v3099_v28 = vpop.f32.mrb[17].mxu0  ;;  %v5576_v30 = vpop.f32.mrb[19].mxu1  ;;  %v9625_v1 = vunpack.i.l.bf16 %v9624_v32 }
 0x315   :  { %3481 = vst [vmem:[#allocation2 + $0xe8] sm:$0xff] %v3433_v57  ;;  %v5682_v14 = vadd.f32 %v13055_v3, %v5659_v16  ;;  %v3323_v26 = vmul.f32 %v13007_v34, %v3099_v28  ;;  %v5660_v11 = vmul.f32 %v13048_v29, %v5576_v30  ;;  %v3101_v61 = vpop.f32.mrb[18].mxu0  ;;  %v9631_v28 = vunpack.i.h.bf16 %v9629_v35 }
 0x316   :  { %v5700_v20 = vmax.f32 %v5684_v33, 0.0  ;;  %v3387_v63 = vadd.f32 %v13010_v15, %v3322_v51  ;;  %v5685_v18 = vadd.f32 %v13055_v3, %v5662_v2  ;;  %v3325_v55 = vmul.f32 %v13004_v62, %v3101_v61  ;;  %v3103_v9 = vpop.f32.mrb[19].mxu0  ;;  %v9639_v61 = vpop.permute.xlu1 %9638 }
 0x317   :  { %v5698_v52 = vmax.f32 %v5682_v14, 0.0  ;;  %v3388_v56 = vadd.f32 %v13013_v10, %v3323_v26  ;;  %v5683_v7 = vadd.f32 %v13055_v3, %v5660_v11  ;;  %v3326_v44 = vmul.f32 %v13007_v34, %v3103_v9 }
 0x318   :  { %5717 = vst.msk [vmem:[#allocation2 + $0x58] sm:$0xff] %vm5714_vm2, %v5700_v20  ;;  %v3435_v40 = vmax.f32 %v3387_v63, 0.0  ;;  %v5701_v12 = vmax.f32 %v5685_v18, 0.0  ;;  %v3390_v60 = vadd.f32 %v13010_v15, %v3325_v55  ;;  %v9626_v11 = vunpack.i.h.bf16 %v9624_v32 }
 0x319   :  { %7846 = vst.msk [vmem:[#allocation2 + $0x58] sm:$0xff] %vm7843_vm3, %v9620_v42  ;;  %v3436_v46 = vmax.f32 %v3388_v56, 0.0  ;;  %v5699_v59 = vmax.f32 %v5683_v7, 0.0  ;;  %v3391_v4 = vadd.f32 %v13013_v10, %v3326_v44  ;;  %v9048_v36 = vpop.f32.mrb[20].mxu1 }
 0x31a   :  { %5715 = vst.msk [vmem:[#allocation2 + $0x18] sm:$0xff] %vm5714_vm2, %v5698_v52  ;;  %3483 = vst [vmem:[#allocation2 + $0x100] sm:$0xff] %v3435_v40  ;;  %v3438_v45 = vmax.f32 %v3390_v60, 0.0  ;;  %v5665_v37 = vmul.f32 %v9048_v36, %v13048_v29  ;;  %v5589_v38 = vpop.f32.mrb[21].mxu1  ;;  %v9634_v60 = vpop.permute.xlu0 %9633 }
 0x31b   :  { %7844 = vst.msk [vmem:[#allocation2 + $0x18] sm:$0xff] %vm7843_vm3, %v9615_v6  ;;  %3484 = vst [vmem:[#allocation2 + $0x108] sm:$0xff] %v3436_v46  ;;  %v3439_v22 = vmax.f32 %v3391_v4, 0.0  ;;  %v5663_v49 = vmul.f32 %v13048_v29, %v5589_v38  ;;  %v3107_v41 = vpop.f32.mrb[20].mxu0  ;;  %v9049_v23 = vpop.f32.mrb[22].mxu1 }
 0x31c   :  { %5718 = vst.msk [vmem:[#allocation2 + $0x78] sm:$0xff] %vm5714_vm2, %v5701_v12  ;;  %5716 = vst.msk [vmem:[#allocation2 + $0x38] sm:$0xff] %vm5714_vm2, %v5699_v59  ;;  %v5688_v47 = vadd.f32 %v13055_v3, %v5665_v37  ;;  %v3328_v21 = vmul.f32 %v13004_v62, %v3107_v41  ;;  %v5666_v53 = vmul.f32 %v9049_v23, %v13048_v29  ;;  %v3109_v54 = vpop.f32.mrb[21].mxu0  ;;  %v5592_v17 = vpop.f32.mrb[23].mxu1 }
 0x31d   :  { %7847 = vst.msk [vmem:[#allocation2 + $0x78] sm:$0xff] %vm7843_vm3, %v9621_v25  ;;  %7845 = vst.msk [vmem:[#allocation2 + $0x38] sm:$0xff] %vm7843_vm3, %v9616_v48  ;;  %v5686_v0 = vadd.f32 %v13055_v3, %v5663_v49  ;;  %v3329_v27 = vmul.f32 %v13007_v34, %v3109_v54  ;;  %v5664_v24 = vmul.f32 %v13048_v29, %v5592_v17  ;;  %v3111_v13 = vpop.f32.mrb[22].mxu0  ;;  %v9640_v25 = vunpack.i.l.bf16 %v9639_v61 }
 0x31e   :  { %3486 = vst [vmem:[#allocation2 + $0x120] sm:$0xff] %v3438_v45  ;;  %3487 = vst [vmem:[#allocation2 + $0x128] sm:$0xff] %v3439_v22  ;;  %v5704_v31 = vmax.f32 %v5688_v47, 0.0  ;;  %v3393_v43 = vadd.f32 %v13010_v15, %v3328_v21  ;;  %v5689_v50 = vadd.f32 %v13055_v3, %v5666_v53  ;;  %v3331_v5 = vmul.f32 %v13004_v62, %v3111_v13  ;;  %v3113_v39 = vpop.f32.mrb[23].mxu0  ;;  %v9649_v13 = vpop.permute.xlu1 %9648 }
 0x31f   :  { %v5702_v42 = vmax.f32 %v5686_v0, 0.0  ;;  %v3394_v57 = vadd.f32 %v13013_v10, %v3329_v27  ;;  %v5687_v16 = vadd.f32 %v13055_v3, %v5664_v24  ;;  %v3332_v19 = vmul.f32 %v13007_v34, %v3113_v39 }
 0x320   :  { %5721 = vst.msk [vmem:[#allocation2 + $0xd8] sm:$0xff] %vm5714_vm2, %v5704_v31  ;;  %v3441_v33 = vmax.f32 %v3393_v43, 0.0  ;;  %v5705_v51 = vmax.f32 %v5689_v50, 0.0  ;;  %v3396_v2 = vadd.f32 %v13010_v15, %v3331_v5  ;;  %v9635_v47 = vunpack.i.l.bf16 %v9634_v60 }
 0x321   :  { %7850 = vst.msk [vmem:[#allocation2 + $0xd8] sm:$0xff] %vm7843_vm3, %v9630_v58  ;;  %v3442_v30 = vmax.f32 %v3394_v57, 0.0  ;;  %v5703_v8 = vmax.f32 %v5687_v16, 0.0  ;;  %v3397_v14 = vadd.f32 %v13013_v10, %v3332_v19  ;;  %v9052_v26 = vpop.f32.mrb[24].mxu1  ;;  %v9641_v17 = vunpack.i.h.bf16 %v9639_v61 }
 0x322   :  { %5719 = vst.msk [vmem:[#allocation2 + $0x98] sm:$0xff] %vm5714_vm2, %v5702_v42  ;;  %3489 = vst [vmem:[#allocation2 + $0x140] sm:$0xff] %v3441_v33  ;;  %v3444_v20 = vmax.f32 %v3396_v2, 0.0  ;;  %v5669_v63 = vmul.f32 %v9052_v26, %v13048_v29  ;;  %v5605_v18 = vpop.f32.mrb[25].mxu1  ;;  %v9636_v24 = vunpack.i.h.bf16 %v9634_v60  ;;  %v9644_v2 = vpop.permute.xlu0 %9643 }
 0x323   :  { %7848 = vst.msk [vmem:[#allocation2 + $0x98] sm:$0xff] %vm7843_vm3, %v9625_v1  ;;  %3490 = vst [vmem:[#allocation2 + $0x148] sm:$0xff] %v3442_v30  ;;  %v3445_v55 = vmax.f32 %v3397_v14, 0.0  ;;  %v5667_v9 = vmul.f32 %v13048_v29, %v5605_v18  ;;  %v3117_v52 = vpop.f32.mrb[24].mxu0  ;;  %v9053_v56 = vpop.f32.mrb[26].mxu1  ;;  %v9646_v60 = vunpack.i.h.bf16 %v9644_v2 }
 0x324   :  { %5722 = vst.msk [vmem:[#allocation2 + $0xf8] sm:$0xff] %vm5714_vm2, %v5705_v51  ;;  %5720 = vst.msk [vmem:[#allocation2 + $0xb8] sm:$0xff] %vm5714_vm2, %v5703_v8  ;;  %v5692_v7 = vadd.f32 %v13055_v3, %v5669_v63  ;;  %v3334_v44 = vmul.f32 %v13004_v62, %v3117_v52  ;;  %v5670_v6 = vmul.f32 %v9053_v56, %v13048_v29  ;;  %v3119_v40 = vpop.f32.mrb[25].mxu0  ;;  %v5608_v12 = vpop.f32.mrb[27].mxu1 }
 0x325   :  { %7851 = vst.msk [vmem:[#allocation2 + $0xf8] sm:$0xff] %vm7843_vm3, %v9631_v28  ;;  %7849 = vst.msk [vmem:[#allocation2 + $0xb8] sm:$0xff] %vm7843_vm3, %v9626_v11  ;;  %v5690_v46 = vadd.f32 %v13055_v3, %v5667_v9  ;;  %v3335_v59 = vmul.f32 %v13007_v34, %v3119_v40  ;;  %v5668_v4 = vmul.f32 %v13048_v29, %v5608_v12  ;;  %v3121_v36 = vpop.f32.mrb[26].mxu0  ;;  %v9650_v28 = vunpack.i.l.bf16 %v9649_v13 }
 0x326   :  { %3492 = vst [vmem:[#allocation2 + $0x160] sm:$0xff] %v3444_v20  ;;  %3493 = vst [vmem:[#allocation2 + $0x168] sm:$0xff] %v3445_v55  ;;  %v5708_v48 = vmax.f32 %v5692_v7, 0.0  ;;  %v3399_v35 = vadd.f32 %v13010_v15, %v3334_v44  ;;  %v5693_v45 = vadd.f32 %v13055_v3, %v5670_v6  ;;  %v3337_v37 = vmul.f32 %v13004_v62, %v3121_v36  ;;  %v3123_v38 = vpop.f32.mrb[27].mxu0 }
 0x327   :  { %v5706_v22 = vmax.f32 %v5690_v46, 0.0  ;;  %v3400_v49 = vadd.f32 %v13013_v10, %v3335_v59  ;;  %v5691_v41 = vadd.f32 %v13055_v3, %v5668_v4  ;;  %v3338_v23 = vmul.f32 %v13007_v34, %v3123_v38 }
 0x328   :  { %5725 = vst.msk [vmem:[#allocation2 + $0x158] sm:$0xff] %vm5714_vm2, %v5708_v48  ;;  %v3447_v21 = vmax.f32 %v3399_v35, 0.0  ;;  %v5709_v53 = vmax.f32 %v5693_v45, 0.0  ;;  %v3402_v54 = vadd.f32 %v13010_v15, %v3337_v37  ;;  %v9645_v7 = vunpack.i.l.bf16 %v9644_v2 }
 0x329   :  { %7854 = vst.msk [vmem:[#allocation2 + $0x158] sm:$0xff] %vm7843_vm3, %v9640_v25  ;;  %v3448_v32 = vmax.f32 %v3400_v49, 0.0  ;;  %v5707_v58 = vmax.f32 %v5691_v41, 0.0  ;;  %v3403_v0 = vadd.f32 %v13013_v10, %v3338_v23  ;;  %v9056_v27 = vpop.f32.mrb[28].mxu1  ;;  %v9651_v40 = vunpack.i.h.bf16 %v9649_v13 }
 0x32a   :  { %5723 = vst.msk [vmem:[#allocation2 + $0x118] sm:$0xff] %vm5714_vm2, %v5706_v22  ;;  %3495 = vst [vmem:[#allocation2 + $0x180] sm:$0xff] %v3447_v21  ;;  %v3450_v31 = vmax.f32 %v3402_v54, 0.0  ;;  %v5673_v43 = vmul.f32 %v9056_v27, %v13048_v29  ;;  %v5621_v50 = vpop.f32.mrb[29].mxu1 }
 0x32b   :  { %7852 = vst.msk [vmem:[#allocation2 + $0x118] sm:$0xff] %vm7843_vm3, %v9635_v47  ;;  %3496 = vst [vmem:[#allocation2 + $0x188] sm:$0xff] %v3448_v32  ;;  %v3451_v5 = vmax.f32 %v3403_v0, 0.0  ;;  %v5671_v39 = vmul.f32 %v13048_v29, %v5621_v50  ;;  %v3127_v42 = vpop.f32.mrb[28].mxu0  ;;  %v9057_v57 = vpop.f32.mrb[30].mxu1 }
 0x32c   :  { %5726 = vst.msk [vmem:[#allocation2 + $0x178] sm:$0xff] %vm5714_vm2, %v5709_v53  ;;  %5724 = vst.msk [vmem:[#allocation2 + $0x138] sm:$0xff] %vm5714_vm2, %v5707_v58  ;;  %v5696_v16 = vadd.f32 %v13055_v3, %v5673_v43  ;;  %v3340_v19 = vmul.f32 %v13004_v62, %v3127_v42  ;;  %v5674_v1 = vmul.f32 %v9057_v57, %v13048_v29  ;;  %v3129_v33 = vpop.f32.mrb[29].mxu0  ;;  %v5624_v51 = vpop.f32.mrb[31].mxu1 }
 0x32d   :  { %7855 = vst.msk [vmem:[#allocation2 + $0x178] sm:$0xff] %vm7843_vm3, %v9641_v17  ;;  %7853 = vst.msk [vmem:[#allocation2 + $0x138] sm:$0xff] %vm7843_vm3, %v9636_v24  ;;  %v5694_v30 = vadd.f32 %v13055_v3, %v5671_v39  ;;  %v3341_v8 = vmul.f32 %v13007_v34, %v3129_v33  ;;  %v5672_v14 = vmul.f32 %v13048_v29, %v5624_v51  ;;  %v3131_v26 = vpop.f32.mrb[30].mxu0 }
 0x32e   :  { %3498 = vst [vmem:[#allocation2 + $0x1a0] sm:$0xff] %v3450_v31  ;;  %3499 = vst [vmem:[#allocation2 + $0x1a8] sm:$0xff] %v3451_v5  ;;  %v5712_v11 = vmax.f32 %v5696_v16, 0.0  ;;  %v3405_v61 = vadd.f32 %v13010_v15, %v3340_v19  ;;  %v5697_v20 = vadd.f32 %v13055_v3, %v5674_v1  ;;  %v3343_v63 = vmul.f32 %v13004_v62, %v3131_v26  ;;  %v3133_v18 = vpop.f32.mrb[31].mxu0 }
 0x32f   :  { %v5710_v55 = vmax.f32 %v5694_v30, 0.0  ;;  %v3406_v9 = vadd.f32 %v13013_v10, %v3341_v8  ;;  %v5695_v52 = vadd.f32 %v13055_v3, %v5672_v14  ;;  %v3344_v56 = vmul.f32 %v13007_v34, %v3133_v18 }
 0x330   :  { %5729 = vst.msk [vmem:[#allocation2 + $0x1d8] sm:$0xff] %vm5714_vm2, %v5712_v11  ;;  %v3453_v29 = vmax.f32 %v3405_v61, 0.0  ;;  %v5713_v44 = vmax.f32 %v5697_v20, 0.0  ;;  %v3408_v6 = vadd.f32 %v13010_v15, %v3343_v63 }
 0x331   :  { %7858 = vst.msk [vmem:[#allocation2 + $0x1d8] sm:$0xff] %vm7843_vm3, %v9650_v28  ;;  %v3454_v62 = vmax.f32 %v3406_v9, 0.0  ;;  %v5711_v12 = vmax.f32 %v5695_v52, 0.0  ;;  %v3409_v3 = vadd.f32 %v13013_v10, %v3344_v56 }
 0x332   :  { %5727 = vst.msk [vmem:[#allocation2 + $0x198] sm:$0xff] %vm5714_vm2, %v5710_v55  ;;  %3501 = vst [vmem:[#allocation2 + $0x1c0] sm:$0xff] %v3453_v29  ;;  %v3456_v34 = vmax.f32 %v3408_v6, 0.0 }
 0x333   :  { %7856 = vst.msk [vmem:[#allocation2 + $0x198] sm:$0xff] %vm7843_vm3, %v9645_v7  ;;  %3502 = vst [vmem:[#allocation2 + $0x1c8] sm:$0xff] %v3454_v62  ;;  %v3457_v15 = vmax.f32 %v3409_v3, 0.0 }
 0x334   :  { %5730 = vst.msk [vmem:[#allocation2 + $0x1f8] sm:$0xff] %vm5714_vm2, %v5713_v44  ;;  %5728 = vst.msk [vmem:[#allocation2 + $0x1b8] sm:$0xff] %vm5714_vm2, %v5711_v12 }
 0x335   :  { %7859 = vst.msk [vmem:[#allocation2 + $0x1f8] sm:$0xff] %vm7843_vm3, %v9651_v40  ;;  %7857 = vst.msk [vmem:[#allocation2 + $0x1b8] sm:$0xff] %vm7843_vm3, %v9646_v60 }
 0x336   :  { %3504 = vst [vmem:[#allocation2 + $0x1e0] sm:$0xff] %v3456_v34  ;;  %3505 = vst [vmem:[#allocation2 + $0x1e8] sm:$0xff] %v3457_v15 }
 0x337   :  { %9961 = shalt.err (!%p9958_p4)
}
 0x338   :  { %s13329_s6 = sld [smem:[#allocation48_spill]] }
 0x33e   :  { %s9962_s16 = scalar_lea.hbm %s13329_s6, 8192 }
 0x33f   :  { %p9963_p5 = scmp.ne.s32.totalorder %s13329_s6, %s9962_s16  ;;  %p9966_p6 = scmp.lt.u32.totalorder %s9962_s16, %s13329_s6 }
 0x341   :  { %p9968_p7 = pnand %p9966_p6, %p9963_p5 }
 0x343   :  { %9971 = shalt.err (!%p9968_p7)
}
 0x344   :  { %s9987_s27 = smov 512   ;;  %s9988_s5 = smov 32  }
 0x345   :  { %7871 = dma.vmem_to_hbm [thread:$0]  %s7866_s0, 8192, %s13329_s6, [#allocation3], %s9987_s27, %s9987_s27, %s9988_s5  }
 0x346   :  { %9972 = dma.done.wait [#allocation3], 8192  }
 0x347   :  { %9973 = vsyncadd [#allocation3], 4294959104 }
 0x348   :  { %7875 = vsyncpa [#allocation3], 1 }

</bundles_post_ra>
